<compile_context>
chip_gen: v7x
topology: tpu7x:2x2x1
jax: 0.10.0
libtpu: 0.0.40
codegen_flags: <defaults>
</compile_context>

<pallas_src>
import jax
import jax.numpy as jnp
from jax.experimental import pallas as pl
from jax.experimental.pallas import tpu as pltpu

EPS = 1e-5


def bn_relu_kernel(x_ref, gamma_ref, beta_ref, o_ref):
    # x_ref: (N, TC, L) block -- TC channels, L = H*W elements per channel.
    x = x_ref[...].astype(jnp.float32)
    n, _, l = x.shape
    inv_count = 1.0 / (n * l)

    # One-pass batch statistics per channel (reduce over batch + spatial).
    # E[x^2] - mean^2 is fine here numerically (f32 sums, small count); the
    # two-pass centered form is safer only for data with mean >> spread.
    s1 = jnp.sum(jnp.sum(x, axis=2, keepdims=True), axis=0, keepdims=True)
    s2 = jnp.sum(jnp.sum(x * x, axis=2, keepdims=True), axis=0, keepdims=True)
    mean = s1 * inv_count                                   # (1, TC, 1)
    var = jnp.maximum(s2 * inv_count - mean * mean, 0.0)    # biased variance
    inv_std = jax.lax.rsqrt(var + EPS)

    gamma = gamma_ref[...][jnp.newaxis]                     # (1, TC, 1)
    beta = beta_ref[...][jnp.newaxis]                       # (1, TC, 1)
    scale = inv_std * gamma
    bias = beta - mean * scale

    y = x * scale + bias
    o_ref[...] = jnp.maximum(y, 0.0).astype(o_ref.dtype)


def _pick_channel_tile(C, N, L, vmem_budget_bytes=8 * 1024 * 1024):
    """Largest multiple-of-8 divisor of C that fits the VMEM budget, preferring
    configurations with >= 2 grid steps (so the 'parallel' axis can shard
    across TensorCores on multi-TC chips)."""
    lanes_padded = ((L + 127) // 128) * 128
    bytes_per_channel = 4 * N * lanes_padded  # f32, one buffer

    def fits(d):
        # double-buffered input block + double-buffered output block
        return 4 * d * bytes_per_channel <= vmem_budget_bytes

    divisors = [d for d in range(1, C + 1) if C % d == 0]
    legal = [d for d in divisors if d % 8 == 0 or d == C]
    fitting = [d for d in legal if fits(d)]
    if not fitting:
        return min(legal)
    multi = [d for d in fitting if C // d >= 2]
    return max(multi) if multi else max(fitting)


def batchnorm_relu(x_nchw, gamma, beta, *, tc=None):
    """x_nchw: (N, C, H, W) float32. gamma/beta: (C,) float32."""
    N, C, H, W = x_nchw.shape
    L = H * W

    # Free reshapes only -- no HBM relayout pass for any batch size.
    x_ncl = x_nchw.reshape(N, C, L)
    gamma_c1 = gamma.reshape(C, 1).astype(jnp.float32)
    beta_c1 = beta.reshape(C, 1).astype(jnp.float32)

    if tc is None:
        tc = _pick_channel_tile(C, N, L)
    assert C % tc == 0

    grid = (C // tc,)

    out = pl.pallas_call(
        bn_relu_kernel,
        out_shape=jax.ShapeDtypeStruct((N, C, L), x_ncl.dtype),
        grid_spec=pltpu.PrefetchScalarGridSpec(
            num_scalar_prefetch=0,
            grid=grid,
            in_specs=[
                pl.BlockSpec((N, tc, L), lambda i: (0, i, 0)),
                pl.BlockSpec((tc, 1), lambda i: (i, 0)),
                pl.BlockSpec((tc, 1), lambda i: (i, 0)),
            ],
            out_specs=pl.BlockSpec((N, tc, L), lambda i: (0, i, 0)),
        ),
        compiler_params=pltpu.CompilerParams(
            dimension_semantics=("parallel",),
        ),
    )(x_ncl, gamma_c1, beta_c1)

    return out.reshape(N, C, H, W)


def reference(x_nchw, gamma, beta):
    mean = jnp.mean(x_nchw, axis=(0, 2, 3), keepdims=True)
    var = jnp.mean((x_nchw - mean) ** 2, axis=(0, 2, 3), keepdims=True)
    y = (x_nchw - mean) * jax.lax.rsqrt(var + EPS)
    y = y * gamma.reshape(1, -1, 1, 1) + beta.reshape(1, -1, 1, 1)
    return jnp.maximum(y, 0.0)


if __name__ == "__main__":
    # Shapes consistent with the module: N=1, C=2904, H=W=14
    N, C, H, W = 1, 2904, 14, 14

    key = jax.random.PRNGKey(0)
    kx, kg, kb = jax.random.split(key, 3)
    x = jax.random.normal(kx, (N, C, H, W), dtype=jnp.float32)
    # PyTorch default init is gamma=1, beta=0; use random values to exercise
    # the affine path deterministically.
    gamma = 1.0 + 0.1 * jax.random.normal(kg, (C,), dtype=jnp.float32)
    beta = 0.1 * jax.random.normal(kb, (C,), dtype=jnp.float32)

    out = jax.block_until_ready(batchnorm_relu(x, gamma, beta))
    ref = jax.block_until_ready(reference(x, gamma, beta))

    assert out.shape == (N, C, H, W)
    max_err = float(jnp.max(jnp.abs(out - ref)))
    assert max_err < 1e-4, f"mismatch: {max_err}"

    print("KERNEL_OK")
</pallas_src>

<mosaic_0001>
module attributes {stable_mosaic.version = 11 : i64} {
  func.func @bn_relu_kernel(%arg0: i32, %arg1: memref<1x968x196xf32, #tpu.memory_space<vmem>>, %arg2: memref<968x1xf32, #tpu.memory_space<vmem>>, %arg3: memref<968x1xf32, #tpu.memory_space<vmem>>, %arg4: memref<1x968x196xf32, #tpu.memory_space<vmem>>) attributes {dimension_semantics = [#tpu.dimension_semantics<parallel>], iteration_bounds = array<i64: 3>, scalar_prefetch = 0 : i64, scratch_operands = 0 : i64, tpu.core_type = #tpu.core_type<tc>, window_params = [{transform_indices = @transform_0, window_bounds = array<i64: 1, 968, 196>}, {transform_indices = @transform_1, window_bounds = array<i64: 968, 1>}, {transform_indices = @transform_2, window_bounds = array<i64: 968, 1>}, {transform_indices = @transform_3, window_bounds = array<i64: 1, 968, 196>}]} {
    %c0 = arith.constant 0 : index
    %c0_0 = arith.constant 0 : index
    %c0_1 = arith.constant 0 : index
    %0 = vector.load %arg1[%c0, %c0_0, %c0_1] : memref<1x968x196xf32, #tpu.memory_space<vmem>>, vector<1x968x196xf32>
    %cst = arith.constant dense<0.000000e+00> : vector<1x968xf32>
    %1 = vector.multi_reduction <add>, %0, %cst [2] : vector<1x968x196xf32> to vector<1x968xf32>
    %2 = vector.shape_cast %1 : vector<1x968xf32> to vector<1x968x1xf32>
    %cst_2 = arith.constant dense<0.000000e+00> : vector<968x1xf32>
    %3 = vector.multi_reduction <add>, %2, %cst_2 [0] : vector<1x968x1xf32> to vector<968x1xf32>
    %4 = vector.shape_cast %3 : vector<968x1xf32> to vector<1x968x1xf32>
    %5 = arith.mulf %0, %0 : vector<1x968x196xf32>
    %cst_3 = arith.constant dense<0.000000e+00> : vector<1x968xf32>
    %6 = vector.multi_reduction <add>, %5, %cst_3 [2] : vector<1x968x196xf32> to vector<1x968xf32>
    %7 = vector.shape_cast %6 : vector<1x968xf32> to vector<1x968x1xf32>
    %cst_4 = arith.constant dense<0.000000e+00> : vector<968x1xf32>
    %8 = vector.multi_reduction <add>, %7, %cst_4 [0] : vector<1x968x1xf32> to vector<968x1xf32>
    %9 = vector.shape_cast %8 : vector<968x1xf32> to vector<1x968x1xf32>
    %cst_5 = arith.constant 0.00510204071 : f32
    %10 = vector.broadcast %cst_5 : f32 to vector<1x968x1xf32>
    %11 = arith.mulf %4, %10 : vector<1x968x1xf32>
    %cst_6 = arith.constant 0.00510204071 : f32
    %12 = vector.broadcast %cst_6 : f32 to vector<1x968x1xf32>
    %13 = arith.mulf %9, %12 : vector<1x968x1xf32>
    %14 = arith.mulf %11, %11 : vector<1x968x1xf32>
    %15 = arith.subf %13, %14 : vector<1x968x1xf32>
    %cst_7 = arith.constant 0.000000e+00 : f32
    %16 = vector.broadcast %cst_7 : f32 to vector<1x968x1xf32>
    %17 = arith.maximumf %15, %16 : vector<1x968x1xf32>
    %cst_8 = arith.constant 9.99999974E-6 : f32
    %18 = vector.broadcast %cst_8 : f32 to vector<1x968x1xf32>
    %19 = arith.addf %17, %18 : vector<1x968x1xf32>
    %20 = math.rsqrt %19 : vector<1x968x1xf32>
    %c0_9 = arith.constant 0 : index
    %c0_10 = arith.constant 0 : index
    %21 = vector.load %arg2[%c0_9, %c0_10] : memref<968x1xf32, #tpu.memory_space<vmem>>, vector<968x1xf32>
    %22 = vector.shape_cast %21 : vector<968x1xf32> to vector<1x968x1xf32>
    %c0_11 = arith.constant 0 : index
    %c0_12 = arith.constant 0 : index
    %23 = vector.load %arg3[%c0_11, %c0_12] : memref<968x1xf32, #tpu.memory_space<vmem>>, vector<968x1xf32>
    %24 = vector.shape_cast %23 : vector<968x1xf32> to vector<1x968x1xf32>
    %25 = arith.mulf %20, %22 : vector<1x968x1xf32>
    %26 = arith.mulf %11, %25 : vector<1x968x1xf32>
    %27 = arith.subf %24, %26 : vector<1x968x1xf32>
    %28 = vector.broadcast %25 : vector<1x968x1xf32> to vector<1x968x196xf32>
    %29 = arith.mulf %0, %28 : vector<1x968x196xf32>
    %30 = vector.broadcast %27 : vector<1x968x1xf32> to vector<1x968x196xf32>
    %31 = arith.addf %29, %30 : vector<1x968x196xf32>
    %cst_13 = arith.constant 0.000000e+00 : f32
    %32 = vector.broadcast %cst_13 : f32 to vector<1x968x196xf32>
    %33 = arith.maximumf %31, %32 : vector<1x968x196xf32>
    %c0_14 = arith.constant 0 : index
    %c0_15 = arith.constant 0 : index
    %c0_16 = arith.constant 0 : index
    %34 = vector.load %arg4[%c0_14, %c0_15, %c0_16] : memref<1x968x196xf32, #tpu.memory_space<vmem>>, vector<1x968x196xf32>
    tpu.vector_store %arg4[%c0_14, %c0_15, %c0_16], %33 {strides = array<i32>} : memref<1x968x196xf32, #tpu.memory_space<vmem>>, vector<1x968x196xf32>,
    return
  }
  func.func @transform_0(%arg0: i32) -> (i32, i32, i32) {
    %c0_i32 = arith.constant 0 : i32
    %c0_i32_0 = arith.constant 0 : i32
    %c0_i32_1 = arith.constant 0 : i32
    return %c0_i32, %arg0, %c0_i32_0 : i32, i32, i32
  }
  func.func @transform_1(%arg0: i32) -> (i32, i32) {
    %c0_i32 = arith.constant 0 : i32
    %c0_i32_0 = arith.constant 0 : i32
    return %arg0, %c0_i32 : i32, i32
  }
  func.func @transform_2(%arg0: i32) -> (i32, i32) {
    %c0_i32 = arith.constant 0 : i32
    %c0_i32_0 = arith.constant 0 : i32
    return %arg0, %c0_i32 : i32, i32
  }
  func.func @transform_3(%arg0: i32) -> (i32, i32, i32) {
    %c0_i32 = arith.constant 0 : i32
    %c0_i32_0 = arith.constant 0 : i32
    %c0_i32_1 = arith.constant 0 : i32
    return %c0_i32, %arg0, %c0_i32_0 : i32, i32, i32
  }
}

</mosaic_0001>

<bundles_post_ra>
// kernel: tpu_custom_call.1
= control target key start
LH: loop header
LB: loop body
LE: loop exit
PB: predicated region body
PF: predicated region fallthrough
CT: control target
= control target key end

     0   :  { %s6411_s12 = smov 0   ;;  %s10326_s0 = inlined_call_operand.vmem [shape: f32[1,2904,196], index: 0, kind: input, shape index: {}]   ;;  %s10327_s1 = inlined_call_operand.vmem [shape: f32[2904,1], index: 1, kind: input, shape index: {}]   ;;  %s10328_s2 = inlined_call_operand.vmem [shape: f32[2904,1], index: 2, kind: input, shape index: {}]   ;;  %s10329_s3 = inlined_call_operand.vmem [shape: f32[1,2904,196], index: 3, kind: output, shape index: {}]  }
   0x1 LB: > { %s5630_s13 = sadd.s32 4294967295, %s6388_s12   ;;  %p5634_p0 = scmp.ge.s32.totalorder %s6388_s12, 1  ;;  %s6388_s12 = sphi %s6411_s12, %s13_s12  }
   0x2   : > { %p161_p1 = scmp.lt.s32.totalorder %s6388_s12, 4 }
   0x4   : > { %p162_p2 = pnand %p5634_p0, %p161_p1 }
   0x6   : > { %165 = sbr.rel (%p162_p2) target bundleno = 1152 (0x480), region = 32 }
   0xd   : > { %s197_s14 = smul.u32 121, %s5630_s13  ;;  %vm465_vm0 = vcmask 556032  }
   0xf   : > { %p198_p3 = scmp.lt.s32.totalorder %s197_s14, 362 }
  0x11   : > { %s11524_s14 = smov (!%p198_p3, %s197_s14), 362 }
  0x12   : > { %s5643_s15 = sshll.u32 %s11524_s14, 4  ;;  %s5637_s19 = sshll.u32 %s11524_s14, 3 }
  0x13   : > { %s6427_s18 = scalar_lea.vmem %s10326_s0, %s5643_s15  ;;  %s7591_s22 = scalar_lea.vmem %s10327_s1, %s5637_s19 }
  0x14   : > { %v227_v0 = vld [vmem:[%s6427_s18 + $0x20] sm:$0xff]  ;;  %v228_v1 = vld [vmem:[%s6427_s18 + $0x28] sm:$0xff]  ;;  %v229_v5 = vld [vmem:[%s6427_s18 + $0x30] sm:$0xff]  ;;  %s8932_s25 = scalar_lea.vmem %s10328_s2, %s5637_s19  ;;  %s9293_s28 = scalar_lea.vmem %s10329_s3, %s5643_s15 }
  0x15   : > { %v223_v2 = vld [vmem:[%s6427_s18] sm:$0xff]  ;;  %v474_v3 = vsel %vm465_vm0, %v228_v1, 0.0  ;;  %v224_v4 = vld [vmem:[%s6427_s18 + $0x8] sm:$0xff]  ;;  %v230_v6 = vld [vmem:[%s6427_s18 + $0x38] sm:$0xff] }
  0x16   : > { %v475_v7 = vadd.f32 %v474_v3, %v227_v0  ;;  %v466_v8 = vsel %vm465_vm0, %v224_v4, 0.0  ;;  %v478_v9 = vsel %vm465_vm0, %v230_v6, 0.0  ;;  %v225_v10 = vld [vmem:[%s6427_s18 + $0x10] sm:$0xff]  ;;  %v226_v11 = vld [vmem:[%s6427_s18 + $0x18] sm:$0xff]  ;;  %v232_v15 = vld [vmem:[%s6427_s18 + $0x48] sm:$0xff] }
  0x17   : > { %v467_v12 = vadd.f32 %v466_v8, %v223_v2  ;;  %v470_v13 = vsel %vm465_vm0, %v226_v11, 0.0  ;;  %v234_v14 = vld [vmem:[%s6427_s18 + $0x58] sm:$0xff]  ;;  %v479_v16 = vadd.f32 %v478_v9, %v229_v5  ;;  %v233_v18 = vld [vmem:[%s6427_s18 + $0x50] sm:$0xff]  ;;  %v231_v20 = vld [vmem:[%s6427_s18 + $0x40] sm:$0xff]  ;;  %v482_v21 = vsel %vm465_vm0, %v232_v15, 0.0 }
  0x18   : > { %476 = vadd.xlane.f32.xlu1 %v475_v7  ;;  %v471_v17 = vadd.f32 %v470_v13, %v225_v10  ;;  %v486_v19 = vsel %vm465_vm0, %v234_v14, 0.0  ;;  %v238_v22 = vld [vmem:[%s6427_s18 + $0x78] sm:$0xff]  ;;  %v236_v23 = vld [vmem:[%s6427_s18 + $0x68] sm:$0xff]  ;;  %v483_v25 = vadd.f32 %v482_v21, %v231_v20  ;;  %v237_v26 = vld [vmem:[%s6427_s18 + $0x70] sm:$0xff] }
  0x19   : > { %468 = vadd.xlane.f32.xlu0 %v467_v12  ;;  %v487_v24 = vadd.f32 %v486_v19, %v233_v18  ;;  %v494_v27 = vsel %vm465_vm0, %v238_v22, 0.0  ;;  %v235_v28 = vld [vmem:[%s6427_s18 + $0x60] sm:$0xff]  ;;  %v490_v29 = vsel %vm465_vm0, %v236_v23, 0.0  ;;  %v242_v30 = vld [vmem:[%s6427_s18 + $0x98] sm:$0xff]  ;;  %v240_v31 = vld [vmem:[%s6427_s18 + $0x88] sm:$0xff] }
  0x1a   : > { %v495_v32 = vadd.f32 %v494_v27, %v237_v26  ;;  %v491_v33 = vadd.f32 %v490_v29, %v235_v28  ;;  %v241_v34 = vld [vmem:[%s6427_s18 + $0x90] sm:$0xff]  ;;  %v502_v35 = vsel %vm465_vm0, %v242_v30, 0.0  ;;  %v239_v36 = vld [vmem:[%s6427_s18 + $0x80] sm:$0xff]  ;;  %v498_v37 = vsel %vm465_vm0, %v240_v31, 0.0  ;;  %v246_v38 = vld [vmem:[%s6427_s18 + $0xb8] sm:$0xff] }
  0x1b   : > { %v244_v39 = vld [vmem:[%s6427_s18 + $0xa8] sm:$0xff]  ;;  %v503_v40 = vadd.f32 %v502_v35, %v241_v34  ;;  %v499_v41 = vadd.f32 %v498_v37, %v239_v36  ;;  %v245_v42 = vld [vmem:[%s6427_s18 + $0xb0] sm:$0xff]  ;;  %v510_v43 = vsel %vm465_vm0, %v246_v38, 0.0  ;;  %v243_v44 = vld [vmem:[%s6427_s18 + $0xa0] sm:$0xff] }
  0x1c   : > { %480 = vadd.xlane.f32.xlu1 %v479_v16  ;;  %v506_v45 = vsel %vm465_vm0, %v244_v39, 0.0  ;;  %v250_v46 = vld [vmem:[%s6427_s18 + $0xd8] sm:$0xff]  ;;  %v248_v47 = vld [vmem:[%s6427_s18 + $0xc8] sm:$0xff]  ;;  %v511_v48 = vadd.f32 %v510_v43, %v245_v42  ;;  %v249_v50 = vld [vmem:[%s6427_s18 + $0xd0] sm:$0xff] }
  0x1d   : > { %472 = vadd.xlane.f32.xlu0 %v471_v17  ;;  %v507_v49 = vadd.f32 %v506_v45, %v243_v44  ;;  %v518_v51 = vsel %vm465_vm0, %v250_v46, 0.0  ;;  %v247_v52 = vld [vmem:[%s6427_s18 + $0xc0] sm:$0xff]  ;;  %v514_v53 = vsel %vm465_vm0, %v248_v47, 0.0  ;;  %v254_v54 = vld [vmem:[%s6427_s18 + $0xf8] sm:$0xff]  ;;  %v252_v55 = vld [vmem:[%s6427_s18 + $0xe8] sm:$0xff] }
  0x1e   : > { %v519_v56 = vadd.f32 %v518_v51, %v249_v50  ;;  %v515_v57 = vadd.f32 %v514_v53, %v247_v52  ;;  %v253_v58 = vld [vmem:[%s6427_s18 + $0xf0] sm:$0xff]  ;;  %v526_v59 = vsel %vm465_vm0, %v254_v54, 0.0  ;;  %v251_v60 = vld [vmem:[%s6427_s18 + $0xe0] sm:$0xff]  ;;  %v522_v61 = vsel %vm465_vm0, %v252_v55, 0.0  ;;  %v258_v62 = vld [vmem:[%s6427_s18 + $0x118] sm:$0xff] }
  0x1f   : > { %v256_v63 = vld [vmem:[%s6427_s18 + $0x108] sm:$0xff]  ;;  %v527_v0 = vadd.f32 %v526_v59, %v253_v58  ;;  %v523_v1 = vadd.f32 %v522_v61, %v251_v60  ;;  %v257_v2 = vld [vmem:[%s6427_s18 + $0x110] sm:$0xff]  ;;  %v534_v3 = vsel %vm465_vm0, %v258_v62, 0.0  ;;  %v255_v4 = vld [vmem:[%s6427_s18 + $0x100] sm:$0xff] }
  0x20   : > { %488 = vadd.xlane.f32.xlu1 %v487_v24  ;;  %v530_v5 = vsel %vm465_vm0, %v256_v63, 0.0  ;;  %v262_v6 = vld [vmem:[%s6427_s18 + $0x138] sm:$0xff]  ;;  %v260_v7 = vld [vmem:[%s6427_s18 + $0x128] sm:$0xff]  ;;  %v535_v8 = vadd.f32 %v534_v3, %v257_v2  ;;  %v261_v10 = vld [vmem:[%s6427_s18 + $0x130] sm:$0xff] }
  0x21   : > { %484 = vadd.xlane.f32.xlu0 %v483_v25  ;;  %v531_v9 = vadd.f32 %v530_v5, %v255_v4  ;;  %v542_v11 = vsel %vm465_vm0, %v262_v6, 0.0  ;;  %v259_v12 = vld [vmem:[%s6427_s18 + $0x120] sm:$0xff]  ;;  %v538_v13 = vsel %vm465_vm0, %v260_v7, 0.0  ;;  %v266_v14 = vld [vmem:[%s6427_s18 + $0x158] sm:$0xff]  ;;  %v264_v15 = vld [vmem:[%s6427_s18 + $0x148] sm:$0xff] }
  0x22   : > { %v543_v16 = vadd.f32 %v542_v11, %v261_v10  ;;  %v539_v17 = vadd.f32 %v538_v13, %v259_v12  ;;  %v265_v18 = vld [vmem:[%s6427_s18 + $0x150] sm:$0xff]  ;;  %v550_v19 = vsel %vm465_vm0, %v266_v14, 0.0  ;;  %v263_v20 = vld [vmem:[%s6427_s18 + $0x140] sm:$0xff]  ;;  %v546_v21 = vsel %vm465_vm0, %v264_v15, 0.0  ;;  %v270_v22 = vld [vmem:[%s6427_s18 + $0x178] sm:$0xff] }
  0x23   : > { %v268_v23 = vld [vmem:[%s6427_s18 + $0x168] sm:$0xff]  ;;  %v551_v24 = vadd.f32 %v550_v19, %v265_v18  ;;  %v547_v25 = vadd.f32 %v546_v21, %v263_v20  ;;  %v269_v26 = vld [vmem:[%s6427_s18 + $0x170] sm:$0xff]  ;;  %v558_v27 = vsel %vm465_vm0, %v270_v22, 0.0  ;;  %v267_v28 = vld [vmem:[%s6427_s18 + $0x160] sm:$0xff] }
  0x24   : > { %496 = vadd.xlane.f32.xlu1 %v495_v32  ;;  %v554_v29 = vsel %vm465_vm0, %v268_v23, 0.0  ;;  %v274_v30 = vld [vmem:[%s6427_s18 + $0x198] sm:$0xff]  ;;  %v272_v31 = vld [vmem:[%s6427_s18 + $0x188] sm:$0xff]  ;;  %v559_v32 = vadd.f32 %v558_v27, %v269_v26  ;;  %v273_v34 = vld [vmem:[%s6427_s18 + $0x190] sm:$0xff] }
  0x25   : > { %492 = vadd.xlane.f32.xlu0 %v491_v33  ;;  %v555_v33 = vadd.f32 %v554_v29, %v267_v28  ;;  %v566_v35 = vsel %vm465_vm0, %v274_v30, 0.0  ;;  %v271_v36 = vld [vmem:[%s6427_s18 + $0x180] sm:$0xff]  ;;  %v562_v37 = vsel %vm465_vm0, %v272_v31, 0.0  ;;  %v278_v38 = vld [vmem:[%s6427_s18 + $0x1b8] sm:$0xff]  ;;  %v276_v39 = vld [vmem:[%s6427_s18 + $0x1a8] sm:$0xff] }
  0x26   : > { %v277_v42 = vld [vmem:[%s6427_s18 + $0x1b0] sm:$0xff]  ;;  %v574_v43 = vsel %vm465_vm0, %v278_v38, 0.0  ;;  %v275_v44 = vld [vmem:[%s6427_s18 + $0x1a0] sm:$0xff]  ;;  %v570_v45 = vsel %vm465_vm0, %v276_v39, 0.0  ;;  %v282_v46 = vld [vmem:[%s6427_s18 + $0x1d8] sm:$0xff] }
  0x27   : > { %v280_v47 = vld [vmem:[%s6427_s18 + $0x1c8] sm:$0xff]  ;;  %v281_v50 = vld [vmem:[%s6427_s18 + $0x1d0] sm:$0xff]  ;;  %v582_v51 = vsel %vm465_vm0, %v282_v46, 0.0  ;;  %v279_v52 = vld [vmem:[%s6427_s18 + $0x1c0] sm:$0xff] }
  0x28   : > { %504 = vadd.xlane.f32.xlu1 %v503_v40  ;;  %v567_v40 = vadd.f32 %v566_v35, %v273_v34  ;;  %v578_v53 = vsel %vm465_vm0, %v280_v47, 0.0  ;;  %v286_v54 = vld [vmem:[%s6427_s18 + $0x1f8] sm:$0xff]  ;;  %v284_v55 = vld [vmem:[%s6427_s18 + $0x1e8] sm:$0xff]  ;;  %v285_v58 = vld [vmem:[%s6427_s18 + $0x1f0] sm:$0xff] }
  0x29   : > { %500 = vadd.xlane.f32.xlu0 %v499_v41  ;;  %v563_v41 = vadd.f32 %v562_v37, %v271_v36  ;;  %v590_v59 = vsel %vm465_vm0, %v286_v54, 0.0  ;;  %v283_v60 = vld [vmem:[%s6427_s18 + $0x1e0] sm:$0xff]  ;;  %v586_v61 = vsel %vm465_vm0, %v284_v55, 0.0  ;;  %v290_v62 = vld [vmem:[%s6427_s18 + $0x218] sm:$0xff]  ;;  %v288_v63 = vld [vmem:[%s6427_s18 + $0x208] sm:$0xff] }
  0x2a   : > { %v289_v2 = vld [vmem:[%s6427_s18 + $0x210] sm:$0xff]  ;;  %v598_v3 = vsel %vm465_vm0, %v290_v62, 0.0  ;;  %v287_v4 = vld [vmem:[%s6427_s18 + $0x200] sm:$0xff]  ;;  %v594_v5 = vsel %vm465_vm0, %v288_v63, 0.0  ;;  %v294_v6 = vld [vmem:[%s6427_s18 + $0x238] sm:$0xff] }
  0x2b   : > { %v292_v7 = vld [vmem:[%s6427_s18 + $0x228] sm:$0xff]  ;;  %v293_v10 = vld [vmem:[%s6427_s18 + $0x230] sm:$0xff]  ;;  %v606_v11 = vsel %vm465_vm0, %v294_v6, 0.0  ;;  %v291_v12 = vld [vmem:[%s6427_s18 + $0x220] sm:$0xff] }
  0x2c   : > { %512 = vadd.xlane.f32.xlu1 %v511_v48  ;;  %v575_v48 = vadd.f32 %v574_v43, %v277_v42  ;;  %v602_v13 = vsel %vm465_vm0, %v292_v7, 0.0  ;;  %v298_v14 = vld [vmem:[%s6427_s18 + $0x258] sm:$0xff]  ;;  %v296_v15 = vld [vmem:[%s6427_s18 + $0x248] sm:$0xff]  ;;  %v297_v18 = vld [vmem:[%s6427_s18 + $0x250] sm:$0xff] }
  0x2d   : > { %508 = vadd.xlane.f32.xlu0 %v507_v49  ;;  %v571_v49 = vadd.f32 %v570_v45, %v275_v44  ;;  %v614_v19 = vsel %vm465_vm0, %v298_v14, 0.0  ;;  %v295_v20 = vld [vmem:[%s6427_s18 + $0x240] sm:$0xff]  ;;  %v610_v21 = vsel %vm465_vm0, %v296_v15, 0.0  ;;  %v302_v22 = vld [vmem:[%s6427_s18 + $0x278] sm:$0xff]  ;;  %v300_v23 = vld [vmem:[%s6427_s18 + $0x268] sm:$0xff] }
  0x2e   : > { %v301_v26 = vld [vmem:[%s6427_s18 + $0x270] sm:$0xff]  ;;  %v622_v27 = vsel %vm465_vm0, %v302_v22, 0.0  ;;  %v299_v28 = vld [vmem:[%s6427_s18 + $0x260] sm:$0xff]  ;;  %v618_v29 = vsel %vm465_vm0, %v300_v23, 0.0  ;;  %v306_v30 = vld [vmem:[%s6427_s18 + $0x298] sm:$0xff] }
  0x2f   : > { %v304_v31 = vld [vmem:[%s6427_s18 + $0x288] sm:$0xff]  ;;  %v305_v34 = vld [vmem:[%s6427_s18 + $0x290] sm:$0xff]  ;;  %v630_v35 = vsel %vm465_vm0, %v306_v30, 0.0  ;;  %v303_v36 = vld [vmem:[%s6427_s18 + $0x280] sm:$0xff] }
  0x30   : > { %520 = vadd.xlane.f32.xlu1 %v519_v56  ;;  %v583_v56 = vadd.f32 %v582_v51, %v281_v50  ;;  %v626_v37 = vsel %vm465_vm0, %v304_v31, 0.0  ;;  %v310_v38 = vld [vmem:[%s6427_s18 + $0x2b8] sm:$0xff]  ;;  %v308_v39 = vld [vmem:[%s6427_s18 + $0x2a8] sm:$0xff]  ;;  %v309_v42 = vld [vmem:[%s6427_s18 + $0x2b0] sm:$0xff] }
  0x31   : > { %516 = vadd.xlane.f32.xlu0 %v515_v57  ;;  %v579_v57 = vadd.f32 %v578_v53, %v279_v52  ;;  %v638_v43 = vsel %vm465_vm0, %v310_v38, 0.0  ;;  %v307_v44 = vld [vmem:[%s6427_s18 + $0x2a0] sm:$0xff]  ;;  %v634_v45 = vsel %vm465_vm0, %v308_v39, 0.0  ;;  %v314_v46 = vld [vmem:[%s6427_s18 + $0x2d8] sm:$0xff]  ;;  %v312_v47 = vld [vmem:[%s6427_s18 + $0x2c8] sm:$0xff] }
  0x32   : > { %v313_v50 = vld [vmem:[%s6427_s18 + $0x2d0] sm:$0xff]  ;;  %v646_v51 = vsel %vm465_vm0, %v314_v46, 0.0  ;;  %v311_v52 = vld [vmem:[%s6427_s18 + $0x2c0] sm:$0xff]  ;;  %v642_v53 = vsel %vm465_vm0, %v312_v47, 0.0  ;;  %v318_v54 = vld [vmem:[%s6427_s18 + $0x2f8] sm:$0xff] }
  0x33   : > { %v316_v55 = vld [vmem:[%s6427_s18 + $0x2e8] sm:$0xff]  ;;  %v322_v62 = vld [vmem:[%s6427_s18 + $0x318] sm:$0xff] }
  0x34   : > { %528 = vadd.xlane.f32.xlu1 %v527_v0  ;;  %v591_v0 = vadd.f32 %v590_v59, %v285_v58  ;;  %v317_v58 = vld [vmem:[%s6427_s18 + $0x2f0] sm:$0xff]  ;;  %v654_v59 = vsel %vm465_vm0, %v318_v54, 0.0  ;;  %v320_v63 = vld [vmem:[%s6427_s18 + $0x308] sm:$0xff]  ;;  %v326_v6 = vld [vmem:[%s6427_s18 + $0x338] sm:$0xff] }
  0x35   : > { %524 = vadd.xlane.f32.xlu0 %v523_v1  ;;  %v587_v1 = vadd.f32 %v586_v61, %v283_v60  ;;  %v315_v60 = vld [vmem:[%s6427_s18 + $0x2e0] sm:$0xff]  ;;  %v650_v61 = vsel %vm465_vm0, %v316_v55, 0.0  ;;  %v324_v7 = vld [vmem:[%s6427_s18 + $0x328] sm:$0xff]  ;;  %v330_v14 = vld [vmem:[%s6427_s18 + $0x358] sm:$0xff] }
  0x36   : > { %v328_v15 = vld [vmem:[%s6427_s18 + $0x348] sm:$0xff]  ;;  %v334_v22 = vld [vmem:[%s6427_s18 + $0x378] sm:$0xff] }
  0x37   : > { %v332_v23 = vld [vmem:[%s6427_s18 + $0x368] sm:$0xff]  ;;  %v338_v30 = vld [vmem:[%s6427_s18 + $0x398] sm:$0xff] }
  0x38   : > { %536 = vadd.xlane.f32.xlu1 %v535_v8  ;;  %v599_v8 = vadd.f32 %v598_v3, %v289_v2  ;;  %v321_v2 = vld [vmem:[%s6427_s18 + $0x310] sm:$0xff]  ;;  %v662_v3 = vsel %vm465_vm0, %v322_v62, 0.0  ;;  %v336_v31 = vld [vmem:[%s6427_s18 + $0x388] sm:$0xff]  ;;  %v342_v38 = vld [vmem:[%s6427_s18 + $0x3b8] sm:$0xff] }
  0x39   : > { %532 = vadd.xlane.f32.xlu0 %v531_v9  ;;  %v595_v9 = vadd.f32 %v594_v5, %v287_v4  ;;  %v319_v4 = vld [vmem:[%s6427_s18 + $0x300] sm:$0xff]  ;;  %v658_v5 = vsel %vm465_vm0, %v320_v63, 0.0  ;;  %v340_v39 = vld [vmem:[%s6427_s18 + $0x3a8] sm:$0xff]  ;;  %v346_v46 = vld [vmem:[%s6427_s18 + $0x3d8] sm:$0xff] }
  0x3a   : > { %v344_v47 = vld [vmem:[%s6427_s18 + $0x3c8] sm:$0xff]  ;;  %v350_v54 = vld [vmem:[%s6427_s18 + $0x3f8] sm:$0xff] }
  0x3b   : > { %v348_v55 = vld [vmem:[%s6427_s18 + $0x3e8] sm:$0xff]  ;;  %v354_v62 = vld [vmem:[%s6427_s18 + $0x418] sm:$0xff] }
  0x3c   : > { %544 = vadd.xlane.f32.xlu1 %v543_v16  ;;  %v607_v16 = vadd.f32 %v606_v11, %v293_v10  ;;  %v325_v10 = vld [vmem:[%s6427_s18 + $0x330] sm:$0xff]  ;;  %v670_v11 = vsel %vm465_vm0, %v326_v6, 0.0  ;;  %v352_v63 = vld [vmem:[%s6427_s18 + $0x408] sm:$0xff]  ;;  %v358_v6 = vld [vmem:[%s6427_s18 + $0x438] sm:$0xff] }
  0x3d   : > { %540 = vadd.xlane.f32.xlu0 %v539_v17  ;;  %v603_v17 = vadd.f32 %v602_v13, %v291_v12  ;;  %v323_v12 = vld [vmem:[%s6427_s18 + $0x320] sm:$0xff]  ;;  %v666_v13 = vsel %vm465_vm0, %v324_v7, 0.0  ;;  %v356_v7 = vld [vmem:[%s6427_s18 + $0x428] sm:$0xff] }
  0x40   : > { %552 = vadd.xlane.f32.xlu1 %v551_v24  ;;  %v615_v24 = vadd.f32 %v614_v19, %v297_v18  ;;  %v329_v18 = vld [vmem:[%s6427_s18 + $0x350] sm:$0xff]  ;;  %v678_v19 = vsel %vm465_vm0, %v330_v14, 0.0  ;;  %v362_v14 = vld [vmem:[%s6427_s18 + $0x458] sm:$0xff] }
  0x41   : > { %548 = vadd.xlane.f32.xlu0 %v547_v25  ;;  %v611_v25 = vadd.f32 %v610_v21, %v295_v20  ;;  %v327_v20 = vld [vmem:[%s6427_s18 + $0x340] sm:$0xff]  ;;  %v674_v21 = vsel %vm465_vm0, %v328_v15, 0.0  ;;  %v360_v15 = vld [vmem:[%s6427_s18 + $0x448] sm:$0xff] }
  0x44   : > { %560 = vadd.xlane.f32.xlu1 %v559_v32  ;;  %v623_v32 = vadd.f32 %v622_v27, %v301_v26  ;;  %v333_v26 = vld [vmem:[%s6427_s18 + $0x370] sm:$0xff]  ;;  %v686_v27 = vsel %vm465_vm0, %v334_v22, 0.0  ;;  %v366_v22 = vld [vmem:[%s6427_s18 + $0x478] sm:$0xff] }
  0x45   : > { %556 = vadd.xlane.f32.xlu0 %v555_v33  ;;  %v619_v33 = vadd.f32 %v618_v29, %v299_v28  ;;  %v331_v28 = vld [vmem:[%s6427_s18 + $0x360] sm:$0xff]  ;;  %v682_v29 = vsel %vm465_vm0, %v332_v23, 0.0  ;;  %v364_v23 = vld [vmem:[%s6427_s18 + $0x468] sm:$0xff] }
  0x48   : > { %568 = vadd.xlane.f32.xlu1 %v567_v40  ;;  %v631_v40 = vadd.f32 %v630_v35, %v305_v34  ;;  %v337_v34 = vld [vmem:[%s6427_s18 + $0x390] sm:$0xff]  ;;  %v694_v35 = vsel %vm465_vm0, %v338_v30, 0.0  ;;  %v370_v30 = vld [vmem:[%s6427_s18 + $0x498] sm:$0xff] }
  0x49   : > { %564 = vadd.xlane.f32.xlu0 %v563_v41  ;;  %v627_v41 = vadd.f32 %v626_v37, %v303_v36  ;;  %v335_v36 = vld [vmem:[%s6427_s18 + $0x380] sm:$0xff]  ;;  %v690_v37 = vsel %vm465_vm0, %v336_v31, 0.0  ;;  %v368_v31 = vld [vmem:[%s6427_s18 + $0x488] sm:$0xff] }
  0x4c   : > { %576 = vadd.xlane.f32.xlu1 %v575_v48  ;;  %v639_v48 = vadd.f32 %v638_v43, %v309_v42  ;;  %v341_v42 = vld [vmem:[%s6427_s18 + $0x3b0] sm:$0xff]  ;;  %v702_v43 = vsel %vm465_vm0, %v342_v38, 0.0  ;;  %v374_v38 = vld [vmem:[%s6427_s18 + $0x4b8] sm:$0xff] }
  0x4d   : > { %572 = vadd.xlane.f32.xlu0 %v571_v49  ;;  %v635_v49 = vadd.f32 %v634_v45, %v307_v44  ;;  %v339_v44 = vld [vmem:[%s6427_s18 + $0x3a0] sm:$0xff]  ;;  %v698_v45 = vsel %vm465_vm0, %v340_v39, 0.0  ;;  %v372_v39 = vld [vmem:[%s6427_s18 + $0x4a8] sm:$0xff] }
  0x50   : > { %584 = vadd.xlane.f32.xlu1 %v583_v56  ;;  %v647_v56 = vadd.f32 %v646_v51, %v313_v50  ;;  %v345_v50 = vld [vmem:[%s6427_s18 + $0x3d0] sm:$0xff]  ;;  %v710_v51 = vsel %vm465_vm0, %v346_v46, 0.0  ;;  %v371_v46 = vld [vmem:[%s6427_s18 + $0x4a0] sm:$0xff] }
  0x51   : > { %580 = vadd.xlane.f32.xlu0 %v579_v57  ;;  %v643_v57 = vadd.f32 %v642_v53, %v311_v52  ;;  %v343_v52 = vld [vmem:[%s6427_s18 + $0x3c0] sm:$0xff]  ;;  %v706_v53 = vsel %vm465_vm0, %v344_v47, 0.0  ;;  %v762_v47 = vsel %vm465_vm0, %v372_v39, 0.0  ;;  %v397_v39 = vld [vmem:[%s6427_s18 + $0x570] sm:$0xff] }
  0x54   : > { %592 = vadd.xlane.f32.xlu1 %v591_v0  ;;  %v655_v0 = vadd.f32 %v654_v59, %v317_v58  ;;  %v349_v58 = vld [vmem:[%s6427_s18 + $0x3f0] sm:$0xff]  ;;  %v718_v59 = vsel %vm465_vm0, %v350_v54, 0.0 }
  0x55   : > { %588 = vadd.xlane.f32.xlu0 %v587_v1  ;;  %v651_v1 = vadd.f32 %v650_v61, %v315_v60  ;;  %v347_v60 = vld [vmem:[%s6427_s18 + $0x3e0] sm:$0xff]  ;;  %v714_v61 = vsel %vm465_vm0, %v348_v55, 0.0 }
  0x58   : > { %600 = vadd.xlane.f32.xlu1 %v599_v8  ;;  %v663_v8 = vadd.f32 %v662_v3, %v321_v2  ;;  %v353_v2 = vld [vmem:[%s6427_s18 + $0x410] sm:$0xff]  ;;  %v726_v3 = vsel %vm465_vm0, %v354_v62, 0.0 }
  0x59   : > { %596 = vadd.xlane.f32.xlu0 %v595_v9  ;;  %v659_v9 = vadd.f32 %v658_v5, %v319_v4  ;;  %v351_v4 = vld [vmem:[%s6427_s18 + $0x400] sm:$0xff]  ;;  %v722_v5 = vsel %vm465_vm0, %v352_v63, 0.0  ;;  %v381_v63 = vld [vmem:[%s6427_s18 + $0x4f0] sm:$0xff] }
  0x5c   : > { %608 = vadd.xlane.f32.xlu1 %v607_v16  ;;  %v671_v16 = vadd.f32 %v670_v11, %v325_v10  ;;  %v357_v10 = vld [vmem:[%s6427_s18 + $0x430] sm:$0xff]  ;;  %v734_v11 = vsel %vm465_vm0, %v358_v6, 0.0 }
  0x5d   : > { %604 = vadd.xlane.f32.xlu0 %v603_v17  ;;  %v667_v17 = vadd.f32 %v666_v13, %v323_v12  ;;  %v355_v12 = vld [vmem:[%s6427_s18 + $0x420] sm:$0xff]  ;;  %v730_v13 = vsel %vm465_vm0, %v356_v7, 0.0 }
  0x60   : > { %616 = vadd.xlane.f32.xlu1 %v615_v24  ;;  %v679_v24 = vadd.f32 %v678_v19, %v329_v18  ;;  %v361_v18 = vld [vmem:[%s6427_s18 + $0x450] sm:$0xff]  ;;  %v742_v19 = vsel %vm465_vm0, %v362_v14, 0.0  ;;  %v390_v14 = vld [vmem:[%s6427_s18 + $0x538] sm:$0xff] }
  0x61   : > { %612 = vadd.xlane.f32.xlu0 %v611_v25  ;;  %v675_v25 = vadd.f32 %v674_v21, %v327_v20  ;;  %v359_v20 = vld [vmem:[%s6427_s18 + $0x440] sm:$0xff]  ;;  %v738_v21 = vsel %vm465_vm0, %v360_v15, 0.0  ;;  %v388_v15 = vld [vmem:[%s6427_s18 + $0x528] sm:$0xff] }
  0x64   : > { %624 = vadd.xlane.f32.xlu1 %v623_v32  ;;  %v687_v32 = vadd.f32 %v686_v27, %v333_v26  ;;  %v365_v26 = vld [vmem:[%s6427_s18 + $0x470] sm:$0xff]  ;;  %v750_v27 = vsel %vm465_vm0, %v366_v22, 0.0  ;;  %v387_v22 = vld [vmem:[%s6427_s18 + $0x520] sm:$0xff] }
  0x65   : > { %620 = vadd.xlane.f32.xlu0 %v619_v33  ;;  %v683_v33 = vadd.f32 %v682_v29, %v331_v28  ;;  %v363_v28 = vld [vmem:[%s6427_s18 + $0x460] sm:$0xff]  ;;  %v746_v29 = vsel %vm465_vm0, %v364_v23, 0.0  ;;  %v794_v23 = vsel %vm465_vm0, %v388_v15, 0.0 }
  0x68   : > { %632 = vadd.xlane.f32.xlu1 %v631_v40  ;;  %v695_v40 = vadd.f32 %v694_v35, %v337_v34  ;;  %v369_v34 = vld [vmem:[%s6427_s18 + $0x490] sm:$0xff]  ;;  %v758_v35 = vsel %vm465_vm0, %v370_v30, 0.0 }
  0x69   : > { %628 = vadd.xlane.f32.xlu0 %v627_v41  ;;  %v691_v41 = vadd.f32 %v690_v37, %v335_v36  ;;  %v367_v36 = vld [vmem:[%s6427_s18 + $0x480] sm:$0xff]  ;;  %v754_v37 = vsel %vm465_vm0, %v368_v31, 0.0 }
  0x6c   : > { %640 = vadd.xlane.f32.xlu1 %v639_v48  ;;  %v703_v48 = vadd.f32 %v702_v43, %v341_v42  ;;  %v755_v42 = vadd.f32 %v754_v37, %v367_v36  ;;  %v373_v43 = vld [vmem:[%s6427_s18 + $0x4b0] sm:$0xff] }
  0x6d   : > { %636 = vadd.xlane.f32.xlu0 %v635_v49  ;;  %v699_v49 = vadd.f32 %v698_v45, %v339_v44  ;;  %v766_v44 = vsel %vm465_vm0, %v374_v38, 0.0 }
  0x70   : > { %648 = vadd.xlane.f32.xlu1 %v647_v56  ;;  %v711_v56 = vadd.f32 %v710_v51, %v345_v50  ;;  %v767_v50 = vadd.f32 %v766_v44, %v373_v43  ;;  %v395_v43 = vld [vmem:[%s6427_s18 + $0x560] sm:$0xff] }
  0x71   : > { %644 = vadd.xlane.f32.xlu0 %v643_v57  ;;  %v707_v57 = vadd.f32 %v706_v53, %v343_v52  ;;  %v763_v52 = vadd.f32 %v762_v47, %v371_v46  ;;  %v377_v53 = vld [vmem:[%s6427_s18 + $0x4d0] sm:$0xff]  ;;  %v402_v46 = vld [vmem:[%s6427_s18 + $0x598] sm:$0xff]  ;;  %v400_v47 = vld [vmem:[%s6427_s18 + $0x588] sm:$0xff] }
  0x74   : > { %656 = vadd.xlane.f32.xlu1 %v655_v0  ;;  %v719_v0 = vadd.f32 %v718_v59, %v349_v58  ;;  %v382_v58 = vld [vmem:[%s6427_s18 + $0x4f8] sm:$0xff]  ;;  %v380_v59 = vld [vmem:[%s6427_s18 + $0x4e8] sm:$0xff] }
  0x75   : > { %652 = vadd.xlane.f32.xlu0 %v651_v1  ;;  %v715_v1 = vadd.f32 %v714_v61, %v347_v60 }
  0x78   : > { %664 = vadd.xlane.f32.xlu1 %v663_v8  ;;  %v727_v8 = vadd.f32 %v726_v3, %v353_v2  ;;  %v379_v2 = vld [vmem:[%s6427_s18 + $0x4e0] sm:$0xff]  ;;  %v778_v3 = vsel %vm465_vm0, %v380_v59, 0.0  ;;  %v404_v59 = vld [vmem:[%s6427_s18 + $0x5a8] sm:$0xff] }
  0x79   : > { %660 = vadd.xlane.f32.xlu0 %v659_v9  ;;  %v723_v9 = vadd.f32 %v722_v5, %v351_v4  ;;  %v386_v4 = vld [vmem:[%s6427_s18 + $0x518] sm:$0xff]  ;;  %v384_v5 = vld [vmem:[%s6427_s18 + $0x508] sm:$0xff] }
  0x7c   : > { %672 = vadd.xlane.f32.xlu1 %v671_v16  ;;  %v735_v16 = vadd.f32 %v734_v11, %v357_v10  ;;  %v790_v10 = vsel %vm465_vm0, %v386_v4, 0.0  ;;  %v403_v4 = vld [vmem:[%s6427_s18 + $0x5a0] sm:$0xff] }
  0x7d   : > { %668 = vadd.xlane.f32.xlu0 %v667_v17  ;;  %v731_v17 = vadd.f32 %v730_v13, %v355_v12  ;;  %v383_v12 = vld [vmem:[%s6427_s18 + $0x500] sm:$0xff]  ;;  %v786_v13 = vsel %vm465_vm0, %v384_v5, 0.0  ;;  %v826_v5 = vsel %vm465_vm0, %v404_v59, 0.0 }
  0x80   : > { %680 = vadd.xlane.f32.xlu1 %v679_v24  ;;  %v743_v24 = vadd.f32 %v742_v19, %v361_v18  ;;  %v787_v18 = vadd.f32 %v786_v13, %v383_v12  ;;  %v389_v19 = vld [vmem:[%s6427_s18 + $0x530] sm:$0xff]  ;;  %v827_v12 = vadd.f32 %v826_v5, %v403_v4 }
  0x81   : > { %676 = vadd.xlane.f32.xlu0 %v675_v25  ;;  %v739_v25 = vadd.f32 %v738_v21, %v359_v20  ;;  %v798_v20 = vsel %vm465_vm0, %v390_v14, 0.0  ;;  %v409_v13 = vld [vmem:[%s6427_s18 + $0x5d0] sm:$0xff] }
  0x82   : > { %v425_v5 = vld [vmem:[%s6427_s18 + $0x650] sm:$0xff] }
  0x84   : > { %688 = vadd.xlane.f32.xlu1 %v687_v32  ;;  %v751_v32 = vadd.f32 %v750_v27, %v365_v26  ;;  %v799_v26 = vadd.f32 %v798_v20, %v389_v19  ;;  %v414_v19 = vld [vmem:[%s6427_s18 + $0x5f8] sm:$0xff]  ;;  %v412_v20 = vld [vmem:[%s6427_s18 + $0x5e8] sm:$0xff] }
  0x85   : > { %684 = vadd.xlane.f32.xlu0 %v683_v33  ;;  %v747_v33 = vadd.f32 %v746_v29, %v363_v28  ;;  %v795_v28 = vadd.f32 %v794_v23, %v387_v22  ;;  %v393_v29 = vld [vmem:[%s6427_s18 + $0x550] sm:$0xff] }
  0x88   : > { %696 = vadd.xlane.f32.xlu1 %v695_v40  ;;  %v759_v40 = vadd.f32 %v758_v35, %v369_v34  ;;  %v398_v34 = vld [vmem:[%s6427_s18 + $0x578] sm:$0xff]  ;;  %v396_v35 = vld [vmem:[%s6427_s18 + $0x568] sm:$0xff] }
  0x89   : > { %692 = vadd.xlane.f32.xlu0 %v691_v41  ;;  %v810_v44 = vsel %vm465_vm0, %v396_v35, 0.0 }
  0x8c   : > { %704 = vadd.xlane.f32.xlu1 %v703_v48  ;;  %v378_v48 = vld [vmem:[%s6427_s18 + $0x4d8] sm:$0xff] }
  0x8d   : > { %700 = vadd.xlane.f32.xlu0 %v699_v49  ;;  %v376_v49 = vld [vmem:[%s6427_s18 + $0x4c8] sm:$0xff]  ;;  %v774_v54 = vsel %vm465_vm0, %v378_v48, 0.0 }
  0x8e   : > { %v775_v60 = vadd.f32 %v774_v54, %v377_v53  ;;  %v822_v53 = vsel %vm465_vm0, %v402_v46, 0.0  ;;  %v422_v46 = vld [vmem:[%s6427_s18 + $0x638] sm:$0xff] }
  0x90   : > { %712 = vadd.xlane.f32.xlu1 %v711_v56  ;;  %v375_v56 = vld [vmem:[%s6427_s18 + $0x4c0] sm:$0xff] }
  0x91   : > { %708 = vadd.xlane.f32.xlu0 %v707_v57  ;;  %v770_v57 = vsel %vm465_vm0, %v376_v49, 0.0 }
  0x92   : > { %v771_v62 = vadd.f32 %v770_v57, %v375_v56  ;;  %v399_v56 = vld [vmem:[%s6427_s18 + $0x580] sm:$0xff]  ;;  %v818_v57 = vsel %vm465_vm0, %v400_v47, 0.0  ;;  %v420_v47 = vld [vmem:[%s6427_s18 + $0x628] sm:$0xff] }
  0x93   : > { %v858_v59 = vsel %vm465_vm0, %v420_v47, 0.0  ;;  %v436_v47 = vld [vmem:[%s6427_s18 + $0x6a8] sm:$0xff] }
  0x94   : > { %720 = vadd.xlane.f32.xlu1 %v719_v0  ;;  %v782_v0 = vsel %vm465_vm0, %v382_v58, 0.0  ;;  %v406_v58 = vld [vmem:[%s6427_s18 + $0x5b8] sm:$0xff] }
  0x95   : > { %716 = vadd.xlane.f32.xlu0 %v715_v1  ;;  %v783_v6 = vadd.f32 %v782_v0, %v381_v63  ;;  %v819_v63 = vadd.f32 %v818_v57, %v399_v56  ;;  %v405_v0 = vld [vmem:[%s6427_s18 + $0x5b0] sm:$0xff]  ;;  %v862_v56 = vsel %vm465_vm0, %v422_v46, 0.0  ;;  %v438_v46 = vld [vmem:[%s6427_s18 + $0x6b8] sm:$0xff] }
  0x98   : > { %728 = vadd.xlane.f32.xlu1 %v727_v8  ;;  %v779_v8 = vadd.f32 %v778_v3, %v379_v2  ;;  %v830_v2 = vsel %vm465_vm0, %v406_v58, 0.0  ;;  %v419_v58 = vld [vmem:[%s6427_s18 + $0x620] sm:$0xff] }
  0x99   : > { %724 = vadd.xlane.f32.xlu0 %v723_v9  ;;  %v385_v9 = vld [vmem:[%s6427_s18 + $0x510] sm:$0xff]  ;;  %v859_v4 = vadd.f32 %v858_v59, %v419_v58  ;;  %v894_v58 = vsel %vm465_vm0, %v438_v46, 0.0 }
  0x9c   : > { %736 = vadd.xlane.f32.xlu1 %v735_v16  ;;  %v791_v16 = vadd.f32 %v790_v10, %v385_v9  ;;  %v831_v9 = vadd.f32 %v830_v2, %v405_v0 }
  0x9d   : > { %732 = vadd.xlane.f32.xlu0 %v731_v17 }
  0xa0   : > { %744 = vadd.xlane.f32.xlu1 %v743_v24  ;;  %v394_v24 = vld [vmem:[%s6427_s18 + $0x558] sm:$0xff] }
  0xa1   : > { %740 = vadd.xlane.f32.xlu0 %v739_v25  ;;  %v392_v25 = vld [vmem:[%s6427_s18 + $0x548] sm:$0xff]  ;;  %v806_v30 = vsel %vm465_vm0, %v394_v24, 0.0 }
  0xa2   : > { %v807_v36 = vadd.f32 %v806_v30, %v393_v29  ;;  %v411_v29 = vld [vmem:[%s6427_s18 + $0x5e0] sm:$0xff]  ;;  %v842_v30 = vsel %vm465_vm0, %v412_v20, 0.0  ;;  %v429_v20 = vld [vmem:[%s6427_s18 + $0x670] sm:$0xff] }
  0xa4   : > { %752 = vadd.xlane.f32.xlu1 %v751_v32  ;;  %v391_v32 = vld [vmem:[%s6427_s18 + $0x540] sm:$0xff] }
  0xa5   : > { %748 = vadd.xlane.f32.xlu0 %v747_v33  ;;  %v6653_v41 = vpop.xlane.xlu1 %476  ;;  %v802_v33 = vsel %vm465_vm0, %v392_v25, 0.0  ;;  %v413_v25 = vld [vmem:[%s6427_s18 + $0x5f0] sm:$0xff] }
  0xa6   : > { %v6657_v45 = vpop.xlane.xlu0 %468  ;;  %v803_v38 = vadd.f32 %v802_v33, %v391_v32  ;;  %v418_v32 = vld [vmem:[%s6427_s18 + $0x618] sm:$0xff]  ;;  %v416_v33 = vld [vmem:[%s6427_s18 + $0x608] sm:$0xff] }
  0xa8   : > { %760 = vadd.xlane.f32.xlu1 %v759_v40  ;;  %v814_v40 = vsel %vm465_vm0, %v398_v34, 0.0 }
  0xa9   : > { %756 = vadd.xlane.f32.xlu0 %v755_v42  ;;  %v6663_v51 = vpop.xlane.xlu1 %480  ;;  %v815_v48 = vadd.f32 %v814_v40, %v397_v39  ;;  %v854_v39 = vsel %vm465_vm0, %v418_v32, 0.0 }
  0xaa   : > { %v6667_v55 = vpop.xlane.xlu0 %472 }
  0xac   : > { %768 = vadd.xlane.f32.xlu1 %v767_v50  ;;  %v811_v50 = vadd.f32 %v810_v44, %v395_v43  ;;  %v415_v43 = vld [vmem:[%s6427_s18 + $0x600] sm:$0xff]  ;;  %v850_v44 = vsel %vm465_vm0, %v416_v33, 0.0 }
  0xad   : > { %764 = vadd.xlane.f32.xlu0 %v763_v52  ;;  %v6673_v61 = vpop.xlane.xlu1 %488  ;;  %v401_v52 = vld [vmem:[%s6427_s18 + $0x590] sm:$0xff] }
  0xae   : > { %v6677_v1 = vpop.xlane.xlu0 %484 }
  0xb0   : > { %776 = vadd.xlane.f32.xlu1 %v775_v60  ;;  %v823_v60 = vadd.f32 %v822_v53, %v401_v52  ;;  %v851_v52 = vadd.f32 %v850_v44, %v415_v43  ;;  %v421_v53 = vld [vmem:[%s6427_s18 + $0x630] sm:$0xff]  ;;  %v431_v43 = vld [vmem:[%s6427_s18 + $0x680] sm:$0xff] }
  0xb1   : > { %772 = vadd.xlane.f32.xlu0 %v771_v62  ;;  %v6683_v7 = vpop.xlane.xlu1 %496  ;;  %v863_v0 = vadd.f32 %v862_v56, %v421_v53  ;;  %v437_v56 = vld [vmem:[%s6427_s18 + $0x6b0] sm:$0xff] }
  0xb2   : > { %v6687_v11 = vpop.xlane.xlu0 %492 }
  0xb4   : > { %784 = vadd.xlane.f32.xlu1 %v783_v6  ;;  %v410_v6 = vld [vmem:[%s6427_s18 + $0x5d8] sm:$0xff] }
  0xb5   : > { %780 = vadd.xlane.f32.xlu0 %v779_v8  ;;  %v6693_v17 = vpop.xlane.xlu1 %504  ;;  %v408_v8 = vld [vmem:[%s6427_s18 + $0x5c8] sm:$0xff]  ;;  %v838_v14 = vsel %vm465_vm0, %v410_v6, 0.0 }
  0xb6   : > { %v6697_v21 = vpop.xlane.xlu0 %500  ;;  %v839_v22 = vadd.f32 %v838_v14, %v409_v13  ;;  %v430_v13 = vld [vmem:[%s6427_s18 + $0x678] sm:$0xff]  ;;  %v428_v14 = vld [vmem:[%s6427_s18 + $0x668] sm:$0xff] }
  0xb8   : > { %792 = vadd.xlane.f32.xlu1 %v791_v16  ;;  %v407_v16 = vld [vmem:[%s6427_s18 + $0x5c0] sm:$0xff] }
  0xb9   : > { %788 = vadd.xlane.f32.xlu0 %v787_v18  ;;  %v6703_v27 = vpop.xlane.xlu1 %512  ;;  %v834_v18 = vsel %vm465_vm0, %v408_v8, 0.0 }
  0xba   : > { %v6707_v31 = vpop.xlane.xlu0 %508  ;;  %v835_v24 = vadd.f32 %v834_v18, %v407_v16 }
  0xbc   : > { %800 = vadd.xlane.f32.xlu1 %v799_v26  ;;  %v846_v26 = vsel %vm465_vm0, %v414_v19, 0.0 }
  0xbd   : > { %796 = vadd.xlane.f32.xlu0 %v795_v28  ;;  %v6713_v37 = vpop.xlane.xlu1 %520  ;;  %v847_v34 = vadd.f32 %v846_v26, %v413_v25  ;;  %v427_v25 = vld [vmem:[%s6427_s18 + $0x660] sm:$0xff]  ;;  %v874_v26 = vsel %vm465_vm0, %v428_v14, 0.0 }
  0xbe   : > { %v6717_v42 = vpop.xlane.xlu0 %516 }
  0xc0   : > { %808 = vadd.xlane.f32.xlu1 %v807_v36  ;;  %v843_v36 = vadd.f32 %v842_v30, %v411_v29  ;;  %v434_v29 = vld [vmem:[%s6427_s18 + $0x698] sm:$0xff]  ;;  %v432_v30 = vld [vmem:[%s6427_s18 + $0x688] sm:$0xff] }
  0xc1   : > { %804 = vadd.xlane.f32.xlu0 %v803_v38  ;;  %v6723_v49 = vpop.xlane.xlu1 %528  ;;  %v417_v38 = vld [vmem:[%s6427_s18 + $0x610] sm:$0xff]  ;;  %v882_v44 = vsel %vm465_vm0, %v432_v30, 0.0 }
  0xc2   : > { %v6727_v54 = vpop.xlane.xlu0 %524  ;;  %v883_v53 = vadd.f32 %v882_v44, %v431_v43  ;;  %v445_v30 = vld [vmem:[%s6427_s18 + $0x6f0] sm:$0xff]  ;;  %v450_v43 = vld [vmem:[%s6427_s18 + $0x718] sm:$0xff]  ;;  %v448_v44 = vld [vmem:[%s6427_s18 + $0x708] sm:$0xff] }
  0xc4   : > { %816 = vadd.xlane.f32.xlu1 %v815_v48  ;;  %v855_v48 = vadd.f32 %v854_v39, %v417_v38  ;;  %v886_v38 = vsel %vm465_vm0, %v434_v29, 0.0 }
  0xc5   : > { %812 = vadd.xlane.f32.xlu0 %v811_v50  ;;  %v6733_v62 = vpop.xlane.xlu1 %536 }
  0xc6   : > { %v6737_v3 = vpop.xlane.xlu0 %532 }
  0xc8   : > { %824 = vadd.xlane.f32.xlu1 %v823_v60  ;;  %v426_v60 = vld [vmem:[%s6427_s18 + $0x658] sm:$0xff] }
  0xc9   : > { %820 = vadd.xlane.f32.xlu0 %v819_v63  ;;  %v6743_v10 = vpop.xlane.xlu1 %544  ;;  %v424_v63 = vld [vmem:[%s6427_s18 + $0x648] sm:$0xff]  ;;  %v870_v6 = vsel %vm465_vm0, %v426_v60, 0.0  ;;  %v435_v60 = vld [vmem:[%s6427_s18 + $0x6a0] sm:$0xff] }
  0xca   : > { %v6747_v15 = vpop.xlane.xlu0 %540  ;;  %v871_v16 = vadd.f32 %v870_v6, %v425_v5  ;;  %v895_v5 = vadd.f32 %v894_v58, %v437_v56  ;;  %v918_v56 = vsel %vm465_vm0, %v450_v43, 0.0 }
  0xcb   : > { %10641 = vst [vmem:[#allocation2_spill] sm:$0xff] %v6747_v15 }
  0xcc   : > { %832 = vadd.xlane.f32.xlu1 %v831_v9  ;;  %v423_v9 = vld [vmem:[%s6427_s18 + $0x640] sm:$0xff] }
  0xcd   : > { %828 = vadd.xlane.f32.xlu0 %v827_v12  ;;  %v6753_v23 = vpop.xlane.xlu1 %552  ;;  %v866_v12 = vsel %vm465_vm0, %v424_v63, 0.0  ;;  %v890_v63 = vsel %vm465_vm0, %v436_v47, 0.0 }
  0xce   : > { %v6757_v28 = vpop.xlane.xlu0 %548  ;;  %v867_v19 = vadd.f32 %v866_v12, %v423_v9  ;;  %v891_v9 = vadd.f32 %v890_v63, %v435_v60  ;;  %v441_v12 = vld [vmem:[%s6427_s18 + $0x6d0] sm:$0xff]  ;;  %v447_v60 = vld [vmem:[%s6427_s18 + $0x700] sm:$0xff]  ;;  %v914_v63 = vsel %vm465_vm0, %v448_v44, 0.0 }
  0xcf   : > { %10642 = vst [vmem:[#allocation3_spill] sm:$0xff] %v6757_v28  ;;  %v6089_v28 = vld [vmem:[%s6427_s18 + $0x5f8] sm:$0xff] }
  0xd0   : > { %840 = vadd.xlane.f32.xlu1 %v839_v22  ;;  %v878_v22 = vsel %vm465_vm0, %v430_v13, 0.0 }
  0xd1   : > { %836 = vadd.xlane.f32.xlu0 %v835_v24  ;;  %v6763_v35 = vpop.xlane.xlu1 %560  ;;  %v879_v32 = vadd.f32 %v878_v22, %v429_v20  ;;  %v446_v20 = vld [vmem:[%s6427_s18 + $0x6f8] sm:$0xff]  ;;  %v444_v22 = vld [vmem:[%s6427_s18 + $0x6e8] sm:$0xff] }
  0xd2   : > { %v6767_v40 = vpop.xlane.xlu0 %556 }
  0xd3   : > { %10643 = vst [vmem:[#allocation4_spill] sm:$0xff] %v6767_v40 }
  0xd4   : > { %848 = vadd.xlane.f32.xlu1 %v847_v34  ;;  %v875_v34 = vadd.f32 %v874_v26, %v427_v25 }
  0xd5   : > { %844 = vadd.xlane.f32.xlu0 %v843_v36  ;;  %v6773_v50 = vpop.xlane.xlu1 %568  ;;  %v433_v36 = vld [vmem:[%s6427_s18 + $0x690] sm:$0xff] }
  0xd6   : > { %v6777_v57 = vpop.xlane.xlu0 %564 }
  0xd7   : > { %10644 = vst [vmem:[#allocation5_spill] sm:$0xff] %v6777_v57  ;;  %v6081_v57 = vld [vmem:[%s6427_s18 + $0x5b8] sm:$0xff] }
  0xd8   : > { %856 = vadd.xlane.f32.xlu1 %v855_v48  ;;  %v887_v48 = vadd.f32 %v886_v38, %v433_v36  ;;  %v443_v36 = vld [vmem:[%s6427_s18 + $0x6e0] sm:$0xff]  ;;  %v906_v38 = vsel %vm465_vm0, %v444_v22, 0.0 }
  0xd9   : > { %852 = vadd.xlane.f32.xlu0 %v851_v52  ;;  %v6783_v2 = vpop.xlane.xlu1 %576 }
  0xda   : > { %10645 = vst [vmem:[#allocation6_spill] sm:$0xff] %v6783_v2  ;;  %v6787_v8 = vpop.xlane.xlu0 %572 }
  0xdb   : > { %10646 = vst [vmem:[#allocation7_spill] sm:$0xff] %v6787_v8 }
  0xdc   : > { %864 = vadd.xlane.f32.xlu1 %v863_v0  ;;  %v442_v0 = vld [vmem:[%s6427_s18 + $0x6d8] sm:$0xff] }
  0xdd   : > { %860 = vadd.xlane.f32.xlu0 %v859_v4  ;;  %v6793_v18 = vpop.xlane.xlu1 %584  ;;  %v440_v4 = vld [vmem:[%s6427_s18 + $0x6c8] sm:$0xff]  ;;  %v902_v13 = vsel %vm465_vm0, %v442_v0, 0.0  ;;  %v454_v0 = vld [vmem:[%s6427_s18 + $0x738] sm:$0xff] }
  0xde   : > { %10647 = vst [vmem:[#allocation8_spill] sm:$0xff] %v6793_v18  ;;  %v6797_v24 = vpop.xlane.xlu0 %580  ;;  %v903_v25 = vadd.f32 %v902_v13, %v441_v12  ;;  %v915_v12 = vadd.f32 %v914_v63, %v447_v60  ;;  %v453_v13 = vld [vmem:[%s6427_s18 + $0x730] sm:$0xff]  ;;  %v5898_v63 = vld [vmem:[%s6427_s18 + $0x8] sm:$0xff]  ;;  %v6097_v18 = vld [vmem:[%s6427_s18 + $0x638] sm:$0xff] }
  0xdf   : > { %10648 = vst [vmem:[#allocation9_spill] sm:$0xff] %v6797_v24  ;;  %v6073_v24 = vld [vmem:[%s6427_s18 + $0x578] sm:$0xff]  ;;  %v1270_v15 = vmul.f32 %v6097_v18, %v6097_v18 }
  0xe0   : > { %872 = vadd.xlane.f32.xlu1 %v871_v16  ;;  %v439_v16 = vld [vmem:[%s6427_s18 + $0x6c0] sm:$0xff] }
  0xe1   : > { %868 = vadd.xlane.f32.xlu0 %v867_v19  ;;  %v6803_v33 = vpop.xlane.xlu1 %592  ;;  %v898_v19 = vsel %vm465_vm0, %v440_v4, 0.0  ;;  %v452_v4 = vld [vmem:[%s6427_s18 + $0x728] sm:$0xff]  ;;  %v1709_v18 = vsel %vm465_vm0, %v1270_v15, 0.0 }
  0xe2   : > { %10649 = vst [vmem:[#allocation10_spill] sm:$0xff] %v6803_v33  ;;  %v6807_v39 = vpop.xlane.xlu0 %588  ;;  %v899_v29 = vadd.f32 %v898_v19, %v439_v16  ;;  %v926_v16 = vsel %vm465_vm0, %v454_v0, 0.0  ;;  %v922_v22 = vsel %vm465_vm0, %v452_v4, 0.0  ;;  %v1072_v0 = vmul.f32 %v5898_v63, %v5898_v63  ;;  %v463_v63 = vld [vmem:[%s6427_s18 + $0x780] sm:$0xff] }
  0xe3   : > { %10650 = vst [vmem:[#allocation11_spill] sm:$0xff] %v6807_v39 }
  0xe4   : > { %880 = vadd.xlane.f32.xlu1 %v879_v32  ;;  %v910_v32 = vsel %vm465_vm0, %v446_v20, 0.0  ;;  %v451_v20 = vld [vmem:[%s6427_s18 + $0x720] sm:$0xff] }
  0xe5   : > { %876 = vadd.xlane.f32.xlu0 %v875_v34  ;;  %v6813_v52 = vpop.xlane.xlu1 %600  ;;  %v911_v46 = vadd.f32 %v910_v32, %v445_v30  ;;  %v927_v30 = vadd.f32 %v926_v16, %v453_v13 }
  0xe6   : > { %10651 = vst [vmem:[#allocation12_spill] sm:$0xff] %v6813_v52  ;;  %v6817_v59 = vpop.xlane.xlu0 %596  ;;  %v1254_v52 = vmul.f32 %v6081_v57, %v6081_v57 }
  0xe7   : > { %10652 = vst [vmem:[#allocation13_spill] sm:$0xff] %v6817_v59  ;;  %v6065_v59 = vld [vmem:[%s6427_s18 + $0x538] sm:$0xff] }
  0xe8   : > { %888 = vadd.xlane.f32.xlu1 %v887_v48  ;;  %v907_v48 = vadd.f32 %v906_v38, %v443_v36  ;;  %v923_v36 = vadd.f32 %v922_v22, %v451_v20  ;;  %v457_v38 = vld [vmem:[%s6427_s18 + $0x750] sm:$0xff]  ;;  %v459_v20 = vld [vmem:[%s6427_s18 + $0x760] sm:$0xff]  ;;  %v1677_v57 = vsel %vm465_vm0, %v1254_v52, 0.0 }
  0xe9   : > { %884 = vadd.xlane.f32.xlu0 %v883_v53  ;;  %v6823_v6 = vpop.xlane.xlu1 %608  ;;  %v449_v53 = vld [vmem:[%s6427_s18 + $0x710] sm:$0xff] }
  0xea   : > { %10653 = vst [vmem:[#allocation14_spill] sm:$0xff] %v6823_v6  ;;  %v6827_v14 = vpop.xlane.xlu0 %604 }
  0xeb   : > { %10654 = vst [vmem:[#allocation15_spill] sm:$0xff] %v6827_v14 }
  0xec   : > { %896 = vadd.xlane.f32.xlu1 %v895_v5  ;;  %v919_v5 = vadd.f32 %v918_v56, %v449_v53  ;;  %v462_v53 = vld [vmem:[%s6427_s18 + $0x778] sm:$0xff]  ;;  %v460_v56 = vld [vmem:[%s6427_s18 + $0x768] sm:$0xff] }
  0xed   : > { %892 = vadd.xlane.f32.xlu0 %v891_v9  ;;  %v6833_v26 = vpop.xlane.xlu1 %616  ;;  %v942_v13 = vsel %vm465_vm0, %v462_v53, 0.0  ;;  %v938_v22 = vsel %vm465_vm0, %v460_v56, 0.0  ;;  %v1313_v53 = vsel %vm465_vm0, %v1072_v0, 0.0 }
  0xee   : > { %10655 = vst [vmem:[#allocation16_spill] sm:$0xff] %v6833_v26  ;;  %v6837_v34 = vpop.xlane.xlu0 %612  ;;  %v1246_v26 = vmul.f32 %v6073_v24, %v6073_v24 }
  0xef   : > { %10656 = vst [vmem:[#allocation17_spill] sm:$0xff] %v6837_v34  ;;  %v6057_v34 = vld [vmem:[%s6427_s18 + $0x4f8] sm:$0xff] }
  0xf0   : > { %904 = vadd.xlane.f32.xlu1 %v903_v25  ;;  %v458_v25 = vld [vmem:[%s6427_s18 + $0x758] sm:$0xff]  ;;  %v1661_v24 = vsel %vm465_vm0, %v1246_v26, 0.0 }
  0xf1   : > { %900 = vadd.xlane.f32.xlu0 %v899_v29  ;;  %v6843_v47 = vpop.xlane.xlu1 %624  ;;  %v456_v29 = vld [vmem:[%s6427_s18 + $0x748] sm:$0xff]  ;;  %v934_v43 = vsel %vm465_vm0, %v458_v25, 0.0 }
  0xf2   : > { %10657 = vst [vmem:[#allocation18_spill] sm:$0xff] %v6843_v47  ;;  %v6847_v58 = vpop.xlane.xlu0 %620  ;;  %v935_v60 = vadd.f32 %v934_v43, %v457_v38  ;;  %v464_v25 = vld [vmem:[%s6427_s18 + $0x788] sm:$0xff] }
  0xf3   : > { %10658 = vst [vmem:[#allocation19_spill] sm:$0xff] %v6847_v58 }
  0xf4   : > { %912 = vadd.xlane.f32.xlu1 %v911_v46  ;;  %v455_v46 = vld [vmem:[%s6427_s18 + $0x740] sm:$0xff] }
  0xf5   : > { %908 = vadd.xlane.f32.xlu0 %v907_v48  ;;  %v6853_v9 = vpop.xlane.xlu1 %632  ;;  %v930_v48 = vsel %vm465_vm0, %v456_v29, 0.0  ;;  %v5899_v29 = vld [vmem:[%s6427_s18] sm:$0xff] }
  0xf6   : > { %10659 = vst [vmem:[#allocation20_spill] sm:$0xff] %v6853_v9  ;;  %v6857_v19 = vpop.xlane.xlu0 %628  ;;  %v1238_v9 = vmul.f32 %v6065_v59, %v6065_v59 }
  0xf7   : > { %10660 = vst [vmem:[#allocation21_spill] sm:$0xff] %v6857_v19 }
  0xf8   : > { %920 = vadd.xlane.f32.xlu1 %v919_v5  ;;  %v931_v5 = vadd.f32 %v930_v48, %v455_v46  ;;  %v939_v48 = vadd.f32 %v938_v22, %v459_v20  ;;  %v5903_v22 = vld [vmem:[%s6427_s18 + $0x10] sm:$0xff]  ;;  %v1645_v59 = vsel %vm465_vm0, %v1238_v9, 0.0 }
  0xf9   : > { %916 = vadd.xlane.f32.xlu0 %v915_v12  ;;  %v6863_v32 = vpop.xlane.xlu1 %640  ;;  %v461_v12 = vld [vmem:[%s6427_s18 + $0x770] sm:$0xff] }
  0xfa   : > { %10661 = vst [vmem:[#allocation22_spill] sm:$0xff] %v6863_v32  ;;  %v6867_v44 = vpop.xlane.xlu0 %636  ;;  %v943_v38 = vadd.f32 %v942_v13, %v461_v12 }
  0xfb   : > { %10662 = vst [vmem:[#allocation23_spill] sm:$0xff] %v6867_v44  ;;  %v5901_v44 = vld [vmem:[%s6427_s18 + $0x18] sm:$0xff] }
  0xfc   : > { %928 = vadd.xlane.f32.xlu1 %v927_v30  ;;  %v1071_v30 = vmul.f32 %v5899_v29, %v5899_v29  ;;  %v1074_v29 = vmul.f32 %v5901_v44, %v5901_v44 }
  0xfd   : > { %924 = vadd.xlane.f32.xlu0 %v923_v36  ;;  %v6874_v4 = vpop.xlane.xlu1 %648  ;;  %v5900_v36 = vld [vmem:[%s6427_s18 + $0x28] sm:$0xff] }
  0xfe   : > { %10663 = vst [vmem:[#allocation24_spill] sm:$0xff] %v6874_v4  ;;  %v6878_v16 = vpop.xlane.xlu0 %644  ;;  %v1076_v43 = vmul.f32 %v5900_v36, %v5900_v36  ;;  %v1073_v36 = vmul.f32 %v5903_v22, %v5903_v22  ;;  %v1230_v4 = vmul.f32 %v6057_v34, %v6057_v34 }
  0xff   : > { %10664 = vst [vmem:[#allocation25_spill] sm:$0xff] %v6878_v16  ;;  %v946_v16 = vsel %vm465_vm0, %v464_v25, 0.0  ;;  %v5904_v25 = vld [vmem:[%s6427_s18 + $0x48] sm:$0xff] }
 0x100   : > { %936 = vadd.xlane.f32.xlu1 %v935_v60  ;;  %v5902_v60 = vld [vmem:[%s6427_s18 + $0x20] sm:$0xff]  ;;  %v947_v13 = vadd.f32 %v946_v16, %v463_v63  ;;  %v1321_v0 = vsel %vm465_vm0, %v1076_v43, 0.0  ;;  %v1080_v19 = vmul.f32 %v5904_v25, %v5904_v25  ;;  %v5908_v25 = vld [vmem:[%s6427_s18 + $0x68] sm:$0xff]  ;;  %v1629_v34 = vsel %vm465_vm0, %v1230_v4, 0.0 }
 0x101   : > { %932 = vadd.xlane.f32.xlu0 %v931_v5  ;;  %v6885_v46 = vpop.xlane.xlu1 %656  ;;  %v1075_v12 = vmul.f32 %v5902_v60, %v5902_v60  ;;  %v1314_v5 = vadd.f32 %v1313_v53, %v1071_v30  ;;  %v5906_v30 = vld [vmem:[%s6427_s18 + $0x40] sm:$0xff]  ;;  %v5907_v53 = vld [vmem:[%s6427_s18 + $0x30] sm:$0xff] }
 0x102   : > { %10665 = vst [vmem:[#allocation26_spill] sm:$0xff] %v6885_v46  ;;  %v6890_v56 = vpop.xlane.xlu0 %652  ;;  %v1077_v63 = vmul.f32 %v5907_v53, %v5907_v53  ;;  %v1329_v22 = vsel %vm465_vm0, %v1080_v19, 0.0  ;;  %v5911_v19 = vld [vmem:[%s6427_s18 + $0x50] sm:$0xff] }
 0x103   : > { %10666 = vst [vmem:[#allocation27_spill] sm:$0xff] %v6890_v56  ;;  %v5905_v56 = vld [vmem:[%s6427_s18 + $0x38] sm:$0xff]  ;;  %v1322_v16 = vadd.f32 %v1321_v0, %v1075_v12 }
 0x104   : > { %944 = vadd.xlane.f32.xlu1 %v943_v38  ;;  %v1078_v58 = vmul.f32 %v5905_v56, %v5905_v56  ;;  %v1317_v38 = vsel %vm465_vm0, %v1074_v29, 0.0  ;;  %v5909_v12 = vld [vmem:[%s6427_s18 + $0x58] sm:$0xff] }
 0x105   : > { %940 = vadd.xlane.f32.xlu0 %v939_v48  ;;  %v6894_v20 = vpop.xlane.xlu1 %664  ;;  %v1079_v48 = vmul.f32 %v5906_v30, %v5906_v30  ;;  %v1318_v60 = vadd.f32 %v1317_v38, %v1073_v36  ;;  %v1081_v38 = vmul.f32 %v5911_v19, %v5911_v19 }
 0x106   : > { %10667 = vst [vmem:[#allocation28_spill] sm:$0xff] %v6894_v20  ;;  %v6900_v44 = vpop.xlane.xlu0 %660  ;;  %v1325_v56 = vsel %vm465_vm0, %v1078_v58, 0.0 }
 0x107   : > { %10668 = vst [vmem:[#allocation29_spill] sm:$0xff] %v6900_v44  ;;  %v1084_v44 = vmul.f32 %v5908_v25, %v5908_v25  ;;  %v1330_v0 = vadd.f32 %v1329_v22, %v1079_v48  ;;  %v1326_v30 = vadd.f32 %v1325_v56, %v1077_v63  ;;  %v5912_v25 = vld [vmem:[%s6427_s18 + $0x88] sm:$0xff]  ;;  %v5914_v63 = vld [vmem:[%s6427_s18 + $0x80] sm:$0xff]  ;;  %v5915_v22 = vld [vmem:[%s6427_s18 + $0x70] sm:$0xff] }
 0x108   : > { %1315 = vadd.xlane.f32.xlu1 %v1314_v5  ;;  %v1082_v5 = vmul.f32 %v5909_v12, %v5909_v12  ;;  %v1085_v56 = vmul.f32 %v5915_v22, %v5915_v22 }
 0x109   : > { %948 = vadd.xlane.f32.xlu0 %v947_v13  ;;  %v6905_v43 = vpop.xlane.xlu1 %672  ;;  %v5910_v13 = vld [vmem:[%s6427_s18 + $0x60] sm:$0xff]  ;;  %v1337_v58 = vsel %vm465_vm0, %v1084_v44, 0.0 }
 0x10a   : > { %10669 = vst [vmem:[#allocation30_spill] sm:$0xff] %v6905_v43  ;;  %v6910_v29 = vpop.xlane.xlu0 %668  ;;  %v1083_v53 = vmul.f32 %v5910_v13, %v5910_v13  ;;  %v1088_v43 = vmul.f32 %v5912_v25, %v5912_v25  ;;  %v5916_v25 = vld [vmem:[%s6427_s18 + $0xa8] sm:$0xff] }
 0x10b   : > { %10670 = vst [vmem:[#allocation31_spill] sm:$0xff] %v6910_v29  ;;  %v5913_v29 = vld [vmem:[%s6427_s18 + $0x78] sm:$0xff] }
 0x10c   : > { %1323 = vadd.xlane.f32.xlu1 %v1322_v16  ;;  %v1086_v20 = vmul.f32 %v5913_v29, %v5913_v29  ;;  %v1333_v16 = vsel %vm465_vm0, %v1082_v5, 0.0  ;;  %v1338_v48 = vadd.f32 %v1337_v58, %v1083_v53  ;;  %v1345_v19 = vsel %vm465_vm0, %v1088_v43, 0.0  ;;  %v5919_v43 = vld [vmem:[%s6427_s18 + $0x90] sm:$0xff] }
 0x10d   : > { %1319 = vadd.xlane.f32.xlu0 %v1318_v60  ;;  %v6914_v36 = vpop.xlane.xlu1 %680  ;;  %v1087_v60 = vmul.f32 %v5914_v63, %v5914_v63  ;;  %v1334_v13 = vadd.f32 %v1333_v16, %v1081_v38  ;;  %v1089_v16 = vmul.f32 %v5919_v43, %v5919_v43 }
 0x10e   : > { %10671 = vst [vmem:[#allocation32_spill] sm:$0xff] %v6914_v36  ;;  %v6920_v12 = vpop.xlane.xlu0 %676  ;;  %v1341_v29 = vsel %vm465_vm0, %v1086_v20, 0.0 }
 0x10f   : > { %10672 = vst [vmem:[#allocation33_spill] sm:$0xff] %v6920_v12  ;;  %v1092_v12 = vmul.f32 %v5916_v25, %v5916_v25  ;;  %v1346_v58 = vadd.f32 %v1345_v19, %v1087_v60  ;;  %v1342_v63 = vadd.f32 %v1341_v29, %v1085_v56  ;;  %v5920_v25 = vld [vmem:[%s6427_s18 + $0xc8] sm:$0xff]  ;;  %v5922_v56 = vld [vmem:[%s6427_s18 + $0xc0] sm:$0xff]  ;;  %v5923_v19 = vld [vmem:[%s6427_s18 + $0xb0] sm:$0xff] }
 0x110   : > { %1331 = vadd.xlane.f32.xlu1 %v1330_v0  ;;  %v5917_v0 = vld [vmem:[%s6427_s18 + $0x98] sm:$0xff]  ;;  %v1093_v29 = vmul.f32 %v5923_v19, %v5923_v19 }
 0x111   : > { %1327 = vadd.xlane.f32.xlu0 %v1326_v30  ;;  %v6925_v44 = vpop.xlane.xlu1 %688  ;;  %v1090_v53 = vmul.f32 %v5917_v0, %v5917_v0  ;;  %v5918_v30 = vld [vmem:[%s6427_s18 + $0xa0] sm:$0xff]  ;;  %v1353_v20 = vsel %vm465_vm0, %v1092_v12, 0.0 }
 0x112   : > { %10673 = vst [vmem:[#allocation34_spill] sm:$0xff] %v6925_v44  ;;  %v6930_v5 = vpop.xlane.xlu0 %684  ;;  %v1091_v22 = vmul.f32 %v5918_v30, %v5918_v30  ;;  %v1096_v44 = vmul.f32 %v5920_v25, %v5920_v25  ;;  %v5924_v25 = vld [vmem:[%s6427_s18 + $0xe8] sm:$0xff] }
 0x113   : > { %10674 = vst [vmem:[#allocation35_spill] sm:$0xff] %v6930_v5  ;;  %v5921_v5 = vld [vmem:[%s6427_s18 + $0xb8] sm:$0xff] }
 0x114   : > { %1339 = vadd.xlane.f32.xlu1 %v1338_v48  ;;  %v1094_v36 = vmul.f32 %v5921_v5, %v5921_v5  ;;  %v1349_v48 = vsel %vm465_vm0, %v1090_v53, 0.0  ;;  %v1354_v60 = vadd.f32 %v1353_v20, %v1091_v22  ;;  %v1361_v43 = vsel %vm465_vm0, %v1096_v44, 0.0  ;;  %v5927_v44 = vld [vmem:[%s6427_s18 + $0xd0] sm:$0xff] }
 0x115   : > { %1335 = vadd.xlane.f32.xlu0 %v1334_v13  ;;  %v6934_v38 = vpop.xlane.xlu1 %696  ;;  %v1095_v13 = vmul.f32 %v5922_v56, %v5922_v56  ;;  %v1350_v30 = vadd.f32 %v1349_v48, %v1089_v16  ;;  %v1097_v48 = vmul.f32 %v5927_v44, %v5927_v44 }
 0x116   : > { %10675 = vst [vmem:[#allocation36_spill] sm:$0xff] %v6934_v38  ;;  %v6940_v0 = vpop.xlane.xlu0 %692  ;;  %v1357_v5 = vsel %vm465_vm0, %v1094_v36, 0.0 }
 0x117   : > { %10676 = vst [vmem:[#allocation37_spill] sm:$0xff] %v6940_v0  ;;  %v1100_v0 = vmul.f32 %v5924_v25, %v5924_v25  ;;  %v1362_v20 = vadd.f32 %v1361_v43, %v1095_v13  ;;  %v1358_v56 = vadd.f32 %v1357_v5, %v1093_v29  ;;  %v5928_v25 = vld [vmem:[%s6427_s18 + $0x108] sm:$0xff]  ;;  %v5930_v29 = vld [vmem:[%s6427_s18 + $0x100] sm:$0xff]  ;;  %v5931_v43 = vld [vmem:[%s6427_s18 + $0xf0] sm:$0xff] }
 0x118   : > { %1347 = vadd.xlane.f32.xlu1 %v1346_v58  ;;  %v5925_v58 = vld [vmem:[%s6427_s18 + $0xd8] sm:$0xff]  ;;  %v1101_v5 = vmul.f32 %v5931_v43, %v5931_v43 }
 0x119   : > { %1343 = vadd.xlane.f32.xlu0 %v1342_v63  ;;  %v6945_v12 = vpop.xlane.xlu1 %704  ;;  %v1098_v22 = vmul.f32 %v5925_v58, %v5925_v58  ;;  %v5926_v63 = vld [vmem:[%s6427_s18 + $0xe0] sm:$0xff]  ;;  %v1369_v36 = vsel %vm465_vm0, %v1100_v0, 0.0 }
 0x11a   : > { %10677 = vst [vmem:[#allocation38_spill] sm:$0xff] %v6945_v12  ;;  %v6950_v53 = vpop.xlane.xlu0 %700  ;;  %v1099_v19 = vmul.f32 %v5926_v63, %v5926_v63  ;;  %v1104_v12 = vmul.f32 %v5928_v25, %v5928_v25  ;;  %v5932_v25 = vld [vmem:[%s6427_s18 + $0x128] sm:$0xff] }
 0x11b   : > { %10678 = vst [vmem:[#allocation39_spill] sm:$0xff] %v6950_v53  ;;  %v5929_v53 = vld [vmem:[%s6427_s18 + $0xf8] sm:$0xff] }
 0x11c   : > { %1355 = vadd.xlane.f32.xlu1 %v1354_v60  ;;  %v1102_v38 = vmul.f32 %v5929_v53, %v5929_v53  ;;  %v1365_v60 = vsel %vm465_vm0, %v1098_v22, 0.0  ;;  %v1370_v13 = vadd.f32 %v1369_v36, %v1099_v19  ;;  %v1377_v44 = vsel %vm465_vm0, %v1104_v12, 0.0  ;;  %v5935_v12 = vld [vmem:[%s6427_s18 + $0x110] sm:$0xff] }
 0x11d   : > { %1351 = vadd.xlane.f32.xlu0 %v1350_v30  ;;  %v6954_v16 = vpop.xlane.xlu1 %712  ;;  %v1103_v30 = vmul.f32 %v5930_v29, %v5930_v29  ;;  %v1366_v63 = vadd.f32 %v1365_v60, %v1097_v48  ;;  %v1105_v60 = vmul.f32 %v5935_v12, %v5935_v12 }
 0x11e   : > { %10679 = vst [vmem:[#allocation40_spill] sm:$0xff] %v6954_v16  ;;  %v6960_v58 = vpop.xlane.xlu0 %708  ;;  %v1373_v53 = vsel %vm465_vm0, %v1102_v38, 0.0 }
 0x11f   : > { %10680 = vst [vmem:[#allocation41_spill] sm:$0xff] %v6960_v58  ;;  %v1108_v58 = vmul.f32 %v5932_v25, %v5932_v25  ;;  %v1378_v36 = vadd.f32 %v1377_v44, %v1103_v30  ;;  %v1374_v29 = vadd.f32 %v1373_v53, %v1101_v5  ;;  %v5936_v25 = vld [vmem:[%s6427_s18 + $0x148] sm:$0xff]  ;;  %v5938_v5 = vld [vmem:[%s6427_s18 + $0x140] sm:$0xff]  ;;  %v5939_v44 = vld [vmem:[%s6427_s18 + $0x130] sm:$0xff] }
 0x120   : > { %1363 = vadd.xlane.f32.xlu1 %v1362_v20  ;;  %v5933_v20 = vld [vmem:[%s6427_s18 + $0x118] sm:$0xff]  ;;  %v1109_v53 = vmul.f32 %v5939_v44, %v5939_v44 }
 0x121   : > { %1359 = vadd.xlane.f32.xlu0 %v1358_v56  ;;  %v6965_v0 = vpop.xlane.xlu1 %720  ;;  %v1106_v19 = vmul.f32 %v5933_v20, %v5933_v20  ;;  %v5934_v56 = vld [vmem:[%s6427_s18 + $0x120] sm:$0xff]  ;;  %v1385_v38 = vsel %vm465_vm0, %v1108_v58, 0.0 }
 0x122   : > { %10681 = vst [vmem:[#allocation42_spill] sm:$0xff] %v6965_v0  ;;  %v6970_v22 = vpop.xlane.xlu0 %716  ;;  %v1107_v43 = vmul.f32 %v5934_v56, %v5934_v56  ;;  %v1112_v0 = vmul.f32 %v5936_v25, %v5936_v25  ;;  %v5940_v25 = vld [vmem:[%s6427_s18 + $0x168] sm:$0xff] }
 0x123   : > { %10682 = vst [vmem:[#allocation43_spill] sm:$0xff] %v6970_v22  ;;  %v5937_v22 = vld [vmem:[%s6427_s18 + $0x138] sm:$0xff] }
 0x124   : > { %1371 = vadd.xlane.f32.xlu1 %v1370_v13  ;;  %v1110_v16 = vmul.f32 %v5937_v22, %v5937_v22  ;;  %v1381_v13 = vsel %vm465_vm0, %v1106_v19, 0.0  ;;  %v1386_v30 = vadd.f32 %v1385_v38, %v1107_v43  ;;  %v1393_v12 = vsel %vm465_vm0, %v1112_v0, 0.0  ;;  %v5943_v0 = vld [vmem:[%s6427_s18 + $0x150] sm:$0xff] }
 0x125   : > { %1367 = vadd.xlane.f32.xlu0 %v1366_v63  ;;  %v6974_v48 = vpop.xlane.xlu1 %728  ;;  %v1111_v63 = vmul.f32 %v5938_v5, %v5938_v5  ;;  %v1382_v56 = vadd.f32 %v1381_v13, %v1105_v60  ;;  %v1113_v13 = vmul.f32 %v5943_v0, %v5943_v0 }
 0x126   : > { %10683 = vst [vmem:[#allocation44_spill] sm:$0xff] %v6974_v48  ;;  %v6980_v20 = vpop.xlane.xlu0 %724  ;;  %v1389_v22 = vsel %vm465_vm0, %v1110_v16, 0.0 }
 0x127   : > { %10684 = vst [vmem:[#allocation45_spill] sm:$0xff] %v6980_v20  ;;  %v1116_v20 = vmul.f32 %v5940_v25, %v5940_v25  ;;  %v1394_v38 = vadd.f32 %v1393_v12, %v1111_v63  ;;  %v1390_v5 = vadd.f32 %v1389_v22, %v1109_v53  ;;  %v5944_v25 = vld [vmem:[%s6427_s18 + $0x188] sm:$0xff]  ;;  %v5946_v53 = vld [vmem:[%s6427_s18 + $0x180] sm:$0xff]  ;;  %v5947_v12 = vld [vmem:[%s6427_s18 + $0x170] sm:$0xff] }
 0x128   : > { %1379 = vadd.xlane.f32.xlu1 %v1378_v36  ;;  %v5941_v36 = vld [vmem:[%s6427_s18 + $0x158] sm:$0xff]  ;;  %v1117_v22 = vmul.f32 %v5947_v12, %v5947_v12 }
 0x129   : > { %1375 = vadd.xlane.f32.xlu0 %v1374_v29  ;;  %v6985_v58 = vpop.xlane.xlu1 %736  ;;  %v1114_v43 = vmul.f32 %v5941_v36, %v5941_v36  ;;  %v5942_v29 = vld [vmem:[%s6427_s18 + $0x160] sm:$0xff]  ;;  %v1401_v16 = vsel %vm465_vm0, %v1116_v20, 0.0 }
 0x12a   : > { %10685 = vst [vmem:[#allocation46_spill] sm:$0xff] %v6985_v58  ;;  %v6990_v19 = vpop.xlane.xlu0 %732  ;;  %v1115_v44 = vmul.f32 %v5942_v29, %v5942_v29  ;;  %v1120_v58 = vmul.f32 %v5944_v25, %v5944_v25  ;;  %v5948_v25 = vld [vmem:[%s6427_s18 + $0x1a8] sm:$0xff] }
 0x12b   : > { %10686 = vst [vmem:[#allocation47_spill] sm:$0xff] %v6990_v19  ;;  %v5945_v19 = vld [vmem:[%s6427_s18 + $0x178] sm:$0xff] }
 0x12c   : > { %1387 = vadd.xlane.f32.xlu1 %v1386_v30  ;;  %v1118_v48 = vmul.f32 %v5945_v19, %v5945_v19  ;;  %v1397_v30 = vsel %vm465_vm0, %v1114_v43, 0.0  ;;  %v1402_v63 = vadd.f32 %v1401_v16, %v1115_v44  ;;  %v1409_v0 = vsel %vm465_vm0, %v1120_v58, 0.0  ;;  %v5951_v58 = vld [vmem:[%s6427_s18 + $0x190] sm:$0xff] }
 0x12d   : > { %1383 = vadd.xlane.f32.xlu0 %v1382_v56  ;;  %v6994_v60 = vpop.xlane.xlu1 %744  ;;  %v1119_v56 = vmul.f32 %v5946_v53, %v5946_v53  ;;  %v1398_v29 = vadd.f32 %v1397_v30, %v1113_v13  ;;  %v1121_v30 = vmul.f32 %v5951_v58, %v5951_v58 }
 0x12e   : > { %10687 = vst [vmem:[#allocation48_spill] sm:$0xff] %v6994_v60  ;;  %v7000_v36 = vpop.xlane.xlu0 %740  ;;  %v1405_v19 = vsel %vm465_vm0, %v1118_v48, 0.0 }
 0x12f   : > { %10688 = vst [vmem:[#allocation49_spill] sm:$0xff] %v7000_v36  ;;  %v1124_v36 = vmul.f32 %v5948_v25, %v5948_v25  ;;  %v1410_v16 = vadd.f32 %v1409_v0, %v1119_v56  ;;  %v1406_v53 = vadd.f32 %v1405_v19, %v1117_v22  ;;  %v5952_v25 = vld [vmem:[%s6427_s18 + $0x1c8] sm:$0xff]  ;;  %v5954_v22 = vld [vmem:[%s6427_s18 + $0x1c0] sm:$0xff]  ;;  %v5955_v0 = vld [vmem:[%s6427_s18 + $0x1b0] sm:$0xff] }
 0x130   : > { %1395 = vadd.xlane.f32.xlu1 %v1394_v38  ;;  %v5949_v38 = vld [vmem:[%s6427_s18 + $0x198] sm:$0xff]  ;;  %v1125_v19 = vmul.f32 %v5955_v0, %v5955_v0 }
 0x131   : > { %1391 = vadd.xlane.f32.xlu0 %v1390_v5  ;;  %v7005_v20 = vpop.xlane.xlu1 %752  ;;  %v1122_v44 = vmul.f32 %v5949_v38, %v5949_v38  ;;  %v5950_v5 = vld [vmem:[%s6427_s18 + $0x1a0] sm:$0xff]  ;;  %v1417_v48 = vsel %vm465_vm0, %v1124_v36, 0.0 }
 0x132   : > { %10689 = vst [vmem:[#allocation50_spill] sm:$0xff] %v7005_v20  ;;  %v7010_v43 = vpop.xlane.xlu0 %748  ;;  %v1123_v12 = vmul.f32 %v5950_v5, %v5950_v5  ;;  %v1128_v20 = vmul.f32 %v5952_v25, %v5952_v25  ;;  %v5956_v25 = vld [vmem:[%s6427_s18 + $0x1e8] sm:$0xff] }
 0x133   : > { %10690 = vst [vmem:[#allocation51_spill] sm:$0xff] %v7010_v43  ;;  %v5953_v43 = vld [vmem:[%s6427_s18 + $0x1b8] sm:$0xff] }
 0x134   : > { %1403 = vadd.xlane.f32.xlu1 %v1402_v63  ;;  %v1126_v60 = vmul.f32 %v5953_v43, %v5953_v43  ;;  %v1413_v63 = vsel %vm465_vm0, %v1122_v44, 0.0  ;;  %v1418_v56 = vadd.f32 %v1417_v48, %v1123_v12  ;;  %v1425_v58 = vsel %vm465_vm0, %v1128_v20, 0.0  ;;  %v5959_v20 = vld [vmem:[%s6427_s18 + $0x1d0] sm:$0xff] }
 0x135   : > { %1399 = vadd.xlane.f32.xlu0 %v1398_v29  ;;  %v7014_v13 = vpop.xlane.xlu1 %760  ;;  %v1127_v29 = vmul.f32 %v5954_v22, %v5954_v22  ;;  %v1414_v5 = vadd.f32 %v1413_v63, %v1121_v30  ;;  %v1129_v63 = vmul.f32 %v5959_v20, %v5959_v20 }
 0x136   : > { %10691 = vst [vmem:[#allocation52_spill] sm:$0xff] %v7014_v13  ;;  %v7020_v38 = vpop.xlane.xlu0 %756  ;;  %v1421_v43 = vsel %vm465_vm0, %v1126_v60, 0.0 }
 0x137   : > { %10692 = vst [vmem:[#allocation53_spill] sm:$0xff] %v7020_v38  ;;  %v1132_v38 = vmul.f32 %v5956_v25, %v5956_v25  ;;  %v1426_v48 = vadd.f32 %v1425_v58, %v1127_v29  ;;  %v1422_v22 = vadd.f32 %v1421_v43, %v1125_v19  ;;  %v5960_v25 = vld [vmem:[%s6427_s18 + $0x208] sm:$0xff]  ;;  %v5962_v19 = vld [vmem:[%s6427_s18 + $0x200] sm:$0xff]  ;;  %v5963_v58 = vld [vmem:[%s6427_s18 + $0x1f0] sm:$0xff] }
 0x138   : > { %1411 = vadd.xlane.f32.xlu1 %v1410_v16  ;;  %v5957_v16 = vld [vmem:[%s6427_s18 + $0x1d8] sm:$0xff]  ;;  %v1133_v43 = vmul.f32 %v5963_v58, %v5963_v58 }
 0x139   : > { %1407 = vadd.xlane.f32.xlu0 %v1406_v53  ;;  %v7025_v36 = vpop.xlane.xlu1 %768  ;;  %v1130_v12 = vmul.f32 %v5957_v16, %v5957_v16  ;;  %v5958_v53 = vld [vmem:[%s6427_s18 + $0x1e0] sm:$0xff]  ;;  %v1433_v60 = vsel %vm465_vm0, %v1132_v38, 0.0 }
 0x13a   : > { %10693 = vst [vmem:[#allocation54_spill] sm:$0xff] %v7025_v36  ;;  %v7030_v44 = vpop.xlane.xlu0 %764  ;;  %v1131_v0 = vmul.f32 %v5958_v53, %v5958_v53  ;;  %v1136_v36 = vmul.f32 %v5960_v25, %v5960_v25  ;;  %v5964_v25 = vld [vmem:[%s6427_s18 + $0x228] sm:$0xff] }
 0x13b   : > { %10694 = vst [vmem:[#allocation55_spill] sm:$0xff] %v7030_v44  ;;  %v5961_v44 = vld [vmem:[%s6427_s18 + $0x1f8] sm:$0xff] }
 0x13c   : > { %1419 = vadd.xlane.f32.xlu1 %v1418_v56  ;;  %v1134_v13 = vmul.f32 %v5961_v44, %v5961_v44  ;;  %v1429_v56 = vsel %vm465_vm0, %v1130_v12, 0.0  ;;  %v1434_v29 = vadd.f32 %v1433_v60, %v1131_v0  ;;  %v1441_v20 = vsel %vm465_vm0, %v1136_v36, 0.0  ;;  %v5967_v36 = vld [vmem:[%s6427_s18 + $0x210] sm:$0xff] }
 0x13d   : > { %1415 = vadd.xlane.f32.xlu0 %v1414_v5  ;;  %v7034_v30 = vpop.xlane.xlu1 %776  ;;  %v1135_v5 = vmul.f32 %v5962_v19, %v5962_v19  ;;  %v1430_v53 = vadd.f32 %v1429_v56, %v1129_v63  ;;  %v1137_v56 = vmul.f32 %v5967_v36, %v5967_v36 }
 0x13e   : > { %10695 = vst [vmem:[#allocation56_spill] sm:$0xff] %v7034_v30  ;;  %v7040_v16 = vpop.xlane.xlu0 %772  ;;  %v1437_v44 = vsel %vm465_vm0, %v1134_v13, 0.0 }
 0x13f   : > { %10696 = vst [vmem:[#allocation57_spill] sm:$0xff] %v7040_v16  ;;  %v1140_v16 = vmul.f32 %v5964_v25, %v5964_v25  ;;  %v1442_v60 = vadd.f32 %v1441_v20, %v1135_v5  ;;  %v1438_v19 = vadd.f32 %v1437_v44, %v1133_v43  ;;  %v5968_v25 = vld [vmem:[%s6427_s18 + $0x248] sm:$0xff]  ;;  %v5970_v43 = vld [vmem:[%s6427_s18 + $0x240] sm:$0xff]  ;;  %v5971_v20 = vld [vmem:[%s6427_s18 + $0x230] sm:$0xff] }
 0x140   : > { %1427 = vadd.xlane.f32.xlu1 %v1426_v48  ;;  %v5965_v48 = vld [vmem:[%s6427_s18 + $0x218] sm:$0xff]  ;;  %v1141_v44 = vmul.f32 %v5971_v20, %v5971_v20 }
 0x141   : > { %1423 = vadd.xlane.f32.xlu0 %v1422_v22  ;;  %v7045_v38 = vpop.xlane.xlu1 %784  ;;  %v1138_v0 = vmul.f32 %v5965_v48, %v5965_v48  ;;  %v5966_v22 = vld [vmem:[%s6427_s18 + $0x220] sm:$0xff]  ;;  %v1449_v13 = vsel %vm465_vm0, %v1140_v16, 0.0 }
 0x142   : > { %10697 = vst [vmem:[#allocation58_spill] sm:$0xff] %v7045_v38  ;;  %v7050_v12 = vpop.xlane.xlu0 %780  ;;  %v1139_v58 = vmul.f32 %v5966_v22, %v5966_v22  ;;  %v1144_v38 = vmul.f32 %v5968_v25, %v5968_v25  ;;  %v5972_v25 = vld [vmem:[%s6427_s18 + $0x268] sm:$0xff] }
 0x143   : > { %10698 = vst [vmem:[#allocation59_spill] sm:$0xff] %v7050_v12  ;;  %v5969_v12 = vld [vmem:[%s6427_s18 + $0x238] sm:$0xff] }
 0x144   : > { %1435 = vadd.xlane.f32.xlu1 %v1434_v29  ;;  %v1142_v30 = vmul.f32 %v5969_v12, %v5969_v12  ;;  %v1445_v29 = vsel %vm465_vm0, %v1138_v0, 0.0  ;;  %v1450_v5 = vadd.f32 %v1449_v13, %v1139_v58  ;;  %v1457_v36 = vsel %vm465_vm0, %v1144_v38, 0.0  ;;  %v5975_v38 = vld [vmem:[%s6427_s18 + $0x250] sm:$0xff] }
 0x145   : > { %1431 = vadd.xlane.f32.xlu0 %v1430_v53  ;;  %v7054_v63 = vpop.xlane.xlu1 %792  ;;  %v1143_v53 = vmul.f32 %v5970_v43, %v5970_v43  ;;  %v1446_v22 = vadd.f32 %v1445_v29, %v1137_v56  ;;  %v1145_v29 = vmul.f32 %v5975_v38, %v5975_v38 }
 0x146   : > { %10699 = vst [vmem:[#allocation60_spill] sm:$0xff] %v7054_v63  ;;  %v7060_v48 = vpop.xlane.xlu0 %788  ;;  %v1453_v12 = vsel %vm465_vm0, %v1142_v30, 0.0 }
 0x147   : > { %10700 = vst [vmem:[#allocation61_spill] sm:$0xff] %v7060_v48  ;;  %v1148_v48 = vmul.f32 %v5972_v25, %v5972_v25  ;;  %v1458_v13 = vadd.f32 %v1457_v36, %v1143_v53  ;;  %v1454_v43 = vadd.f32 %v1453_v12, %v1141_v44  ;;  %v5976_v25 = vld [vmem:[%s6427_s18 + $0x288] sm:$0xff]  ;;  %v5978_v44 = vld [vmem:[%s6427_s18 + $0x280] sm:$0xff]  ;;  %v5979_v36 = vld [vmem:[%s6427_s18 + $0x270] sm:$0xff] }
 0x148   : > { %1443 = vadd.xlane.f32.xlu1 %v1442_v60  ;;  %v5973_v60 = vld [vmem:[%s6427_s18 + $0x258] sm:$0xff]  ;;  %v1149_v12 = vmul.f32 %v5979_v36, %v5979_v36 }
 0x149   : > { %1439 = vadd.xlane.f32.xlu0 %v1438_v19  ;;  %v7065_v16 = vpop.xlane.xlu1 %800  ;;  %v1146_v58 = vmul.f32 %v5973_v60, %v5973_v60  ;;  %v5974_v19 = vld [vmem:[%s6427_s18 + $0x260] sm:$0xff]  ;;  %v1465_v30 = vsel %vm465_vm0, %v1148_v48, 0.0 }
 0x14a   : > { %10701 = vst [vmem:[#allocation62_spill] sm:$0xff] %v7065_v16  ;;  %v7070_v0 = vpop.xlane.xlu0 %796  ;;  %v1147_v20 = vmul.f32 %v5974_v19, %v5974_v19  ;;  %v1152_v16 = vmul.f32 %v5976_v25, %v5976_v25  ;;  %v5980_v25 = vld [vmem:[%s6427_s18 + $0x2a8] sm:$0xff] }
 0x14b   : > { %10702 = vst [vmem:[#allocation63_spill] sm:$0xff] %v7070_v0  ;;  %v5977_v0 = vld [vmem:[%s6427_s18 + $0x278] sm:$0xff] }
 0x14c   : > { %1451 = vadd.xlane.f32.xlu1 %v1450_v5  ;;  %v1150_v63 = vmul.f32 %v5977_v0, %v5977_v0  ;;  %v1461_v5 = vsel %vm465_vm0, %v1146_v58, 0.0  ;;  %v1466_v53 = vadd.f32 %v1465_v30, %v1147_v20  ;;  %v1473_v38 = vsel %vm465_vm0, %v1152_v16, 0.0  ;;  %v5983_v16 = vld [vmem:[%s6427_s18 + $0x290] sm:$0xff] }
 0x14d   : > { %1447 = vadd.xlane.f32.xlu0 %v1446_v22  ;;  %v7074_v56 = vpop.xlane.xlu1 %808  ;;  %v1151_v22 = vmul.f32 %v5978_v44, %v5978_v44  ;;  %v1462_v19 = vadd.f32 %v1461_v5, %v1145_v29  ;;  %v1153_v5 = vmul.f32 %v5983_v16, %v5983_v16 }
 0x14e   : > { %10703 = vst [vmem:[#allocation64_spill] sm:$0xff] %v7074_v56  ;;  %v7080_v60 = vpop.xlane.xlu0 %804  ;;  %v1469_v0 = vsel %vm465_vm0, %v1150_v63, 0.0 }
 0x14f   : > { %10704 = vst [vmem:[#allocation65_spill] sm:$0xff] %v7080_v60  ;;  %v1156_v60 = vmul.f32 %v5980_v25, %v5980_v25  ;;  %v1474_v30 = vadd.f32 %v1473_v38, %v1151_v22  ;;  %v1470_v44 = vadd.f32 %v1469_v0, %v1149_v12  ;;  %v5984_v25 = vld [vmem:[%s6427_s18 + $0x2c8] sm:$0xff]  ;;  %v5986_v12 = vld [vmem:[%s6427_s18 + $0x2c0] sm:$0xff]  ;;  %v5987_v38 = vld [vmem:[%s6427_s18 + $0x2b0] sm:$0xff] }
 0x150   : > { %1459 = vadd.xlane.f32.xlu1 %v1458_v13  ;;  %v5981_v13 = vld [vmem:[%s6427_s18 + $0x298] sm:$0xff]  ;;  %v1157_v0 = vmul.f32 %v5987_v38, %v5987_v38 }
 0x151   : > { %1455 = vadd.xlane.f32.xlu0 %v1454_v43  ;;  %v7085_v48 = vpop.xlane.xlu1 %816  ;;  %v1154_v20 = vmul.f32 %v5981_v13, %v5981_v13  ;;  %v5982_v43 = vld [vmem:[%s6427_s18 + $0x2a0] sm:$0xff]  ;;  %v1481_v63 = vsel %vm465_vm0, %v1156_v60, 0.0 }
 0x152   : > { %10705 = vst [vmem:[#allocation66_spill] sm:$0xff] %v7085_v48  ;;  %v7090_v58 = vpop.xlane.xlu0 %812  ;;  %v1155_v36 = vmul.f32 %v5982_v43, %v5982_v43  ;;  %v1160_v48 = vmul.f32 %v5984_v25, %v5984_v25  ;;  %v5988_v25 = vld [vmem:[%s6427_s18 + $0x2e8] sm:$0xff] }
 0x153   : > { %10706 = vst [vmem:[#allocation67_spill] sm:$0xff] %v7090_v58  ;;  %v5985_v58 = vld [vmem:[%s6427_s18 + $0x2b8] sm:$0xff] }
 0x154   : > { %1467 = vadd.xlane.f32.xlu1 %v1466_v53  ;;  %v1158_v56 = vmul.f32 %v5985_v58, %v5985_v58  ;;  %v1477_v53 = vsel %vm465_vm0, %v1154_v20, 0.0  ;;  %v1482_v22 = vadd.f32 %v1481_v63, %v1155_v36  ;;  %v1489_v16 = vsel %vm465_vm0, %v1160_v48, 0.0  ;;  %v5991_v48 = vld [vmem:[%s6427_s18 + $0x2d0] sm:$0xff] }
 0x155   : > { %1463 = vadd.xlane.f32.xlu0 %v1462_v19  ;;  %v7094_v29 = vpop.xlane.xlu1 %824  ;;  %v1159_v19 = vmul.f32 %v5986_v12, %v5986_v12  ;;  %v1478_v43 = vadd.f32 %v1477_v53, %v1153_v5  ;;  %v1161_v53 = vmul.f32 %v5991_v48, %v5991_v48 }
 0x156   : > { %10707 = vst [vmem:[#allocation68_spill] sm:$0xff] %v7094_v29  ;;  %v7100_v13 = vpop.xlane.xlu0 %820  ;;  %v1485_v58 = vsel %vm465_vm0, %v1158_v56, 0.0 }
 0x157   : > { %10708 = vst [vmem:[#allocation69_spill] sm:$0xff] %v7100_v13  ;;  %v1164_v13 = vmul.f32 %v5988_v25, %v5988_v25  ;;  %v1490_v63 = vadd.f32 %v1489_v16, %v1159_v19  ;;  %v1486_v12 = vadd.f32 %v1485_v58, %v1157_v0  ;;  %v5992_v25 = vld [vmem:[%s6427_s18 + $0x308] sm:$0xff]  ;;  %v5994_v0 = vld [vmem:[%s6427_s18 + $0x300] sm:$0xff]  ;;  %v5995_v16 = vld [vmem:[%s6427_s18 + $0x2f0] sm:$0xff] }
 0x158   : > { %1475 = vadd.xlane.f32.xlu1 %v1474_v30  ;;  %v5989_v30 = vld [vmem:[%s6427_s18 + $0x2d8] sm:$0xff]  ;;  %v1165_v58 = vmul.f32 %v5995_v16, %v5995_v16 }
 0x159   : > { %1471 = vadd.xlane.f32.xlu0 %v1470_v44  ;;  %v7105_v60 = vpop.xlane.xlu1 %832  ;;  %v1162_v36 = vmul.f32 %v5989_v30, %v5989_v30  ;;  %v5990_v44 = vld [vmem:[%s6427_s18 + $0x2e0] sm:$0xff]  ;;  %v1497_v56 = vsel %vm465_vm0, %v1164_v13, 0.0 }
 0x15a   : > { %10709 = vst [vmem:[#allocation70_spill] sm:$0xff] %v7105_v60  ;;  %v7110_v20 = vpop.xlane.xlu0 %828  ;;  %v1163_v38 = vmul.f32 %v5990_v44, %v5990_v44  ;;  %v1168_v60 = vmul.f32 %v5992_v25, %v5992_v25  ;;  %v5996_v25 = vld [vmem:[%s6427_s18 + $0x328] sm:$0xff] }
 0x15b   : > { %10710 = vst [vmem:[#allocation71_spill] sm:$0xff] %v7110_v20  ;;  %v5993_v20 = vld [vmem:[%s6427_s18 + $0x2f8] sm:$0xff] }
 0x15c   : > { %1483 = vadd.xlane.f32.xlu1 %v1482_v22  ;;  %v1166_v29 = vmul.f32 %v5993_v20, %v5993_v20  ;;  %v1493_v22 = vsel %vm465_vm0, %v1162_v36, 0.0  ;;  %v1498_v19 = vadd.f32 %v1497_v56, %v1163_v38  ;;  %v1505_v48 = vsel %vm465_vm0, %v1168_v60, 0.0  ;;  %v5999_v60 = vld [vmem:[%s6427_s18 + $0x310] sm:$0xff] }
 0x15d   : > { %1479 = vadd.xlane.f32.xlu0 %v1478_v43  ;;  %v7114_v5 = vpop.xlane.xlu1 %840  ;;  %v1167_v43 = vmul.f32 %v5994_v0, %v5994_v0  ;;  %v1494_v44 = vadd.f32 %v1493_v22, %v1161_v53  ;;  %v1169_v22 = vmul.f32 %v5999_v60, %v5999_v60 }
 0x15e   : > { %10711 = vst [vmem:[#allocation72_spill] sm:$0xff] %v7114_v5  ;;  %v7120_v30 = vpop.xlane.xlu0 %836  ;;  %v1501_v20 = vsel %vm465_vm0, %v1166_v29, 0.0 }
 0x15f   : > { %10712 = vst [vmem:[#allocation73_spill] sm:$0xff] %v7120_v30  ;;  %v1172_v30 = vmul.f32 %v5996_v25, %v5996_v25  ;;  %v1506_v56 = vadd.f32 %v1505_v48, %v1167_v43  ;;  %v1502_v0 = vadd.f32 %v1501_v20, %v1165_v58  ;;  %v6000_v25 = vld [vmem:[%s6427_s18 + $0x348] sm:$0xff]  ;;  %v6002_v58 = vld [vmem:[%s6427_s18 + $0x340] sm:$0xff]  ;;  %v6003_v48 = vld [vmem:[%s6427_s18 + $0x330] sm:$0xff] }
 0x160   : > { %1491 = vadd.xlane.f32.xlu1 %v1490_v63  ;;  %v5997_v63 = vld [vmem:[%s6427_s18 + $0x318] sm:$0xff]  ;;  %v1173_v20 = vmul.f32 %v6003_v48, %v6003_v48 }
 0x161   : > { %1487 = vadd.xlane.f32.xlu0 %v1486_v12  ;;  %v7125_v13 = vpop.xlane.xlu1 %848  ;;  %v1170_v38 = vmul.f32 %v5997_v63, %v5997_v63  ;;  %v5998_v12 = vld [vmem:[%s6427_s18 + $0x320] sm:$0xff]  ;;  %v1513_v29 = vsel %vm465_vm0, %v1172_v30, 0.0 }
 0x162   : > { %10713 = vst [vmem:[#allocation74_spill] sm:$0xff] %v7125_v13  ;;  %v7130_v36 = vpop.xlane.xlu0 %844  ;;  %v1171_v16 = vmul.f32 %v5998_v12, %v5998_v12  ;;  %v1176_v13 = vmul.f32 %v6000_v25, %v6000_v25  ;;  %v6004_v25 = vld [vmem:[%s6427_s18 + $0x368] sm:$0xff] }
 0x163   : > { %10714 = vst [vmem:[#allocation75_spill] sm:$0xff] %v7130_v36  ;;  %v6001_v36 = vld [vmem:[%s6427_s18 + $0x338] sm:$0xff] }
 0x164   : > { %1499 = vadd.xlane.f32.xlu1 %v1498_v19  ;;  %v1174_v5 = vmul.f32 %v6001_v36, %v6001_v36  ;;  %v1509_v19 = vsel %vm465_vm0, %v1170_v38, 0.0  ;;  %v1514_v43 = vadd.f32 %v1513_v29, %v1171_v16  ;;  %v1521_v60 = vsel %vm465_vm0, %v1176_v13, 0.0  ;;  %v6007_v13 = vld [vmem:[%s6427_s18 + $0x350] sm:$0xff] }
 0x165   : > { %1495 = vadd.xlane.f32.xlu0 %v1494_v44  ;;  %v7134_v53 = vpop.xlane.xlu1 %856  ;;  %v1175_v44 = vmul.f32 %v6002_v58, %v6002_v58  ;;  %v1510_v12 = vadd.f32 %v1509_v19, %v1169_v22  ;;  %v1177_v19 = vmul.f32 %v6007_v13, %v6007_v13 }
 0x166   : > { %10715 = vst [vmem:[#allocation76_spill] sm:$0xff] %v7134_v53  ;;  %v7140_v63 = vpop.xlane.xlu0 %852  ;;  %v1517_v36 = vsel %vm465_vm0, %v1174_v5, 0.0 }
 0x167   : > { %10716 = vst [vmem:[#allocation77_spill] sm:$0xff] %v7140_v63  ;;  %v1180_v63 = vmul.f32 %v6004_v25, %v6004_v25  ;;  %v1522_v29 = vadd.f32 %v1521_v60, %v1175_v44  ;;  %v1518_v58 = vadd.f32 %v1517_v36, %v1173_v20  ;;  %v6008_v25 = vld [vmem:[%s6427_s18 + $0x388] sm:$0xff]  ;;  %v6010_v20 = vld [vmem:[%s6427_s18 + $0x380] sm:$0xff]  ;;  %v6011_v60 = vld [vmem:[%s6427_s18 + $0x370] sm:$0xff] }
 0x168   : > { %1507 = vadd.xlane.f32.xlu1 %v1506_v56  ;;  %v6005_v56 = vld [vmem:[%s6427_s18 + $0x358] sm:$0xff]  ;;  %v1181_v36 = vmul.f32 %v6011_v60, %v6011_v60 }
 0x169   : > { %1503 = vadd.xlane.f32.xlu0 %v1502_v0  ;;  %v7145_v30 = vpop.xlane.xlu1 %864  ;;  %v1178_v16 = vmul.f32 %v6005_v56, %v6005_v56  ;;  %v6006_v0 = vld [vmem:[%s6427_s18 + $0x360] sm:$0xff]  ;;  %v1529_v5 = vsel %vm465_vm0, %v1180_v63, 0.0 }
 0x16a   : > { %10717 = vst [vmem:[#allocation78_spill] sm:$0xff] %v7145_v30  ;;  %v7150_v38 = vpop.xlane.xlu0 %860  ;;  %v1179_v48 = vmul.f32 %v6006_v0, %v6006_v0  ;;  %v1184_v30 = vmul.f32 %v6008_v25, %v6008_v25  ;;  %v6012_v25 = vld [vmem:[%s6427_s18 + $0x3a8] sm:$0xff] }
 0x16b   : > { %10718 = vst [vmem:[#allocation79_spill] sm:$0xff] %v7150_v38  ;;  %v6009_v38 = vld [vmem:[%s6427_s18 + $0x378] sm:$0xff] }
 0x16c   : > { %1515 = vadd.xlane.f32.xlu1 %v1514_v43  ;;  %v1182_v53 = vmul.f32 %v6009_v38, %v6009_v38  ;;  %v1525_v43 = vsel %vm465_vm0, %v1178_v16, 0.0  ;;  %v1530_v44 = vadd.f32 %v1529_v5, %v1179_v48  ;;  %v1537_v13 = vsel %vm465_vm0, %v1184_v30, 0.0  ;;  %v6015_v30 = vld [vmem:[%s6427_s18 + $0x390] sm:$0xff] }
 0x16d   : > { %1511 = vadd.xlane.f32.xlu0 %v1510_v12  ;;  %v7154_v22 = vpop.xlane.xlu1 %872  ;;  %v1183_v12 = vmul.f32 %v6010_v20, %v6010_v20  ;;  %v1526_v0 = vadd.f32 %v1525_v43, %v1177_v19  ;;  %v1185_v43 = vmul.f32 %v6015_v30, %v6015_v30 }
 0x16e   : > { %10719 = vst [vmem:[#allocation80_spill] sm:$0xff] %v7154_v22  ;;  %v7160_v56 = vpop.xlane.xlu0 %868  ;;  %v1533_v38 = vsel %vm465_vm0, %v1182_v53, 0.0 }
 0x16f   : > { %10720 = vst [vmem:[#allocation81_spill] sm:$0xff] %v7160_v56  ;;  %v1188_v56 = vmul.f32 %v6012_v25, %v6012_v25  ;;  %v1538_v5 = vadd.f32 %v1537_v13, %v1183_v12  ;;  %v1534_v20 = vadd.f32 %v1533_v38, %v1181_v36  ;;  %v6016_v25 = vld [vmem:[%s6427_s18 + $0x3c8] sm:$0xff]  ;;  %v6018_v36 = vld [vmem:[%s6427_s18 + $0x3c0] sm:$0xff]  ;;  %v6019_v13 = vld [vmem:[%s6427_s18 + $0x3b0] sm:$0xff] }
 0x170   : > { %1523 = vadd.xlane.f32.xlu1 %v1522_v29  ;;  %v6013_v29 = vld [vmem:[%s6427_s18 + $0x398] sm:$0xff]  ;;  %v1189_v38 = vmul.f32 %v6019_v13, %v6019_v13 }
 0x171   : > { %1519 = vadd.xlane.f32.xlu0 %v1518_v58  ;;  %v7165_v63 = vpop.xlane.xlu1 %880  ;;  %v1186_v48 = vmul.f32 %v6013_v29, %v6013_v29  ;;  %v6014_v58 = vld [vmem:[%s6427_s18 + $0x3a0] sm:$0xff]  ;;  %v1545_v53 = vsel %vm465_vm0, %v1188_v56, 0.0 }
 0x172   : > { %10721 = vst [vmem:[#allocation82_spill] sm:$0xff] %v7165_v63  ;;  %v7170_v16 = vpop.xlane.xlu0 %876  ;;  %v1187_v60 = vmul.f32 %v6014_v58, %v6014_v58  ;;  %v1192_v63 = vmul.f32 %v6016_v25, %v6016_v25  ;;  %v6020_v25 = vld [vmem:[%s6427_s18 + $0x3e8] sm:$0xff] }
 0x173   : > { %10722 = vst [vmem:[#allocation83_spill] sm:$0xff] %v7170_v16  ;;  %v6017_v16 = vld [vmem:[%s6427_s18 + $0x3b8] sm:$0xff] }
 0x174   : > { %1531 = vadd.xlane.f32.xlu1 %v1530_v44  ;;  %v1190_v22 = vmul.f32 %v6017_v16, %v6017_v16  ;;  %v1541_v44 = vsel %vm465_vm0, %v1186_v48, 0.0  ;;  %v1546_v12 = vadd.f32 %v1545_v53, %v1187_v60  ;;  %v1553_v30 = vsel %vm465_vm0, %v1192_v63, 0.0  ;;  %v6023_v63 = vld [vmem:[%s6427_s18 + $0x3d0] sm:$0xff] }
 0x175   : > { %1527 = vadd.xlane.f32.xlu0 %v1526_v0  ;;  %v7174_v19 = vpop.xlane.xlu1 %888  ;;  %v1191_v0 = vmul.f32 %v6018_v36, %v6018_v36  ;;  %v1542_v58 = vadd.f32 %v1541_v44, %v1185_v43  ;;  %v1193_v44 = vmul.f32 %v6023_v63, %v6023_v63 }
 0x176   : > { %10723 = vst [vmem:[#allocation84_spill] sm:$0xff] %v7174_v19  ;;  %v7180_v29 = vpop.xlane.xlu0 %884  ;;  %v1549_v16 = vsel %vm465_vm0, %v1190_v22, 0.0 }
 0x177   : > { %10724 = vst [vmem:[#allocation85_spill] sm:$0xff] %v7180_v29  ;;  %v1196_v29 = vmul.f32 %v6020_v25, %v6020_v25  ;;  %v1554_v53 = vadd.f32 %v1553_v30, %v1191_v0  ;;  %v1550_v36 = vadd.f32 %v1549_v16, %v1189_v38  ;;  %v6024_v25 = vld [vmem:[%s6427_s18 + $0x408] sm:$0xff]  ;;  %v6026_v38 = vld [vmem:[%s6427_s18 + $0x400] sm:$0xff]  ;;  %v6027_v30 = vld [vmem:[%s6427_s18 + $0x3f0] sm:$0xff] }
 0x178   : > { %1539 = vadd.xlane.f32.xlu1 %v1538_v5  ;;  %v6021_v5 = vld [vmem:[%s6427_s18 + $0x3d8] sm:$0xff]  ;;  %v1197_v16 = vmul.f32 %v6027_v30, %v6027_v30 }
 0x179   : > { %1535 = vadd.xlane.f32.xlu0 %v1534_v20  ;;  %v7185_v56 = vpop.xlane.xlu1 %896  ;;  %v1194_v60 = vmul.f32 %v6021_v5, %v6021_v5  ;;  %v6022_v20 = vld [vmem:[%s6427_s18 + $0x3e0] sm:$0xff]  ;;  %v1561_v22 = vsel %vm465_vm0, %v1196_v29, 0.0 }
 0x17a   : > { %10725 = vst [vmem:[#allocation86_spill] sm:$0xff] %v7185_v56  ;;  %v7190_v48 = vpop.xlane.xlu0 %892  ;;  %v1195_v13 = vmul.f32 %v6022_v20, %v6022_v20  ;;  %v1200_v56 = vmul.f32 %v6024_v25, %v6024_v25  ;;  %v6028_v25 = vld [vmem:[%s6427_s18 + $0x428] sm:$0xff] }
 0x17b   : > { %10726 = vst [vmem:[#allocation87_spill] sm:$0xff] %v7190_v48  ;;  %v6025_v48 = vld [vmem:[%s6427_s18 + $0x3f8] sm:$0xff] }
 0x17c   : > { %1547 = vadd.xlane.f32.xlu1 %v1546_v12  ;;  %v1198_v19 = vmul.f32 %v6025_v48, %v6025_v48  ;;  %v1557_v12 = vsel %vm465_vm0, %v1194_v60, 0.0  ;;  %v1562_v0 = vadd.f32 %v1561_v22, %v1195_v13  ;;  %v1569_v63 = vsel %vm465_vm0, %v1200_v56, 0.0  ;;  %v6031_v56 = vld [vmem:[%s6427_s18 + $0x410] sm:$0xff] }
 0x17d   : > { %1543 = vadd.xlane.f32.xlu0 %v1542_v58  ;;  %v7194_v43 = vpop.xlane.xlu1 %904  ;;  %v1199_v58 = vmul.f32 %v6026_v38, %v6026_v38  ;;  %v1558_v20 = vadd.f32 %v1557_v12, %v1193_v44  ;;  %v1201_v12 = vmul.f32 %v6031_v56, %v6031_v56 }
 0x17e   : > { %10727 = vst [vmem:[#allocation88_spill] sm:$0xff] %v7194_v43  ;;  %v7200_v5 = vpop.xlane.xlu0 %900  ;;  %v1565_v48 = vsel %vm465_vm0, %v1198_v19, 0.0 }
 0x17f   : > { %10728 = vst [vmem:[#allocation89_spill] sm:$0xff] %v7200_v5  ;;  %v1204_v5 = vmul.f32 %v6028_v25, %v6028_v25  ;;  %v1570_v22 = vadd.f32 %v1569_v63, %v1199_v58  ;;  %v1566_v38 = vadd.f32 %v1565_v48, %v1197_v16  ;;  %v6032_v25 = vld [vmem:[%s6427_s18 + $0x448] sm:$0xff]  ;;  %v6034_v16 = vld [vmem:[%s6427_s18 + $0x440] sm:$0xff]  ;;  %v6035_v63 = vld [vmem:[%s6427_s18 + $0x430] sm:$0xff] }
 0x180   : > { %1555 = vadd.xlane.f32.xlu1 %v1554_v53  ;;  %v6029_v53 = vld [vmem:[%s6427_s18 + $0x418] sm:$0xff]  ;;  %v1205_v48 = vmul.f32 %v6035_v63, %v6035_v63  ;;  %v6039_v63 = vld [vmem:[%s6427_s18 + $0x450] sm:$0xff] }
 0x181   : > { %1551 = vadd.xlane.f32.xlu0 %v1550_v36  ;;  %v7205_v29 = vpop.xlane.xlu1 %912  ;;  %v1202_v13 = vmul.f32 %v6029_v53, %v6029_v53  ;;  %v6030_v36 = vld [vmem:[%s6427_s18 + $0x420] sm:$0xff]  ;;  %v1577_v19 = vsel %vm465_vm0, %v1204_v5, 0.0 }
 0x182   : > { %10729 = vst [vmem:[#allocation90_spill] sm:$0xff] %v7205_v29  ;;  %v7210_v60 = vpop.xlane.xlu0 %908  ;;  %v1203_v30 = vmul.f32 %v6030_v36, %v6030_v36  ;;  %v1208_v29 = vmul.f32 %v6032_v25, %v6032_v25  ;;  %v6036_v25 = vld [vmem:[%s6427_s18 + $0x468] sm:$0xff] }
 0x183   : > { %10730 = vst [vmem:[#allocation91_spill] sm:$0xff] %v7210_v60  ;;  %v6033_v60 = vld [vmem:[%s6427_s18 + $0x438] sm:$0xff] }
 0x184   : > { %1563 = vadd.xlane.f32.xlu1 %v1562_v0  ;;  %v1206_v43 = vmul.f32 %v6033_v60, %v6033_v60  ;;  %v1573_v0 = vsel %vm465_vm0, %v1202_v13, 0.0  ;;  %v1578_v58 = vadd.f32 %v1577_v19, %v1203_v30  ;;  %v1585_v56 = vsel %vm465_vm0, %v1208_v29, 0.0  ;;  %v6037_v30 = vld [vmem:[%s6427_s18 + $0x458] sm:$0xff] }
 0x185   : > { %1559 = vadd.xlane.f32.xlu0 %v1558_v20  ;;  %v7214_v44 = vpop.xlane.xlu1 %920  ;;  %v1207_v20 = vmul.f32 %v6034_v16, %v6034_v16  ;;  %v1574_v36 = vadd.f32 %v1573_v0, %v1201_v12  ;;  %v6390_v13 = vmov 0   ;;  %v1210_v19 = vmul.f32 %v6037_v30, %v6037_v30  ;;  %v6038_v12 = vld [vmem:[%s6427_s18 + $0x460] sm:$0xff] }
 0x186   : > { %10731 = vst [vmem:[#allocation92_spill] sm:$0xff] %v7214_v44  ;;  %v7220_v53 = vpop.xlane.xlu0 %916  ;;  %v1581_v60 = vsel %vm465_vm0, %v1206_v43, 0.0  ;;  %5655 = vset.pattern.permute.xlu1 %v6390_v13  ;;  %5654 = vset.pattern.permute.xlu0 %v6390_v13  ;;  %v1211_v29 = vmul.f32 %v6038_v12, %v6038_v12  ;;  %v6041_v44 = vld [vmem:[%s6427_s18 + $0x478] sm:$0xff] }
 0x187   : > { %10732 = vst [vmem:[#allocation93_spill] sm:$0xff] %v7220_v53  ;;  %v1212_v53 = vmul.f32 %v6036_v25, %v6036_v25  ;;  %v1582_v16 = vadd.f32 %v1581_v60, %v1205_v48  ;;  %v1209_v25 = vmul.f32 %v6039_v63, %v6039_v63  ;;  %v1214_v30 = vmul.f32 %v6041_v44, %v6041_v44  ;;  %v6042_v48 = vld [vmem:[%s6427_s18 + $0x480] sm:$0xff]  ;;  %v6044_v63 = vld [vmem:[%s6427_s18 + $0x4a8] sm:$0xff] }
 0x188   : > { %1571 = vadd.xlane.f32.xlu1 %v1570_v22 }
 0x189   : > { %1567 = vadd.xlane.f32.xlu0 %v1566_v38  ;;  %v7225_v5 = vpop.xlane.xlu1 %928  ;;  %v1586_v38 = vadd.f32 %v1585_v56, %v1207_v20  ;;  %v1593_v0 = vsel %vm465_vm0, %v1212_v53, 0.0  ;;  %v6043_v56 = vld [vmem:[%s6427_s18 + $0x470] sm:$0xff]  ;;  %v1597_v44 = vsel %vm465_vm0, %v1214_v30, 0.0 }
 0x18a   : > { %10733 = vst [vmem:[#allocation94_spill] sm:$0xff] %v7225_v5  ;;  %v7230_v22 = vpop.xlane.xlu0 %924  ;;  %v6040_v5 = vld [vmem:[%s6427_s18 + $0x488] sm:$0xff]  ;;  %v1594_v20 = vadd.f32 %v1593_v0, %v1211_v29  ;;  %v1213_v60 = vmul.f32 %v6043_v56, %v6043_v56  ;;  %v6047_v30 = vld [vmem:[%s6427_s18 + $0x490] sm:$0xff] }
 0x18b   : > { %10734 = vst [vmem:[#allocation95_spill] sm:$0xff] %v7230_v22  ;;  %v1216_v22 = vmul.f32 %v6040_v5, %v6040_v5 }
 0x18c   : > { %1579 = vadd.xlane.f32.xlu1 %v1578_v58  ;;  %v1589_v58 = vsel %vm465_vm0, %v1210_v19, 0.0 }
 0x18d   : > { %1575 = vadd.xlane.f32.xlu0 %v1574_v36  ;;  %v7234_v43 = vpop.xlane.xlu1 %936  ;;  %v1215_v36 = vmul.f32 %v6042_v48, %v6042_v48  ;;  %v1590_v12 = vadd.f32 %v1589_v58, %v1209_v25  ;;  %v1601_v5 = vsel %vm465_vm0, %v1216_v22, 0.0  ;;  %v1598_v48 = vadd.f32 %v1597_v44, %v1213_v60  ;;  %v6050_v60 = vld [vmem:[%s6427_s18 + $0x4c0] sm:$0xff] }
 0x18e   : > { %10735 = vst [vmem:[#allocation96_spill] sm:$0xff] %v7234_v43  ;;  %v7240_v13 = vpop.xlane.xlu0 %932  ;;  %v1217_v58 = vmul.f32 %v6047_v30, %v6047_v30 }
 0x18f   : > { %10736 = vst [vmem:[#allocation97_spill] sm:$0xff] %v7240_v13  ;;  %v1220_v13 = vmul.f32 %v6044_v63, %v6044_v63  ;;  %v1602_v0 = vadd.f32 %v1601_v5, %v1215_v36  ;;  %v6048_v63 = vld [vmem:[%s6427_s18 + $0x4c8] sm:$0xff]  ;;  %v6051_v5 = vld [vmem:[%s6427_s18 + $0x4b0] sm:$0xff] }
 0x190   : > { %1587 = vadd.xlane.f32.xlu1 %v1586_v38  ;;  %v6045_v38 = vld [vmem:[%s6427_s18 + $0x498] sm:$0xff]  ;;  %v1221_v44 = vmul.f32 %v6051_v5, %v6051_v5 }
 0x191   : > { %1583 = vadd.xlane.f32.xlu0 %v1582_v16  ;;  %v7245_v53 = vpop.xlane.xlu1 %944  ;;  %v1218_v29 = vmul.f32 %v6045_v38, %v6045_v38  ;;  %v6046_v16 = vld [vmem:[%s6427_s18 + $0x4a0] sm:$0xff]  ;;  %v1609_v22 = vsel %vm465_vm0, %v1220_v13, 0.0 }
 0x192   : > { %10737 = vst [vmem:[#allocation98_spill] sm:$0xff] %v7245_v53  ;;  %v7250_v19 = vpop.xlane.xlu0 %940  ;;  %v1219_v56 = vmul.f32 %v6046_v16, %v6046_v16  ;;  %v1224_v53 = vmul.f32 %v6048_v63, %v6048_v63  ;;  %v6052_v63 = vld [vmem:[%s6427_s18 + $0x4e8] sm:$0xff] }
 0x193   : > { %10738 = vst [vmem:[#allocation99_spill] sm:$0xff] %v7250_v19  ;;  %v6049_v19 = vld [vmem:[%s6427_s18 + $0x4b8] sm:$0xff] }
 0x194   : > { %1595 = vadd.xlane.f32.xlu1 %v1594_v20  ;;  %v1222_v43 = vmul.f32 %v6049_v19, %v6049_v19  ;;  %v1605_v20 = vsel %vm465_vm0, %v1218_v29, 0.0  ;;  %v1610_v36 = vadd.f32 %v1609_v22, %v1219_v56  ;;  %v1617_v30 = vsel %vm465_vm0, %v1224_v53, 0.0  ;;  %v6055_v53 = vld [vmem:[%s6427_s18 + $0x4d0] sm:$0xff] }
 0x195   : > { %1591 = vadd.xlane.f32.xlu0 %v1590_v12  ;;  %v7254_v25 = vpop.xlane.xlu1 %1315  ;;  %v1223_v12 = vmul.f32 %v6050_v60, %v6050_v60  ;;  %v1606_v16 = vadd.f32 %v1605_v20, %v1217_v58  ;;  %v1225_v20 = vmul.f32 %v6055_v53, %v6055_v53 }
 0x196   : > { %v7260_v38 = vpop.xlane.xlu0 %948  ;;  %v1613_v19 = vsel %vm465_vm0, %v1222_v43, 0.0 }
 0x197   : > { %10739 = vst [vmem:[#allocation100_spill] sm:$0xff] %v7260_v38  ;;  %v1228_v38 = vmul.f32 %v6052_v63, %v6052_v63  ;;  %v1618_v22 = vadd.f32 %v1617_v30, %v1223_v12  ;;  %v1614_v60 = vadd.f32 %v1613_v19, %v1221_v44  ;;  %v6056_v63 = vld [vmem:[%s6427_s18 + $0x508] sm:$0xff]  ;;  %v6058_v44 = vld [vmem:[%s6427_s18 + $0x500] sm:$0xff]  ;;  %v6059_v30 = vld [vmem:[%s6427_s18 + $0x4f0] sm:$0xff] }
 0x198   : > { %1603 = vadd.xlane.f32.xlu1 %v1602_v0  ;;  %v6053_v0 = vld [vmem:[%s6427_s18 + $0x4d8] sm:$0xff]  ;;  %v1232_v46 = vmul.f32 %v6056_v63, %v6056_v63  ;;  %v1229_v19 = vmul.f32 %v6059_v30, %v6059_v30  ;;  %v6060_v63 = vld [vmem:[%s6427_s18 + $0x528] sm:$0xff] }
 0x199   : > { %1599 = vadd.xlane.f32.xlu0 %v1598_v48  ;;  %v7265_v13 = vpop.xlane.xlu1 %1323  ;;  %v1226_v56 = vmul.f32 %v6053_v0, %v6053_v0  ;;  %v6054_v48 = vld [vmem:[%s6427_s18 + $0x4e0] sm:$0xff]  ;;  %v1625_v43 = vsel %vm465_vm0, %v1228_v38, 0.0  ;;  %v1236_v14 = vmul.f32 %v6060_v63, %v6060_v63  ;;  %v6064_v63 = vld [vmem:[%s6427_s18 + $0x548] sm:$0xff] }
 0x19a   : > { %v7270_v29 = vpop.xlane.xlu0 %1319  ;;  %v1227_v5 = vmul.f32 %v6054_v48, %v6054_v48  ;;  %v1633_v53 = vsel %vm465_vm0, %v1232_v46, 0.0  ;;  %v6063_v46 = vld [vmem:[%s6427_s18 + $0x510] sm:$0xff]  ;;  %v1240_v32 = vmul.f32 %v6064_v63, %v6064_v63  ;;  %v6068_v63 = vld [vmem:[%s6427_s18 + $0x568] sm:$0xff] }
 0x19b   : > { %v1641_v4 = vsel %vm465_vm0, %v1236_v14, 0.0  ;;  %v1244_v39 = vmul.f32 %v6068_v63, %v6068_v63  ;;  %v6072_v63 = vld [vmem:[%s6427_s18 + $0x588] sm:$0xff] }
 0x19c   : > { %1611 = vadd.xlane.f32.xlu1 %v1610_v36  ;;  %v1621_v36 = vsel %vm465_vm0, %v1226_v56, 0.0  ;;  %v1626_v12 = vadd.f32 %v1625_v43, %v1227_v5  ;;  %v1248_v47 = vmul.f32 %v6072_v63, %v6072_v63  ;;  %v6076_v63 = vld [vmem:[%s6427_s18 + $0x5a8] sm:$0xff] }
 0x19d   : > { %1607 = vadd.xlane.f32.xlu0 %v1606_v16  ;;  %v7274_v58 = vpop.xlane.xlu1 %1331  ;;  %v1231_v16 = vmul.f32 %v6058_v44, %v6058_v44  ;;  %v1622_v48 = vadd.f32 %v1621_v36, %v1225_v20  ;;  %v1630_v44 = vadd.f32 %v1629_v34, %v1229_v19  ;;  %v1233_v36 = vmul.f32 %v6063_v46, %v6063_v46  ;;  %v6066_v19 = vld [vmem:[%s6427_s18 + $0x540] sm:$0xff] }
 0x19e   : > { %v7280_v0 = vpop.xlane.xlu0 %1327  ;;  %v1649_v46 = vsel %vm465_vm0, %v1240_v32, 0.0  ;;  %v1657_v9 = vsel %vm465_vm0, %v1244_v39, 0.0  ;;  %v6071_v32 = vld [vmem:[%s6427_s18 + $0x550] sm:$0xff]  ;;  %v1252_v8 = vmul.f32 %v6076_v63, %v6076_v63  ;;  %v6080_v63 = vld [vmem:[%s6427_s18 + $0x5c8] sm:$0xff] }
 0x19f   : > { %v1634_v43 = vadd.f32 %v1633_v53, %v1231_v16  ;;  %v6067_v53 = vld [vmem:[%s6427_s18 + $0x530] sm:$0xff]  ;;  %v1256_v6 = vmul.f32 %v6080_v63, %v6080_v63  ;;  %v6084_v63 = vld [vmem:[%s6427_s18 + $0x5e8] sm:$0xff] }
 0x1a0   : > { %1619 = vadd.xlane.f32.xlu1 %v1618_v22  ;;  %v6061_v22 = vld [vmem:[%s6427_s18 + $0x518] sm:$0xff]  ;;  %v1237_v34 = vmul.f32 %v6067_v53, %v6067_v53  ;;  %v1673_v26 = vsel %vm465_vm0, %v1252_v8, 0.0  ;;  %v1260_v40 = vmul.f32 %v6084_v63, %v6084_v63  ;;  %v6088_v63 = vld [vmem:[%s6427_s18 + $0x608] sm:$0xff] }
 0x1a1   : > { %1615 = vadd.xlane.f32.xlu0 %v1614_v60  ;;  %v7285_v38 = vpop.xlane.xlu1 %1339  ;;  %v1234_v5 = vmul.f32 %v6061_v22, %v6061_v22  ;;  %v6062_v60 = vld [vmem:[%s6427_s18 + $0x520] sm:$0xff]  ;;  %v1264_v33 = vmul.f32 %v6088_v63, %v6088_v63  ;;  %v6092_v63 = vld [vmem:[%s6427_s18 + $0x628] sm:$0xff] }
 0x1a2   : > { %v7290_v56 = vpop.xlane.xlu0 %1335  ;;  %v1235_v30 = vmul.f32 %v6062_v60, %v6062_v60  ;;  %v1689_v52 = vsel %vm465_vm0, %v1260_v40, 0.0 }
 0x1a4   : > { %1627 = vadd.xlane.f32.xlu1 %v1626_v12  ;;  %v1637_v12 = vsel %vm465_vm0, %v1234_v5, 0.0  ;;  %v1642_v16 = vadd.f32 %v1641_v4, %v1235_v30 }
 0x1a5   : > { %1623 = vadd.xlane.f32.xlu0 %v1622_v48  ;;  %v7294_v20 = vpop.xlane.xlu1 %1347  ;;  %v1239_v48 = vmul.f32 %v6066_v19, %v6066_v19  ;;  %v1638_v60 = vadd.f32 %v1637_v12, %v1233_v36  ;;  %v1646_v19 = vadd.f32 %v1645_v59, %v1237_v34  ;;  %v1241_v12 = vmul.f32 %v6071_v32, %v6071_v32  ;;  %v6074_v34 = vld [vmem:[%s6427_s18 + $0x580] sm:$0xff] }
 0x1a6   : > { %v7300_v22 = vpop.xlane.xlu0 %1343  ;;  %v1665_v32 = vsel %vm465_vm0, %v1248_v47, 0.0  ;;  %v6079_v47 = vld [vmem:[%s6427_s18 + $0x590] sm:$0xff] }
 0x1a7   : > { %v1650_v4 = vadd.f32 %v1649_v46, %v1239_v48  ;;  %v6075_v46 = vld [vmem:[%s6427_s18 + $0x570] sm:$0xff] }
 0x1a8   : > { %1635 = vadd.xlane.f32.xlu1 %v1634_v43  ;;  %v6069_v43 = vld [vmem:[%s6427_s18 + $0x558] sm:$0xff]  ;;  %v1245_v59 = vmul.f32 %v6075_v46, %v6075_v46 }
 0x1a9   : > { %1631 = vadd.xlane.f32.xlu0 %v1630_v44  ;;  %v7305_v14 = vpop.xlane.xlu1 %1355  ;;  %v1242_v30 = vmul.f32 %v6069_v43, %v6069_v43  ;;  %v6070_v44 = vld [vmem:[%s6427_s18 + $0x560] sm:$0xff] }
 0x1aa   : > { %v7310_v5 = vpop.xlane.xlu0 %1351  ;;  %v1243_v53 = vmul.f32 %v6070_v44, %v6070_v44 }
 0x1ac   : > { %1643 = vadd.xlane.f32.xlu1 %v1642_v16  ;;  %v1653_v16 = vsel %vm465_vm0, %v1242_v30, 0.0  ;;  %v1658_v48 = vadd.f32 %v1657_v9, %v1243_v53 }
 0x1ad   : > { %1639 = vadd.xlane.f32.xlu0 %v1638_v60  ;;  %v7314_v36 = vpop.xlane.xlu1 %1363  ;;  %v1247_v60 = vmul.f32 %v6074_v34, %v6074_v34  ;;  %v1654_v44 = vadd.f32 %v1653_v16, %v1241_v12  ;;  %v1662_v34 = vadd.f32 %v1661_v24, %v1245_v59  ;;  %v1249_v16 = vmul.f32 %v6079_v47, %v6079_v47  ;;  %v6082_v59 = vld [vmem:[%s6427_s18 + $0x5c0] sm:$0xff] }
 0x1ae   : > { %v7320_v43 = vpop.xlane.xlu0 %1359  ;;  %v1681_v47 = vsel %vm465_vm0, %v1256_v6, 0.0  ;;  %v6087_v6 = vld [vmem:[%s6427_s18 + $0x5d0] sm:$0xff] }
 0x1af   : > { %v1666_v9 = vadd.f32 %v1665_v32, %v1247_v60  ;;  %v6083_v32 = vld [vmem:[%s6427_s18 + $0x5b0] sm:$0xff] }
 0x1b0   : > { %1651 = vadd.xlane.f32.xlu1 %v1650_v4  ;;  %v6077_v4 = vld [vmem:[%s6427_s18 + $0x598] sm:$0xff]  ;;  %v1253_v24 = vmul.f32 %v6083_v32, %v6083_v32 }
 0x1b1   : > { %1647 = vadd.xlane.f32.xlu0 %v1646_v19  ;;  %v7325_v39 = vpop.xlane.xlu1 %1371  ;;  %v1250_v53 = vmul.f32 %v6077_v4, %v6077_v4  ;;  %v6078_v19 = vld [vmem:[%s6427_s18 + $0x5a0] sm:$0xff] }
 0x1b2   : > { %v7330_v30 = vpop.xlane.xlu0 %1367  ;;  %v1251_v46 = vmul.f32 %v6078_v19, %v6078_v19 }
 0x1b4   : > { %1659 = vadd.xlane.f32.xlu1 %v1658_v48  ;;  %v1669_v48 = vsel %vm465_vm0, %v1250_v53, 0.0  ;;  %v1674_v60 = vadd.f32 %v1673_v26, %v1251_v46 }
 0x1b5   : > { %1655 = vadd.xlane.f32.xlu0 %v1654_v44  ;;  %v7334_v12 = vpop.xlane.xlu1 %1379  ;;  %v1255_v44 = vmul.f32 %v6082_v59, %v6082_v59  ;;  %v1670_v19 = vadd.f32 %v1669_v48, %v1249_v16  ;;  %v1678_v59 = vadd.f32 %v1677_v57, %v1253_v24  ;;  %v1257_v48 = vmul.f32 %v6087_v6, %v6087_v6  ;;  %v6090_v24 = vld [vmem:[%s6427_s18 + $0x600] sm:$0xff] }
 0x1b6   : > { %10740 = vst [vmem:[#allocation101_spill] sm:$0xff] %v7334_v12  ;;  %v7340_v4 = vpop.xlane.xlu0 %1375  ;;  %v1697_v6 = vsel %vm465_vm0, %v1264_v33, 0.0  ;;  %v6105_v12 = vld [vmem:[%s6427_s18 + $0x678] sm:$0xff] }
 0x1b7   : > { %v1682_v26 = vadd.f32 %v1681_v47, %v1255_v44  ;;  %v6091_v47 = vld [vmem:[%s6427_s18 + $0x5f0] sm:$0xff]  ;;  %v1278_v2 = vmul.f32 %v6105_v12, %v6105_v12 }
 0x1b8   : > { %1667 = vadd.xlane.f32.xlu1 %v1666_v9  ;;  %v6085_v9 = vld [vmem:[%s6427_s18 + $0x5d8] sm:$0xff]  ;;  %v1261_v57 = vmul.f32 %v6091_v47, %v6091_v47 }
 0x1b9   : > { %1663 = vadd.xlane.f32.xlu0 %v1662_v34  ;;  %v7345_v8 = vpop.xlane.xlu1 %1387  ;;  %v1258_v46 = vmul.f32 %v6085_v9, %v6085_v9  ;;  %v6086_v34 = vld [vmem:[%s6427_s18 + $0x5e0] sm:$0xff]  ;;  %v1725_v12 = vsel %vm465_vm0, %v1278_v2, 0.0 }
 0x1ba   : > { %10741 = vst [vmem:[#allocation102_spill] sm:$0xff] %v7345_v8  ;;  %v7350_v53 = vpop.xlane.xlu0 %1383  ;;  %v1259_v32 = vmul.f32 %v6086_v34, %v6086_v34  ;;  %v1262_v8 = vmul.f32 %v6089_v28, %v6089_v28 }
 0x1bc   : > { %1675 = vadd.xlane.f32.xlu1 %v1674_v60  ;;  %v1685_v60 = vsel %vm465_vm0, %v1258_v46, 0.0  ;;  %v1690_v44 = vadd.f32 %v1689_v52, %v1259_v32  ;;  %v1693_v28 = vsel %vm465_vm0, %v1262_v8, 0.0  ;;  %v6095_v8 = vld [vmem:[%s6427_s18 + $0x610] sm:$0xff] }
 0x1bd   : > { %1671 = vadd.xlane.f32.xlu0 %v1670_v19  ;;  %v7354_v16 = vpop.xlane.xlu1 %1395  ;;  %v1263_v19 = vmul.f32 %v6090_v24, %v6090_v24  ;;  %v1686_v34 = vadd.f32 %v1685_v60, %v1257_v48  ;;  %v1694_v24 = vadd.f32 %v1693_v28, %v1261_v57  ;;  %v1265_v60 = vmul.f32 %v6095_v8, %v6095_v8  ;;  %v6098_v57 = vld [vmem:[%s6427_s18 + $0x640] sm:$0xff] }
 0x1be   : > { %10742 = vst [vmem:[#allocation103_spill] sm:$0xff] %v7354_v16  ;;  %v7360_v9 = vpop.xlane.xlu0 %1391  ;;  %v1268_v16 = vmul.f32 %v6092_v63, %v6092_v63  ;;  %v6096_v63 = vld [vmem:[%s6427_s18 + $0x648] sm:$0xff] }
 0x1bf   : > { %v1698_v52 = vadd.f32 %v1697_v6, %v1263_v19  ;;  %v6099_v6 = vld [vmem:[%s6427_s18 + $0x630] sm:$0xff] }
 0x1c0   : > { %1683 = vadd.xlane.f32.xlu1 %v1682_v26  ;;  %v6093_v26 = vld [vmem:[%s6427_s18 + $0x618] sm:$0xff]  ;;  %v1705_v33 = vsel %vm465_vm0, %v1268_v16, 0.0  ;;  %v1269_v28 = vmul.f32 %v6099_v6, %v6099_v6 }
 0x1c1   : > { %1679 = vadd.xlane.f32.xlu0 %v1678_v59  ;;  %v7365_v40 = vpop.xlane.xlu1 %1403  ;;  %v1266_v32 = vmul.f32 %v6093_v26, %v6093_v26  ;;  %v6094_v59 = vld [vmem:[%s6427_s18 + $0x620] sm:$0xff] }
 0x1c2   : > { %10743 = vst [vmem:[#allocation104_spill] sm:$0xff] %v7365_v40  ;;  %v7370_v46 = vpop.xlane.xlu0 %1399  ;;  %v1267_v47 = vmul.f32 %v6094_v59, %v6094_v59  ;;  %v1272_v40 = vmul.f32 %v6096_v63, %v6096_v63  ;;  %v6100_v63 = vld [vmem:[%s6427_s18 + $0x668] sm:$0xff] }
 0x1c4   : > { %1691 = vadd.xlane.f32.xlu1 %v1690_v44  ;;  %v1701_v44 = vsel %vm465_vm0, %v1266_v32, 0.0  ;;  %v1706_v19 = vadd.f32 %v1705_v33, %v1267_v47  ;;  %v1713_v8 = vsel %vm465_vm0, %v1272_v40, 0.0  ;;  %v6103_v40 = vld [vmem:[%s6427_s18 + $0x650] sm:$0xff] }
 0x1c5   : > { %1687 = vadd.xlane.f32.xlu0 %v1686_v34  ;;  %v7374_v48 = vpop.xlane.xlu1 %1411  ;;  %v1271_v34 = vmul.f32 %v6098_v57, %v6098_v57  ;;  %v1702_v59 = vadd.f32 %v1701_v44, %v1265_v60  ;;  %v1710_v57 = vadd.f32 %v1709_v18, %v1269_v28  ;;  %v1273_v44 = vmul.f32 %v6103_v40, %v6103_v40  ;;  %v6106_v28 = vld [vmem:[%s6427_s18 + $0x680] sm:$0xff] }
 0x1c6   : > { %10744 = vst [vmem:[#allocation105_spill] sm:$0xff] %v7374_v48  ;;  %v7380_v26 = vpop.xlane.xlu0 %1407  ;;  %v1276_v48 = vmul.f32 %v6100_v63, %v6100_v63  ;;  %v6104_v63 = vld [vmem:[%s6427_s18 + $0x688] sm:$0xff] }
 0x1c7   : > { %v1714_v33 = vadd.f32 %v1713_v8, %v1271_v34  ;;  %v6107_v8 = vld [vmem:[%s6427_s18 + $0x670] sm:$0xff] }
 0x1c8   : > { %1699 = vadd.xlane.f32.xlu1 %v1698_v52  ;;  %v6101_v52 = vld [vmem:[%s6427_s18 + $0x658] sm:$0xff]  ;;  %v1721_v15 = vsel %vm465_vm0, %v1276_v48, 0.0  ;;  %v1277_v18 = vmul.f32 %v6107_v8, %v6107_v8 }
 0x1c9   : > { %1695 = vadd.xlane.f32.xlu0 %v1694_v24  ;;  %v7385_v16 = vpop.xlane.xlu1 %1419  ;;  %v1274_v47 = vmul.f32 %v6101_v52, %v6101_v52  ;;  %v6102_v24 = vld [vmem:[%s6427_s18 + $0x660] sm:$0xff] }
 0x1ca   : > { %10745 = vst [vmem:[#allocation106_spill] sm:$0xff] %v7385_v16  ;;  %v7390_v32 = vpop.xlane.xlu0 %1415  ;;  %v1275_v6 = vmul.f32 %v6102_v24, %v6102_v24  ;;  %v1280_v16 = vmul.f32 %v6104_v63, %v6104_v63  ;;  %v6108_v63 = vld [vmem:[%s6427_s18 + $0x6a8] sm:$0xff] }
 0x1cc   : > { %1707 = vadd.xlane.f32.xlu1 %v1706_v19  ;;  %v1717_v19 = vsel %vm465_vm0, %v1274_v47, 0.0  ;;  %v1722_v34 = vadd.f32 %v1721_v15, %v1275_v6  ;;  %v1729_v40 = vsel %vm465_vm0, %v1280_v16, 0.0  ;;  %v6111_v16 = vld [vmem:[%s6427_s18 + $0x690] sm:$0xff] }
 0x1cd   : > { %1703 = vadd.xlane.f32.xlu0 %v1702_v59  ;;  %v7394_v60 = vpop.xlane.xlu1 %1427  ;;  %v1279_v59 = vmul.f32 %v6106_v28, %v6106_v28  ;;  %v1718_v24 = vadd.f32 %v1717_v19, %v1273_v44  ;;  %v1726_v28 = vadd.f32 %v1725_v12, %v1277_v18  ;;  %v1281_v19 = vmul.f32 %v6111_v16, %v6111_v16  ;;  %v6114_v18 = vld [vmem:[%s6427_s18 + $0x6c0] sm:$0xff] }
 0x1ce   : > { %10746 = vst [vmem:[#allocation107_spill] sm:$0xff] %v7394_v60  ;;  %v7400_v52 = vpop.xlane.xlu0 %1423  ;;  %v1284_v60 = vmul.f32 %v6108_v63, %v6108_v63  ;;  %v6112_v63 = vld [vmem:[%s6427_s18 + $0x6c8] sm:$0xff] }
 0x1cf   : > { %10747 = vst [vmem:[#allocation108_spill] sm:$0xff] %v7400_v52  ;;  %v1730_v15 = vadd.f32 %v1729_v40, %v1279_v59  ;;  %v6115_v40 = vld [vmem:[%s6427_s18 + $0x6b0] sm:$0xff] }
 0x1d0   : > { %1715 = vadd.xlane.f32.xlu1 %v1714_v33  ;;  %v6109_v33 = vld [vmem:[%s6427_s18 + $0x698] sm:$0xff]  ;;  %v1737_v2 = vsel %vm465_vm0, %v1284_v60, 0.0  ;;  %v1285_v12 = vmul.f32 %v6115_v40, %v6115_v40 }
 0x1d1   : > { %1711 = vadd.xlane.f32.xlu0 %v1710_v57  ;;  %v7405_v48 = vpop.xlane.xlu1 %1435  ;;  %v1282_v6 = vmul.f32 %v6109_v33, %v6109_v33  ;;  %v6110_v57 = vld [vmem:[%s6427_s18 + $0x6a0] sm:$0xff] }
 0x1d2   : > { %10748 = vst [vmem:[#allocation109_spill] sm:$0xff] %v7405_v48  ;;  %v7410_v47 = vpop.xlane.xlu0 %1431  ;;  %v1283_v8 = vmul.f32 %v6110_v57, %v6110_v57  ;;  %v1288_v48 = vmul.f32 %v6112_v63, %v6112_v63  ;;  %v6116_v63 = vld [vmem:[%s6427_s18 + $0x6e8] sm:$0xff] }
 0x1d3   : > { %10749 = vst [vmem:[#allocation110_spill] sm:$0xff] %v7410_v47  ;;  %v6113_v47 = vld [vmem:[%s6427_s18 + $0x6b8] sm:$0xff] }
 0x1d4   : > { %1723 = vadd.xlane.f32.xlu1 %v1722_v34  ;;  %v1286_v52 = vmul.f32 %v6113_v47, %v6113_v47  ;;  %v1733_v34 = vsel %vm465_vm0, %v1282_v6, 0.0  ;;  %v1738_v59 = vadd.f32 %v1737_v2, %v1283_v8  ;;  %v1745_v16 = vsel %vm465_vm0, %v1288_v48, 0.0  ;;  %v6119_v48 = vld [vmem:[%s6427_s18 + $0x6d0] sm:$0xff] }
 0x1d5   : > { %1719 = vadd.xlane.f32.xlu0 %v1718_v24  ;;  %v7414_v44 = vpop.xlane.xlu1 %1443  ;;  %v1287_v24 = vmul.f32 %v6114_v18, %v6114_v18  ;;  %v1734_v57 = vadd.f32 %v1733_v34, %v1281_v19  ;;  %v1289_v34 = vmul.f32 %v6119_v48, %v6119_v48 }
 0x1d6   : > { %10750 = vst [vmem:[#allocation111_spill] sm:$0xff] %v7414_v44  ;;  %v7420_v33 = vpop.xlane.xlu0 %1439  ;;  %v1741_v47 = vsel %vm465_vm0, %v1286_v52, 0.0  ;;  %v1292_v44 = vmul.f32 %v6116_v63, %v6116_v63  ;;  %v6120_v63 = vld [vmem:[%s6427_s18 + $0x708] sm:$0xff] }
 0x1d7   : > { %10751 = vst [vmem:[#allocation112_spill] sm:$0xff] %v7420_v33  ;;  %v1746_v2 = vadd.f32 %v1745_v16, %v1287_v24  ;;  %v1742_v18 = vadd.f32 %v1741_v47, %v1285_v12  ;;  %v6122_v12 = vld [vmem:[%s6427_s18 + $0x700] sm:$0xff]  ;;  %v6123_v16 = vld [vmem:[%s6427_s18 + $0x6f0] sm:$0xff] }
 0x1d8   : > { %1731 = vadd.xlane.f32.xlu1 %v1730_v15  ;;  %v6117_v15 = vld [vmem:[%s6427_s18 + $0x6d8] sm:$0xff]  ;;  %v1753_v52 = vsel %vm465_vm0, %v1292_v44, 0.0  ;;  %v1293_v47 = vmul.f32 %v6123_v16, %v6123_v16 }
 0x1d9   : > { %1727 = vadd.xlane.f32.xlu0 %v1726_v28  ;;  %v7425_v60 = vpop.xlane.xlu1 %1451  ;;  %v1290_v8 = vmul.f32 %v6117_v15, %v6117_v15  ;;  %v6118_v28 = vld [vmem:[%s6427_s18 + $0x6e0] sm:$0xff] }
 0x1da   : > { %10752 = vst [vmem:[#allocation113_spill] sm:$0xff] %v7425_v60  ;;  %v7430_v6 = vpop.xlane.xlu0 %1447  ;;  %v1291_v40 = vmul.f32 %v6118_v28, %v6118_v28  ;;  %v1296_v60 = vmul.f32 %v6120_v63, %v6120_v63  ;;  %v6124_v63 = vld [vmem:[%s6427_s18 + $0x728] sm:$0xff] }
 0x1db   : > { %10753 = vst [vmem:[#allocation114_spill] sm:$0xff] %v7430_v6  ;;  %v6121_v6 = vld [vmem:[%s6427_s18 + $0x6f8] sm:$0xff] }
 0x1dc   : > { %1739 = vadd.xlane.f32.xlu1 %v1738_v59  ;;  %v1294_v33 = vmul.f32 %v6121_v6, %v6121_v6  ;;  %v1749_v59 = vsel %vm465_vm0, %v1290_v8, 0.0  ;;  %v1754_v24 = vadd.f32 %v1753_v52, %v1291_v40  ;;  %v1761_v48 = vsel %vm465_vm0, %v1296_v60, 0.0  ;;  %v6127_v60 = vld [vmem:[%s6427_s18 + $0x710] sm:$0xff] }
 0x1dd   : > { %1735 = vadd.xlane.f32.xlu0 %v1734_v57  ;;  %v7434_v19 = vpop.xlane.xlu1 %1459  ;;  %v1295_v57 = vmul.f32 %v6122_v12, %v6122_v12  ;;  %v1750_v28 = vadd.f32 %v1749_v59, %v1289_v34  ;;  %v1297_v59 = vmul.f32 %v6127_v60, %v6127_v60 }
 0x1de   : > { %10754 = vst [vmem:[#allocation115_spill] sm:$0xff] %v7434_v19  ;;  %v7440_v15 = vpop.xlane.xlu0 %1455  ;;  %v1757_v6 = vsel %vm465_vm0, %v1294_v33, 0.0  ;;  %v1300_v19 = vmul.f32 %v6124_v63, %v6124_v63  ;;  %v6128_v63 = vld [vmem:[%s6427_s18 + $0x748] sm:$0xff] }
 0x1df   : > { %10755 = vst [vmem:[#allocation116_spill] sm:$0xff] %v7440_v15  ;;  %v1762_v52 = vadd.f32 %v1761_v48, %v1295_v57  ;;  %v1758_v12 = vadd.f32 %v1757_v6, %v1293_v47  ;;  %v6129_v15 = vld [vmem:[%s6427_s18 + $0x738] sm:$0xff]  ;;  %v7464_v57 = vmul.f32 0.0051020407, %v6667_v55  ;;  %v2040_v55 = vmul.f32 0.0051020407, %v7270_v29 }
 0x1e0   : > { %1747 = vadd.xlane.f32.xlu1 %v1746_v2  ;;  %v6125_v2 = vld [vmem:[%s6427_s18 + $0x718] sm:$0xff]  ;;  %v1769_v33 = vsel %vm465_vm0, %v1300_v19, 0.0  ;;  %v6131_v19 = vld [vmem:[%s6427_s18 + $0x730] sm:$0xff]  ;;  %v6134_v29 = vld [vmem:[%s6427_s18 + $0x760] sm:$0xff] }
 0x1e1   : > { %1743 = vadd.xlane.f32.xlu0 %v1742_v18  ;;  %v7445_v44 = vpop.xlane.xlu1 %1467  ;;  %v1298_v40 = vmul.f32 %v6125_v2, %v6125_v2  ;;  %v6126_v18 = vld [vmem:[%s6427_s18 + $0x720] sm:$0xff]  ;;  %10760 = vst [vmem:[#allocation121_spill] sm:$0xff] %v7464_v57  ;;  %v1301_v6 = vmul.f32 %v6131_v19, %v6131_v19  ;;  %v2041_v19 = vmul.f32 0.0051020407, %v7265_v13 }
 0x1e2   : > { %10756 = vst [vmem:[#allocation117_spill] sm:$0xff] %v7445_v44  ;;  %v7450_v8 = vpop.xlane.xlu0 %1463  ;;  %v1299_v16 = vmul.f32 %v6126_v18, %v6126_v18  ;;  %v1304_v44 = vmul.f32 %v6128_v63, %v6128_v63 }
 0x1e3   : > { %10757 = vst [vmem:[#allocation118_spill] sm:$0xff] %v7450_v8  ;;  %v1302_v8 = vmul.f32 %v6129_v15, %v6129_v15 }
 0x1e4   : > { %1755 = vadd.xlane.f32.xlu1 %v1754_v24  ;;  %v1765_v24 = vsel %vm465_vm0, %v1298_v40, 0.0  ;;  %v1770_v47 = vadd.f32 %v1769_v33, %v1299_v16  ;;  %v1777_v15 = vsel %vm465_vm0, %v1304_v44, 0.0  ;;  %v6132_v40 = vld [vmem:[%s6427_s18 + $0x768] sm:$0xff]  ;;  %v6133_v16 = vld [vmem:[%s6427_s18 + $0x758] sm:$0xff]  ;;  %v2161_v44 = vmul.f32 %v7464_v57, %v7464_v57 }
 0x1e5   : > { %1751 = vadd.xlane.f32.xlu0 %v1750_v28  ;;  %v7454_v34 = vpop.xlane.xlu1 %1475  ;;  %v6130_v28 = vld [vmem:[%s6427_s18 + $0x740] sm:$0xff]  ;;  %v1766_v60 = vadd.f32 %v1765_v24, %v1297_v59  ;;  %v1773_v63 = vsel %vm465_vm0, %v1302_v8, 0.0  ;;  %v1306_v33 = vmul.f32 %v6133_v16, %v6133_v16  ;;  %v1307_v24 = vmul.f32 %v6134_v29, %v6134_v29  ;;  %v6135_v16 = vld [vmem:[%s6427_s18 + $0x750] sm:$0xff] }
 0x1e6   : > { %10758 = vst [vmem:[#allocation119_spill] sm:$0xff] %v7454_v34  ;;  %v7460_v2 = vpop.xlane.xlu0 %1471  ;;  %v1303_v48 = vmul.f32 %v6130_v28, %v6130_v28  ;;  %v1308_v34 = vmul.f32 %v6132_v40, %v6132_v40  ;;  %v7481_v28 = vmul.f32 0.0051020407, %v6657_v45  ;;  %v1774_v59 = vadd.f32 %v1773_v63, %v1301_v6  ;;  %v6138_v63 = vld [vmem:[%s6427_s18 + $0x780] sm:$0xff] }
 0x1e7   : > { %10759 = vst [vmem:[#allocation120_spill] sm:$0xff] %v7460_v2  ;;  %v1305_v45 = vmul.f32 %v6135_v16, %v6135_v16  ;;  %v2282_v2 = vsub.f32 %v2040_v55, %v2161_v44  ;;  %v1311_v55 = vmul.f32 %v6138_v63, %v6138_v63 }
 0x1e8   : > { %1763 = vadd.xlane.f32.xlu1 %v1762_v52  ;;  %10764 = vst [vmem:[#allocation125_spill] sm:$0xff] %v7481_v28  ;;  %v1778_v8 = vadd.f32 %v1777_v15, %v1303_v48  ;;  %v6137_v48 = vld [vmem:[%s6427_s18 + $0x778] sm:$0xff]  ;;  %v2039_v15 = vmul.f32 0.0051020407, %v7254_v25 }
 0x1e9   : > { %1759 = vadd.xlane.f32.xlu0 %v1758_v12  ;;  %v7468_v18 = vpop.xlane.xlu1 %1483  ;;  %v7478_v12 = vmul.f32 0.0051020407, %v6653_v41  ;;  %v1785_v41 = vsel %vm465_vm0, %v1308_v34, 0.0  ;;  %v1310_v6 = vmul.f32 %v6137_v48, %v6137_v48  ;;  %v2160_v34 = vmul.f32 %v7481_v28, %v7481_v28  ;;  %v6139_v48 = vld [vmem:[%s6427_s18 + $0x770] sm:$0xff] }
 0x1ea   : > { %10761 = vst [vmem:[#allocation122_spill] sm:$0xff] %v7468_v18  ;;  %v7474_v52 = vpop.xlane.xlu0 %1479  ;;  %v6136_v18 = vld [vmem:[%s6427_s18 + $0x788] sm:$0xff]  ;;  %v2042_v28 = vmul.f32 0.0051020407, %v7280_v0 }
 0x1eb   : > { %10762 = vst [vmem:[#allocation123_spill] sm:$0xff] %v7474_v52  ;;  %10763 = vst [vmem:[#allocation124_spill] sm:$0xff] %v7478_v12  ;;  %v1312_v52 = vmul.f32 %v6136_v18, %v6136_v18  ;;  %v2162_v13 = vmul.f32 %v7478_v12, %v7478_v12  ;;  %v1786_v18 = vadd.f32 %v1785_v41, %v1307_v24  ;;  %v7519_v24 = vmul.f32 0.0051020407, %v6677_v1 }
 0x1ec   : > { %1771 = vadd.xlane.f32.xlu1 %v1770_v47  ;;  %v1781_v47 = vsel %vm465_vm0, %v1306_v33, 0.0  ;;  %v1309_v12 = vmul.f32 %v6139_v48, %v6139_v48  ;;  %v2043_v1 = vmul.f32 0.0051020407, %v7274_v58 }
 0x1ed   : > { %1767 = vadd.xlane.f32.xlu0 %v1766_v60  ;;  %v7487_v40 = vpop.xlane.xlu1 %1491  ;;  %v7499_v60 = vmul.f32 0.0051020407, %v6663_v51  ;;  %v2283_v44 = vsub.f32 %v2041_v19, %v2162_v13  ;;  %v1782_v29 = vadd.f32 %v1781_v47, %v1305_v45  ;;  %v1793_v16 = vsel %vm465_vm0, %v1312_v52, 0.0  ;;  %10768 = vst [vmem:[#allocation129_spill] sm:$0xff] %v7519_v24 }
 0x1ee   : > { %10765 = vst [vmem:[#allocation126_spill] sm:$0xff] %v7487_v40  ;;  %v7492_v57 = vpop.xlane.xlu0 %1487  ;;  %v7510_v51 = vmul.f32 0.0051020407, %v6693_v17  ;;  %v2403_v40 = vmax.f32 %v2282_v2, 0.0  ;;  %v2281_v19 = vsub.f32 %v2039_v15, %v2160_v34  ;;  %v2048_v52 = vmul.f32 0.0051020407, %v7310_v5 }
 0x1ef   : > { %10766 = vst [vmem:[#allocation127_spill] sm:$0xff] %v7499_v60  ;;  %v1794_v41 = vadd.f32 %v1793_v16, %v1311_v55  ;;  %v7523_v17 = vmul.f32 0.0051020407, %v6703_v27  ;;  %v2404_v2 = vmax.f32 %v2283_v44, 0.0  ;;  %v2050_v5 = vmul.f32 0.0051020407, %v7320_v43 }
 0x1f0   : > { %1779 = vadd.xlane.f32.xlu1 %v1778_v8  ;;  %10767 = vst [vmem:[#allocation128_spill] sm:$0xff] %v7510_v51  ;;  %v1789_v8 = vsel %vm465_vm0, %v1310_v6, 0.0  ;;  %v2169_v47 = vmul.f32 %v7510_v51, %v7510_v51  ;;  %v2524_v6 = vadd.f32 1e-05, %v2403_v40  ;;  %v7534_v15 = vmul.f32 0.0051020407, %v6673_v61 }
 0x1f1   : > { %1775 = vadd.xlane.f32.xlu0 %v1774_v59  ;;  %v7505_v33 = vpop.xlane.xlu1 %1499  ;;  %v2163_v59 = vmul.f32 %v7499_v60, %v7499_v60  ;;  %10769 = vst [vmem:[#allocation130_spill] sm:$0xff] %v7523_v17  ;;  %v1790_v45 = vadd.f32 %v1789_v8, %v1309_v12  ;;  %v2164_v27 = vmul.f32 %v7519_v24, %v7519_v24  ;;  %v7541_v40 = vmul.f32 0.0051020407, %v6713_v37  ;;  %v10799_v51 = vld [vmem:[#allocation8_spill] sm:$0xff] }
 0x1f2   : > { %v7513_v25 = vpop.xlane.xlu0 %1495  ;;  %10770 = vst [vmem:[#allocation131_spill] sm:$0xff] %v7534_v15  ;;  %v2290_v63 = vsub.f32 %v2048_v52, %v2169_v47  ;;  %v2171_v12 = vmul.f32 %v7523_v17, %v7523_v17  ;;  %v2525_v58 = vadd.f32 1e-05, %v2404_v2  ;;  %5656 = vrsqrt.f32 %v2524_v6 }
 0x1f3   : > { %v2284_v13 = vsub.f32 %v2042_v28, %v2163_v59  ;;  %10771 = vst [vmem:[#allocation132_spill] sm:$0xff] %v7541_v40  ;;  %v2285_v43 = vsub.f32 %v2043_v1, %v2164_v27  ;;  %v2044_v55 = vmul.f32 0.0051020407, %v7290_v56  ;;  %v2165_v48 = vmul.f32 %v7534_v15, %v7534_v15 }
 0x1f4   : > { %1787 = vadd.xlane.f32.xlu1 %v1786_v18  ;;  %v2402_v18 = vmax.f32 %v2281_v19, 0.0  ;;  %v2292_v16 = vsub.f32 %v2050_v5, %v2171_v12  ;;  %v2411_v8 = vmax.f32 %v2290_v63, 0.0  ;;  %v2052_v59 = vmul.f32 0.0051020407, %v7330_v30 }
 0x1f5   : > { %1783 = vadd.xlane.f32.xlu0 %v1782_v29  ;;  %v7525_v0 = vpop.xlane.xlu1 %1507  ;;  %v2405_v61 = vmax.f32 %v2284_v13, 0.0  ;;  %v7549_v29 = vmul.f32 0.0051020407, %v6687_v11  ;;  %v2173_v19 = vmul.f32 %v7541_v40, %v7541_v40  ;;  %v7557_v52 = vmul.f32 0.0051020407, %v6723_v49 }
 0x1f6   : > { %v7530_v34 = vpop.xlane.xlu0 %1503  ;;  %v2523_v37 = vadd.f32 1e-05, %v2402_v18  ;;  %v2045_v56 = vmul.f32 0.0051020407, %v7285_v38  ;;  %5658 = vrsqrt.f32 %v2525_v58  ;;  %v2406_v11 = vmax.f32 %v2285_v43, 0.0 }
 0x1f7   : > { %10772 = vst [vmem:[#allocation133_spill] sm:$0xff] %v7549_v29  ;;  %10773 = vst [vmem:[#allocation134_spill] sm:$0xff] %v7557_v52  ;;  %v2526_v2 = vadd.f32 1e-05, %v2405_v61  ;;  %v7565_v6 = vmul.f32 0.0051020407, %v6683_v7  ;;  %v2166_v30 = vmul.f32 %v7549_v29, %v7549_v29  ;;  %v2294_v13 = vsub.f32 %v2052_v59, %v2173_v19 }
 0x1f8   : > { %1795 = vadd.xlane.f32.xlu1 %v1794_v41  ;;  %v2413_v1 = vmax.f32 %v2292_v16, 0.0  ;;  %5660 = vrsqrt.f32 %v2523_v37  ;;  %v2532_v49 = vadd.f32 1e-05, %v2411_v8  ;;  %v2054_v38 = vmul.f32 0.0051020407, %v7340_v4  ;;  %v2766_v37 = vld [vmem:[%s7591_s22 + $0x8] sm:$0xff] }
 0x1f9   : > { %1791 = vadd.xlane.f32.xlu0 %v1790_v45  ;;  %v7543_v28 = vpop.xlane.xlu1 %1515  ;;  %v2286_v45 = vsub.f32 %v2044_v55, %v2165_v48  ;;  %10774 = vst [vmem:[#allocation135_spill] sm:$0xff] %v7565_v6  ;;  %v2175_v5 = vmul.f32 %v7557_v52, %v7557_v52  ;;  %v7574_v27 = vmul.f32 0.0051020407, %v6733_v62  ;;  %v2287_v18 = vsub.f32 %v2045_v56, %v2166_v30 }
 0x1fa   : > { %v7546_v44 = vpop.xlane.xlu0 %1511  ;;  %v2527_v63 = vadd.f32 1e-05, %v2406_v11  ;;  %5662 = vrsqrt.f32 %v2526_v2  ;;  %v2046_v58 = vmul.f32 0.0051020407, %v7300_v22  ;;  %v2167_v4 = vmul.f32 %v7565_v6, %v7565_v6 }
 0x1fb   : > { %10775 = vst [vmem:[#allocation136_spill] sm:$0xff] %v7574_v27  ;;  %v2407_v12 = vmax.f32 %v2286_v45, 0.0  ;;  %v7584_v61 = vmul.f32 0.0051020407, %v6697_v21  ;;  %v2534_v55 = vadd.f32 1e-05, %v2413_v1  ;;  %5664 = vrsqrt.f32 %v2532_v49 }
 0x1fc   : > { %v5657_v62 = vpop.eup %5656  ;;  %v2415_v16 = vmax.f32 %v2294_v13, 0.0  ;;  %v2296_v22 = vsub.f32 %v2054_v38, %v2175_v5  ;;  %v2056_v48 = vmul.f32 0.0051020407, %v7350_v53  ;;  %v2177_v8 = vmul.f32 %v7574_v27, %v7574_v27  ;;  %v10791_v27 = vld [vmem:[#allocation6_spill] sm:$0xff] }
 0x1fd   : > { %v7560_v41 = vpop.xlane.xlu1 %1523  ;;  %10776 = vst [vmem:[#allocation137_spill] sm:$0xff] %v7584_v61  ;;  %v7598_v21 = vmul.f32 0.0051020407, %v6743_v10  ;;  %v2408_v59 = vmax.f32 %v2287_v18, 0.0  ;;  %5666 = vrsqrt.f32 %v2527_v63  ;;  %v2528_v56 = vadd.f32 1e-05, %v2407_v12 }
 0x1fe   : > { %v7562_v47 = vpop.xlane.xlu0 %1519  ;;  %v2047_v11 = vmul.f32 0.0051020407, %v7294_v20  ;;  %v2288_v2 = vsub.f32 %v2046_v58, %v2167_v4  ;;  %v2168_v53 = vmul.f32 %v7584_v61, %v7584_v61  ;;  %v7608_v30 = vmul.f32 0.0051020407, %v6707_v31  ;;  %v2767_v20 = vld [vmem:[%s7591_s22 + $0x10] sm:$0xff] }
 0x1ff   : > { %10777 = vst [vmem:[#allocation138_spill] sm:$0xff] %v7598_v21  ;;  %5668 = vrsqrt.f32 %v2534_v55  ;;  %v7610_v10 = vmul.f32 %v5657_v62, %v2766_v37  ;;  %v2536_v49 = vadd.f32 1e-05, %v2415_v16  ;;  %v2417_v13 = vmax.f32 %v2296_v22, 0.0  ;;  %v2765_v16 = vld [vmem:[%s7591_s22] sm:$0xff]  ;;  %v10831_v61 = vld [vmem:[#allocation16_spill] sm:$0xff] }
 0x200   : > { %10778 = vst [vmem:[#allocation139_spill] sm:$0xff] %v7608_v30  ;;  %v5659_v1 = vpop.eup %5658  ;;  %v2298_v38 = vsub.f32 %v2056_v48, %v2177_v8  ;;  %v2058_v5 = vmul.f32 0.0051020407, %v7360_v9  ;;  %v2179_v18 = vmul.f32 %v7598_v21, %v7598_v21  ;;  %v7617_v63 = vmul.f32 0.0051020407, %v6753_v23 }
 0x201   : > { %v7576_v7 = vpop.xlane.xlu1 %1531  ;;  %10779 = vst [vmem:[#allocation140_spill] sm:$0xff] %v7610_v10  ;;  %v2529_v12 = vadd.f32 1e-05, %v2408_v59  ;;  %5670 = vrsqrt.f32 %v2528_v56  ;;  %v2289_v4 = vsub.f32 %v2047_v11, %v2168_v53  ;;  %v2409_v55 = vmax.f32 %v2288_v2, 0.0 }
 0x202   : > { %v7579_v43 = vpop.xlane.xlu0 %1527  ;;  %10780 = vst [vmem:[#allocation141_spill] sm:$0xff] %v7617_v63  ;;  %v5661_v58 = vpop.eup %5660  ;;  %v2049_v62 = vmul.f32 0.0051020407, %v7305_v14  ;;  %v2170_v22 = vmul.f32 %v7608_v30, %v7608_v30  ;;  %v7629_v23 = vmul.f32 0.0051020407, %v6717_v42  ;;  %v7632_v37 = vmul.f32 %v5659_v1, %v2767_v20  ;;  %v2768_v14 = vld [vmem:[%s7591_s22 + $0x18] sm:$0xff] }
 0x203   : > { %v2060_v48 = vmul.f32 0.0051020407, %v7370_v46  ;;  %5672 = vrsqrt.f32 %v2536_v49  ;;  %v2538_v59 = vadd.f32 1e-05, %v2417_v13  ;;  %v2419_v56 = vmax.f32 %v2298_v38, 0.0  ;;  %v2774_v20 = vld [vmem:[%s7591_s22 + $0x48] sm:$0xff] }
 0x204   : > { %10781 = vst [vmem:[#allocation142_spill] sm:$0xff] %v7629_v23  ;;  %10782 = vst [vmem:[#allocation143_spill] sm:$0xff] %v7632_v37  ;;  %v5663_v8 = vpop.eup %5662  ;;  %v2300_v11 = vsub.f32 %v2058_v5, %v2179_v18  ;;  %v2181_v2 = vmul.f32 %v7617_v63, %v7617_v63  ;;  %v7638_v53 = vmul.f32 0.0051020407, %v6763_v35  ;;  %v2051_v42 = vmul.f32 0.0051020407, %v7314_v36 }
 0x205   : > { %v7600_v19 = vpop.xlane.xlu1 %1539  ;;  %v7644_v46 = vmul.f32 %v5661_v58, %v2765_v16  ;;  %v5665_v1 = vpop.eup %5664  ;;  %5674 = vrsqrt.f32 %v2529_v12  ;;  %v2410_v49 = vmax.f32 %v2289_v4, 0.0  ;;  %v2530_v13 = vadd.f32 1e-05, %v2409_v55 }
 0x206   : > { %v7603_v45 = vpop.xlane.xlu0 %1535  ;;  %10783 = vst [vmem:[#allocation144_spill] sm:$0xff] %v7638_v53  ;;  %v2291_v38 = vsub.f32 %v2049_v62, %v2170_v22  ;;  %v2172_v35 = vmul.f32 %v7629_v23, %v7629_v23  ;;  %v7652_v36 = vmul.f32 0.0051020407, %v6727_v54  ;;  %v2302_v18 = vsub.f32 %v2060_v48, %v2181_v2  ;;  %v2769_v62 = vld [vmem:[%s7591_s22 + $0x20] sm:$0xff] }
 0x207   : > { %10784 = vst [vmem:[#allocation145_spill] sm:$0xff] %v7644_v46  ;;  %v7655_v58 = vmul.f32 %v5663_v8, %v2768_v14  ;;  %v5667_v16 = vpop.eup %5666  ;;  %5676 = vrsqrt.f32 %v2538_v59  ;;  %v2540_v12 = vadd.f32 1e-05, %v2419_v56  ;;  %v2421_v4 = vmax.f32 %v2300_v11, 0.0  ;;  %v2776_v14 = vld [vmem:[%s7591_s22 + $0x58] sm:$0xff] }
 0x208   : > { %10785 = vst [vmem:[#allocation146_spill] sm:$0xff] %v7652_v36  ;;  %v2062_v55 = vmul.f32 0.0051020407, %v7380_v26  ;;  %v2183_v63 = vmul.f32 %v7638_v53, %v7638_v53  ;;  %v7662_v54 = vmul.f32 0.0051020407, %v6773_v50  ;;  %v2293_v48 = vsub.f32 %v2051_v42, %v2172_v35 }
 0x209   : > { %v7619_v31 = vpop.xlane.xlu1 %1547  ;;  %3377 = vperm.xlu1 %5655, %v7610_v10   ;;  %10786 = vst [vmem:[#allocation147_spill] sm:$0xff] %v7655_v58  ;;  %v5669_v22 = vpop.eup %5668  ;;  %v7667_v8 = vmul.f32 %v5665_v1, %v2774_v20  ;;  %v2531_v59 = vadd.f32 1e-05, %v2410_v49  ;;  %5678 = vrsqrt.f32 %v2530_v13  ;;  %v2412_v56 = vmax.f32 %v2291_v38, 0.0  ;;  %v2770_v20 = vld [vmem:[%s7591_s22 + $0x28] sm:$0xff]  ;;  %v10823_v10 = vld [vmem:[#allocation14_spill] sm:$0xff] }
 0x20a   : > { %v7623_v9 = vpop.xlane.xlu0 %1543  ;;  %10787 = vst [vmem:[#allocation148_spill] sm:$0xff] %v7662_v54  ;;  %v2053_v26 = vmul.f32 0.0051020407, %v7325_v39  ;;  %v2174_v50 = vmul.f32 %v7652_v36, %v7652_v36  ;;  %v7676_v42 = vmul.f32 0.0051020407, %v6737_v3  ;;  %v2423_v35 = vmax.f32 %v2302_v18, 0.0 }
 0x20b   : > { %10788 = vst [vmem:[#allocation149_spill] sm:$0xff] %v7667_v8  ;;  %v7679_v1 = vmul.f32 %v5667_v16, %v2769_v62  ;;  %v5671_v49 = vpop.eup %5670  ;;  %5680 = vrsqrt.f32 %v2540_v12  ;;  %v2542_v13 = vadd.f32 1e-05, %v2421_v4  ;;  %v2304_v38 = vsub.f32 %v2062_v55, %v2183_v63  ;;  %v10813_v36 = vld [vmem:[#allocation112_spill] sm:$0xff] }
 0x20c   : > { %10789 = vst [vmem:[#allocation150_spill] sm:$0xff] %v7676_v42  ;;  %v2064_v39 = vmul.f32 0.0051020407, %v7390_v32  ;;  %v2185_v53 = vmul.f32 %v7662_v54, %v7662_v54  ;;  %v7686_v52 = vmul.f32 0.0051020407, %v10791_v27  ;;  %v2414_v3 = vmax.f32 %v2293_v48, 0.0 }
 0x20d   : > { %v7641_v21 = vpop.xlane.xlu1 %1555  ;;  %3382 = vperm.xlu1 %5655, %v7632_v37   ;;  %10790 = vst [vmem:[#allocation151_spill] sm:$0xff] %v7679_v1  ;;  %v7691_v16 = vmul.f32 %v5669_v22, %v2776_v14  ;;  %v5673_v12 = vpop.eup %5672  ;;  %5682 = vrsqrt.f32 %v2531_v59  ;;  %v2533_v63 = vadd.f32 1e-05, %v2412_v56  ;;  %v2295_v4 = vsub.f32 %v2053_v26, %v2174_v50  ;;  %v10794_v32 = vld [vmem:[#allocation101_spill] sm:$0xff]  ;;  %v2778_v54 = vld [vmem:[%s7591_s22 + $0x68] sm:$0xff]  ;;  %v10795_v48 = vld [vmem:[#allocation2_spill] sm:$0xff] }
 0x20e   : > { %v7646_v5 = vpop.xlane.xlu0 %1551  ;;  %10792 = vst [vmem:[#allocation6_spill] sm:$0xff] %v7686_v52  ;;  %v2055_v55 = vmul.f32 0.0051020407, %v10794_v32  ;;  %v2176_v27 = vmul.f32 %v7676_v42, %v7676_v42  ;;  %v7700_v40 = vmul.f32 0.0051020407, %v10795_v48  ;;  %v7703_v22 = vmul.f32 %v5671_v49, %v2770_v20  ;;  %v10798_v14 = vld [vmem:[#allocation108_spill] sm:$0xff] }
 0x20f   : > { %3372 = vperm.xlu0 %5654, %v7644_v46   ;;  %10793 = vst [vmem:[#allocation152_spill] sm:$0xff] %v7691_v16  ;;  %v2544_v17 = vadd.f32 1e-05, %v2423_v35  ;;  %v5675_v59 = vpop.eup %5674  ;;  %5684 = vrsqrt.f32 %v2542_v13  ;;  %v2425_v56 = vmax.f32 %v2304_v38, 0.0  ;;  %v2306_v26 = vsub.f32 %v2064_v39, %v2185_v53  ;;  %v2771_v32 = vld [vmem:[%s7591_s22 + $0x30] sm:$0xff]  ;;  %v10802_v39 = vld [vmem:[#allocation102_spill] sm:$0xff] }
 0x210   : > { %10796 = vst [vmem:[#allocation101_spill] sm:$0xff] %v7700_v40  ;;  %10797 = vst [vmem:[#allocation2_spill] sm:$0xff] %v7703_v22  ;;  %v2066_v50 = vmul.f32 0.0051020407, %v10798_v14  ;;  %v7710_v6 = vmul.f32 0.0051020407, %v10799_v51  ;;  %v7715_v49 = vmul.f32 %v5673_v12, %v2778_v54  ;;  %5686 = vrsqrt.f32 %v2533_v63 }
 0x211   : > { %v7664_v2 = vpop.xlane.xlu1 %1563  ;;  %3387 = vperm.xlu1 %5655, %v7655_v58   ;;  %v2535_v48 = vadd.f32 1e-05, %v2414_v3  ;;  %v5677_v13 = vpop.eup %5676  ;;  %v2416_v53 = vmax.f32 %v2295_v4, 0.0  ;;  %v2297_v38 = vsub.f32 %v2055_v55, %v2176_v27  ;;  %v2057_v20 = vmul.f32 0.0051020407, %v10802_v39  ;;  %v10803_v3 = vld [vmem:[#allocation3_spill] sm:$0xff] }
 0x212   : > { %v7670_v11 = vpop.xlane.xlu0 %1559  ;;  %10800 = vst [vmem:[#allocation108_spill] sm:$0xff] %v7710_v6  ;;  %10801 = vst [vmem:[#allocation8_spill] sm:$0xff] %v7715_v49  ;;  %v2178_v51 = vmul.f32 %v7700_v40, %v7700_v40  ;;  %5688 = vrsqrt.f32 %v2544_v17  ;;  %v7727_v54 = vmul.f32 %v5675_v59, %v2771_v32  ;;  %v2546_v63 = vadd.f32 1e-05, %v2425_v56  ;;  %v10806_v27 = vld [vmem:[#allocation110_spill] sm:$0xff]  ;;  %v2772_v42 = vld [vmem:[%s7591_s22 + $0x38] sm:$0xff] }
 0x213   : > { %3417 = vperm.xlu0 %5654, %v7667_v8   ;;  %v2187_v8 = vmul.f32 %v7686_v52, %v7686_v52  ;;  %v2780_v52 = vld [vmem:[%s7591_s22 + $0x78] sm:$0xff]  ;;  %v5679_v12 = vpop.eup %5678  ;;  %v2427_v4 = vmax.f32 %v2306_v26, 0.0  ;;  %v2068_v39 = vmul.f32 0.0051020407, %v10806_v27  ;;  %v10807_v40 = vld [vmem:[#allocation10_spill] sm:$0xff]  ;;  %5690 = vrsqrt.f32 %v2535_v48  ;;  %v10810_v32 = vld [vmem:[#allocation103_spill] sm:$0xff] }
 0x214   : > { %10805 = vst [vmem:[#allocation3_spill] sm:$0xff] %v7727_v54  ;;  %v7734_v15 = vmul.f32 0.0051020407, %v10807_v40  ;;  %v7739_v59 = vmul.f32 %v5677_v13, %v2780_v52  ;;  %v2537_v26 = vadd.f32 1e-05, %v2416_v53  ;;  %v10811_v48 = vld [vmem:[#allocation4_spill] sm:$0xff]  ;;  %v7752_v52 = vmul.f32 %v5679_v12, %v2772_v42 }
 0x215   : > { %v7688_v18 = vpop.xlane.xlu1 %1571  ;;  %3392 = vperm.xlu1 %5655, %v7679_v1   ;;  %v2308_v55 = vsub.f32 %v2066_v50, %v2187_v8  ;;  %v5681_v56 = vpop.eup %5680  ;;  %v2418_v8 = vmax.f32 %v2297_v38, 0.0  ;;  %v2299_v50 = vsub.f32 %v2057_v20, %v2178_v51  ;;  %v2070_v58 = vmul.f32 0.0051020407, %v10813_v36  ;;  %v2773_v51 = vld [vmem:[%s7591_s22 + $0x40] sm:$0xff]  ;;  %v10854_v37 = vld [vmem:[#allocation123_spill] sm:$0xff] }
 0x216   : > { %v7694_v62 = vpop.xlane.xlu0 %1567  ;;  %10808 = vst [vmem:[#allocation110_spill] sm:$0xff] %v7734_v15  ;;  %10809 = vst [vmem:[#allocation10_spill] sm:$0xff] %v7739_v59  ;;  %5692 = vrsqrt.f32 %v2546_v63  ;;  %v2548_v53 = vadd.f32 1e-05, %v2427_v4 }
 0x217   : > { %3427 = vperm.xlu0 %5654, %v7691_v16   ;;  %v7724_v16 = vmul.f32 0.0051020407, %v10803_v3  ;;  %v2059_v3 = vmul.f32 0.0051020407, %v10810_v32  ;;  %10814 = vst [vmem:[#allocation4_spill] sm:$0xff] %v7752_v52  ;;  %v5683_v13 = vpop.eup %5682  ;;  %v2429_v38 = vmax.f32 %v2308_v55, 0.0  ;;  %v2191_v32 = vmul.f32 %v7734_v15, %v7734_v15 }
 0x218   : > { %5694 = vrsqrt.f32 %v2537_v26  ;;  %v2539_v63 = vadd.f32 1e-05, %v2418_v8  ;;  %v10819_v15 = vld [vmem:[#allocation5_spill] sm:$0xff] }
 0x219   : > { %v7712_v35 = vpop.xlane.xlu1 %1579  ;;  %3397 = vperm.xlu1 %5655, %v7703_v22   ;;  %10804 = vst [vmem:[#allocation102_spill] sm:$0xff] %v7724_v16  ;;  %v2189_v22 = vmul.f32 %v7710_v6, %v7710_v6  ;;  %v2782_v6 = vld [vmem:[%s7591_s22 + $0x88] sm:$0xff]  ;;  %v2180_v40 = vmul.f32 %v7724_v16, %v7724_v16  ;;  %v10815_v16 = vld [vmem:[#allocation12_spill] sm:$0xff]  ;;  %v5685_v12 = vpop.eup %5684  ;;  %5696 = vrsqrt.f32 %v2548_v53  ;;  %v2550_v26 = vadd.f32 1e-05, %v2429_v38 }
 0x21a   : > { %v7718_v14 = vpop.xlane.xlu0 %1575  ;;  %v7758_v60 = vmul.f32 0.0051020407, %v10815_v16  ;;  %v7764_v42 = vmul.f32 %v5681_v56, %v2782_v6  ;;  %v7775_v6 = vmul.f32 %v5683_v13, %v2773_v51  ;;  %v5687_v56 = vpop.eup %5686  ;;  %5698 = vrsqrt.f32 %v2539_v63 }
 0x21b   : > { %3437 = vperm.xlu0 %5654, %v7715_v49   ;;  %v7748_v49 = vmul.f32 0.0051020407, %v10811_v48  ;;  %v2310_v20 = vsub.f32 %v2068_v39, %v2189_v22  ;;  %v10817_v48 = vld [vmem:[#allocation104_spill] sm:$0xff]  ;;  %v2420_v22 = vmax.f32 %v2299_v50, 0.0  ;;  %v2301_v4 = vsub.f32 %v2059_v3, %v2180_v40  ;;  %v2784_v39 = vld [vmem:[%s7591_s22 + $0x98] sm:$0xff]  ;;  %v10822_v50 = vld [vmem:[#allocation114_spill] sm:$0xff] }
 0x21c   : > { %10816 = vst [vmem:[#allocation112_spill] sm:$0xff] %v7758_v60  ;;  %v2061_v23 = vmul.f32 0.0051020407, %v10817_v48  ;;  %10818 = vst [vmem:[#allocation12_spill] sm:$0xff] %v7764_v42  ;;  %v7772_v48 = vmul.f32 0.0051020407, %v10819_v15  ;;  %v7787_v13 = vmul.f32 %v5685_v12, %v2784_v39  ;;  %5700 = vrsqrt.f32 %v2550_v26 }
 0x21d   : > { %v7736_v17 = vpop.xlane.xlu1 %1587  ;;  %3402 = vperm.xlu1 %5655, %v7727_v54   ;;  %10812 = vst [vmem:[#allocation103_spill] sm:$0xff] %v7748_v49  ;;  %v2182_v16 = vmul.f32 %v7748_v49, %v7748_v49  ;;  %10821 = vst [vmem:[#allocation5_spill] sm:$0xff] %v7775_v6  ;;  %v2431_v8 = vmax.f32 %v2310_v20, 0.0  ;;  %v2072_v3 = vmul.f32 0.0051020407, %v10822_v50  ;;  %v2775_v40 = vld [vmem:[%s7591_s22 + $0x50] sm:$0xff]  ;;  %v2193_v49 = vmul.f32 %v7758_v60, %v7758_v60 }
 0x21e   : > { %v7742_v27 = vpop.xlane.xlu0 %1583  ;;  %10820 = vst [vmem:[#allocation104_spill] sm:$0xff] %v7772_v48  ;;  %v7782_v15 = vmul.f32 0.0051020407, %v10823_v10  ;;  %10825 = vst [vmem:[#allocation14_spill] sm:$0xff] %v7787_v13  ;;  %v2541_v53 = vadd.f32 1e-05, %v2420_v22  ;;  %v2184_v10 = vmul.f32 %v7772_v48, %v7772_v48  ;;  %v7799_v12 = vmul.f32 %v5687_v56, %v2775_v40 }
 0x21f   : > { %3447 = vperm.xlu0 %5654, %v7739_v59   ;;  %v2312_v59 = vsub.f32 %v2070_v58, %v2191_v32  ;;  %v2303_v58 = vsub.f32 %v2061_v23, %v2182_v16  ;;  %v2422_v38 = vmax.f32 %v2301_v4, 0.0  ;;  %v10826_v20 = vld [vmem:[#allocation105_spill] sm:$0xff]  ;;  %v10827_v23 = vld [vmem:[#allocation7_spill] sm:$0xff]  ;;  %v2552_v63 = vadd.f32 1e-05, %v2431_v8  ;;  %v10830_v4 = vld [vmem:[#allocation116_spill] sm:$0xff] }
 0x220   : > { %10824 = vst [vmem:[#allocation114_spill] sm:$0xff] %v7782_v15  ;;  %v2063_v51 = vmul.f32 0.0051020407, %v10826_v20  ;;  %v7796_v16 = vmul.f32 0.0051020407, %v10827_v23  ;;  %10829 = vst [vmem:[#allocation7_spill] sm:$0xff] %v7799_v12  ;;  %v2314_v22 = vsub.f32 %v2072_v3, %v2193_v49  ;;  %5702 = vrsqrt.f32 %v2541_v53 }
 0x221   : > { %v7761_v36 = vpop.xlane.xlu1 %1595  ;;  %3407 = vperm.xlu1 %5655, %v7752_v52   ;;  %v5689_v52 = vpop.eup %5688  ;;  %v2433_v30 = vmax.f32 %v2312_v59, 0.0  ;;  %v2074_v39 = vmul.f32 0.0051020407, %v10830_v4  ;;  %v2777_v20 = vld [vmem:[%s7591_s22 + $0x60] sm:$0xff]  ;;  %v7806_v48 = vmul.f32 0.0051020407, %v10831_v61  ;;  %5704 = vrsqrt.f32 %v2552_v63 }
 0x222   : > { %v7766_v55 = vpop.xlane.xlu0 %1591  ;;  %v5691_v60 = vpop.eup %5690  ;;  %10828 = vst [vmem:[#allocation105_spill] sm:$0xff] %v7796_v16  ;;  %v2424_v23 = vmax.f32 %v2303_v58, 0.0  ;;  %v2543_v49 = vadd.f32 1e-05, %v2422_v38  ;;  %v2305_v26 = vsub.f32 %v2063_v51, %v2184_v10  ;;  %v10834_v8 = vld [vmem:[#allocation106_spill] sm:$0xff]  ;;  %v2788_v4 = vld [vmem:[%s7591_s22 + $0xb8] sm:$0xff]  ;;  %v2186_v61 = vmul.f32 %v7796_v16, %v7796_v16 }
 0x223   : > { %3457 = vperm.xlu0 %5654, %v7764_v42   ;;  %v2786_v42 = vld [vmem:[%s7591_s22 + $0xa8] sm:$0xff]  ;;  %10832 = vst [vmem:[#allocation116_spill] sm:$0xff] %v7806_v48  ;;  %v5693_v56 = vpop.eup %5692  ;;  %v2065_v3 = vmul.f32 0.0051020407, %v10834_v8  ;;  %v10835_v58 = vld [vmem:[#allocation9_spill] sm:$0xff]  ;;  %v2435_v53 = vmax.f32 %v2314_v22, 0.0 }
 0x224   : > { %v7811_v59 = vmul.f32 %v5689_v52, %v2786_v42  ;;  %v7823_v52 = vmul.f32 %v5691_v60, %v2777_v20  ;;  %v5695_v42 = vpop.eup %5694  ;;  %v10838_v51 = vld [vmem:[#allocation118_spill] sm:$0xff]  ;;  %v2779_v8 = vld [vmem:[%s7591_s22 + $0x70] sm:$0xff]  ;;  %v7835_v60 = vmul.f32 %v5693_v56, %v2788_v4  ;;  %5706 = vrsqrt.f32 %v2543_v49 }
 0x225   : > { %v7784_v32 = vpop.xlane.xlu1 %1603  ;;  %3412 = vperm.xlu1 %5655, %v7775_v6   ;;  %v2195_v6 = vmul.f32 %v7782_v15, %v7782_v15  ;;  %v7820_v15 = vmul.f32 0.0051020407, %v10835_v58  ;;  %v2076_v10 = vmul.f32 0.0051020407, %v10838_v51  ;;  %v10839_v16 = vld [vmem:[#allocation18_spill] sm:$0xff]  ;;  %v5697_v63 = vpop.eup %5696  ;;  %v2307_v22 = vsub.f32 %v2065_v3, %v2186_v61  ;;  %v10846_v61 = vld [vmem:[#allocation120_spill] sm:$0xff] }
 0x226   : > { %v7790_v50 = vpop.xlane.xlu0 %1599  ;;  %10833 = vst [vmem:[#allocation16_spill] sm:$0xff] %v7811_v59  ;;  %10837 = vst [vmem:[#allocation9_spill] sm:$0xff] %v7823_v52  ;;  %v7830_v29 = vmul.f32 0.0051020407, %v10839_v16  ;;  %v2545_v58 = vadd.f32 1e-05, %v2424_v23  ;;  %v7847_v56 = vmul.f32 %v5695_v42, %v2779_v8  ;;  %v5699_v49 = vpop.eup %5698 }
 0x227   : > { %3467 = vperm.xlu0 %5654, %v7787_v13   ;;  %10836 = vst [vmem:[#allocation106_spill] sm:$0xff] %v7820_v15  ;;  %v2554_v13 = vadd.f32 1e-05, %v2433_v30  ;;  %v2316_v38 = vsub.f32 %v2074_v39, %v2195_v6  ;;  %10841 = vst [vmem:[#allocation18_spill] sm:$0xff] %v7835_v60  ;;  %v2426_v6 = vmax.f32 %v2305_v26, 0.0  ;;  %v10842_v39 = vld [vmem:[#allocation107_spill] sm:$0xff]  ;;  %v2188_v16 = vmul.f32 %v7820_v15, %v7820_v15 }
 0x228   : > { %10840 = vst [vmem:[#allocation118_spill] sm:$0xff] %v7830_v29  ;;  %v2067_v20 = vmul.f32 0.0051020407, %v10842_v39  ;;  %v10843_v23 = vld [vmem:[#allocation11_spill] sm:$0xff]  ;;  %v2556_v4 = vadd.f32 1e-05, %v2435_v53  ;;  %v2199_v1 = vmul.f32 %v7830_v29, %v7830_v29  ;;  %v5701_v53 = vpop.eup %5700 }
 0x229   : > { %v7808_v54 = vpop.xlane.xlu1 %1611  ;;  %3422 = vperm.xlu1 %5655, %v7799_v12   ;;  %v2197_v12 = vmul.f32 %v7806_v48, %v7806_v48  ;;  %v2790_v48 = vld [vmem:[%s7591_s22 + $0xc8] sm:$0xff]  ;;  %5708 = vrsqrt.f32 %v2554_v13  ;;  %10845 = vst [vmem:[#allocation11_spill] sm:$0xff] %v7847_v56  ;;  %v2437_v26 = vmax.f32 %v2316_v38, 0.0  ;;  %v2078_v39 = vmul.f32 0.0051020407, %v10846_v61  ;;  %v10847_v15 = vld [vmem:[#allocation20_spill] sm:$0xff] }
 0x22a   : > { %v7814_v40 = vpop.xlane.xlu0 %1607  ;;  %v7854_v24 = vmul.f32 0.0051020407, %v10847_v15  ;;  %5710 = vrsqrt.f32 %v2545_v58  ;;  %v7859_v42 = vmul.f32 %v5697_v63, %v2790_v48  ;;  %v2547_v38 = vadd.f32 1e-05, %v2426_v6  ;;  %v10851_v8 = vld [vmem:[#allocation109_spill] sm:$0xff]  ;;  %v5703_v63 = vpop.eup %5702 }
 0x22b   : > { %3477 = vperm.xlu0 %5654, %v7811_v59   ;;  %v7844_v59 = vmul.f32 0.0051020407, %v10843_v23  ;;  %v2318_v3 = vsub.f32 %v2076_v10, %v2197_v12  ;;  %v2428_v12 = vmax.f32 %v2307_v22, 0.0  ;;  %v2309_v10 = vsub.f32 %v2067_v20, %v2188_v16  ;;  %v2792_v29 = vld [vmem:[%s7591_s22 + $0xd8] sm:$0xff]  ;;  %v2783_v16 = vld [vmem:[%s7591_s22 + $0x90] sm:$0xff] }
 0x22c   : > { %10848 = vst [vmem:[#allocation120_spill] sm:$0xff] %v7854_v24  ;;  %10850 = vst [vmem:[#allocation153_spill] sm:$0xff] %v7859_v42  ;;  %v2069_v23 = vmul.f32 0.0051020407, %v10851_v8  ;;  %v10852_v58 = vld [vmem:[#allocation13_spill] sm:$0xff]  ;;  %5712 = vrsqrt.f32 %v2556_v4  ;;  %v2320_v20 = vsub.f32 %v2078_v39, %v2199_v1  ;;  %v2201_v8 = vmul.f32 %v7854_v24, %v7854_v24  ;;  %v2794_v39 = vld [vmem:[%s7591_s22 + $0xe8] sm:$0xff] }
 0x22d   : > { %v7832_v30 = vpop.xlane.xlu1 %1619  ;;  %3432 = vperm.xlu1 %5655, %v7823_v52   ;;  %10844 = vst [vmem:[#allocation107_spill] sm:$0xff] %v7844_v59  ;;  %v2781_v52 = vld [vmem:[%s7591_s22 + $0x80] sm:$0xff]  ;;  %v2190_v15 = vmul.f32 %v7844_v59, %v7844_v59  ;;  %v2558_v6 = vadd.f32 1e-05, %v2437_v26  ;;  %v2439_v22 = vmax.f32 %v2318_v3, 0.0  ;;  %5714 = vrsqrt.f32 %v2547_v38  ;;  %v10861_v24 = vld [vmem:[#allocation15_spill] sm:$0xff] }
 0x22e   : > { %v7838_v51 = vpop.xlane.xlu0 %1615  ;;  %v7872_v48 = vmul.f32 %v5699_v49, %v2781_v52  ;;  %v10856_v59 = vld [vmem:[#allocation22_spill] sm:$0xff]  ;;  %v7884_v52 = vmul.f32 %v5701_v53, %v2792_v29  ;;  %v5705_v49 = vpop.eup %5704  ;;  %v2549_v4 = vadd.f32 1e-05, %v2428_v12  ;;  %v2430_v1 = vmax.f32 %v2309_v10, 0.0 }
 0x22f   : > { %3487 = vperm.xlu0 %5654, %v7835_v60   ;;  %v7868_v60 = vmul.f32 0.0051020407, %v10852_v58  ;;  %v7878_v46 = vmul.f32 0.0051020407, %v10856_v59  ;;  %v10858_v58 = vld [vmem:[#allocation111_spill] sm:$0xff]  ;;  %v2311_v26 = vsub.f32 %v2069_v23, %v2190_v15  ;;  %v7895_v29 = vmul.f32 %v5703_v63, %v2783_v16  ;;  %v5707_v53 = vpop.eup %5706  ;;  %v2785_v23 = vld [vmem:[%s7591_s22 + $0xa0] sm:$0xff] }
 0x230   : > { %10855 = vst [vmem:[#allocation13_spill] sm:$0xff] %v7872_v48  ;;  %10860 = vst [vmem:[#allocation111_spill] sm:$0xff] %v7884_v52  ;;  %5716 = vrsqrt.f32 %v2558_v6  ;;  %v2560_v38 = vadd.f32 1e-05, %v2439_v22  ;;  %v2441_v12 = vmax.f32 %v2320_v20, 0.0  ;;  %v7907_v63 = vmul.f32 %v5705_v49, %v2794_v39  ;;  %v2787_v39 = vld [vmem:[%s7591_s22 + $0xb0] sm:$0xff] }
 0x231   : > { %v7856_v13 = vpop.xlane.xlu1 %1627  ;;  %3442 = vperm.xlu1 %5655, %v7847_v56   ;;  %10853 = vst [vmem:[#allocation109_spill] sm:$0xff] %v7868_v60  ;;  %v2080_v56 = vmul.f32 0.0051020407, %v10854_v37  ;;  %10857 = vst [vmem:[#allocation123_spill] sm:$0xff] %v7878_v46  ;;  %v2192_v59 = vmul.f32 %v7868_v60, %v7868_v60  ;;  %v2082_v10 = vmul.f32 0.0051020407, %v7492_v57  ;;  %v2203_v60 = vmul.f32 %v7878_v46, %v7878_v46 }
 0x232   : > { %10849 = vst [vmem:[#allocation20_spill] sm:$0xff] %v7856_v13  ;;  %v7862_v61 = vpop.xlane.xlu0 %1623  ;;  %v2071_v13 = vmul.f32 0.0051020407, %v10858_v58  ;;  %v7892_v58 = vmul.f32 0.0051020407, %v10861_v24  ;;  %10863 = vst [vmem:[#allocation154_spill] sm:$0xff] %v7895_v29  ;;  %5718 = vrsqrt.f32 %v2549_v4  ;;  %v7919_v49 = vmul.f32 %v5707_v53, %v2785_v23 }
 0x233   : > { %3497 = vperm.xlu0 %5654, %v7859_v42   ;;  %v2322_v42 = vsub.f32 %v2080_v56, %v2201_v8  ;;  %v5709_v15 = vpop.eup %5708  ;;  %10867 = vst [vmem:[#allocation156_spill] sm:$0xff] %v7907_v63  ;;  %v2551_v6 = vadd.f32 1e-05, %v2430_v1  ;;  %v2432_v22 = vmax.f32 %v2311_v26, 0.0  ;;  %v10868_v57 = vld [vmem:[#allocation113_spill] sm:$0xff]  ;;  %5720 = vrsqrt.f32 %v2560_v38  ;;  %v2798_v23 = vld [vmem:[%s7591_s22 + $0x108] sm:$0xff] }
 0x234   : > { %10862 = vst [vmem:[#allocation15_spill] sm:$0xff] %v7892_v58  ;;  %v2313_v56 = vsub.f32 %v2071_v13, %v2192_v59  ;;  %v2073_v20 = vmul.f32 0.0051020407, %v10868_v57  ;;  %v5711_v46 = vpop.eup %5710  ;;  %v10869_v13 = vld [vmem:[#allocation17_spill] sm:$0xff]  ;;  %v2562_v4 = vadd.f32 1e-05, %v2441_v12  ;;  %v2324_v1 = vsub.f32 %v2082_v10, %v2203_v60 }
 0x235   : > { %v7881_v37 = vpop.xlane.xlu1 %1635  ;;  %3452 = vperm.xlu1 %5655, %v7872_v48   ;;  %v10864_v48 = vld [vmem:[#allocation24_spill] sm:$0xff]  ;;  %v7916_v59 = vmul.f32 0.0051020407, %v10869_v13  ;;  %10871 = vst [vmem:[#allocation17_spill] sm:$0xff] %v7919_v49  ;;  %v2084_v26 = vmul.f32 0.0051020407, %v7513_v25  ;;  %5722 = vrsqrt.f32 %v2551_v6 }
 0x236   : > { %10859 = vst [vmem:[#allocation22_spill] sm:$0xff] %v7881_v37  ;;  %v7886_v3 = vpop.xlane.xlu0 %1631  ;;  %v7902_v24 = vmul.f32 0.0051020407, %v10864_v48  ;;  %v2194_v48 = vmul.f32 %v7892_v58, %v7892_v58  ;;  %v2434_v13 = vmax.f32 %v2313_v56, 0.0  ;;  %v5713_v53 = vpop.eup %5712  ;;  %v2553_v60 = vadd.f32 1e-05, %v2432_v22 }
 0x237   : > { %3507 = vperm.xlu0 %5654, %v7884_v52   ;;  %v2796_v52 = vld [vmem:[%s7591_s22 + $0xf8] sm:$0xff]  ;;  %10870 = vst [vmem:[#allocation113_spill] sm:$0xff] %v7916_v59  ;;  %v10876_v25 = vld [vmem:[#allocation115_spill] sm:$0xff]  ;;  %5724 = vrsqrt.f32 %v2562_v4  ;;  %v2445_v6 = vmax.f32 %v2324_v1, 0.0 }
 0x238   : > { %10865 = vst [vmem:[#allocation24_spill] sm:$0xff] %v7902_v24  ;;  %v2205_v57 = vmul.f32 %v7902_v24, %v7902_v24  ;;  %v2315_v38 = vsub.f32 %v2073_v20, %v2194_v48  ;;  %v2075_v12 = vmul.f32 0.0051020407, %v10876_v25  ;;  %v10877_v56 = vld [vmem:[#allocation19_spill] sm:$0xff]  ;;  %v2086_v20 = vmul.f32 0.0051020407, %v7530_v34 }
 0x239   : > { %v7904_v8 = vpop.xlane.xlu1 %1643  ;;  %3462 = vperm.xlu1 %5655, %v7895_v29   ;;  %v10872_v29 = vld [vmem:[#allocation26_spill] sm:$0xff]  ;;  %v7940_v24 = vmul.f32 0.0051020407, %v10877_v56  ;;  %v2555_v56 = vadd.f32 1e-05, %v2434_v13  ;;  %5726 = vrsqrt.f32 %v2553_v60  ;;  %v10884_v34 = vld [vmem:[#allocation117_spill] sm:$0xff] }
 0x23a   : > { %10866 = vst [vmem:[#allocation155_spill] sm:$0xff] %v7904_v8  ;;  %v7910_v16 = vpop.xlane.xlu0 %1639  ;;  %v2443_v8 = vmax.f32 %v2322_v42, 0.0  ;;  %v7926_v58 = vmul.f32 0.0051020407, %v10872_v29  ;;  %v7931_v42 = vmul.f32 %v5709_v15, %v2796_v52  ;;  %v2196_v29 = vmul.f32 %v7916_v59, %v7916_v59  ;;  %v5715_v15 = vpop.eup %5714  ;;  %v2789_v48 = vld [vmem:[%s7591_s22 + $0xc0] sm:$0xff]  ;;  %v10880_v59 = vld [vmem:[#allocation28_spill] sm:$0xff] }
 0x23b   : > { %3517 = vperm.xlu0 %5654, %v7907_v63   ;;  %10878 = vst [vmem:[#allocation115_spill] sm:$0xff] %v7940_v24  ;;  %v7943_v52 = vmul.f32 %v5711_v46, %v2787_v39  ;;  %v2326_v22 = vsub.f32 %v2084_v26, %v2205_v57  ;;  %v7955_v46 = vmul.f32 %v5713_v53, %v2798_v23  ;;  %v5717_v4 = vpop.eup %5716  ;;  %v2436_v1 = vmax.f32 %v2315_v38, 0.0  ;;  %v10885_v13 = vld [vmem:[#allocation21_spill] sm:$0xff] }
 0x23c   : > { %10873 = vst [vmem:[#allocation26_spill] sm:$0xff] %v7926_v58  ;;  %10875 = vst [vmem:[#allocation158_spill] sm:$0xff] %v7931_v42  ;;  %v2564_v63 = vadd.f32 1e-05, %v2443_v8  ;;  %v2207_v25 = vmul.f32 %v7926_v58, %v7926_v58  ;;  %v2317_v26 = vsub.f32 %v2075_v12, %v2196_v29  ;;  %v2077_v39 = vmul.f32 0.0051020407, %v10884_v34  ;;  %v5719_v60 = vpop.eup %5718 }
 0x23d   : > { %v7928_v37 = vpop.xlane.xlu1 %1651  ;;  %3472 = vperm.xlu1 %5655, %v7919_v49   ;;  %10879 = vst [vmem:[#allocation19_spill] sm:$0xff] %v7943_v52  ;;  %v7950_v49 = vmul.f32 0.0051020407, %v10880_v59  ;;  %10883 = vst [vmem:[#allocation160_spill] sm:$0xff] %v7955_v46  ;;  %v2800_v58 = vld [vmem:[%s7591_s22 + $0x118] sm:$0xff]  ;;  %v2198_v59 = vmul.f32 %v7940_v24, %v7940_v24  ;;  %v7967_v53 = vmul.f32 %v5715_v15, %v2789_v48  ;;  %v2447_v38 = vmax.f32 %v2326_v22, 0.0 }
 0x23e   : > { %10874 = vst [vmem:[#allocation157_spill] sm:$0xff] %v7928_v37  ;;  %v7934_v10 = vpop.xlane.xlu0 %1647  ;;  %5728 = vrsqrt.f32 %v2564_v63  ;;  %v2566_v23 = vadd.f32 1e-05, %v2445_v6  ;;  %v2328_v12 = vsub.f32 %v2086_v20, %v2207_v25  ;;  %v2088_v29 = vmul.f32 0.0051020407, %v7546_v44  ;;  %v2791_v34 = vld [vmem:[%s7591_s22 + $0xd0] sm:$0xff]  ;;  %v5721_v6 = vpop.eup %5720 }
 0x23f   : > { %3527 = vperm.xlu0 %5654, %v7931_v42   ;;  %10881 = vst [vmem:[#allocation28_spill] sm:$0xff] %v7950_v49  ;;  %v7964_v42 = vmul.f32 0.0051020407, %v10885_v13  ;;  %10887 = vst [vmem:[#allocation21_spill] sm:$0xff] %v7967_v53  ;;  %v10888_v24 = vld [vmem:[#allocation30_spill] sm:$0xff]  ;;  %5730 = vrsqrt.f32 %v2555_v56  ;;  %v7979_v15 = vmul.f32 %v5717_v4, %v2800_v58  ;;  %v2438_v20 = vmax.f32 %v2317_v26, 0.0  ;;  %v5723_v4 = vpop.eup %5722 }
 0x240   : > { %v2557_v22 = vadd.f32 1e-05, %v2436_v1  ;;  %v2319_v48 = vsub.f32 %v2077_v39, %v2198_v59  ;;  %v10892_v44 = vld [vmem:[#allocation119_spill] sm:$0xff]  ;;  %v7992_v58 = vmul.f32 %v5719_v60, %v2791_v34  ;;  %5732 = vrsqrt.f32 %v2566_v23  ;;  %v2793_v59 = vld [vmem:[%s7591_s22 + $0xe0] sm:$0xff]  ;;  %v2804_v34 = vld [vmem:[%s7591_s22 + $0x138] sm:$0xff] }
 0x241   : > { %v7952_v8 = vpop.xlane.xlu1 %1659  ;;  %3482 = vperm.xlu1 %5655, %v7943_v52   ;;  %10886 = vst [vmem:[#allocation117_spill] sm:$0xff] %v7964_v42  ;;  %v2209_v52 = vmul.f32 %v7950_v49, %v7950_v49  ;;  %10891 = vst [vmem:[#allocation162_spill] sm:$0xff] %v7979_v15  ;;  %v2079_v25 = vmul.f32 0.0051020407, %v10892_v44  ;;  %v2802_v49 = vld [vmem:[%s7591_s22 + $0x128] sm:$0xff]  ;;  %v2449_v26 = vmax.f32 %v2328_v12, 0.0  ;;  %v5725_v23 = vpop.eup %5724 }
 0x242   : > { %10882 = vst [vmem:[#allocation159_spill] sm:$0xff] %v7952_v8  ;;  %v7958_v57 = vpop.xlane.xlu0 %1655  ;;  %v7974_v8 = vmul.f32 0.0051020407, %v10888_v24  ;;  %v2200_v24 = vmul.f32 %v7964_v42, %v7964_v42  ;;  %v10893_v56 = vld [vmem:[#allocation23_spill] sm:$0xff]  ;;  %v2568_v1 = vadd.f32 1e-05, %v2447_v38  ;;  %v8004_v60 = vmul.f32 %v5721_v6, %v2802_v49 }
 0x243   : > { %3537 = vperm.xlu0 %5654, %v7955_v46   ;;  %v7988_v46 = vmul.f32 0.0051020407, %v10893_v56  ;;  %10895 = vst [vmem:[#allocation23_spill] sm:$0xff] %v7992_v58  ;;  %v2330_v39 = vsub.f32 %v2088_v29, %v2209_v52  ;;  %v10896_v42 = vld [vmem:[#allocation32_spill] sm:$0xff]  ;;  %v10898_v56 = vld [vmem:[#allocation122_spill] sm:$0xff]  ;;  %5734 = vrsqrt.f32 %v2557_v22  ;;  %v2440_v52 = vmax.f32 %v2319_v48, 0.0  ;;  %v5727_v6 = vpop.eup %5726 }
 0x244   : > { %10889 = vst [vmem:[#allocation30_spill] sm:$0xff] %v7974_v8  ;;  %v2211_v44 = vmul.f32 %v7974_v8, %v7974_v8  ;;  %v2081_v37 = vmul.f32 0.0051020407, %v10898_v56  ;;  %10900 = vst [vmem:[#allocation163_spill] sm:$0xff] %v8004_v60  ;;  %v2559_v38 = vadd.f32 1e-05, %v2438_v20  ;;  %v2321_v12 = vsub.f32 %v2079_v25, %v2200_v24 }
 0x245   : > { %v7976_v63 = vpop.xlane.xlu1 %1667  ;;  %3492 = vperm.xlu1 %5655, %v7967_v53   ;;  %10894 = vst [vmem:[#allocation119_spill] sm:$0xff] %v7988_v46  ;;  %v2090_v53 = vmul.f32 0.0051020407, %v7562_v47  ;;  %v10901_v8 = vld [vmem:[#allocation25_spill] sm:$0xff]  ;;  %v8015_v49 = vmul.f32 %v5723_v4, %v2793_v59  ;;  %5736 = vrsqrt.f32 %v2568_v1  ;;  %v2570_v22 = vadd.f32 1e-05, %v2449_v26 }
 0x246   : > { %10890 = vst [vmem:[#allocation161_spill] sm:$0xff] %v7976_v63  ;;  %v7982_v13 = vpop.xlane.xlu0 %1663  ;;  %v7998_v63 = vmul.f32 0.0051020407, %v10896_v42  ;;  %v2202_v42 = vmul.f32 %v7988_v46, %v7988_v46  ;;  %v8012_v56 = vmul.f32 0.0051020407, %v10901_v8  ;;  %v2451_v20 = vmax.f32 %v2330_v39, 0.0 }
 0x247   : > { %3547 = vperm.xlu0 %5654, %v7979_v15   ;;  %v2332_v15 = vsub.f32 %v2090_v53, %v2211_v44  ;;  %10903 = vst [vmem:[#allocation164_spill] sm:$0xff] %v8015_v49  ;;  %v2092_v48 = vmul.f32 0.0051020407, %v7579_v43  ;;  %v2795_v25 = vld [vmem:[%s7591_s22 + $0xf0] sm:$0xff]  ;;  %v8027_v4 = vmul.f32 %v5725_v23, %v2804_v34  ;;  %5738 = vrsqrt.f32 %v2559_v38  ;;  %v10908_v43 = vld [vmem:[#allocation126_spill] sm:$0xff] }
 0x248   : > { %10897 = vst [vmem:[#allocation32_spill] sm:$0xff] %v7998_v63  ;;  %10902 = vst [vmem:[#allocation25_spill] sm:$0xff] %v8012_v56  ;;  %v5729_v24 = vpop.eup %5728  ;;  %v2213_v46 = vmul.f32 %v7998_v63, %v7998_v63  ;;  %v2323_v53 = vsub.f32 %v2081_v37, %v2202_v42  ;;  %v2561_v1 = vadd.f32 1e-05, %v2440_v52  ;;  %v2442_v26 = vmax.f32 %v2321_v12, 0.0  ;;  %v10909_v37 = vld [vmem:[#allocation27_spill] sm:$0xff] }
 0x249   : > { %v8001_v47 = vpop.xlane.xlu1 %1675  ;;  %3502 = vperm.xlu1 %5655, %v7992_v58   ;;  %v10904_v58 = vld [vmem:[#allocation34_spill] sm:$0xff]  ;;  %10907 = vst [vmem:[#allocation166_spill] sm:$0xff] %v8027_v4  ;;  %v2083_v39 = vmul.f32 0.0051020407, %v10908_v43  ;;  %v5731_v63 = vpop.eup %5730  ;;  %v8036_v42 = vmul.f32 0.0051020407, %v10909_v37  ;;  %v8039_v23 = vmul.f32 %v5727_v6, %v2795_v25  ;;  %5740 = vrsqrt.f32 %v2570_v22 }
 0x24a   : > { %10899 = vst [vmem:[#allocation122_spill] sm:$0xff] %v8001_v47  ;;  %v8006_v29 = vpop.xlane.xlu0 %1671  ;;  %v8022_v8 = vmul.f32 0.0051020407, %v10904_v58  ;;  %v2204_v58 = vmul.f32 %v8012_v56, %v8012_v56  ;;  %v2572_v38 = vadd.f32 1e-05, %v2451_v20  ;;  %v2334_v52 = vsub.f32 %v2092_v48, %v2213_v46  ;;  %v2797_v34 = vld [vmem:[%s7591_s22 + $0x100] sm:$0xff]  ;;  %v5733_v6 = vpop.eup %5732 }
 0x24b   : > { %3557 = vperm.xlu0 %5654, %v8004_v60   ;;  %v2806_v60 = vld [vmem:[%s7591_s22 + $0x148] sm:$0xff]  ;;  %10910 = vst [vmem:[#allocation126_spill] sm:$0xff] %v8036_v42  ;;  %10911 = vst [vmem:[#allocation27_spill] sm:$0xff] %v8039_v23  ;;  %v2094_v12 = vmul.f32 0.0051020407, %v7603_v45  ;;  %v2444_v37 = vmax.f32 %v2323_v53, 0.0  ;;  %5742 = vrsqrt.f32 %v2561_v1 }
 0x24c   : > { %10905 = vst [vmem:[#allocation34_spill] sm:$0xff] %v8022_v8  ;;  %v2215_v43 = vmul.f32 %v8022_v8, %v8022_v8  ;;  %v2563_v46 = vadd.f32 1e-05, %v2442_v26  ;;  %v2325_v22 = vsub.f32 %v2083_v39, %v2204_v58  ;;  %v2085_v45 = vmul.f32 0.0051020407, %v7505_v33  ;;  %v2808_v48 = vld [vmem:[%s7591_s22 + $0x158] sm:$0xff] }
 0x24d   : > { %v8024_v44 = vpop.xlane.xlu1 %1683  ;;  %3512 = vperm.xlu1 %5655, %v8015_v49   ;;  %v10912_v49 = vld [vmem:[#allocation36_spill] sm:$0xff]  ;;  %v10915_v25 = vld [vmem:[#allocation29_spill] sm:$0xff]  ;;  %5744 = vrsqrt.f32 %v2572_v38  ;;  %v2455_v1 = vmax.f32 %v2334_v52, 0.0  ;;  %v2096_v33 = vmul.f32 0.0051020407, %v7623_v9 }
 0x24e   : > { %10906 = vst [vmem:[#allocation165_spill] sm:$0xff] %v8024_v44  ;;  %v8030_v59 = vpop.xlane.xlu0 %1679  ;;  %v2453_v44 = vmax.f32 %v2332_v15, 0.0  ;;  %v8046_v56 = vmul.f32 0.0051020407, %v10912_v49  ;;  %v8051_v15 = vmul.f32 %v5729_v24, %v2806_v60  ;;  %v2206_v49 = vmul.f32 %v8036_v42, %v8036_v42  ;;  %v5735_v24 = vpop.eup %5734  ;;  %v2799_v39 = vld [vmem:[%s7591_s22 + $0x110] sm:$0xff] }
 0x24f   : > { %3567 = vperm.xlu0 %5654, %v8027_v4   ;;  %v8060_v53 = vmul.f32 0.0051020407, %v10915_v25  ;;  %v8063_v60 = vmul.f32 %v5731_v63, %v2797_v34  ;;  %v2336_v26 = vsub.f32 %v2094_v12, %v2215_v43  ;;  %v10918_v4 = vld [vmem:[#allocation38_spill] sm:$0xff]  ;;  %v2565_v25 = vadd.f32 1e-05, %v2444_v37  ;;  %v5737_v38 = vpop.eup %5736  ;;  %v2810_v43 = vld [vmem:[%s7591_s22 + $0x168] sm:$0xff] }
 0x250   : > { %10913 = vst [vmem:[#allocation36_spill] sm:$0xff] %v8046_v56  ;;  %10914 = vst [vmem:[#allocation167_spill] sm:$0xff] %v8051_v15  ;;  %v2574_v8 = vadd.f32 1e-05, %v2453_v44  ;;  %v2217_v58 = vmul.f32 %v8046_v56, %v8046_v56  ;;  %v8070_v42 = vmul.f32 0.0051020407, %v10918_v4  ;;  %v8075_v63 = vmul.f32 %v5733_v6, %v2808_v48 }
 0x251   : > { %v8048_v47 = vpop.xlane.xlu1 %1691  ;;  %3522 = vperm.xlu1 %5655, %v8039_v23   ;;  %10916 = vst [vmem:[#allocation29_spill] sm:$0xff] %v8060_v53  ;;  %10917 = vst [vmem:[#allocation168_spill] sm:$0xff] %v8063_v60  ;;  %5746 = vrsqrt.f32 %v2563_v46  ;;  %v2446_v52 = vmax.f32 %v2325_v22, 0.0  ;;  %v2327_v12 = vsub.f32 %v2085_v45, %v2206_v49  ;;  %v2087_v9 = vmul.f32 0.0051020407, %v7525_v0  ;;  %v10921_v37 = vld [vmem:[#allocation31_spill] sm:$0xff]  ;;  %v5739_v46 = vpop.eup %5738 }
 0x252   : > { %v8054_v20 = vpop.xlane.xlu0 %1687  ;;  %10919 = vst [vmem:[#allocation38_spill] sm:$0xff] %v8070_v42  ;;  %10920 = vst [vmem:[#allocation169_spill] sm:$0xff] %v8075_v63  ;;  %v2208_v4 = vmul.f32 %v8060_v53, %v8060_v53  ;;  %v8084_v56 = vmul.f32 0.0051020407, %v10921_v37  ;;  %5748 = vrsqrt.f32 %v2574_v8  ;;  %v8087_v6 = vmul.f32 %v5735_v24, %v2799_v39  ;;  %v2801_v49 = vld [vmem:[%s7591_s22 + $0x120] sm:$0xff]  ;;  %v10924_v53 = vld [vmem:[#allocation40_spill] sm:$0xff] }
 0x253   : > { %3577 = vperm.xlu0 %5654, %v8051_v15   ;;  %v2576_v48 = vadd.f32 1e-05, %v2455_v1  ;;  %v2457_v22 = vmax.f32 %v2336_v26, 0.0  ;;  %v2338_v45 = vsub.f32 %v2096_v33, %v2217_v58  ;;  %v2098_v0 = vmul.f32 0.0051020407, %v7646_v5  ;;  %v5741_v1 = vpop.eup %5740  ;;  %v2812_v37 = vld [vmem:[%s7591_s22 + $0x178] sm:$0xff] }
 0x254   : > { %10922 = vst [vmem:[#allocation31_spill] sm:$0xff] %v8084_v56  ;;  %10923 = vst [vmem:[#allocation170_spill] sm:$0xff] %v8087_v6  ;;  %v2219_v15 = vmul.f32 %v8070_v42, %v8070_v42  ;;  %5750 = vrsqrt.f32 %v2565_v25  ;;  %v8099_v24 = vmul.f32 %v5737_v38, %v2810_v43  ;;  %v2567_v26 = vadd.f32 1e-05, %v2446_v52  ;;  %v10927_v25 = vld [vmem:[#allocation33_spill] sm:$0xff]  ;;  %v2803_v43 = vld [vmem:[%s7591_s22 + $0x130] sm:$0xff] }
 0x255   : > { %v8072_v44 = vpop.xlane.xlu1 %1699  ;;  %3532 = vperm.xlu1 %5655, %v8063_v60   ;;  %v8094_v60 = vmul.f32 0.0051020407, %v10924_v53  ;;  %v2448_v33 = vmax.f32 %v2327_v12, 0.0  ;;  %v2329_v39 = vsub.f32 %v2087_v9, %v2208_v4  ;;  %v2089_v5 = vmul.f32 0.0051020407, %v7543_v28  ;;  %v5743_v52 = vpop.eup %5742 }
 0x256   : > { %v8078_v34 = vpop.xlane.xlu0 %1695  ;;  %10926 = vst [vmem:[#allocation171_spill] sm:$0xff] %v8099_v24  ;;  %v2210_v53 = vmul.f32 %v8084_v56, %v8084_v56  ;;  %v8108_v42 = vmul.f32 0.0051020407, %v10927_v25  ;;  %v8112_v38 = vmul.f32 %v5739_v46, %v2801_v49  ;;  %5752 = vrsqrt.f32 %v2576_v48  ;;  %v10930_v56 = vld [vmem:[#allocation42_spill] sm:$0xff]  ;;  %v2814_v49 = vld [vmem:[%s7591_s22 + $0x188] sm:$0xff] }
 0x257   : > { %3587 = vperm.xlu0 %5654, %v8075_v63   ;;  %10925 = vst [vmem:[#allocation40_spill] sm:$0xff] %v8094_v60  ;;  %v2100_v63 = vmul.f32 0.0051020407, %v7670_v11  ;;  %v2578_v12 = vadd.f32 1e-05, %v2457_v22  ;;  %v2459_v28 = vmax.f32 %v2338_v45, 0.0  ;;  %v2340_v9 = vsub.f32 %v2098_v0, %v2219_v15  ;;  %v5745_v48 = vpop.eup %5744 }
 0x258   : > { %10928 = vst [vmem:[#allocation33_spill] sm:$0xff] %v8108_v42  ;;  %10929 = vst [vmem:[#allocation172_spill] sm:$0xff] %v8112_v38  ;;  %v2221_v4 = vmul.f32 %v8094_v60, %v8094_v60  ;;  %v2091_v25 = vmul.f32 0.0051020407, %v7560_v41  ;;  %v8124_v46 = vmul.f32 %v5741_v1, %v2812_v37  ;;  %5754 = vrsqrt.f32 %v2567_v26  ;;  %v10933_v60 = vld [vmem:[#allocation35_spill] sm:$0xff] }
 0x259   : > { %v8096_v8 = vpop.xlane.xlu1 %1707  ;;  %3542 = vperm.xlu1 %5655, %v8087_v6   ;;  %v8118_v6 = vmul.f32 0.0051020407, %v10930_v56  ;;  %v2569_v22 = vadd.f32 1e-05, %v2448_v33  ;;  %v2450_v15 = vmax.f32 %v2329_v39, 0.0  ;;  %v2331_v45 = vsub.f32 %v2089_v5, %v2210_v53  ;;  %v2805_v5 = vld [vmem:[%s7591_s22 + $0x140] sm:$0xff] }
 0x25a   : > { %v8102_v58 = vpop.xlane.xlu0 %1703  ;;  %10932 = vst [vmem:[#allocation173_spill] sm:$0xff] %v8124_v46  ;;  %v2212_v56 = vmul.f32 %v8108_v42, %v8108_v42  ;;  %v8132_v41 = vmul.f32 0.0051020407, %v10933_v60  ;;  %v8135_v1 = vmul.f32 %v5743_v52, %v2803_v43  ;;  %5756 = vrsqrt.f32 %v2578_v12  ;;  %v2816_v43 = vld [vmem:[%s7591_s22 + $0x198] sm:$0xff] }
 0x25b   : > { %3597 = vperm.xlu0 %5654, %v8099_v24   ;;  %10931 = vst [vmem:[#allocation42_spill] sm:$0xff] %v8118_v6  ;;  %v2342_v24 = vsub.f32 %v2100_v63, %v2221_v4  ;;  %v5747_v37 = vpop.eup %5746  ;;  %v2580_v26 = vadd.f32 1e-05, %v2459_v28  ;;  %v2461_v33 = vmax.f32 %v2340_v9, 0.0  ;;  %v2102_v39 = vmul.f32 0.0051020407, %v7694_v62 }
 0x25c   : > { %10934 = vst [vmem:[#allocation35_spill] sm:$0xff] %v8132_v41  ;;  %10935 = vst [vmem:[#allocation174_spill] sm:$0xff] %v8135_v1  ;;  %v5749_v53 = vpop.eup %5748  ;;  %v2223_v42 = vmul.f32 %v8118_v6, %v8118_v6  ;;  %v2333_v63 = vsub.f32 %v2091_v25, %v2212_v56  ;;  %v8147_v52 = vmul.f32 %v5745_v48, %v2814_v49  ;;  %5758 = vrsqrt.f32 %v2569_v22  ;;  %v10939_v25 = vld [vmem:[#allocation37_spill] sm:$0xff] }
 0x25d   : > { %v8121_v11 = vpop.xlane.xlu1 %1715  ;;  %3552 = vperm.xlu1 %5655, %v8112_v38   ;;  %v10936_v38 = vld [vmem:[#allocation44_spill] sm:$0xff]  ;;  %v2571_v12 = vadd.f32 1e-05, %v2450_v15  ;;  %v2452_v28 = vmax.f32 %v2331_v45, 0.0  ;;  %v2093_v62 = vmul.f32 0.0051020407, %v7576_v7  ;;  %v8159_v48 = vmul.f32 %v5747_v37, %v2805_v5 }
 0x25e   : > { %v8126_v0 = vpop.xlane.xlu0 %1711  ;;  %v8142_v60 = vmul.f32 0.0051020407, %v10936_v38  ;;  %10938 = vst [vmem:[#allocation175_spill] sm:$0xff] %v8147_v52  ;;  %v5751_v6 = vpop.eup %5750  ;;  %v2214_v38 = vmul.f32 %v8132_v41, %v8132_v41  ;;  %v8156_v56 = vmul.f32 0.0051020407, %v10939_v25  ;;  %5760 = vrsqrt.f32 %v2580_v26  ;;  %v2807_v45 = vld [vmem:[%s7591_s22 + $0x150] sm:$0xff] }
 0x25f   : > { %3607 = vperm.xlu0 %5654, %v8124_v46   ;;  %v2463_v46 = vmax.f32 %v2342_v24, 0.0  ;;  %10941 = vst [vmem:[#allocation176_spill] sm:$0xff] %v8159_v48  ;;  %v2582_v22 = vadd.f32 1e-05, %v2461_v33  ;;  %v2344_v15 = vsub.f32 %v2102_v39, %v2223_v42  ;;  %v2104_v7 = vmul.f32 0.0051020407, %v7718_v14 }
 0x260   : > { %10937 = vst [vmem:[#allocation44_spill] sm:$0xff] %v8142_v60  ;;  %10940 = vst [vmem:[#allocation37_spill] sm:$0xff] %v8156_v56  ;;  %v2225_v49 = vmul.f32 %v8142_v60, %v8142_v60  ;;  %v2454_v25 = vmax.f32 %v2333_v63, 0.0  ;;  %v8171_v24 = vmul.f32 %v5749_v53, %v2816_v43  ;;  %v5753_v37 = vpop.eup %5752  ;;  %5762 = vrsqrt.f32 %v2571_v12  ;;  %v2818_v39 = vld [vmem:[%s7591_s22 + $0x1a8] sm:$0xff]  ;;  %v2809_v43 = vld [vmem:[%s7591_s22 + $0x160] sm:$0xff] }
 0x261   : > { %v8144_v4 = vpop.xlane.xlu1 %1723  ;;  %3562 = vperm.xlu1 %5655, %v8135_v1   ;;  %v10942_v1 = vld [vmem:[#allocation46_spill] sm:$0xff]  ;;  %v2573_v42 = vadd.f32 1e-05, %v2452_v28  ;;  %v2335_v26 = vsub.f32 %v2093_v62, %v2214_v38  ;;  %v2095_v14 = vmul.f32 0.0051020407, %v7600_v19  ;;  %v10945_v5 = vld [vmem:[#allocation39_spill] sm:$0xff]  ;;  %v8183_v53 = vmul.f32 %v5751_v6, %v2807_v45 }
 0x262   : > { %v8150_v9 = vpop.xlane.xlu0 %1719  ;;  %v8166_v41 = vmul.f32 0.0051020407, %v10942_v1  ;;  %10944 = vst [vmem:[#allocation177_spill] sm:$0xff] %v8171_v24  ;;  %v2216_v1 = vmul.f32 %v8156_v56, %v8156_v56  ;;  %v8180_v63 = vmul.f32 0.0051020407, %v10945_v5  ;;  %v5755_v12 = vpop.eup %5754  ;;  %5764 = vrsqrt.f32 %v2582_v22 }
 0x263   : > { %3617 = vperm.xlu0 %5654, %v8147_v52   ;;  %v2584_v60 = vadd.f32 1e-05, %v2463_v46  ;;  %10947 = vst [vmem:[#allocation178_spill] sm:$0xff] %v8183_v53  ;;  %v2465_v28 = vmax.f32 %v2344_v15, 0.0  ;;  %v2346_v62 = vsub.f32 %v2104_v7, %v2225_v49  ;;  %v2106_v19 = vmul.f32 0.0051020407, %v7742_v27 }
 0x264   : > { %10943 = vst [vmem:[#allocation46_spill] sm:$0xff] %v8166_v41  ;;  %10946 = vst [vmem:[#allocation39_spill] sm:$0xff] %v8180_v63  ;;  %v2227_v38 = vmul.f32 %v8166_v41, %v8166_v41  ;;  %v10948_v52 = vld [vmem:[#allocation48_spill] sm:$0xff]  ;;  %v2575_v5 = vadd.f32 1e-05, %v2454_v25  ;;  %v8195_v6 = vmul.f32 %v5753_v37, %v2818_v39  ;;  %v5757_v22 = vpop.eup %5756  ;;  %5766 = vrsqrt.f32 %v2573_v42  ;;  %v2820_v49 = vld [vmem:[%s7591_s22 + $0x1b8] sm:$0xff] }
 0x265   : > { %v8168_v23 = vpop.xlane.xlu1 %1731  ;;  %3572 = vperm.xlu1 %5655, %v8159_v48   ;;  %v8190_v56 = vmul.f32 0.0051020407, %v10948_v52  ;;  %v2456_v15 = vmax.f32 %v2335_v26, 0.0  ;;  %v2337_v7 = vsub.f32 %v2095_v14, %v2216_v1  ;;  %v2097_v27 = vmul.f32 0.0051020407, %v7619_v31  ;;  %v10951_v25 = vld [vmem:[#allocation41_spill] sm:$0xff] }
 0x266   : > { %v8174_v33 = vpop.xlane.xlu0 %1727  ;;  %10950 = vst [vmem:[#allocation179_spill] sm:$0xff] %v8195_v6  ;;  %v2218_v52 = vmul.f32 %v8180_v63, %v8180_v63  ;;  %v8204_v41 = vmul.f32 0.0051020407, %v10951_v25  ;;  %5768 = vrsqrt.f32 %v2584_v60  ;;  %v8207_v37 = vmul.f32 %v5755_v12, %v2809_v43  ;;  %v5759_v42 = vpop.eup %5758  ;;  %v2811_v1 = vld [vmem:[%s7591_s22 + $0x170] sm:$0xff]  ;;  %v10954_v63 = vld [vmem:[#allocation50_spill] sm:$0xff]  ;;  %v2822_v25 = vld [vmem:[%s7591_s22 + $0x1c8] sm:$0xff] }
 0x267   : > { %3627 = vperm.xlu0 %5654, %v8171_v24   ;;  %10949 = vst [vmem:[#allocation48_spill] sm:$0xff] %v8190_v56  ;;  %v2586_v39 = vadd.f32 1e-05, %v2465_v28  ;;  %v2467_v26 = vmax.f32 %v2346_v62, 0.0  ;;  %v2348_v14 = vsub.f32 %v2106_v19, %v2227_v38  ;;  %v2108_v31 = vmul.f32 0.0051020407, %v7766_v55 }
 0x268   : > { %10952 = vst [vmem:[#allocation41_spill] sm:$0xff] %v8204_v41  ;;  %10953 = vst [vmem:[#allocation180_spill] sm:$0xff] %v8207_v37  ;;  %v2229_v24 = vmul.f32 %v8190_v56, %v8190_v56  ;;  %5770 = vrsqrt.f32 %v2575_v5  ;;  %v8219_v12 = vmul.f32 %v5757_v22, %v2820_v49  ;;  %v5761_v28 = vpop.eup %5760  ;;  %v2577_v62 = vadd.f32 1e-05, %v2456_v15  ;;  %v10957_v5 = vld [vmem:[#allocation43_spill] sm:$0xff]  ;;  %v2813_v49 = vld [vmem:[%s7591_s22 + $0x180] sm:$0xff] }
 0x269   : > { %v8192_v46 = vpop.xlane.xlu1 %1739  ;;  %3582 = vperm.xlu1 %5655, %v8183_v53   ;;  %v8214_v53 = vmul.f32 0.0051020407, %v10954_v63  ;;  %v2458_v19 = vmax.f32 %v2337_v7, 0.0  ;;  %v2339_v43 = vsub.f32 %v2097_v27, %v2218_v52  ;;  %v2099_v55 = vmul.f32 0.0051020407, %v7641_v21 }
 0x26a   : > { %v8198_v45 = vpop.xlane.xlu0 %1735  ;;  %10956 = vst [vmem:[#allocation181_spill] sm:$0xff] %v8219_v12  ;;  %v2220_v63 = vmul.f32 %v8204_v41, %v8204_v41  ;;  %v8228_v56 = vmul.f32 0.0051020407, %v10957_v5  ;;  %v8232_v22 = vmul.f32 %v5759_v42, %v2811_v1  ;;  %v5763_v15 = vpop.eup %5762  ;;  %5772 = vrsqrt.f32 %v2586_v39  ;;  %v10960_v41 = vld [vmem:[#allocation52_spill] sm:$0xff]  ;;  %v2824_v1 = vld [vmem:[%s7591_s22 + $0x1d8] sm:$0xff] }
 0x26b   : > { %3637 = vperm.xlu0 %5654, %v8195_v6   ;;  %10955 = vst [vmem:[#allocation50_spill] sm:$0xff] %v8214_v53  ;;  %v2110_v6 = vmul.f32 0.0051020407, %v7790_v50  ;;  %v2588_v7 = vadd.f32 1e-05, %v2467_v26  ;;  %v2469_v21 = vmax.f32 %v2348_v14, 0.0  ;;  %v2350_v27 = vsub.f32 %v2108_v31, %v2229_v24 }
 0x26c   : > { %10958 = vst [vmem:[#allocation43_spill] sm:$0xff] %v8228_v56  ;;  %10959 = vst [vmem:[#allocation182_spill] sm:$0xff] %v8232_v22  ;;  %v2231_v52 = vmul.f32 %v8214_v53, %v8214_v53  ;;  %v2101_v5 = vmul.f32 0.0051020407, %v7664_v2  ;;  %v8244_v42 = vmul.f32 %v5761_v28, %v2822_v25  ;;  %v5765_v39 = vpop.eup %5764  ;;  %5774 = vrsqrt.f32 %v2577_v62  ;;  %v10963_v53 = vld [vmem:[#allocation45_spill] sm:$0xff] }
 0x26d   : > { %v8216_v60 = vpop.xlane.xlu1 %1747  ;;  %3592 = vperm.xlu1 %5655, %v8207_v37   ;;  %v8238_v37 = vmul.f32 0.0051020407, %v10960_v41  ;;  %v2579_v26 = vadd.f32 1e-05, %v2458_v19  ;;  %v2460_v24 = vmax.f32 %v2339_v43, 0.0  ;;  %v2341_v14 = vsub.f32 %v2099_v55, %v2220_v63  ;;  %v2815_v55 = vld [vmem:[%s7591_s22 + $0x190] sm:$0xff] }
 0x26e   : > { %v8222_v38 = vpop.xlane.xlu0 %1743  ;;  %10962 = vst [vmem:[#allocation183_spill] sm:$0xff] %v8244_v42  ;;  %v2222_v41 = vmul.f32 %v8228_v56, %v8228_v56  ;;  %v8252_v2 = vmul.f32 0.0051020407, %v10963_v53  ;;  %v8255_v28 = vmul.f32 %v5763_v15, %v2813_v49  ;;  %v5767_v25 = vpop.eup %5766  ;;  %5776 = vrsqrt.f32 %v2588_v7  ;;  %v2826_v49 = vld [vmem:[%s7591_s22 + $0x1e8] sm:$0xff] }
 0x26f   : > { %3647 = vperm.xlu0 %5654, %v8219_v12   ;;  %10961 = vst [vmem:[#allocation52_spill] sm:$0xff] %v8238_v37  ;;  %v2352_v12 = vsub.f32 %v2110_v6, %v2231_v52  ;;  %v2590_v62 = vadd.f32 1e-05, %v2469_v21  ;;  %v2471_v19 = vmax.f32 %v2350_v27, 0.0  ;;  %v2112_v43 = vmul.f32 0.0051020407, %v7814_v40 }
 0x270   : > { %10964 = vst [vmem:[#allocation45_spill] sm:$0xff] %v8252_v2  ;;  %10965 = vst [vmem:[#allocation184_spill] sm:$0xff] %v8255_v28  ;;  %v5769_v63 = vpop.eup %5768  ;;  %v2233_v56 = vmul.f32 %v8238_v37, %v8238_v37  ;;  %v2343_v6 = vsub.f32 %v2101_v5, %v2222_v41  ;;  %v8267_v15 = vmul.f32 %v5765_v39, %v2824_v1  ;;  %5778 = vrsqrt.f32 %v2579_v26  ;;  %v10969_v5 = vld [vmem:[#allocation47_spill] sm:$0xff] }
 0x271   : > { %v8241_v50 = vpop.xlane.xlu1 %1755  ;;  %3602 = vperm.xlu1 %5655, %v8232_v22   ;;  %v10966_v22 = vld [vmem:[#allocation54_spill] sm:$0xff]  ;;  %v2581_v7 = vadd.f32 1e-05, %v2460_v24  ;;  %v2462_v21 = vmax.f32 %v2341_v14, 0.0  ;;  %v2103_v40 = vmul.f32 0.0051020407, %v7688_v18  ;;  %v8279_v39 = vmul.f32 %v5767_v25, %v2815_v55 }
 0x272   : > { %v8246_v31 = vpop.xlane.xlu0 %1751  ;;  %v8262_v53 = vmul.f32 0.0051020407, %v10966_v22  ;;  %10968 = vst [vmem:[#allocation185_spill] sm:$0xff] %v8267_v15  ;;  %v5771_v37 = vpop.eup %5770  ;;  %v2224_v22 = vmul.f32 %v8252_v2, %v8252_v2  ;;  %v8276_v41 = vmul.f32 0.0051020407, %v10969_v5  ;;  %5780 = vrsqrt.f32 %v2590_v62  ;;  %v2817_v14 = vld [vmem:[%s7591_s22 + $0x1a0] sm:$0xff] }
 0x273   : > { %3657 = vperm.xlu0 %5654, %v8244_v42   ;;  %v2473_v42 = vmax.f32 %v2352_v12, 0.0  ;;  %v2592_v26 = vadd.f32 1e-05, %v2471_v19  ;;  %v2354_v24 = vsub.f32 %v2112_v43, %v2233_v56  ;;  %v2114_v18 = vmul.f32 0.0051020407, %v7838_v51  ;;  %v2828_v43 = vld [vmem:[%s7591_s22 + $0x1f8] sm:$0xff] }
 0x274   : > { %10967 = vst [vmem:[#allocation54_spill] sm:$0xff] %v8262_v53  ;;  %10970 = vst [vmem:[#allocation47_spill] sm:$0xff] %v8276_v41  ;;  %v2235_v1 = vmul.f32 %v8262_v53, %v8262_v53  ;;  %v2464_v5 = vmax.f32 %v2343_v6, 0.0  ;;  %v8291_v12 = vmul.f32 %v5769_v63, %v2826_v49  ;;  %v5773_v25 = vpop.eup %5772  ;;  %5782 = vrsqrt.f32 %v2581_v7  ;;  %v10974_v55 = vld [vmem:[#allocation49_spill] sm:$0xff]  ;;  %v2819_v49 = vld [vmem:[%s7591_s22 + $0x1b0] sm:$0xff] }
 0x275   : > { %v8264_v52 = vpop.xlane.xlu1 %1763  ;;  %3612 = vperm.xlu1 %5655, %v8255_v28   ;;  %v10971_v28 = vld [vmem:[#allocation56_spill] sm:$0xff]  ;;  %v2583_v56 = vadd.f32 1e-05, %v2462_v21  ;;  %v2345_v62 = vsub.f32 %v2103_v40, %v2224_v22  ;;  %v2105_v51 = vmul.f32 0.0051020407, %v7712_v35  ;;  %v8303_v63 = vmul.f32 %v5771_v37, %v2817_v14 }
 0x276   : > { %v8270_v27 = vpop.xlane.xlu0 %1759  ;;  %v8286_v2 = vmul.f32 0.0051020407, %v10971_v28  ;;  %10973 = vst [vmem:[#allocation186_spill] sm:$0xff] %v8291_v12  ;;  %v2226_v28 = vmul.f32 %v8276_v41, %v8276_v41  ;;  %v8300_v6 = vmul.f32 0.0051020407, %v10974_v55  ;;  %v5775_v7 = vpop.eup %5774  ;;  %5784 = vrsqrt.f32 %v2592_v26 }
 0x277   : > { %3667 = vperm.xlu0 %5654, %v8267_v15   ;;  %v2594_v53 = vadd.f32 1e-05, %v2473_v42  ;;  %10976 = vst [vmem:[#allocation187_spill] sm:$0xff] %v8303_v63  ;;  %v2475_v21 = vmax.f32 %v2354_v24, 0.0  ;;  %v2356_v40 = vsub.f32 %v2114_v18, %v2235_v1  ;;  %v2116_v35 = vmul.f32 0.0051020407, %v7862_v61 }
 0x278   : > { %10972 = vst [vmem:[#allocation56_spill] sm:$0xff] %v8286_v2  ;;  %10975 = vst [vmem:[#allocation49_spill] sm:$0xff] %v8300_v6  ;;  %v2237_v22 = vmul.f32 %v8286_v2, %v8286_v2  ;;  %v10977_v15 = vld [vmem:[#allocation58_spill] sm:$0xff]  ;;  %v2585_v55 = vadd.f32 1e-05, %v2464_v5  ;;  %v8315_v37 = vmul.f32 %v5773_v25, %v2828_v43  ;;  %v5777_v26 = vpop.eup %5776  ;;  %5786 = vrsqrt.f32 %v2583_v56  ;;  %v2830_v1 = vld [vmem:[%s7591_s22 + $0x208] sm:$0xff] }
 0x279   : > { %v8288_v48 = vpop.xlane.xlu1 %1771  ;;  %3622 = vperm.xlu1 %5655, %v8279_v39   ;;  %v8310_v41 = vmul.f32 0.0051020407, %v10977_v15  ;;  %v2466_v24 = vmax.f32 %v2345_v62, 0.0  ;;  %v2347_v18 = vsub.f32 %v2105_v51, %v2226_v28  ;;  %v2107_v61 = vmul.f32 0.0051020407, %v7736_v17  ;;  %v10980_v5 = vld [vmem:[#allocation51_spill] sm:$0xff] }
 0x27a   : > { %v8294_v19 = vpop.xlane.xlu0 %1767  ;;  %10979 = vst [vmem:[#allocation188_spill] sm:$0xff] %v8315_v37  ;;  %v2228_v15 = vmul.f32 %v8300_v6, %v8300_v6  ;;  %v8324_v2 = vmul.f32 0.0051020407, %v10980_v5  ;;  %5788 = vrsqrt.f32 %v2594_v53  ;;  %v8327_v25 = vmul.f32 %v5775_v7, %v2819_v49  ;;  %v5779_v56 = vpop.eup %5778  ;;  %v2821_v28 = vld [vmem:[%s7591_s22 + $0x1c0] sm:$0xff]  ;;  %v10983_v6 = vld [vmem:[#allocation60_spill] sm:$0xff] }
 0x27b   : > { %3677 = vperm.xlu0 %5654, %v8291_v12   ;;  %10978 = vst [vmem:[#allocation58_spill] sm:$0xff] %v8310_v41  ;;  %v2596_v43 = vadd.f32 1e-05, %v2475_v21  ;;  %v2477_v62 = vmax.f32 %v2356_v40, 0.0  ;;  %v2358_v51 = vsub.f32 %v2116_v35, %v2237_v22  ;;  %v2118_v17 = vmul.f32 0.0051020407, %v7886_v3 }
 0x27c   : > { %10981 = vst [vmem:[#allocation51_spill] sm:$0xff] %v8324_v2  ;;  %10982 = vst [vmem:[#allocation189_spill] sm:$0xff] %v8327_v25  ;;  %v2239_v12 = vmul.f32 %v8310_v41, %v8310_v41  ;;  %5790 = vrsqrt.f32 %v2585_v55  ;;  %v8339_v7 = vmul.f32 %v5777_v26, %v2830_v1  ;;  %v5781_v21 = vpop.eup %5780  ;;  %v2587_v49 = vadd.f32 1e-05, %v2466_v24  ;;  %v2832_v22 = vld [vmem:[%s7591_s22 + $0x218] sm:$0xff] }
 0x27d   : > { %v8312_v42 = vpop.xlane.xlu1 %1779  ;;  %3632 = vperm.xlu1 %5655, %v8303_v63   ;;  %v8334_v63 = vmul.f32 0.0051020407, %v10983_v6  ;;  %v2468_v40 = vmax.f32 %v2347_v18, 0.0  ;;  %v2349_v35 = vsub.f32 %v2107_v61, %v2228_v15  ;;  %v2109_v3 = vmul.f32 0.0051020407, %v7761_v36  ;;  %v10986_v6 = vld [vmem:[#allocation53_spill] sm:$0xff] }
 0x27e   : > { %v8318_v14 = vpop.xlane.xlu0 %1775  ;;  %10985 = vst [vmem:[#allocation190_spill] sm:$0xff] %v8339_v7  ;;  %v2230_v5 = vmul.f32 %v8324_v2, %v8324_v2  ;;  %v8346_v41 = vmul.f32 0.0051020407, %v10986_v6  ;;  %v2120_v55 = vmul.f32 0.0051020407, %v7910_v16  ;;  %v8350_v26 = vmul.f32 %v5779_v56, %v2821_v28  ;;  %v5783_v1 = vpop.eup %5782  ;;  %v2823_v15 = vld [vmem:[%s7591_s22 + $0x1d0] sm:$0xff] }
 0x27f   : > { %3687 = vperm.xlu0 %5654, %v8315_v37   ;;  %10984 = vst [vmem:[#allocation60_spill] sm:$0xff] %v8334_v63  ;;  %5792 = vrsqrt.f32 %v2596_v43  ;;  %v2598_v24 = vadd.f32 1e-05, %v2477_v62  ;;  %v2479_v18 = vmax.f32 %v2358_v51, 0.0  ;;  %v2360_v61 = vsub.f32 %v2118_v17, %v2239_v12  ;;  %v10988_v6 = vld [vmem:[#allocation62_spill] sm:$0xff]  ;;  %v2834_v17 = vld [vmem:[%s7591_s22 + $0x228] sm:$0xff] }
 0x280   : > { %10987 = vst [vmem:[#allocation53_spill] sm:$0xff] %v8346_v41  ;;  %v2241_v37 = vmul.f32 %v8334_v63, %v8334_v63  ;;  %v8358_v2 = vmul.f32 0.0051020407, %v10988_v6  ;;  %v2111_v16 = vmul.f32 0.0051020407, %v7784_v32  ;;  %v8364_v56 = vmul.f32 %v5781_v21, %v2832_v22  ;;  %v5785_v43 = vpop.eup %5784  ;;  %v10991_v6 = vld [vmem:[#allocation55_spill] sm:$0xff] }
 0x281   : > { %v8336_v53 = vpop.xlane.xlu1 %1787  ;;  %3642 = vperm.xlu1 %5655, %v8327_v25   ;;  %5794 = vrsqrt.f32 %v2587_v49  ;;  %v2589_v12 = vadd.f32 1e-05, %v2468_v40  ;;  %v2470_v62 = vmax.f32 %v2349_v35, 0.0  ;;  %v2351_v51 = vsub.f32 %v2109_v3, %v2230_v5  ;;  %v2825_v35 = vld [vmem:[%s7591_s22 + $0x1e0] sm:$0xff] }
 0x282   : > { %v8352_v36 = vpop.xlane.xlu0 %1783  ;;  %10989 = vst [vmem:[#allocation62_spill] sm:$0xff] %v8358_v2  ;;  %10990 = vst [vmem:[#allocation191_spill] sm:$0xff] %v8364_v56  ;;  %v2232_v28 = vmul.f32 %v8346_v41, %v8346_v41  ;;  %v8370_v63 = vmul.f32 0.0051020407, %v10991_v6  ;;  %v2362_v32 = vsub.f32 %v2120_v55, %v2241_v37  ;;  %v8373_v25 = vmul.f32 %v5783_v1, %v2823_v15  ;;  %v5787_v21 = vpop.eup %5786  ;;  %v10994_v41 = vld [vmem:[#allocation64_spill] sm:$0xff]  ;;  %v2836_v15 = vld [vmem:[%s7591_s22 + $0x238] sm:$0xff] }
 0x283   : > { %3697 = vperm.xlu0 %5654, %v8339_v7   ;;  %5796 = vrsqrt.f32 %v2598_v24  ;;  %v2600_v22 = vadd.f32 1e-05, %v2479_v18  ;;  %v2481_v49 = vmax.f32 %v2360_v61, 0.0  ;;  %v2122_v40 = vmul.f32 0.0051020407, %v7934_v10 }
 0x284   : > { %10992 = vst [vmem:[#allocation55_spill] sm:$0xff] %v8370_v63  ;;  %10993 = vst [vmem:[#allocation192_spill] sm:$0xff] %v8373_v25  ;;  %v5789_v3 = vpop.eup %5788  ;;  %v2243_v5 = vmul.f32 %v8358_v2, %v8358_v2  ;;  %v8380_v6 = vmul.f32 0.0051020407, %v10994_v41  ;;  %v2353_v37 = vsub.f32 %v2111_v16, %v2232_v28  ;;  %v8385_v1 = vmul.f32 %v5785_v43, %v2834_v17  ;;  %v10998_v16 = vld [vmem:[#allocation57_spill] sm:$0xff] }
 0x285   : > { %v8361_v7 = vpop.xlane.xlu1 %1795  ;;  %3652 = vperm.xlu1 %5655, %v8350_v26   ;;  %5798 = vrsqrt.f32 %v2589_v12  ;;  %v2591_v24 = vadd.f32 1e-05, %v2470_v62  ;;  %v2472_v18 = vmax.f32 %v2351_v51, 0.0  ;;  %v2113_v10 = vmul.f32 0.0051020407, %v7808_v54  ;;  %v2827_v51 = vld [vmem:[%s7591_s22 + $0x1f0] sm:$0xff] }
 0x286   : > { %10995 = vst [vmem:[#allocation64_spill] sm:$0xff] %v8380_v6  ;;  %10997 = vst [vmem:[#allocation194_spill] sm:$0xff] %v8385_v1  ;;  %v8388_v61 = vpop.xlane.xlu0 %1791  ;;  %v5791_v2 = vpop.eup %5790  ;;  %v2234_v41 = vmul.f32 %v8370_v63, %v8370_v63  ;;  %v8394_v28 = vmul.f32 0.0051020407, %v10998_v16  ;;  %v8397_v43 = vmul.f32 %v5787_v21, %v2825_v35  ;;  %5800 = vrsqrt.f32 %v2600_v22  ;;  %v2838_v35 = vld [vmem:[%s7591_s22 + $0x248] sm:$0xff] }
 0x287   : > { %3707 = vperm.xlu0 %5654, %v8364_v56   ;;  %v2602_v12 = vadd.f32 1e-05, %v2481_v49  ;;  %v2364_v62 = vsub.f32 %v2122_v40, %v2243_v5  ;;  %v2124_v54 = vmul.f32 0.0051020407, %v7958_v57  ;;  %v2245_v17 = vmul.f32 %v8380_v6, %v8380_v6  ;;  %v11000_v56 = vld [vmem:[#allocation66_spill] sm:$0xff]  ;;  %v11004_v5 = vld [vmem:[#allocation59_spill] sm:$0xff] }
 0x288   : > { %10999 = vst [vmem:[#allocation57_spill] sm:$0xff] %v8394_v28  ;;  %v8404_v63 = vmul.f32 0.0051020407, %v11000_v56  ;;  %v2474_v16 = vmax.f32 %v2353_v37, 0.0  ;;  %5802 = vrsqrt.f32 %v2591_v24  ;;  %v2593_v22 = vadd.f32 1e-05, %v2472_v18 }
 0x289   : > { %v8382_v55 = vpop.permute.xlu1 %3377  ;;  %3662 = vperm.xlu1 %5655, %v8373_v25   ;;  %v5793_v21 = vpop.eup %5792  ;;  %v2355_v49 = vsub.f32 %v2113_v10, %v2234_v41  ;;  %v2115_v57 = vmul.f32 0.0051020407, %v7832_v30  ;;  %v2236_v56 = vmul.f32 %v8394_v28, %v8394_v28  ;;  %v8418_v37 = vmul.f32 0.0051020407, %v11004_v5 }
 0x28a   : > { %10996 = vst [vmem:[#allocation193_spill] sm:$0xff] %v8382_v55  ;;  %v2483_v55 = vmax.f32 %v2362_v32, 0.0  ;;  %11001 = vst [vmem:[#allocation66_spill] sm:$0xff] %v8404_v63  ;;  %v8409_v32 = vmul.f32 %v5789_v3, %v2836_v15  ;;  %v8421_v3 = vmul.f32 %v5791_v2, %v2827_v51  ;;  %5804 = vrsqrt.f32 %v2602_v12  ;;  %v2829_v15 = vld [vmem:[%s7591_s22 + $0x200] sm:$0xff] }
 0x28b   : > { %3717 = vperm.xlu0 %5654, %v8385_v1   ;;  %11005 = vst [vmem:[#allocation59_spill] sm:$0xff] %v8418_v37  ;;  %v5795_v24 = vpop.eup %5794  ;;  %v2485_v18 = vmax.f32 %v2364_v62, 0.0  ;;  %v2366_v10 = vsub.f32 %v2124_v54, %v2245_v17  ;;  %v2126_v30 = vmul.f32 0.0051020407, %v7982_v13  ;;  %v2247_v41 = vmul.f32 %v8404_v63, %v8404_v63  ;;  %v11006_v1 = vld [vmem:[#allocation68_spill] sm:$0xff]  ;;  %v2840_v63 = vld [vmem:[%s7591_s22 + $0x258] sm:$0xff] }
 0x28c   : > { %11003 = vst [vmem:[#allocation196_spill] sm:$0xff] %v8409_v32  ;;  %v2604_v6 = vadd.f32 1e-05, %v2483_v55  ;;  %v8428_v28 = vmul.f32 0.0051020407, %v11006_v1  ;;  %v8433_v2 = vmul.f32 %v5793_v21, %v2838_v35  ;;  %5806 = vrsqrt.f32 %v2593_v22  ;;  %v11010_v13 = vld [vmem:[#allocation20_spill] sm:$0xff] }
 0x28d   : > { %v8406_v25 = vpop.permute.xlu1 %3382  ;;  %3672 = vperm.xlu1 %5655, %v8397_v43   ;;  %v2595_v5 = vadd.f32 1e-05, %v2474_v16  ;;  %v5797_v12 = vpop.eup %5796  ;;  %v2476_v62 = vmax.f32 %v2355_v49, 0.0  ;;  %v2357_v54 = vsub.f32 %v2115_v57, %v2236_v56  ;;  %v2117_v51 = vmul.f32 0.0051020407, %v11010_v13  ;;  %v11012_v16 = vld [vmem:[#allocation61_spill] sm:$0xff] }
 0x28e   : > { %11002 = vst [vmem:[#allocation195_spill] sm:$0xff] %v8406_v25  ;;  %v8412_v40 = vpop.permute.xlu0 %3372  ;;  %11007 = vst [vmem:[#allocation68_spill] sm:$0xff] %v8428_v28  ;;  %v2238_v1 = vmul.f32 %v8418_v37, %v8418_v37  ;;  %5808 = vrsqrt.f32 %v2604_v6  ;;  %v8445_v21 = vmul.f32 %v5795_v24, %v2829_v15  ;;  %v2606_v35 = vadd.f32 1e-05, %v2485_v18  ;;  %v2831_v13 = vld [vmem:[%s7591_s22 + $0x210] sm:$0xff] }
 0x28f   : > { %3727 = vperm.xlu0 %5654, %v8409_v32   ;;  %11009 = vst [vmem:[#allocation198_spill] sm:$0xff] %v8433_v2  ;;  %v8442_v32 = vmul.f32 0.0051020407, %v11012_v16  ;;  %v5799_v22 = vpop.eup %5798  ;;  %v2487_v49 = vmax.f32 %v2366_v10, 0.0  ;;  %v2368_v57 = vsub.f32 %v2126_v30, %v2247_v41  ;;  %v2128_v56 = vmul.f32 0.0051020407, %v8006_v29 }
 0x290   : > { %5810 = vrsqrt.f32 %v2595_v5  ;;  %v8457_v24 = vmul.f32 %v5797_v12, %v2840_v63  ;;  %v5801_v18 = vpop.eup %5800  ;;  %v2597_v10 = vadd.f32 1e-05, %v2476_v62  ;;  %v2478_v30 = vmax.f32 %v2357_v54, 0.0  ;;  %v11018_v29 = vld [vmem:[#allocation22_spill] sm:$0xff]  ;;  %v11020_v5 = vld [vmem:[#allocation63_spill] sm:$0xff] }
 0x291   : > { %v8430_v55 = vpop.permute.xlu1 %3387  ;;  %3682 = vperm.xlu1 %5655, %v8421_v3   ;;  %11013 = vst [vmem:[#allocation61_spill] sm:$0xff] %v8442_v32  ;;  %v2359_v15 = vsub.f32 %v2117_v51, %v2238_v1  ;;  %v2119_v41 = vmul.f32 0.0051020407, %v11018_v29  ;;  %v8470_v63 = vmul.f32 %v5799_v22, %v2831_v13  ;;  %5812 = vrsqrt.f32 %v2606_v35  ;;  %v2833_v1 = vld [vmem:[%s7591_s22 + $0x220] sm:$0xff]  ;;  %v2844_v13 = vld [vmem:[%s7591_s22 + $0x278] sm:$0xff] }
 0x292   : > { %11008 = vst [vmem:[#allocation197_spill] sm:$0xff] %v8430_v55  ;;  %v8436_v17 = vpop.permute.xlu0 %3417  ;;  %v11014_v55 = vld [vmem:[#allocation70_spill] sm:$0xff]  ;;  %11017 = vst [vmem:[#allocation200_spill] sm:$0xff] %v8457_v24  ;;  %v5803_v12 = vpop.eup %5802  ;;  %v2608_v62 = vadd.f32 1e-05, %v2487_v49  ;;  %v2489_v54 = vmax.f32 %v2368_v57, 0.0  ;;  %5814 = vrsqrt.f32 %v2597_v10 }
 0x293   : > { %11011 = vst [vmem:[#allocation20_spill] sm:$0xff] %v8436_v17  ;;  %3737 = vperm.xlu0 %5654, %v8433_v2   ;;  %v2249_v17 = vmul.f32 %v8428_v28, %v8428_v28  ;;  %v8452_v37 = vmul.f32 0.0051020407, %v11014_v55  ;;  %v2842_v28 = vld [vmem:[%s7591_s22 + $0x268] sm:$0xff]  ;;  %v2240_v55 = vmul.f32 %v8442_v32, %v8442_v32  ;;  %v8466_v2 = vmul.f32 0.0051020407, %v11020_v5 }
 0x294   : > { %v11024_v5 = vld [vmem:[#allocation155_spill] sm:$0xff]  ;;  %v8482_v22 = vmul.f32 %v5801_v18, %v2842_v28  ;;  %v5805_v35 = vpop.eup %5804  ;;  %v2599_v49 = vadd.f32 1e-05, %v2478_v30  ;;  %v8493_v28 = vmul.f32 %v5803_v12, %v2833_v1  ;;  %5816 = vrsqrt.f32 %v2608_v62 }
 0x295   : > { %11015 = vst [vmem:[#allocation70_spill] sm:$0xff] %v8452_v37  ;;  %v8454_v6 = vpop.permute.xlu1 %3392  ;;  %3692 = vperm.xlu1 %5655, %v8445_v21   ;;  %11021 = vst [vmem:[#allocation63_spill] sm:$0xff] %v8466_v2  ;;  %v2370_v51 = vsub.f32 %v2128_v56, %v2249_v17  ;;  %v2251_v29 = vmul.f32 %v8452_v37, %v8452_v37  ;;  %v2121_v25 = vmul.f32 0.0051020407, %v11024_v5  ;;  %v2480_v17 = vmax.f32 %v2359_v15, 0.0  ;;  %v11028_v37 = vld [vmem:[#allocation65_spill] sm:$0xff] }
 0x296   : > { %11016 = vst [vmem:[#allocation199_spill] sm:$0xff] %v8454_v6  ;;  %v8460_v16 = vpop.permute.xlu0 %3427  ;;  %v2130_v6 = vmul.f32 0.0051020407, %v8030_v59  ;;  %11026 = vst [vmem:[#allocation201_spill] sm:$0xff] %v8482_v22  ;;  %v2361_v57 = vsub.f32 %v2119_v41, %v2240_v55  ;;  %v8490_v5 = vmul.f32 0.0051020407, %v11028_v37  ;;  %v5807_v18 = vpop.eup %5806  ;;  %v8505_v12 = vmul.f32 %v5805_v35, %v2844_v13 }
 0x297   : > { %11019 = vst [vmem:[#allocation22_spill] sm:$0xff] %v8460_v16  ;;  %3747 = vperm.xlu0 %5654, %v8457_v24   ;;  %v11022_v16 = vld [vmem:[#allocation72_spill] sm:$0xff]  ;;  %v2610_v10 = vadd.f32 1e-05, %v2489_v54  ;;  %v2491_v30 = vmax.f32 %v2370_v51, 0.0  ;;  %5818 = vrsqrt.f32 %v2599_v49  ;;  %v2837_v13 = vld [vmem:[%s7591_s22 + $0x240] sm:$0xff] }
 0x298   : > { %v8476_v32 = vmul.f32 0.0051020407, %v11022_v16  ;;  %v2242_v16 = vmul.f32 %v8466_v2, %v8466_v2  ;;  %11029 = vst [vmem:[#allocation65_spill] sm:$0xff] %v8490_v5  ;;  %v2372_v24 = vsub.f32 %v2130_v6, %v2251_v29  ;;  %v2132_v15 = vmul.f32 0.0051020407, %v8054_v20  ;;  %v2835_v41 = vld [vmem:[%s7591_s22 + $0x230] sm:$0xff]  ;;  %v5809_v55 = vpop.eup %5808 }
 0x299   : > { %v8479_v59 = vpop.permute.xlu1 %3397  ;;  %3702 = vperm.xlu1 %5655, %v8470_v63   ;;  %11033 = vst [vmem:[#allocation204_spill] sm:$0xff] %v8505_v12  ;;  %v2601_v62 = vadd.f32 1e-05, %v2480_v17  ;;  %v2482_v54 = vmax.f32 %v2361_v57, 0.0  ;;  %v11034_v20 = vld [vmem:[#allocation157_spill] sm:$0xff]  ;;  %v8517_v35 = vmul.f32 %v5807_v18, %v2835_v41  ;;  %5820 = vrsqrt.f32 %v2610_v10 }
 0x29a   : > { %11023 = vst [vmem:[#allocation72_spill] sm:$0xff] %v8476_v32  ;;  %11025 = vst [vmem:[#allocation155_spill] sm:$0xff] %v8479_v59  ;;  %v8484_v56 = vpop.permute.xlu0 %3437  ;;  %v11030_v59 = vld [vmem:[#allocation74_spill] sm:$0xff]  ;;  %v2363_v6 = vsub.f32 %v2121_v25, %v2242_v16  ;;  %v2123_v51 = vmul.f32 0.0051020407, %v11034_v20  ;;  %v11036_v25 = vld [vmem:[#allocation67_spill] sm:$0xff] }
 0x29b   : > { %11027 = vst [vmem:[#allocation202_spill] sm:$0xff] %v8484_v56  ;;  %3757 = vperm.xlu0 %5654, %v8482_v22   ;;  %v2253_v56 = vmul.f32 %v8476_v32, %v8476_v32  ;;  %v8500_v37 = vmul.f32 0.0051020407, %v11030_v59  ;;  %v2846_v22 = vld [vmem:[%s7591_s22 + $0x288] sm:$0xff]  ;;  %v5811_v32 = vpop.eup %5810  ;;  %v2244_v59 = vmul.f32 %v8490_v5, %v8490_v5  ;;  %v8514_v16 = vmul.f32 0.0051020407, %v11036_v25 }
 0x29c   : > { %v2493_v2 = vmax.f32 %v2372_v24, 0.0  ;;  %v2612_v49 = vadd.f32 1e-05, %v2491_v30  ;;  %v2134_v57 = vmul.f32 0.0051020407, %v8078_v34  ;;  %v2484_v25 = vmax.f32 %v2363_v6, 0.0  ;;  %v5813_v10 = vpop.eup %5812 }
 0x29d   : > { %11031 = vst [vmem:[#allocation74_spill] sm:$0xff] %v8500_v37  ;;  %v8502_v29 = vpop.permute.xlu1 %3402  ;;  %3712 = vperm.xlu1 %5655, %v8493_v28   ;;  %11037 = vst [vmem:[#allocation67_spill] sm:$0xff] %v8514_v16  ;;  %v2374_v17 = vsub.f32 %v2132_v15, %v2253_v56  ;;  %v2255_v20 = vmul.f32 %v8500_v37, %v8500_v37  ;;  %v8529_v18 = vmul.f32 %v5809_v55, %v2846_v22  ;;  %v11042_v34 = vld [vmem:[#allocation159_spill] sm:$0xff]  ;;  %v2848_v37 = vld [vmem:[%s7591_s22 + $0x298] sm:$0xff]  ;;  %v5815_v55 = vpop.eup %5814 }
 0x29e   : > { %11032 = vst [vmem:[#allocation203_spill] sm:$0xff] %v8502_v29  ;;  %v8508_v1 = vpop.permute.xlu0 %3447  ;;  %5822 = vrsqrt.f32 %v2601_v62  ;;  %v2603_v56 = vadd.f32 1e-05, %v2482_v54  ;;  %v2365_v30 = vsub.f32 %v2123_v51, %v2244_v59  ;;  %v2125_v15 = vmul.f32 0.0051020407, %v11042_v34  ;;  %v11044_v6 = vld [vmem:[#allocation69_spill] sm:$0xff] }
 0x29f   : > { %11035 = vst [vmem:[#allocation157_spill] sm:$0xff] %v8508_v1  ;;  %3767 = vperm.xlu0 %5654, %v8505_v12   ;;  %v11038_v1 = vld [vmem:[#allocation76_spill] sm:$0xff]  ;;  %11041 = vst [vmem:[#allocation206_spill] sm:$0xff] %v8529_v18  ;;  %v8538_v12 = vmul.f32 0.0051020407, %v11044_v6  ;;  %v8541_v22 = vmul.f32 %v5811_v32, %v2837_v13  ;;  %5824 = vrsqrt.f32 %v2612_v49  ;;  %v2495_v62 = vmax.f32 %v2374_v17, 0.0  ;;  %v5817_v49 = vpop.eup %5816 }
 0x2a0   : > { %v8524_v5 = vmul.f32 0.0051020407, %v11038_v1  ;;  %v2246_v1 = vmul.f32 %v8514_v16, %v8514_v16  ;;  %v2614_v29 = vadd.f32 1e-05, %v2493_v2  ;;  %v2376_v54 = vsub.f32 %v2134_v57, %v2255_v20  ;;  %v2839_v59 = vld [vmem:[%s7591_s22 + $0x250] sm:$0xff] }
 0x2a1   : > { %3722 = vperm.xlu1 %5655, %v8517_v35   ;;  %v8527_v24 = vpop.permute.xlu1 %3407  ;;  %11045 = vst [vmem:[#allocation69_spill] sm:$0xff] %v8538_v12  ;;  %v2136_v51 = vmul.f32 0.0051020407, %v8102_v58  ;;  %v2605_v6 = vadd.f32 1e-05, %v2484_v25  ;;  %v8553_v32 = vmul.f32 %v5813_v10, %v2848_v37  ;;  %5826 = vrsqrt.f32 %v2603_v56  ;;  %v11050_v58 = vld [vmem:[#allocation161_spill] sm:$0xff]  ;;  %v5819_v10 = vpop.eup %5818 }
 0x2a2   : > { %11039 = vst [vmem:[#allocation76_spill] sm:$0xff] %v8524_v5  ;;  %11040 = vst [vmem:[#allocation205_spill] sm:$0xff] %v8527_v24  ;;  %v8532_v41 = vpop.permute.xlu0 %3457  ;;  %v2257_v34 = vmul.f32 %v8524_v5, %v8524_v5  ;;  %v2486_v17 = vmax.f32 %v2365_v30, 0.0  ;;  %v2367_v57 = vsub.f32 %v2125_v15, %v2246_v1  ;;  %v2127_v13 = vmul.f32 0.0051020407, %v11050_v58  ;;  %v2850_v5 = vld [vmem:[%s7591_s22 + $0x2a8] sm:$0xff] }
 0x2a3   : > { %11043 = vst [vmem:[#allocation159_spill] sm:$0xff] %v8532_v41  ;;  %3777 = vperm.xlu0 %5654, %v8529_v18   ;;  %v11046_v41 = vld [vmem:[#allocation78_spill] sm:$0xff]  ;;  %11049 = vst [vmem:[#allocation208_spill] sm:$0xff] %v8553_v32  ;;  %v11052_v25 = vld [vmem:[#allocation71_spill] sm:$0xff]  ;;  %5828 = vrsqrt.f32 %v2614_v29  ;;  %v8565_v37 = vmul.f32 %v5815_v55, %v2839_v59  ;;  %v2616_v56 = vadd.f32 1e-05, %v2495_v62  ;;  %v8577_v55 = vmul.f32 %v5817_v49, %v2850_v5  ;;  %v5821_v62 = vpop.eup %5820 }
 0x2a4   : > { %v8548_v16 = vmul.f32 0.0051020407, %v11046_v41  ;;  %v2248_v41 = vmul.f32 %v8538_v12, %v8538_v12  ;;  %v8562_v18 = vmul.f32 0.0051020407, %v11052_v25  ;;  %v2497_v30 = vmax.f32 %v2376_v54, 0.0  ;;  %v2841_v58 = vld [vmem:[%s7591_s22 + $0x260] sm:$0xff] }
 0x2a5   : > { %3732 = vperm.xlu1 %5655, %v8541_v22   ;;  %v8551_v2 = vpop.permute.xlu1 %3412  ;;  %v2378_v15 = vsub.f32 %v2136_v51, %v2257_v34  ;;  %v2138_v1 = vmul.f32 0.0051020407, %v8126_v0  ;;  %v11054_v12 = vld [vmem:[#allocation80_spill] sm:$0xff]  ;;  %5830 = vrsqrt.f32 %v2605_v6  ;;  %11057 = vst [vmem:[#allocation210_spill] sm:$0xff] %v8577_v55  ;;  %v2607_v54 = vadd.f32 1e-05, %v2486_v17 }
 0x2a6   : > { %11047 = vst [vmem:[#allocation78_spill] sm:$0xff] %v8548_v16  ;;  %11048 = vst [vmem:[#allocation207_spill] sm:$0xff] %v8551_v2  ;;  %v8556_v20 = vpop.permute.xlu0 %3467  ;;  %v8572_v24 = vmul.f32 0.0051020407, %v11054_v12  ;;  %v2488_v51 = vmax.f32 %v2367_v57, 0.0  ;;  %v2369_v59 = vsub.f32 %v2127_v13, %v2248_v41  ;;  %v11058_v0 = vld [vmem:[#allocation122_spill] sm:$0xff]  ;;  %v2250_v12 = vmul.f32 %v8562_v18, %v8562_v18 }
 0x2a7   : > { %11051 = vst [vmem:[#allocation161_spill] sm:$0xff] %v8556_v20  ;;  %11053 = vst [vmem:[#allocation71_spill] sm:$0xff] %v8562_v18  ;;  %3787 = vperm.xlu0 %5654, %v8553_v32   ;;  %v2259_v20 = vmul.f32 %v8548_v16, %v8548_v16  ;;  %v2129_v34 = vmul.f32 0.0051020407, %v11058_v0  ;;  %v2852_v16 = vld [vmem:[%s7591_s22 + $0x2b8] sm:$0xff]  ;;  %v8590_v5 = vmul.f32 %v5819_v10, %v2841_v58  ;;  %5832 = vrsqrt.f32 %v2616_v56  ;;  %v2843_v41 = vld [vmem:[%s7591_s22 + $0x270] sm:$0xff] }
 0x2a8   : > { %11055 = vst [vmem:[#allocation80_spill] sm:$0xff] %v8572_v24  ;;  %v11060_v6 = vld [vmem:[#allocation73_spill] sm:$0xff]  ;;  %v5823_v49 = vpop.eup %5822  ;;  %v2618_v17 = vadd.f32 1e-05, %v2497_v30  ;;  %v2499_v57 = vmax.f32 %v2378_v15, 0.0  ;;  %v2261_v0 = vmul.f32 %v8572_v24, %v8572_v24  ;;  %v8602_v10 = vmul.f32 %v5821_v62, %v2852_v16  ;;  %v2854_v58 = vld [vmem:[%s7591_s22 + $0x2c8] sm:$0xff] }
 0x2a9   : > { %3742 = vperm.xlu1 %5655, %v8565_v37   ;;  %v8575_v29 = vpop.permute.xlu1 %3422  ;;  %v8586_v32 = vmul.f32 0.0051020407, %v11060_v6  ;;  %v2380_v13 = vsub.f32 %v2138_v1, %v2259_v20  ;;  %v11064_v6 = vld [vmem:[#allocation165_spill] sm:$0xff]  ;;  %v5825_v56 = vpop.eup %5824  ;;  %5834 = vrsqrt.f32 %v2607_v54  ;;  %v2609_v30 = vadd.f32 1e-05, %v2488_v51  ;;  %v11067_v24 = vld [vmem:[#allocation75_spill] sm:$0xff] }
 0x2aa   : > { %11056 = vst [vmem:[#allocation209_spill] sm:$0xff] %v8575_v29  ;;  %v8580_v25 = vpop.permute.xlu0 %3477  ;;  %v2140_v29 = vmul.f32 0.0051020407, %v8150_v9  ;;  %v2131_v2 = vmul.f32 0.0051020407, %v11064_v6  ;;  %11065 = vst [vmem:[#allocation165_spill] sm:$0xff] %v8602_v10  ;;  %v2371_v15 = vsub.f32 %v2129_v34, %v2250_v12  ;;  %v8613_v16 = vmul.f32 %v5823_v49, %v2843_v41 }
 0x2ab   : > { %11059 = vst [vmem:[#allocation122_spill] sm:$0xff] %v8580_v25  ;;  %11061 = vst [vmem:[#allocation73_spill] sm:$0xff] %v8586_v32  ;;  %3797 = vperm.xlu0 %5654, %v8577_v55   ;;  %v11062_v25 = vld [vmem:[#allocation82_spill] sm:$0xff]  ;;  %v2490_v20 = vmax.f32 %v2369_v59, 0.0  ;;  %v8610_v6 = vmul.f32 0.0051020407, %v11067_v24  ;;  %v5827_v62 = vpop.eup %5826  ;;  %5836 = vrsqrt.f32 %v2618_v17  ;;  %v8625_v41 = vmul.f32 %v5825_v56, %v2854_v58 }
 0x2ac   : > { %v8596_v18 = vmul.f32 0.0051020407, %v11062_v25  ;;  %v2252_v25 = vmul.f32 %v8586_v32, %v8586_v32  ;;  %v2382_v55 = vsub.f32 %v2140_v29, %v2261_v0  ;;  %v2620_v54 = vadd.f32 1e-05, %v2499_v57  ;;  %v2845_v34 = vld [vmem:[%s7591_s22 + $0x280] sm:$0xff]  ;;  %v11069_v32 = vld [vmem:[#allocation84_spill] sm:$0xff] }
 0x2ad   : > { %3752 = vperm.xlu1 %5655, %v8590_v5   ;;  %v8600_v9 = vpop.permute.xlu1 %3432  ;;  %11068 = vst [vmem:[#allocation75_spill] sm:$0xff] %v8610_v6  ;;  %v2501_v51 = vmax.f32 %v2380_v13, 0.0  ;;  %v2142_v59 = vmul.f32 0.0051020407, %v8174_v33  ;;  %v5829_v12 = vpop.eup %5828  ;;  %v8620_v24 = vmul.f32 0.0051020407, %v11069_v32  ;;  %5838 = vrsqrt.f32 %v2609_v30 }
 0x2ae   : > { %11063 = vst [vmem:[#allocation82_spill] sm:$0xff] %v8596_v18  ;;  %v8604_v1 = vpop.permute.xlu0 %3487  ;;  %v2373_v29 = vsub.f32 %v2131_v2, %v2252_v25  ;;  %11071 = vst [vmem:[#allocation212_spill] sm:$0xff] %v8625_v41  ;;  %v2611_v17 = vadd.f32 1e-05, %v2490_v20  ;;  %v2492_v57 = vmax.f32 %v2371_v15, 0.0  ;;  %v2856_v0 = vld [vmem:[%s7591_s22 + $0x2d8] sm:$0xff]  ;;  %v2254_v32 = vmul.f32 %v8610_v6, %v8610_v6 }
 0x2af   : > { %11066 = vst [vmem:[#allocation211_spill] sm:$0xff] %v8604_v1  ;;  %3807 = vperm.xlu0 %5654, %v8602_v10   ;;  %v2263_v1 = vmul.f32 %v8596_v18, %v8596_v18  ;;  %11070 = vst [vmem:[#allocation84_spill] sm:$0xff] %v8620_v24  ;;  %v2133_v33 = vmul.f32 0.0051020407, %v8048_v47  ;;  %v5831_v18 = vpop.eup %5830  ;;  %v11073_v2 = vld [vmem:[#allocation77_spill] sm:$0xff]  ;;  %v2503_v10 = vmax.f32 %v2382_v55, 0.0  ;;  %v8637_v56 = vmul.f32 %v5827_v62, %v2845_v34 }
 0x2b0   : > { %v8634_v25 = vmul.f32 0.0051020407, %v11073_v2  ;;  %5840 = vrsqrt.f32 %v2620_v54  ;;  %v2622_v30 = vadd.f32 1e-05, %v2501_v51  ;;  %v2144_v47 = vmul.f32 0.0051020407, %v8198_v45 }
 0x2b1   : > { %3762 = vperm.xlu1 %5655, %v8613_v16   ;;  %v8623_v49 = vpop.permute.xlu1 %3442  ;;  %v2384_v20 = vsub.f32 %v2142_v59, %v2263_v1  ;;  %v2847_v15 = vld [vmem:[%s7591_s22 + $0x290] sm:$0xff]  ;;  %v2265_v58 = vmul.f32 %v8620_v24, %v8620_v24  ;;  %v2494_v2 = vmax.f32 %v2373_v29, 0.0  ;;  %v8649_v62 = vmul.f32 %v5829_v12, %v2856_v0  ;;  %v5833_v54 = vpop.eup %5832  ;;  %v2858_v34 = vld [vmem:[%s7591_s22 + $0x2e8] sm:$0xff]  ;;  %v2849_v0 = vld [vmem:[%s7591_s22 + $0x2a0] sm:$0xff] }
 0x2b2   : > { %v8628_v13 = vpop.permute.xlu0 %3497  ;;  %11074 = vst [vmem:[#allocation77_spill] sm:$0xff] %v8634_v25  ;;  %5842 = vrsqrt.f32 %v2611_v17  ;;  %v2613_v1 = vadd.f32 1e-05, %v2492_v57  ;;  %v2375_v51 = vsub.f32 %v2133_v33, %v2254_v32  ;;  %v2135_v45 = vmul.f32 0.0051020407, %v8072_v44  ;;  %v11079_v29 = vld [vmem:[#allocation79_spill] sm:$0xff] }
 0x2b3   : > { %11072 = vst [vmem:[#allocation213_spill] sm:$0xff] %v8628_v13  ;;  %3817 = vperm.xlu0 %5654, %v8625_v41   ;;  %v11075_v13 = vld [vmem:[#allocation86_spill] sm:$0xff]  ;;  %11077 = vst [vmem:[#allocation214_spill] sm:$0xff] %v8649_v62  ;;  %v8658_v24 = vmul.f32 0.0051020407, %v11079_v29  ;;  %v8661_v12 = vmul.f32 %v5831_v18, %v2847_v15  ;;  %v5835_v17 = vpop.eup %5834  ;;  %5844 = vrsqrt.f32 %v2622_v30  ;;  %v2505_v57 = vmax.f32 %v2384_v20, 0.0 }
 0x2b4   : > { %v8644_v6 = vmul.f32 0.0051020407, %v11075_v13  ;;  %v2256_v13 = vmul.f32 %v8634_v25, %v8634_v25  ;;  %v2624_v41 = vadd.f32 1e-05, %v2503_v10  ;;  %v2386_v33 = vsub.f32 %v2144_v47, %v2265_v58  ;;  %v2860_v58 = vld [vmem:[%s7591_s22 + $0x2f8] sm:$0xff] }
 0x2b5   : > { %3772 = vperm.xlu1 %5655, %v8637_v56   ;;  %v8647_v55 = vpop.permute.xlu1 %3452  ;;  %11080 = vst [vmem:[#allocation79_spill] sm:$0xff] %v8658_v24  ;;  %v2146_v44 = vmul.f32 0.0051020407, %v8222_v38  ;;  %v2615_v29 = vadd.f32 1e-05, %v2494_v2  ;;  %v8673_v18 = vmul.f32 %v5833_v54, %v2858_v34  ;;  %v5837_v30 = vpop.eup %5836  ;;  %5846 = vrsqrt.f32 %v2613_v1  ;;  %v11085_v2 = vld [vmem:[#allocation81_spill] sm:$0xff] }
 0x2b6   : > { %11076 = vst [vmem:[#allocation86_spill] sm:$0xff] %v8644_v6  ;;  %v8652_v59 = vpop.permute.xlu0 %3507  ;;  %v2267_v32 = vmul.f32 %v8644_v6, %v8644_v6  ;;  %v2496_v20 = vmax.f32 %v2375_v51, 0.0  ;;  %v2377_v47 = vsub.f32 %v2135_v45, %v2256_v13  ;;  %v2137_v38 = vmul.f32 0.0051020407, %v8096_v8  ;;  %v2851_v13 = vld [vmem:[%s7591_s22 + $0x2b0] sm:$0xff] }
 0x2b7   : > { %11078 = vst [vmem:[#allocation215_spill] sm:$0xff] %v8652_v59  ;;  %3827 = vperm.xlu0 %5654, %v8649_v62   ;;  %v11081_v59 = vld [vmem:[#allocation88_spill] sm:$0xff]  ;;  %11083 = vst [vmem:[#allocation216_spill] sm:$0xff] %v8673_v18  ;;  %v8682_v6 = vmul.f32 0.0051020407, %v11085_v2  ;;  %5848 = vrsqrt.f32 %v2624_v41  ;;  %v8685_v54 = vmul.f32 %v5835_v17, %v2849_v0  ;;  %v5839_v1 = vpop.eup %5838  ;;  %v2507_v51 = vmax.f32 %v2386_v33, 0.0 }
 0x2b8   : > { %v8668_v25 = vmul.f32 0.0051020407, %v11081_v59  ;;  %v2258_v59 = vmul.f32 %v8658_v24, %v8658_v24  ;;  %v2626_v34 = vadd.f32 1e-05, %v2505_v57  ;;  %v2388_v45 = vsub.f32 %v2146_v44, %v2267_v32  ;;  %v11087_v62 = vld [vmem:[#allocation90_spill] sm:$0xff]  ;;  %v2862_v2 = vld [vmem:[%s7591_s22 + $0x308] sm:$0xff] }
 0x2b9   : > { %3782 = vperm.xlu1 %5655, %v8661_v12   ;;  %v8671_v10 = vpop.permute.xlu1 %3462  ;;  %11086 = vst [vmem:[#allocation81_spill] sm:$0xff] %v8682_v6  ;;  %v2148_v8 = vmul.f32 0.0051020407, %v8246_v31  ;;  %v8692_v24 = vmul.f32 0.0051020407, %v11087_v62  ;;  %5850 = vrsqrt.f32 %v2615_v29  ;;  %v8697_v17 = vmul.f32 %v5837_v30, %v2860_v58  ;;  %v11091_v29 = vld [vmem:[#allocation83_spill] sm:$0xff] }
 0x2ba   : > { %11082 = vst [vmem:[#allocation88_spill] sm:$0xff] %v8668_v25  ;;  %v8676_v15 = vpop.permute.xlu0 %3517  ;;  %v5841_v57 = vpop.eup %5840  ;;  %v2617_v33 = vadd.f32 1e-05, %v2496_v20  ;;  %v2498_v44 = vmax.f32 %v2377_v47, 0.0  ;;  %v2379_v0 = vsub.f32 %v2137_v38, %v2258_v59  ;;  %v2139_v31 = vmul.f32 0.0051020407, %v8121_v11 }
 0x2bb   : > { %11084 = vst [vmem:[#allocation217_spill] sm:$0xff] %v8676_v15  ;;  %3837 = vperm.xlu0 %5654, %v8673_v18   ;;  %v2269_v15 = vmul.f32 %v8668_v25, %v8668_v25  ;;  %11088 = vst [vmem:[#allocation90_spill] sm:$0xff] %v8692_v24  ;;  %v2260_v62 = vmul.f32 %v8682_v6, %v8682_v6  ;;  %v8706_v25 = vmul.f32 0.0051020407, %v11091_v29  ;;  %v2150_v18 = vmul.f32 0.0051020407, %v8270_v27 }
 0x2bc   : > { %11089 = vst [vmem:[#allocation218_spill] sm:$0xff] %v8697_v17  ;;  %v8710_v30 = vmul.f32 %v5839_v1, %v2851_v13  ;;  %v5843_v20 = vpop.eup %5842  ;;  %5852 = vrsqrt.f32 %v2626_v34  ;;  %v2628_v47 = vadd.f32 1e-05, %v2507_v51  ;;  %v2509_v11 = vmax.f32 %v2388_v45, 0.0  ;;  %v2853_v58 = vld [vmem:[%s7591_s22 + $0x2c0] sm:$0xff]  ;;  %v2864_v13 = vld [vmem:[%s7591_s22 + $0x318] sm:$0xff] }
 0x2bd   : > { %3792 = vperm.xlu1 %5655, %v8685_v54   ;;  %v8695_v41 = vpop.permute.xlu1 %3472  ;;  %11092 = vst [vmem:[#allocation83_spill] sm:$0xff] %v8706_v25  ;;  %v2390_v38 = vsub.f32 %v2148_v8, %v2269_v15  ;;  %v2271_v59 = vmul.f32 %v8692_v24, %v8692_v24  ;;  %v2141_v29 = vmul.f32 0.0051020407, %v8144_v4  ;;  %v8722_v1 = vmul.f32 %v5841_v57, %v2862_v2  ;;  %v5845_v34 = vpop.eup %5844  ;;  %v11097_v24 = vld [vmem:[#allocation85_spill] sm:$0xff] }
 0x2be   : > { %v8700_v32 = vpop.permute.xlu0 %3527  ;;  %5854 = vrsqrt.f32 %v2617_v33  ;;  %v2619_v51 = vadd.f32 1e-05, %v2498_v44  ;;  %v2500_v15 = vmax.f32 %v2379_v0, 0.0  ;;  %v2381_v45 = vsub.f32 %v2139_v31, %v2260_v62  ;;  %v2855_v31 = vld [vmem:[%s7591_s22 + $0x2d0] sm:$0xff] }
 0x2bf   : > { %11090 = vst [vmem:[#allocation219_spill] sm:$0xff] %v8700_v32  ;;  %3847 = vperm.xlu0 %5654, %v8697_v17   ;;  %v11093_v32 = vld [vmem:[#allocation92_spill] sm:$0xff]  ;;  %11095 = vst [vmem:[#allocation220_spill] sm:$0xff] %v8722_v1  ;;  %v8730_v4 = vmul.f32 0.0051020407, %v11097_v24  ;;  %v2392_v17 = vsub.f32 %v2150_v18, %v2271_v59  ;;  %v8733_v57 = vmul.f32 %v5843_v20, %v2853_v58  ;;  %v5847_v2 = vpop.eup %5846  ;;  %5856 = vrsqrt.f32 %v2628_v47  ;;  %v2866_v59 = vld [vmem:[%s7591_s22 + $0x328] sm:$0xff] }
 0x2c0   : > { %v8716_v6 = vmul.f32 0.0051020407, %v11093_v32  ;;  %v2262_v32 = vmul.f32 %v8706_v25, %v8706_v25  ;;  %v2630_v33 = vadd.f32 1e-05, %v2509_v11  ;;  %v2511_v44 = vmax.f32 %v2390_v38, 0.0  ;;  %v11099_v25 = vld [vmem:[#allocation94_spill] sm:$0xff] }
 0x2c1   : > { %3802 = vperm.xlu1 %5655, %v8710_v30   ;;  %v8720_v27 = vpop.permute.xlu1 %3482  ;;  %11098 = vst [vmem:[#allocation85_spill] sm:$0xff] %v8730_v4  ;;  %v2152_v0 = vmul.f32 0.0051020407, %v8294_v19  ;;  %v5849_v62 = vpop.eup %5848  ;;  %v8740_v24 = vmul.f32 0.0051020407, %v11099_v25  ;;  %v8745_v58 = vmul.f32 %v5845_v34, %v2864_v13  ;;  %5858 = vrsqrt.f32 %v2619_v51 }
 0x2c2   : > { %11094 = vst [vmem:[#allocation92_spill] sm:$0xff] %v8716_v6  ;;  %v8724_v8 = vpop.permute.xlu0 %3537  ;;  %v2383_v18 = vsub.f32 %v2141_v29, %v2262_v32  ;;  %v2621_v47 = vadd.f32 1e-05, %v2500_v15  ;;  %v2502_v11 = vmax.f32 %v2381_v45, 0.0  ;;  %v2143_v19 = vmul.f32 0.0051020407, %v8168_v23 }
 0x2c3   : > { %11096 = vst [vmem:[#allocation221_spill] sm:$0xff] %v8724_v8  ;;  %3857 = vperm.xlu0 %5654, %v8722_v1   ;;  %v2273_v8 = vmul.f32 %v8716_v6, %v8716_v6  ;;  %11100 = vst [vmem:[#allocation94_spill] sm:$0xff] %v8740_v24  ;;  %v5851_v6 = vpop.eup %5850  ;;  %v2264_v25 = vmul.f32 %v8730_v4, %v8730_v4  ;;  %v11103_v29 = vld [vmem:[#allocation87_spill] sm:$0xff]  ;;  %v2513_v1 = vmax.f32 %v2392_v17, 0.0  ;;  %5860 = vrsqrt.f32 %v2630_v33  ;;  %v2857_v45 = vld [vmem:[%s7591_s22 + $0x2e0] sm:$0xff] }
 0x2c4   : > { %11101 = vst [vmem:[#allocation222_spill] sm:$0xff] %v8745_v58  ;;  %v8754_v32 = vmul.f32 0.0051020407, %v11103_v29  ;;  %v8757_v34 = vmul.f32 %v5847_v2, %v2855_v31  ;;  %v2632_v51 = vadd.f32 1e-05, %v2511_v44  ;;  %v2275_v13 = vmul.f32 %v8740_v24, %v8740_v24  ;;  %v2868_v31 = vld [vmem:[%s7591_s22 + $0x338] sm:$0xff] }
 0x2c5   : > { %3812 = vperm.xlu1 %5655, %v8733_v57   ;;  %v8743_v20 = vpop.permute.xlu1 %3492  ;;  %v2394_v15 = vsub.f32 %v2152_v0, %v2273_v8  ;;  %v2154_v23 = vmul.f32 0.0051020407, %v8318_v14  ;;  %v2504_v29 = vmax.f32 %v2383_v18, 0.0  ;;  %v8769_v2 = vmul.f32 %v5849_v62, %v2866_v59  ;;  %v11109_v18 = vld [vmem:[#allocation89_spill] sm:$0xff]  ;;  %v2859_v59 = vld [vmem:[%s7591_s22 + $0x2f0] sm:$0xff] }
 0x2c6   : > { %v8748_v38 = vpop.permute.xlu0 %3547  ;;  %11104 = vst [vmem:[#allocation87_spill] sm:$0xff] %v8754_v32  ;;  %v5853_v33 = vpop.eup %5852  ;;  %5862 = vrsqrt.f32 %v2621_v47  ;;  %v2623_v8 = vadd.f32 1e-05, %v2502_v11  ;;  %v2385_v44 = vsub.f32 %v2143_v19, %v2264_v25  ;;  %v2145_v14 = vmul.f32 0.0051020407, %v8192_v46 }
 0x2c7   : > { %11102 = vst [vmem:[#allocation223_spill] sm:$0xff] %v8748_v38  ;;  %3867 = vperm.xlu0 %5654, %v8745_v58   ;;  %v11105_v38 = vld [vmem:[#allocation96_spill] sm:$0xff]  ;;  %11107 = vst [vmem:[#allocation224_spill] sm:$0xff] %v8769_v2  ;;  %v8778_v24 = vmul.f32 0.0051020407, %v11109_v18  ;;  %v8781_v62 = vmul.f32 %v5851_v6, %v2857_v45  ;;  %5864 = vrsqrt.f32 %v2632_v51  ;;  %v2515_v11 = vmax.f32 %v2394_v15, 0.0 }
 0x2c8   : > { %v8764_v4 = vmul.f32 0.0051020407, %v11105_v38  ;;  %v2266_v38 = vmul.f32 %v8754_v32, %v8754_v32  ;;  %v2634_v58 = vadd.f32 1e-05, %v2513_v1  ;;  %v5855_v47 = vpop.eup %5854  ;;  %v2396_v19 = vsub.f32 %v2154_v23, %v2275_v13  ;;  %v2870_v13 = vld [vmem:[%s7591_s22 + $0x348] sm:$0xff] }
 0x2c9   : > { %3822 = vperm.xlu1 %5655, %v8757_v34   ;;  %v8767_v17 = vpop.permute.xlu1 %3502  ;;  %v2156_v46 = vmul.f32 0.0051020407, %v8352_v36  ;;  %v2625_v18 = vadd.f32 1e-05, %v2504_v29  ;;  %v8793_v6 = vmul.f32 %v5853_v33, %v2868_v31  ;;  %v5857_v51 = vpop.eup %5856  ;;  %5866 = vrsqrt.f32 %v2623_v8  ;;  %v11114_v29 = vld [vmem:[#allocation91_spill] sm:$0xff] }
 0x2ca   : > { %11106 = vst [vmem:[#allocation96_spill] sm:$0xff] %v8764_v4  ;;  %v8772_v0 = vpop.permute.xlu0 %3557  ;;  %v2277_v25 = vmul.f32 %v8764_v4, %v8764_v4  ;;  %v2506_v15 = vmax.f32 %v2385_v44, 0.0  ;;  %v2387_v23 = vsub.f32 %v2145_v14, %v2266_v38  ;;  %v2147_v36 = vmul.f32 0.0051020407, %v8216_v60  ;;  %v2861_v38 = vld [vmem:[%s7591_s22 + $0x300] sm:$0xff] }
 0x2cb   : > { %11108 = vst [vmem:[#allocation225_spill] sm:$0xff] %v8772_v0  ;;  %3877 = vperm.xlu0 %5654, %v8769_v2   ;;  %v11110_v0 = vld [vmem:[#allocation98_spill] sm:$0xff]  ;;  %v8802_v4 = vmul.f32 0.0051020407, %v11114_v29  ;;  %5868 = vrsqrt.f32 %v2634_v58  ;;  %v8805_v33 = vmul.f32 %v5855_v47, %v2859_v59  ;;  %v5859_v8 = vpop.eup %5858  ;;  %v2636_v31 = vadd.f32 1e-05, %v2515_v11 }
 0x2cc   : > { %v8788_v32 = vmul.f32 0.0051020407, %v11110_v0  ;;  %11112 = vst [vmem:[#allocation98_spill] sm:$0xff] %v8793_v6  ;;  %v2268_v0 = vmul.f32 %v8778_v24, %v8778_v24  ;;  %v2517_v44 = vmax.f32 %v2396_v19, 0.0  ;;  %v2398_v14 = vsub.f32 %v2156_v46, %v2277_v25 }
 0x2cd   : > { %3832 = vperm.xlu1 %5655, %v8781_v62   ;;  %v8791_v1 = vpop.permute.xlu1 %3512  ;;  %11115 = vst [vmem:[#allocation91_spill] sm:$0xff] %v8802_v4  ;;  %v2158_v60 = vmul.f32 0.0051020407, %v8388_v61  ;;  %5870 = vrsqrt.f32 %v2625_v18  ;;  %v8814_v58 = vmul.f32 %v5857_v51, %v2870_v13  ;;  %v5861_v47 = vpop.eup %5860  ;;  %v2627_v59 = vadd.f32 1e-05, %v2506_v15  ;;  %v2872_v61 = vld [vmem:[%s7591_s22 + $0x358] sm:$0xff] }
 0x2ce   : > { %11111 = vst [vmem:[#allocation89_spill] sm:$0xff] %v8788_v32  ;;  %v8796_v45 = vpop.permute.xlu0 %3567  ;;  %v2508_v11 = vmax.f32 %v2387_v23, 0.0  ;;  %v2149_v19 = vmul.f32 0.0051020407, %v8241_v50  ;;  %v2270_v25 = vmul.f32 %v8802_v4, %v8802_v4  ;;  %v11118_v18 = vld [vmem:[#allocation93_spill] sm:$0xff]  ;;  %v8826_v51 = vmul.f32 %v5859_v8, %v2861_v38  ;;  %v2863_v50 = vld [vmem:[%s7591_s22 + $0x310] sm:$0xff] }
 0x2cf   : > { %11113 = vst [vmem:[#allocation226_spill] sm:$0xff] %v8796_v45  ;;  %3887 = vperm.xlu0 %5654, %v8793_v6   ;;  %v2279_v45 = vmul.f32 %v8788_v32, %v8788_v32  ;;  %11116 = vst [vmem:[#allocation227_spill] sm:$0xff] %v8814_v58  ;;  %v2389_v6 = vsub.f32 %v2147_v36, %v2268_v0  ;;  %v8823_v32 = vmul.f32 0.0051020407, %v11118_v18  ;;  %5872 = vrsqrt.f32 %v2636_v31  ;;  %v2874_v31 = vld [vmem:[%s7591_s22 + $0x368] sm:$0xff] }
 0x2d0   : > { %v5863_v13 = vpop.eup %5862  ;;  %v2638_v15 = vadd.f32 1e-05, %v2517_v44  ;;  %v2519_v23 = vmax.f32 %v2398_v14, 0.0  ;;  %v2151_v0 = vmul.f32 0.0051020407, %v8264_v52  ;;  %v8833_v2 = vmul.f32 %v5861_v47, %v2872_v61  ;;  %v11122_v14 = vld [vmem:[#allocation95_spill] sm:$0xff] }
 0x2d1   : > { %3842 = vperm.xlu1 %5655, %v8805_v33   ;;  %v8812_v29 = vpop.permute.xlu1 %3522  ;;  %11119 = vst [vmem:[#allocation93_spill] sm:$0xff] %v8823_v32  ;;  %v2400_v36 = vsub.f32 %v2158_v60, %v2279_v45  ;;  %v5865_v18 = vpop.eup %5864  ;;  %5874 = vrsqrt.f32 %v2627_v59  ;;  %v2629_v8 = vadd.f32 1e-05, %v2508_v11  ;;  %v2510_v38 = vmax.f32 %v2389_v6, 0.0  ;;  %v2865_v6 = vld [vmem:[%s7591_s22 + $0x320] sm:$0xff] }
 0x2d2   : > { %v8817_v46 = vpop.permute.xlu0 %3577  ;;  %11120 = vst [vmem:[#allocation229_spill] sm:$0xff] %v8833_v2  ;;  %v2272_v45 = vmul.f32 %v8823_v32, %v8823_v32  ;;  %v8841_v52 = vmul.f32 %v5863_v13, %v2863_v50  ;;  %v8844_v60 = vmul.f32 0.0051020407, %v11122_v14  ;;  %5876 = vrsqrt.f32 %v2638_v15  ;;  %v2876_v15 = vld [vmem:[%s7591_s22 + $0x378] sm:$0xff]  ;;  %v2877_v32 = vld [vmem:[%s7591_s22 + $0x380] sm:$0xff] }
 0x2d3   : > { %11117 = vst [vmem:[#allocation228_spill] sm:$0xff] %v8817_v46  ;;  %3897 = vperm.xlu0 %5654, %v8814_v58   ;;  %v2391_v58 = vsub.f32 %v2149_v19, %v2270_v25  ;;  %v5867_v44 = vpop.eup %5866  ;;  %v2640_v47 = vadd.f32 1e-05, %v2519_v23  ;;  %v2521_v59 = vmax.f32 %v2400_v36, 0.0  ;;  %v8850_v25 = vmul.f32 %v5865_v18, %v2874_v31 }
 0x2d4   : > { %11123 = vst [vmem:[#allocation95_spill] sm:$0xff] %v8844_v60  ;;  %v2393_v19 = vsub.f32 %v2151_v0, %v2272_v45  ;;  %5878 = vrsqrt.f32 %v2629_v8  ;;  %v2631_v13 = vadd.f32 1e-05, %v2510_v38  ;;  %v8857_v36 = vmul.f32 %v5867_v44, %v2865_v6  ;;  %v11126_v45 = vld [vmem:[#allocation97_spill] sm:$0xff] }
 0x2d5   : > { %3852 = vperm.xlu1 %5655, %v8826_v51   ;;  %v8831_v46 = vpop.permute.xlu1 %3532  ;;  %v5869_v11 = vpop.eup %5868  ;;  %11124 = vst [vmem:[#allocation231_spill] sm:$0xff] %v8850_v25  ;;  %v2512_v50 = vmax.f32 %v2391_v58, 0.0  ;;  %v2274_v0 = vmul.f32 %v8844_v60, %v8844_v60  ;;  %v8862_v18 = vmul.f32 0.0051020407, %v11126_v45  ;;  %5880 = vrsqrt.f32 %v2640_v47  ;;  %v2867_v58 = vld [vmem:[%s7591_s22 + $0x330] sm:$0xff]  ;;  %v2878_v45 = vld [vmem:[%s7591_s22 + $0x388] sm:$0xff] }
 0x2d6   : > { %v8835_v4 = vpop.permute.xlu0 %3587  ;;  %v2642_v8 = vadd.f32 1e-05, %v2521_v59  ;;  %v2514_v38 = vmax.f32 %v2393_v19, 0.0  ;;  %v8868_v31 = vmul.f32 %v5869_v11, %v2876_v15  ;;  %5882 = vrsqrt.f32 %v2631_v13  ;;  %v11130_v11 = vld [vmem:[#allocation99_spill] sm:$0xff]  ;;  %v2869_v13 = vld [vmem:[%s7591_s22 + $0x340] sm:$0xff] }
 0x2d7   : > { %11121 = vst [vmem:[#allocation230_spill] sm:$0xff] %v8835_v4  ;;  %3907 = vperm.xlu0 %5654, %v8833_v2   ;;  %v2153_v4 = vmul.f32 0.0051020407, %v8288_v48  ;;  %v5871_v23 = vpop.eup %5870  ;;  %11127 = vst [vmem:[#allocation97_spill] sm:$0xff] %v8862_v18  ;;  %v2633_v6 = vadd.f32 1e-05, %v2512_v50  ;;  %v2276_v19 = vmul.f32 %v8862_v18, %v8862_v18 }
 0x2d8   : > { %11128 = vst [vmem:[#allocation233_spill] sm:$0xff] %v8868_v31  ;;  %v8875_v47 = vmul.f32 %v5871_v23, %v2867_v58  ;;  %v8880_v15 = vmul.f32 0.0051020407, %v11130_v11  ;;  %5884 = vrsqrt.f32 %v2642_v8  ;;  %v2880_v11 = vld [vmem:[%s7591_s22 + $0x398] sm:$0xff] }
 0x2d9   : > { %3862 = vperm.xlu1 %5655, %v8841_v52   ;;  %v8848_v61 = vpop.permute.xlu1 %3542  ;;  %v5873_v44 = vpop.eup %5872  ;;  %5886 = vrsqrt.f32 %v2633_v6  ;;  %v2871_v6 = vld [vmem:[%s7591_s22 + $0x350] sm:$0xff] }
 0x2da   : > { %v8853_v14 = vpop.permute.xlu0 %3597  ;;  %11131 = vst [vmem:[#allocation99_spill] sm:$0xff] %v8880_v15  ;;  %v8886_v50 = vmul.f32 %v5873_v44, %v2878_v45  ;;  %v2278_v18 = vmul.f32 %v8880_v15, %v8880_v15  ;;  %v11134_v44 = vld [vmem:[#allocation100_spill] sm:$0xff] }
 0x2db   : > { %11125 = vst [vmem:[#allocation232_spill] sm:$0xff] %v8853_v14  ;;  %3917 = vperm.xlu0 %5654, %v8850_v25   ;;  %v2395_v14 = vsub.f32 %v2153_v4, %v2274_v0  ;;  %v2155_v25 = vmul.f32 0.0051020407, %v8312_v42  ;;  %v5875_v59 = vpop.eup %5874  ;;  %v2635_v4 = vadd.f32 1e-05, %v2514_v38 }
 0x2dc   : > { %11132 = vst [vmem:[#allocation235_spill] sm:$0xff] %v8886_v50  ;;  %v5877_v23 = vpop.eup %5876  ;;  %v8893_v8 = vmul.f32 %v5875_v59, %v2869_v13  ;;  %v8898_v45 = vmul.f32 0.0051020407, %v11134_v44  ;;  %v2882_v44 = vld [vmem:[%s7591_s22 + $0x3a8] sm:$0xff] }
 0x2dd   : > { %3872 = vperm.xlu1 %5655, %v8857_v36   ;;  %v8866_v48 = vpop.permute.xlu1 %3552  ;;  %v2516_v0 = vmax.f32 %v2395_v14, 0.0  ;;  %v2397_v58 = vsub.f32 %v2155_v25, %v2276_v19  ;;  %5888 = vrsqrt.f32 %v2635_v4  ;;  %v8904_v25 = vmul.f32 %v5877_v23, %v2880_v11  ;;  %v2873_v11 = vld [vmem:[%s7591_s22 + $0x360] sm:$0xff] }
 0x2de   : > { %v8871_v2 = vpop.permute.xlu0 %3607  ;;  %v5879_v38 = vpop.eup %5878  ;;  %11135 = vst [vmem:[#allocation100_spill] sm:$0xff] %v8898_v45  ;;  %v2280_v23 = vmul.f32 %v8898_v45, %v8898_v45 }
 0x2df   : > { %11129 = vst [vmem:[#allocation234_spill] sm:$0xff] %v8871_v2  ;;  %3927 = vperm.xlu0 %5654, %v8868_v31   ;;  %v2157_v2 = vmul.f32 0.0051020407, %v8336_v53  ;;  %11136 = vst [vmem:[#allocation237_spill] sm:$0xff] %v8904_v25  ;;  %v5881_v14 = vpop.eup %5880  ;;  %v2637_v19 = vadd.f32 1e-05, %v2516_v0  ;;  %v8911_v15 = vmul.f32 %v5879_v38, %v2871_v6 }
 0x2e0   : > { %v2518_v59 = vmax.f32 %v2397_v58, 0.0  ;;  %v5883_v4 = vpop.eup %5882  ;;  %v2884_v6 = vld [vmem:[%s7591_s22 + $0x3b8] sm:$0xff] }
 0x2e1   : > { %3882 = vperm.xlu1 %5655, %v8875_v47   ;;  %v8884_v42 = vpop.permute.xlu1 %3562  ;;  %v2399_v13 = vsub.f32 %v2157_v2, %v2278_v18  ;;  %5890 = vrsqrt.f32 %v2637_v19  ;;  %v2875_v19 = vld [vmem:[%s7591_s22 + $0x370] sm:$0xff] }
 0x2e2   : > { %v8889_v31 = vpop.permute.xlu0 %3617  ;;  %v5885_v18 = vpop.eup %5884  ;;  %v2639_v0 = vadd.f32 1e-05, %v2518_v59 }
 0x2e3   : > { %11133 = vst [vmem:[#allocation236_spill] sm:$0xff] %v8889_v31  ;;  %3937 = vperm.xlu0 %5654, %v8886_v50   ;;  %v2159_v31 = vmul.f32 0.0051020407, %v8361_v7  ;;  %v8919_v7 = vmul.f32 %v5881_v14, %v2882_v44  ;;  %v2520_v58 = vmax.f32 %v2399_v13, 0.0  ;;  %v5887_v14 = vpop.eup %5886  ;;  %v8938_v59 = vmul.f32 %v5885_v18, %v2884_v6  ;;  %v11142_v13 = vld [vmem:[#allocation125_spill] sm:$0xff] }
 0x2e4   : > { %v11143_v44 = vld [vmem:[#allocation145_spill] sm:$0xff]  ;;  %5892 = vrsqrt.f32 %v2639_v0  ;;  %v8946_v60 = vmul.f32 %v5887_v14, %v2875_v19  ;;  %v11148_v0 = vld [vmem:[#allocation143_spill] sm:$0xff]  ;;  %v2879_v19 = vld [vmem:[%s7591_s22 + $0x390] sm:$0xff] }
 0x2e5   : > { %3892 = vperm.xlu1 %5655, %v8893_v8   ;;  %v8902_v53 = vpop.permute.xlu1 %3572  ;;  %11138 = vst [vmem:[#allocation239_spill] sm:$0xff] %v8919_v7  ;;  %11141 = vst [vmem:[#allocation242_spill] sm:$0xff] %v8938_v59 }
 0x2e6   : > { %v8907_v50 = vpop.permute.xlu0 %3627  ;;  %11145 = vst [vmem:[#allocation145_spill] sm:$0xff] %v8946_v60 }
 0x2e7   : > { %11137 = vst [vmem:[#allocation238_spill] sm:$0xff] %v8907_v50  ;;  %3947 = vperm.xlu0 %5654, %v8904_v25   ;;  %v2401_v50 = vsub.f32 %v2159_v31, %v2280_v23  ;;  %v8925_v25 = vmul.f32 %v5883_v4, %v2873_v11  ;;  %v3128_v4 = vmul.f32 %v11143_v44, %v11142_v13  ;;  %v2641_v23 = vadd.f32 1e-05, %v2520_v58  ;;  %v5889_v45 = vpop.eup %5888  ;;  %v11147_v13 = vld [vmem:[#allocation124_spill] sm:$0xff] }
 0x2e8   : > { %v3130_v58 = vmul.f32 %v11148_v0, %v11147_v13 }
 0x2e9   : > { %3902 = vperm.xlu1 %5655, %v8911_v15   ;;  %v8917_v2 = vpop.permute.xlu1 %3582  ;;  %v2522_v11 = vmax.f32 %v2401_v50, 0.0  ;;  %5894 = vrsqrt.f32 %v2641_v23 }
 0x2ea   : > { %v8921_v38 = vpop.permute.xlu0 %3637 }
 0x2eb   : > { %11139 = vst [vmem:[#allocation240_spill] sm:$0xff] %v8921_v38  ;;  %3957 = vperm.xlu0 %5654, %v8919_v7   ;;  %v2886_v7 = vld [vmem:[%s8932_s25] sm:$0xff]  ;;  %v2643_v50 = vadd.f32 1e-05, %v2522_v11  ;;  %v5891_v14 = vpop.eup %5890 }
 0x2ec   : > { %v3249_v6 = vsub.f32 %v2886_v7, %v3128_v4  ;;  %v11152_v4 = vld [vmem:[#allocation129_spill] sm:$0xff]  ;;  %v2890_v11 = vld [vmem:[%s8932_s25 + $0x20] sm:$0xff] }
 0x2ed   : > { %3912 = vperm.xlu1 %5655, %v8925_v25   ;;  %v8936_v31 = vpop.permute.xlu1 %3592  ;;  %5896 = vrsqrt.f32 %v2643_v50  ;;  %v2892_v50 = vld [vmem:[%s8932_s25 + $0x30] sm:$0xff] }
 0x2ee   : > { %11140 = vst [vmem:[#allocation241_spill] sm:$0xff] %v8936_v31  ;;  %v8942_v38 = vpop.permute.xlu0 %3647  ;;  %v11153_v31 = vld [vmem:[#allocation151_spill] sm:$0xff] }
 0x2ef   : > { %11144 = vst [vmem:[#allocation125_spill] sm:$0xff] %v8942_v38  ;;  %3967 = vperm.xlu0 %5654, %v8938_v59   ;;  %v2888_v38 = vld [vmem:[%s8932_s25 + $0x10] sm:$0xff]  ;;  %v8957_v59 = vmul.f32 %v5889_v45, %v2877_v32  ;;  %v3132_v13 = vmul.f32 %v11153_v31, %v11152_v4  ;;  %v5893_v32 = vpop.eup %5892  ;;  %v2881_v45 = vld [vmem:[%s7591_s22 + $0x3a0] sm:$0xff] }
 0x2f0   : > { %v3251_v7 = vsub.f32 %v2888_v38, %v3130_v58  ;;  %v11157_v38 = vld [vmem:[#allocation133_spill] sm:$0xff]  ;;  %v11158_v58 = vld [vmem:[#allocation3_spill] sm:$0xff]  ;;  %v8979_v4 = vmul.f32 %v5893_v32, %v2881_v45  ;;  %v2885_v32 = vld [vmem:[%s7591_s22 + $0x3c0] sm:$0xff] }
 0x2f1   : > { %3922 = vperm.xlu1 %5655, %v8946_v60   ;;  %v8950_v18 = vpop.permute.xlu1 %3602  ;;  %11150 = vst [vmem:[#allocation143_spill] sm:$0xff] %v8957_v59  ;;  %v2891_v60 = vld [vmem:[%s8932_s25 + $0x28] sm:$0xff] }
 0x2f2   : > { %11146 = vst [vmem:[#allocation243_spill] sm:$0xff] %v8950_v18  ;;  %v8954_v44 = vpop.permute.xlu0 %3657  ;;  %11160 = vst [vmem:[#allocation3_spill] sm:$0xff] %v8979_v4 }
 0x2f3   : > { %11149 = vst [vmem:[#allocation124_spill] sm:$0xff] %v8954_v44  ;;  %4219 = vperm.xlu0 %5654, %v3249_v6   ;;  %v8968_v6 = vmul.f32 %v5891_v14, %v2879_v19  ;;  %v3253_v44 = vsub.f32 %v2890_v11, %v3132_v13  ;;  %v5895_v14 = vpop.eup %5894  ;;  %v2883_v19 = vld [vmem:[%s7591_s22 + $0x3b0] sm:$0xff]  ;;  %v11163_v13 = vld [vmem:[#allocation5_spill] sm:$0xff] }
 0x2f5   : > { %3932 = vperm.xlu1 %5655, %v8957_v59   ;;  %v8961_v18 = vpop.permute.xlu1 %3612  ;;  %11155 = vst [vmem:[#allocation151_spill] sm:$0xff] %v8968_v6 }
 0x2f6   : > { %11151 = vst [vmem:[#allocation244_spill] sm:$0xff] %v8961_v18  ;;  %v8965_v23 = vpop.permute.xlu0 %3667  ;;  %v3134_v18 = vmul.f32 %v11158_v58, %v11157_v38  ;;  %v2894_v58 = vld [vmem:[%s8932_s25 + $0x40] sm:$0xff] }
 0x2f7   : > { %11154 = vst [vmem:[#allocation129_spill] sm:$0xff] %v8965_v23  ;;  %4229 = vperm.xlu0 %5654, %v3251_v7  }
 0x2f8   : > { %v3255_v23 = vsub.f32 %v2892_v50, %v3134_v18  ;;  %v11168_v18 = vld [vmem:[#allocation7_spill] sm:$0xff] }
 0x2f9   : > { %3942 = vperm.xlu1 %5655, %v8968_v6   ;;  %v8972_v0 = vpop.permute.xlu1 %3622  ;;  %v2887_v6 = vld [vmem:[%s8932_s25 + $0x8] sm:$0xff] }
 0x2fa   : > { %11156 = vst [vmem:[#allocation245_spill] sm:$0xff] %v8972_v0  ;;  %v8976_v31 = vpop.permute.xlu0 %3677  ;;  %v11162_v0 = vld [vmem:[#allocation137_spill] sm:$0xff] }
 0x2fb   : > { %11159 = vst [vmem:[#allocation133_spill] sm:$0xff] %v8976_v31  ;;  %4239 = vperm.xlu0 %5654, %v3253_v44   ;;  %v3136_v11 = vmul.f32 %v11163_v13, %v11162_v0  ;;  %v8990_v31 = vmul.f32 %v5895_v14, %v2883_v19  ;;  %v5897_v44 = vpop.eup %5896  ;;  %v2896_v13 = vld [vmem:[%s8932_s25 + $0x50] sm:$0xff] }
 0x2fc   : > { %v11172_v14 = vld [vmem:[#allocation140_spill] sm:$0xff] }
 0x2fd   : > { %3952 = vperm.xlu1 %5655, %v8979_v4   ;;  %v8983_v7 = vpop.permute.xlu1 %3632  ;;  %11165 = vst [vmem:[#allocation5_spill] sm:$0xff] %v8990_v31  ;;  %v3257_v4 = vsub.f32 %v2894_v58, %v3136_v11  ;;  %v11174_v58 = vld [vmem:[#allocation142_spill] sm:$0xff] }
 0x2fe   : > { %11161 = vst [vmem:[#allocation246_spill] sm:$0xff] %v8983_v7  ;;  %v8987_v38 = vpop.permute.xlu0 %3687  ;;  %v11167_v7 = vld [vmem:[#allocation139_spill] sm:$0xff] }
 0x2ff   : > { %11164 = vst [vmem:[#allocation137_spill] sm:$0xff] %v8987_v38  ;;  %4249 = vperm.xlu0 %5654, %v3255_v23   ;;  %v3138_v50 = vmul.f32 %v11168_v18, %v11167_v7  ;;  %v9001_v38 = vmul.f32 %v5897_v44, %v2885_v32  ;;  %v11171_v23 = vld [vmem:[#allocation121_spill] sm:$0xff]  ;;  %v11177_v44 = vld [vmem:[#allocation127_spill] sm:$0xff] }
 0x300   : > { %v3129_v19 = vmul.f32 %v11172_v14, %v11171_v23  ;;  %v11178_v32 = vld [vmem:[#allocation147_spill] sm:$0xff]  ;;  %v2889_v23 = vld [vmem:[%s8932_s25 + $0x18] sm:$0xff] }
 0x301   : > { %3962 = vperm.xlu1 %5655, %v8990_v31   ;;  %v8994_v45 = vpop.permute.xlu1 %3642  ;;  %11170 = vst [vmem:[#allocation7_spill] sm:$0xff] %v9001_v38  ;;  %v3259_v11 = vsub.f32 %v2896_v13, %v3138_v50  ;;  %v3131_v59 = vmul.f32 %v11178_v32, %v11177_v44  ;;  %v11181_v50 = vld [vmem:[#allocation11_spill] sm:$0xff]  ;;  %v11186_v32 = vld [vmem:[#allocation150_spill] sm:$0xff] }
 0x302   : > { %11166 = vst [vmem:[#allocation247_spill] sm:$0xff] %v8994_v45  ;;  %v8998_v0 = vpop.permute.xlu0 %3697  ;;  %v11175_v45 = vld [vmem:[#allocation9_spill] sm:$0xff] }
 0x303   : > { %11169 = vst [vmem:[#allocation139_spill] sm:$0xff] %v8998_v0  ;;  %4259 = vperm.xlu0 %5654, %v3257_v4   ;;  %v3140_v7 = vmul.f32 %v11175_v45, %v11174_v58  ;;  %v2898_v0 = vld [vmem:[%s8932_s25 + $0x60] sm:$0xff]  ;;  %v3250_v4 = vsub.f32 %v2887_v6, %v3129_v19  ;;  %v2900_v58 = vld [vmem:[%s8932_s25 + $0x70] sm:$0xff] }
 0x304   : > { %v11184_v6 = vld [vmem:[#allocation2_spill] sm:$0xff] }
 0x305   : > { %3972 = vperm.xlu1 %5655, %v9001_v38   ;;  %v9007_v31 = vpop.permute.xlu1 %3652  ;;  %v3261_v38 = vsub.f32 %v2898_v0, %v3140_v7  ;;  %v11187_v0 = vld [vmem:[#allocation13_spill] sm:$0xff] }
 0x306   : > { %11173 = vst [vmem:[#allocation121_spill] sm:$0xff] %v9007_v31  ;;  %v9011_v18 = vpop.permute.xlu0 %3707  ;;  %v11180_v31 = vld [vmem:[#allocation146_spill] sm:$0xff]  ;;  %v3144_v7 = vmul.f32 %v11187_v0, %v11186_v32  ;;  %v2904_v0 = vld [vmem:[%s8932_s25 + $0x90] sm:$0xff] }
 0x307   : > { %11176 = vst [vmem:[#allocation140_spill] sm:$0xff] %v9011_v18  ;;  %4269 = vperm.xlu0 %5654, %v3259_v11   ;;  %v3142_v13 = vmul.f32 %v11181_v50, %v11180_v31  ;;  %v3252_v18 = vsub.f32 %v2889_v23, %v3131_v59  ;;  %v11183_v11 = vld [vmem:[#allocation131_spill] sm:$0xff]  ;;  %v2902_v50 = vld [vmem:[%s8932_s25 + $0x80] sm:$0xff]  ;;  %v11190_v59 = vld [vmem:[#allocation4_spill] sm:$0xff] }
 0x308   : > { %v3133_v19 = vmul.f32 %v11184_v6, %v11183_v11  ;;  %v11192_v6 = vld [vmem:[#allocation101_spill] sm:$0xff] }
 0x309   : > { %4224 = vperm.xlu1 %5655, %v3250_v4   ;;  %v9017_v14 = vpop.permute.xlu1 %3662  ;;  %v3263_v4 = vsub.f32 %v2900_v58, %v3142_v13  ;;  %v11193_v13 = vld [vmem:[#allocation154_spill] sm:$0xff] }
 0x30a   : > { %11179 = vst [vmem:[#allocation142_spill] sm:$0xff] %v9017_v14  ;;  %v9021_v45 = vpop.permute.xlu0 %3717  ;;  %v2893_v14 = vld [vmem:[%s8932_s25 + $0x38] sm:$0xff]  ;;  %v3146_v58 = vmul.f32 %v11193_v13, %v11192_v6  ;;  %v2906_v13 = vld [vmem:[%s8932_s25 + $0xa0] sm:$0xff] }
 0x30b   : > { %11182 = vst [vmem:[#allocation9_spill] sm:$0xff] %v9021_v45  ;;  %4279 = vperm.xlu0 %5654, %v3261_v38   ;;  %v3254_v45 = vsub.f32 %v2891_v60, %v3133_v19  ;;  %v11189_v38 = vld [vmem:[#allocation135_spill] sm:$0xff]  ;;  %v11196_v60 = vld [vmem:[#allocation149_spill] sm:$0xff] }
 0x30c   : > { %v3135_v23 = vmul.f32 %v11190_v59, %v11189_v38  ;;  %v11198_v59 = vld [vmem:[#allocation102_spill] sm:$0xff] }
 0x30d   : > { %4234 = vperm.xlu1 %5655, %v3252_v18   ;;  %v9027_v44 = vpop.permute.xlu1 %3672  ;;  %v3265_v18 = vsub.f32 %v2902_v50, %v3144_v7  ;;  %v11199_v7 = vld [vmem:[#allocation17_spill] sm:$0xff] }
 0x30e   : > { %11185 = vst [vmem:[#allocation127_spill] sm:$0xff] %v9027_v44  ;;  %v9031_v31 = vpop.permute.xlu0 %3727  ;;  %v2895_v44 = vld [vmem:[%s8932_s25 + $0x48] sm:$0xff]  ;;  %v3148_v50 = vmul.f32 %v11199_v7, %v11198_v59  ;;  %v2908_v7 = vld [vmem:[%s8932_s25 + $0xb0] sm:$0xff] }
 0x30f   : > { %11188 = vst [vmem:[#allocation147_spill] sm:$0xff] %v9031_v31  ;;  %4289 = vperm.xlu0 %5654, %v3263_v4   ;;  %v3256_v31 = vsub.f32 %v2893_v14, %v3135_v23  ;;  %v11195_v4 = vld [vmem:[#allocation128_spill] sm:$0xff] }
 0x310   : > { %v3137_v19 = vmul.f32 %v11196_v60, %v11195_v4  ;;  %v11202_v14 = vld [vmem:[#allocation152_spill] sm:$0xff]  ;;  %v3269_v60 = vsub.f32 %v2906_v13, %v3148_v50  ;;  %v11211_v50 = vld [vmem:[#allocation21_spill] sm:$0xff] }
 0x311   : > { %4244 = vperm.xlu1 %5655, %v3254_v45   ;;  %v9037_v11 = vpop.permute.xlu1 %3682  ;;  %v3267_v45 = vsub.f32 %v2904_v0, %v3146_v58  ;;  %v11205_v58 = vld [vmem:[#allocation19_spill] sm:$0xff] }
 0x312   : > { %11191 = vst [vmem:[#allocation146_spill] sm:$0xff] %v9037_v11  ;;  %v9041_v32 = vpop.permute.xlu0 %3737  ;;  %v2897_v11 = vld [vmem:[%s8932_s25 + $0x58] sm:$0xff] }
 0x313   : > { %11194 = vst [vmem:[#allocation11_spill] sm:$0xff] %v9041_v32  ;;  %4299 = vperm.xlu0 %5654, %v3265_v18   ;;  %v3258_v32 = vsub.f32 %v2895_v44, %v3137_v19  ;;  %v11201_v18 = vld [vmem:[#allocation130_spill] sm:$0xff]  ;;  %v11208_v44 = vld [vmem:[#allocation8_spill] sm:$0xff] }
 0x314   : > { %v3139_v23 = vmul.f32 %v11202_v14, %v11201_v18 }
 0x315   : > { %v9047_v38 = vpop.permute.xlu1 %3692  ;;  %4254 = vperm.xlu1 %5655, %v3256_v31   ;;  %v11204_v31 = vld [vmem:[#allocation103_spill] sm:$0xff] }
 0x316   : > { %11197 = vst [vmem:[#allocation131_spill] sm:$0xff] %v9047_v38  ;;  %v9051_v6 = vpop.permute.xlu0 %3747  ;;  %v3150_v0 = vmul.f32 %v11205_v58, %v11204_v31  ;;  %v2899_v38 = vld [vmem:[%s8932_s25 + $0x68] sm:$0xff]  ;;  %v2910_v58 = vld [vmem:[%s8932_s25 + $0xc0] sm:$0xff] }
 0x317   : > { %11200 = vst [vmem:[#allocation2_spill] sm:$0xff] %v9051_v6  ;;  %4309 = vperm.xlu0 %5654, %v3267_v45   ;;  %v3260_v6 = vsub.f32 %v2897_v11, %v3139_v23  ;;  %v11207_v45 = vld [vmem:[#allocation132_spill] sm:$0xff]  ;;  %v11214_v11 = vld [vmem:[#allocation10_spill] sm:$0xff] }
 0x318   : > { %v3141_v19 = vmul.f32 %v11208_v44, %v11207_v45  ;;  %v3271_v14 = vsub.f32 %v2908_v7, %v3150_v0  ;;  %v11217_v0 = vld [vmem:[#allocation23_spill] sm:$0xff] }
 0x319   : > { %v9057_v4 = vpop.permute.xlu1 %3702  ;;  %4264 = vperm.xlu1 %5655, %v3258_v32   ;;  %v11210_v32 = vld [vmem:[#allocation104_spill] sm:$0xff] }
 0x31a   : > { %11203 = vst [vmem:[#allocation150_spill] sm:$0xff] %v9057_v4  ;;  %v9061_v59 = vpop.permute.xlu0 %3757  ;;  %v3152_v13 = vmul.f32 %v11211_v50, %v11210_v32  ;;  %v2901_v4 = vld [vmem:[%s8932_s25 + $0x78] sm:$0xff]  ;;  %v2912_v50 = vld [vmem:[%s8932_s25 + $0xd0] sm:$0xff] }
 0x31b   : > { %11206 = vst [vmem:[#allocation13_spill] sm:$0xff] %v9061_v59  ;;  %4319 = vperm.xlu0 %5654, %v3269_v60   ;;  %v3262_v59 = vsub.f32 %v2899_v38, %v3141_v19  ;;  %v11213_v60 = vld [vmem:[#allocation134_spill] sm:$0xff]  ;;  %v11220_v38 = vld [vmem:[#allocation12_spill] sm:$0xff] }
 0x31c   : > { %v3143_v23 = vmul.f32 %v11214_v11, %v11213_v60  ;;  %v3273_v44 = vsub.f32 %v2910_v58, %v3152_v13  ;;  %v11223_v13 = vld [vmem:[#allocation164_spill] sm:$0xff] }
 0x31d   : > { %v9067_v18 = vpop.permute.xlu1 %3712  ;;  %4274 = vperm.xlu1 %5655, %v3260_v6   ;;  %v11216_v6 = vld [vmem:[#allocation105_spill] sm:$0xff] }
 0x31e   : > { %11209 = vst [vmem:[#allocation135_spill] sm:$0xff] %v9067_v18  ;;  %v9071_v31 = vpop.permute.xlu0 %3767  ;;  %v3154_v7 = vmul.f32 %v11217_v0, %v11216_v6  ;;  %v2903_v18 = vld [vmem:[%s8932_s25 + $0x88] sm:$0xff]  ;;  %v2914_v0 = vld [vmem:[%s8932_s25 + $0xe0] sm:$0xff] }
 0x31f   : > { %11212 = vst [vmem:[#allocation4_spill] sm:$0xff] %v9071_v31  ;;  %4329 = vperm.xlu0 %5654, %v3271_v14   ;;  %v3264_v31 = vsub.f32 %v2901_v4, %v3143_v23  ;;  %v11219_v14 = vld [vmem:[#allocation136_spill] sm:$0xff]  ;;  %v11226_v4 = vld [vmem:[#allocation14_spill] sm:$0xff] }
 0x320   : > { %v3145_v19 = vmul.f32 %v11220_v38, %v11219_v14  ;;  %v3275_v11 = vsub.f32 %v2912_v50, %v3154_v7  ;;  %v11229_v7 = vld [vmem:[#allocation27_spill] sm:$0xff] }
 0x321   : > { %v9077_v45 = vpop.permute.xlu1 %3722  ;;  %4284 = vperm.xlu1 %5655, %v3262_v59   ;;  %v11222_v59 = vld [vmem:[#allocation106_spill] sm:$0xff] }
 0x322   : > { %11215 = vst [vmem:[#allocation101_spill] sm:$0xff] %v9077_v45  ;;  %v9081_v32 = vpop.permute.xlu0 %3777  ;;  %v3156_v58 = vmul.f32 %v11223_v13, %v11222_v59  ;;  %v2905_v45 = vld [vmem:[%s8932_s25 + $0x98] sm:$0xff]  ;;  %v2916_v13 = vld [vmem:[%s8932_s25 + $0xf0] sm:$0xff] }
 0x323   : > { %11218 = vst [vmem:[#allocation154_spill] sm:$0xff] %v9081_v32  ;;  %4339 = vperm.xlu0 %5654, %v3273_v44   ;;  %v3266_v32 = vsub.f32 %v2903_v18, %v3145_v19  ;;  %v11225_v44 = vld [vmem:[#allocation138_spill] sm:$0xff]  ;;  %v11232_v18 = vld [vmem:[#allocation16_spill] sm:$0xff] }
 0x324   : > { %v3147_v23 = vmul.f32 %v11226_v4, %v11225_v44  ;;  %v3277_v38 = vsub.f32 %v2914_v0, %v3156_v58  ;;  %v11235_v58 = vld [vmem:[#allocation168_spill] sm:$0xff] }
 0x325   : > { %v9087_v60 = vpop.permute.xlu1 %3732  ;;  %4294 = vperm.xlu1 %5655, %v3264_v31   ;;  %v11228_v31 = vld [vmem:[#allocation107_spill] sm:$0xff] }
 0x326   : > { %11221 = vst [vmem:[#allocation128_spill] sm:$0xff] %v9087_v60  ;;  %v9091_v6 = vpop.permute.xlu0 %3787  ;;  %v3158_v50 = vmul.f32 %v11229_v7, %v11228_v31  ;;  %v2907_v60 = vld [vmem:[%s8932_s25 + $0xa8] sm:$0xff]  ;;  %v2918_v7 = vld [vmem:[%s8932_s25 + $0x100] sm:$0xff] }
 0x327   : > { %11224 = vst [vmem:[#allocation149_spill] sm:$0xff] %v9091_v6  ;;  %4349 = vperm.xlu0 %5654, %v3275_v11   ;;  %v3268_v6 = vsub.f32 %v2905_v45, %v3147_v23  ;;  %v11231_v11 = vld [vmem:[#allocation141_spill] sm:$0xff]  ;;  %v11238_v45 = vld [vmem:[#allocation18_spill] sm:$0xff] }
 0x328   : > { %v3149_v19 = vmul.f32 %v11232_v18, %v11231_v11  ;;  %v3279_v4 = vsub.f32 %v2916_v13, %v3158_v50  ;;  %v11241_v50 = vld [vmem:[#allocation170_spill] sm:$0xff] }
 0x329   : > { %v9097_v14 = vpop.permute.xlu1 %3742  ;;  %4304 = vperm.xlu1 %5655, %v3266_v32   ;;  %v11234_v32 = vld [vmem:[#allocation109_spill] sm:$0xff] }
 0x32a   : > { %11227 = vst [vmem:[#allocation102_spill] sm:$0xff] %v9097_v14  ;;  %v9101_v59 = vpop.permute.xlu0 %3797  ;;  %v3160_v0 = vmul.f32 %v11235_v58, %v11234_v32  ;;  %v2909_v14 = vld [vmem:[%s8932_s25 + $0xb8] sm:$0xff]  ;;  %v2920_v58 = vld [vmem:[%s8932_s25 + $0x110] sm:$0xff] }
 0x32b   : > { %11230 = vst [vmem:[#allocation17_spill] sm:$0xff] %v9101_v59  ;;  %4359 = vperm.xlu0 %5654, %v3277_v38   ;;  %v3270_v59 = vsub.f32 %v2907_v60, %v3149_v19  ;;  %v11237_v38 = vld [vmem:[#allocation144_spill] sm:$0xff]  ;;  %v11244_v60 = vld [vmem:[#allocation153_spill] sm:$0xff] }
 0x32c   : > { %v3151_v23 = vmul.f32 %v11238_v45, %v11237_v38  ;;  %v3281_v18 = vsub.f32 %v2918_v7, %v3160_v0  ;;  %v11247_v0 = vld [vmem:[#allocation172_spill] sm:$0xff] }
 0x32d   : > { %v9107_v44 = vpop.permute.xlu1 %3752  ;;  %4314 = vperm.xlu1 %5655, %v3268_v6   ;;  %v11240_v6 = vld [vmem:[#allocation15_spill] sm:$0xff] }
 0x32e   : > { %11233 = vst [vmem:[#allocation130_spill] sm:$0xff] %v9107_v44  ;;  %v9111_v31 = vpop.permute.xlu0 %3807  ;;  %v3162_v13 = vmul.f32 %v11241_v50, %v11240_v6  ;;  %v2911_v44 = vld [vmem:[%s8932_s25 + $0xc8] sm:$0xff]  ;;  %v2922_v50 = vld [vmem:[%s8932_s25 + $0x120] sm:$0xff] }
 0x32f   : > { %11236 = vst [vmem:[#allocation152_spill] sm:$0xff] %v9111_v31  ;;  %4369 = vperm.xlu0 %5654, %v3279_v4   ;;  %v3272_v31 = vsub.f32 %v2909_v14, %v3151_v23  ;;  %v11243_v4 = vld [vmem:[#allocation148_spill] sm:$0xff]  ;;  %v11250_v14 = vld [vmem:[#allocation111_spill] sm:$0xff] }
 0x330   : > { %v3153_v19 = vmul.f32 %v11244_v60, %v11243_v4  ;;  %v3283_v45 = vsub.f32 %v2920_v58, %v3162_v13  ;;  %v11253_v13 = vld [vmem:[#allocation174_spill] sm:$0xff] }
 0x331   : > { %v9117_v11 = vpop.permute.xlu1 %3762  ;;  %4324 = vperm.xlu1 %5655, %v3270_v59   ;;  %v11246_v59 = vld [vmem:[#allocation113_spill] sm:$0xff] }
 0x332   : > { %11239 = vst [vmem:[#allocation103_spill] sm:$0xff] %v9117_v11  ;;  %v9121_v32 = vpop.permute.xlu0 %3817  ;;  %v3164_v7 = vmul.f32 %v11247_v0, %v11246_v59  ;;  %v2913_v11 = vld [vmem:[%s8932_s25 + $0xd8] sm:$0xff]  ;;  %v2924_v0 = vld [vmem:[%s8932_s25 + $0x130] sm:$0xff] }
 0x333   : > { %11242 = vst [vmem:[#allocation19_spill] sm:$0xff] %v9121_v32  ;;  %4379 = vperm.xlu0 %5654, %v3281_v18   ;;  %v3274_v32 = vsub.f32 %v2911_v44, %v3153_v19  ;;  %v11249_v18 = vld [vmem:[#allocation6_spill] sm:$0xff]  ;;  %v11256_v44 = vld [vmem:[#allocation156_spill] sm:$0xff] }
 0x334   : > { %v3155_v23 = vmul.f32 %v11250_v14, %v11249_v18  ;;  %v3285_v60 = vsub.f32 %v2922_v50, %v3164_v7  ;;  %v11259_v7 = vld [vmem:[#allocation176_spill] sm:$0xff] }
 0x335   : > { %v9127_v38 = vpop.permute.xlu1 %3772  ;;  %4334 = vperm.xlu1 %5655, %v3272_v31   ;;  %v11252_v31 = vld [vmem:[#allocation115_spill] sm:$0xff] }
 0x336   : > { %11245 = vst [vmem:[#allocation132_spill] sm:$0xff] %v9127_v38  ;;  %v9131_v6 = vpop.permute.xlu0 %3827  ;;  %v3166_v58 = vmul.f32 %v11253_v13, %v11252_v31  ;;  %v2915_v38 = vld [vmem:[%s8932_s25 + $0xe8] sm:$0xff]  ;;  %v2926_v13 = vld [vmem:[%s8932_s25 + $0x140] sm:$0xff] }
 0x337   : > { %11248 = vst [vmem:[#allocation8_spill] sm:$0xff] %v9131_v6  ;;  %4389 = vperm.xlu0 %5654, %v3283_v45   ;;  %v3276_v6 = vsub.f32 %v2913_v11, %v3155_v23  ;;  %v11255_v45 = vld [vmem:[#allocation108_spill] sm:$0xff]  ;;  %v11262_v11 = vld [vmem:[#allocation158_spill] sm:$0xff] }
 0x338   : > { %v3157_v19 = vmul.f32 %v11256_v44, %v11255_v45  ;;  %v3287_v14 = vsub.f32 %v2924_v0, %v3166_v58  ;;  %v11265_v58 = vld [vmem:[#allocation178_spill] sm:$0xff] }
 0x339   : > { %v9137_v4 = vpop.permute.xlu1 %3782  ;;  %4344 = vperm.xlu1 %5655, %v3274_v32   ;;  %v11258_v32 = vld [vmem:[#allocation117_spill] sm:$0xff] }
 0x33a   : > { %11251 = vst [vmem:[#allocation104_spill] sm:$0xff] %v9137_v4  ;;  %v9141_v59 = vpop.permute.xlu0 %3837  ;;  %v3168_v50 = vmul.f32 %v11259_v7, %v11258_v32  ;;  %v2917_v4 = vld [vmem:[%s8932_s25 + $0xf8] sm:$0xff]  ;;  %v2928_v7 = vld [vmem:[%s8932_s25 + $0x150] sm:$0xff] }
 0x33b   : > { %11254 = vst [vmem:[#allocation21_spill] sm:$0xff] %v9141_v59  ;;  %4399 = vperm.xlu0 %5654, %v3285_v60   ;;  %v3278_v59 = vsub.f32 %v2915_v38, %v3157_v19  ;;  %v11261_v60 = vld [vmem:[#allocation110_spill] sm:$0xff]  ;;  %v11268_v38 = vld [vmem:[#allocation160_spill] sm:$0xff] }
 0x33c   : > { %v3159_v23 = vmul.f32 %v11262_v11, %v11261_v60  ;;  %v3289_v44 = vsub.f32 %v2926_v13, %v3168_v50  ;;  %v11271_v50 = vld [vmem:[#allocation180_spill] sm:$0xff] }
 0x33d   : > { %v9147_v18 = vpop.permute.xlu1 %3792  ;;  %4354 = vperm.xlu1 %5655, %v3276_v6   ;;  %v11264_v6 = vld [vmem:[#allocation119_spill] sm:$0xff] }
 0x33e   : > { %11257 = vst [vmem:[#allocation134_spill] sm:$0xff] %v9147_v18  ;;  %v9151_v31 = vpop.permute.xlu0 %3847  ;;  %v3170_v0 = vmul.f32 %v11265_v58, %v11264_v6  ;;  %v2919_v18 = vld [vmem:[%s8932_s25 + $0x108] sm:$0xff]  ;;  %v2930_v58 = vld [vmem:[%s8932_s25 + $0x160] sm:$0xff] }
 0x33f   : > { %11260 = vst [vmem:[#allocation10_spill] sm:$0xff] %v9151_v31  ;;  %4409 = vperm.xlu0 %5654, %v3287_v14   ;;  %v3280_v31 = vsub.f32 %v2917_v4, %v3159_v23  ;;  %v11267_v14 = vld [vmem:[#allocation112_spill] sm:$0xff]  ;;  %v11274_v4 = vld [vmem:[#allocation162_spill] sm:$0xff] }
 0x340   : > { %v3161_v19 = vmul.f32 %v11268_v38, %v11267_v14  ;;  %v3291_v11 = vsub.f32 %v2928_v7, %v3170_v0  ;;  %v11277_v0 = vld [vmem:[#allocation182_spill] sm:$0xff] }
 0x341   : > { %v9157_v45 = vpop.permute.xlu1 %3802  ;;  %4364 = vperm.xlu1 %5655, %v3278_v59   ;;  %v11270_v59 = vld [vmem:[#allocation25_spill] sm:$0xff] }
 0x342   : > { %11263 = vst [vmem:[#allocation105_spill] sm:$0xff] %v9157_v45  ;;  %v9161_v32 = vpop.permute.xlu0 %3857  ;;  %v3172_v13 = vmul.f32 %v11271_v50, %v11270_v59  ;;  %v2921_v45 = vld [vmem:[%s8932_s25 + $0x118] sm:$0xff]  ;;  %v2932_v50 = vld [vmem:[%s8932_s25 + $0x170] sm:$0xff] }
 0x343   : > { %11266 = vst [vmem:[#allocation23_spill] sm:$0xff] %v9161_v32  ;;  %4419 = vperm.xlu0 %5654, %v3289_v44   ;;  %v3282_v32 = vsub.f32 %v2919_v18, %v3161_v19  ;;  %v11273_v44 = vld [vmem:[#allocation114_spill] sm:$0xff]  ;;  %v11280_v18 = vld [vmem:[#allocation163_spill] sm:$0xff] }
 0x344   : > { %v3163_v23 = vmul.f32 %v11274_v4, %v11273_v44  ;;  %v3293_v38 = vsub.f32 %v2930_v58, %v3172_v13  ;;  %v11282_v13 = vld [vmem:[#allocation184_spill] sm:$0xff] }
 0x345   : > { %v9167_v60 = vpop.permute.xlu1 %3812  ;;  %4374 = vperm.xlu1 %5655, %v3280_v31   ;;  %v11276_v31 = vld [vmem:[#allocation126_spill] sm:$0xff] }
 0x346   : > { %11269 = vst [vmem:[#allocation136_spill] sm:$0xff] %v9167_v60  ;;  %v9171_v6 = vpop.permute.xlu0 %3867  ;;  %v3174_v7 = vmul.f32 %v11277_v0, %v11276_v31  ;;  %v2923_v60 = vld [vmem:[%s8932_s25 + $0x128] sm:$0xff]  ;;  %v2934_v0 = vld [vmem:[%s8932_s25 + $0x180] sm:$0xff] }
 0x347   : > { %11272 = vst [vmem:[#allocation12_spill] sm:$0xff] %v9171_v6  ;;  %4429 = vperm.xlu0 %5654, %v3291_v11   ;;  %v3284_v6 = vsub.f32 %v2921_v45, %v3163_v23  ;;  %v11279_v11 = vld [vmem:[#allocation116_spill] sm:$0xff]  ;;  %v11285_v45 = vld [vmem:[#allocation166_spill] sm:$0xff] }
 0x348   : > { %v3165_v19 = vmul.f32 %v11280_v18, %v11279_v11  ;;  %v3295_v4 = vsub.f32 %v2932_v50, %v3174_v7 }
 0x349   : > { %v9177_v14 = vpop.permute.xlu1 %3822  ;;  %4384 = vperm.xlu1 %5655, %v3282_v32   ;;  %v11281_v32 = vld [vmem:[#allocation29_spill] sm:$0xff] }
 0x34a   : > { %11275 = vst [vmem:[#allocation106_spill] sm:$0xff] %v9177_v14  ;;  %v9181_v59 = vpop.permute.xlu0 %3877  ;;  %v3176_v58 = vmul.f32 %v11282_v13, %v11281_v32  ;;  %v2925_v14 = vld [vmem:[%s8932_s25 + $0x138] sm:$0xff]  ;;  %v2936_v32 = vld [vmem:[%s8932_s25 + $0x190] sm:$0xff] }
 0x34b   : > { %11278 = vst [vmem:[#allocation164_spill] sm:$0xff] %v9181_v59  ;;  %4439 = vperm.xlu0 %5654, %v3293_v38   ;;  %v3286_v59 = vsub.f32 %v2923_v60, %v3165_v19  ;;  %v11284_v38 = vld [vmem:[#allocation118_spill] sm:$0xff]  ;;  %v11290_v60 = vld [vmem:[#allocation167_spill] sm:$0xff] }
 0x34c   : > { %v3167_v23 = vmul.f32 %v11285_v45, %v11284_v38  ;;  %v3297_v18 = vsub.f32 %v2934_v0, %v3176_v58  ;;  %v11293_v58 = vld [vmem:[#allocation187_spill] sm:$0xff] }
 0x34d   : > { %v9187_v44 = vpop.permute.xlu1 %3832  ;;  %4394 = vperm.xlu1 %5655, %v3284_v6   ;;  %v11287_v6 = vld [vmem:[#allocation31_spill] sm:$0xff] }
 0x34e   : > { %v9191_v31 = vpop.permute.xlu0 %3887  ;;  %v3178_v7 = vmul.f32 %v8279_v39, %v11287_v6  ;;  %v3288_v13 = vsub.f32 %v2925_v14, %v3167_v23  ;;  %v2938_v6 = vld [vmem:[%s8932_s25 + $0x1a0] sm:$0xff]  ;;  %v11296_v14 = vld [vmem:[#allocation169_spill] sm:$0xff] }
 0x34f   : > { %11283 = vst [vmem:[#allocation138_spill] sm:$0xff] %v9191_v31  ;;  %4449 = vperm.xlu0 %5654, %v3295_v4   ;;  %v11289_v4 = vld [vmem:[#allocation120_spill] sm:$0xff]  ;;  %v2927_v31 = vld [vmem:[%s8932_s25 + $0x148] sm:$0xff] }
 0x350   : > { %v3169_v19 = vmul.f32 %v11290_v60, %v11289_v4  ;;  %v3299_v45 = vsub.f32 %v2936_v32, %v3178_v7  ;;  %v11298_v7 = vld [vmem:[#allocation189_spill] sm:$0xff] }
 0x351   : > { %v9197_v11 = vpop.permute.xlu1 %3842  ;;  %4404 = vperm.xlu1 %5655, %v3286_v59   ;;  %v11292_v59 = vld [vmem:[#allocation33_spill] sm:$0xff] }
 0x352   : > { %11286 = vst [vmem:[#allocation14_spill] sm:$0xff] %v9197_v11  ;;  %v9201_v50 = vpop.permute.xlu0 %3897  ;;  %v3180_v0 = vmul.f32 %v11293_v58, %v11292_v59  ;;  %v2929_v11 = vld [vmem:[%s8932_s25 + $0x158] sm:$0xff]  ;;  %v2940_v58 = vld [vmem:[%s8932_s25 + $0x1b0] sm:$0xff] }
 0x353   : > { %11288 = vst [vmem:[#allocation107_spill] sm:$0xff] %v9201_v50  ;;  %4459 = vperm.xlu0 %5654, %v3297_v18   ;;  %v3290_v50 = vsub.f32 %v2927_v31, %v3169_v19  ;;  %v11295_v18 = vld [vmem:[#allocation123_spill] sm:$0xff] }
 0x354   : > { %v3171_v23 = vmul.f32 %v11296_v14, %v11295_v18  ;;  %v3301_v60 = vsub.f32 %v2938_v6, %v3180_v0  ;;  %v11301_v31 = vld [vmem:[#allocation171_spill] sm:$0xff] }
 0x355   : > { %v9207_v38 = vpop.permute.xlu1 %3852  ;;  %4414 = vperm.xlu1 %5655, %v3288_v13   ;;  %v11297_v13 = vld [vmem:[#allocation35_spill] sm:$0xff] }
 0x356   : > { %11291 = vst [vmem:[#allocation27_spill] sm:$0xff] %v9207_v38  ;;  %v9211_v39 = vpop.permute.xlu0 %3907  ;;  %v3182_v32 = vmul.f32 %v11298_v7, %v11297_v13  ;;  %v2931_v38 = vld [vmem:[%s8932_s25 + $0x168] sm:$0xff]  ;;  %v2942_v13 = vld [vmem:[%s8932_s25 + $0x1c0] sm:$0xff] }
 0x357   : > { %11294 = vst [vmem:[#allocation141_spill] sm:$0xff] %v9211_v39  ;;  %4469 = vperm.xlu0 %5654, %v3299_v45   ;;  %v3292_v39 = vsub.f32 %v2929_v11, %v3171_v23  ;;  %v11300_v45 = vld [vmem:[#allocation24_spill] sm:$0xff]  ;;  %v11306_v11 = vld [vmem:[#allocation173_spill] sm:$0xff] }
 0x358   : > { %v3173_v19 = vmul.f32 %v11301_v31, %v11300_v45  ;;  %v3303_v14 = vsub.f32 %v2940_v58, %v3182_v32  ;;  %v11308_v32 = vld [vmem:[#allocation192_spill] sm:$0xff] }
 0x359   : > { %v9217_v4 = vpop.permute.xlu1 %3862  ;;  %4424 = vperm.xlu1 %5655, %v3290_v50   ;;  %v11303_v50 = vld [vmem:[#allocation37_spill] sm:$0xff] }
 0x35a   : > { %v9221_v59 = vpop.permute.xlu0 %3917  ;;  %v3184_v0 = vmul.f32 %v8350_v26, %v11303_v50  ;;  %v3294_v7 = vsub.f32 %v2931_v38, %v3173_v19  ;;  %v2944_v50 = vld [vmem:[%s8932_s25 + $0x1d0] sm:$0xff]  ;;  %v11311_v38 = vld [vmem:[#allocation175_spill] sm:$0xff] }
 0x35b   : > { %11299 = vst [vmem:[#allocation16_spill] sm:$0xff] %v9221_v59  ;;  %4479 = vperm.xlu0 %5654, %v3301_v60   ;;  %v11305_v60 = vld [vmem:[#allocation26_spill] sm:$0xff]  ;;  %v2933_v59 = vld [vmem:[%s8932_s25 + $0x178] sm:$0xff] }
 0x35c   : > { %v3175_v23 = vmul.f32 %v11306_v11, %v11305_v60  ;;  %v3305_v31 = vsub.f32 %v2942_v13, %v3184_v0 }
 0x35d   : > { %v9227_v18 = vpop.permute.xlu1 %3872  ;;  %4434 = vperm.xlu1 %5655, %v3292_v39   ;;  %v11307_v39 = vld [vmem:[#allocation39_spill] sm:$0xff] }
 0x35e   : > { %11302 = vst [vmem:[#allocation109_spill] sm:$0xff] %v9227_v18  ;;  %v9231_v6 = vpop.permute.xlu0 %3927  ;;  %v3186_v58 = vmul.f32 %v11308_v32, %v11307_v39  ;;  %v2935_v18 = vld [vmem:[%s8932_s25 + $0x188] sm:$0xff]  ;;  %v2946_v39 = vld [vmem:[%s8932_s25 + $0x1e0] sm:$0xff] }
 0x35f   : > { %11304 = vst [vmem:[#allocation168_spill] sm:$0xff] %v9231_v6  ;;  %4489 = vperm.xlu0 %5654, %v3303_v14   ;;  %v3296_v6 = vsub.f32 %v2933_v59, %v3175_v23  ;;  %v11310_v14 = vld [vmem:[#allocation28_spill] sm:$0xff]  ;;  %v11315_v59 = vld [vmem:[#allocation177_spill] sm:$0xff] }
 0x360   : > { %v3177_v19 = vmul.f32 %v11311_v38, %v11310_v14  ;;  %v3307_v11 = vsub.f32 %v2944_v50, %v3186_v58  ;;  %v2948_v50 = vld [vmem:[%s8932_s25 + $0x1f0] sm:$0xff] }
 0x361   : > { %v9237_v45 = vpop.permute.xlu1 %3882  ;;  %4444 = vperm.xlu1 %5655, %v3294_v7   ;;  %v11312_v7 = vld [vmem:[#allocation41_spill] sm:$0xff] }
 0x362   : > { %v9241_v26 = vpop.permute.xlu0 %3937  ;;  %v3188_v0 = vmul.f32 %v8397_v43, %v11312_v7  ;;  %v3298_v32 = vsub.f32 %v2935_v18, %v3177_v19  ;;  %v11319_v18 = vld [vmem:[#allocation32_spill] sm:$0xff]  ;;  %v11320_v19 = vld [vmem:[#allocation179_spill] sm:$0xff] }
 0x363   : > { %11309 = vst [vmem:[#allocation144_spill] sm:$0xff] %v9241_v26  ;;  %4499 = vperm.xlu0 %5654, %v3305_v31   ;;  %v11314_v31 = vld [vmem:[#allocation30_spill] sm:$0xff]  ;;  %v2937_v26 = vld [vmem:[%s8932_s25 + $0x198] sm:$0xff]  ;;  %v3181_v7 = vmul.f32 %v11320_v19, %v11319_v18 }
 0x364   : > { %v3179_v23 = vmul.f32 %v11315_v59, %v11314_v31  ;;  %v3309_v38 = vsub.f32 %v2946_v39, %v3188_v0  ;;  %v2939_v31 = vld [vmem:[%s8932_s25 + $0x1a8] sm:$0xff]  ;;  %v11322_v0 = vld [vmem:[#allocation45_spill] sm:$0xff]  ;;  %v6140_v19 = vld [vmem:[%s6427_s18] sm:$0xff] }
 0x365   : > { %v9247_v60 = vpop.permute.xlu1 %3892  ;;  %4454 = vperm.xlu1 %5655, %v3296_v6   ;;  %v11317_v6 = vld [vmem:[#allocation43_spill] sm:$0xff] }
 0x366   : > { %v9251_v13 = vpop.permute.xlu0 %3947  ;;  %v3190_v58 = vmul.f32 %v8421_v3, %v11317_v6  ;;  %v3192_v3 = vmul.f32 %v8445_v21, %v11322_v0  ;;  %v2950_v6 = vld [vmem:[%s8932_s25 + $0x200] sm:$0xff] }
 0x367   : > { %11313 = vst [vmem:[#allocation18_spill] sm:$0xff] %v9251_v13  ;;  %4509 = vperm.xlu0 %5654, %v3307_v11   ;;  %v3300_v11 = vsub.f32 %v2937_v26, %v3179_v23  ;;  %v11325_v26 = vld [vmem:[#allocation181_spill] sm:$0xff] }
 0x368   : > { %v2941_v13 = vld [vmem:[%s8932_s25 + $0x1b8] sm:$0xff] }
 0x369   : > { %v9257_v14 = vpop.permute.xlu1 %3902  ;;  %4464 = vperm.xlu1 %5655, %v3298_v32   ;;  %v3311_v32 = vsub.f32 %v2948_v50, %v3190_v58  ;;  %v3975_v58 = vmul.f32 %v6140_v19, %v8412_v40  ;;  %v6141_v50 = vld [vmem:[%s6427_s18 + $0x8] sm:$0xff]  ;;  %v6142_v19 = vld [vmem:[%s6427_s18 + $0x20] sm:$0xff] }
 0x36a   : > { %11316 = vst [vmem:[#allocation15_spill] sm:$0xff] %v9257_v14  ;;  %v9261_v43 = vpop.permute.xlu0 %3957  ;;  %v11326_v14 = vld [vmem:[#allocation47_spill] sm:$0xff]  ;;  %v3976_v21 = vmul.f32 %v6141_v50, %v8412_v40 }
 0x36b   : > { %11318 = vst [vmem:[#allocation170_spill] sm:$0xff] %v9261_v43  ;;  %4519 = vperm.xlu0 %5654, %v3309_v38   ;;  %v3302_v43 = vsub.f32 %v2939_v31, %v3181_v7  ;;  %v11324_v38 = vld [vmem:[#allocation34_spill] sm:$0xff]  ;;  %v3194_v18 = vmul.f32 %v8470_v63, %v11326_v14  ;;  %v3313_v7 = vsub.f32 %v2950_v6, %v3192_v3  ;;  %v2952_v31 = vld [vmem:[%s8932_s25 + $0x210] sm:$0xff]  ;;  %v11330_v3 = vld [vmem:[#allocation49_spill] sm:$0xff] }
 0x36c   : > { %v3183_v23 = vmul.f32 %v11325_v26, %v11324_v38  ;;  %v11328_v14 = vld [vmem:[#allocation36_spill] sm:$0xff]  ;;  %v11329_v26 = vld [vmem:[#allocation183_spill] sm:$0xff]  ;;  %v3196_v6 = vmul.f32 %v8493_v28, %v11330_v3  ;;  %v11333_v3 = vld [vmem:[#allocation38_spill] sm:$0xff] }
 0x36d   : > { %v9267_v59 = vpop.permute.xlu1 %3912  ;;  %4474 = vperm.xlu1 %5655, %v3300_v11   ;;  %v3315_v40 = vsub.f32 %v2952_v31, %v3194_v18 }
 0x36e   : > { %11321 = vst [vmem:[#allocation148_spill] sm:$0xff] %v9267_v59  ;;  %v9271_v39 = vpop.permute.xlu0 %3967  ;;  %v3304_v63 = vsub.f32 %v2941_v13, %v3183_v23  ;;  %v6143_v13 = vld [vmem:[%s6427_s18 + $0x28] sm:$0xff] }
 0x36f   : > { %11323 = vst [vmem:[#allocation153_spill] sm:$0xff] %v9271_v39  ;;  %4529 = vperm.xlu0 %5654, %v3311_v32   ;;  %v3185_v39 = vmul.f32 %v11329_v26, %v11328_v14  ;;  %v2954_v14 = vld [vmem:[%s8932_s25 + $0x220] sm:$0xff]  ;;  %v6145_v59 = vld [vmem:[%s6427_s18 + $0x48] sm:$0xff] }
 0x371   : > { %v9283_v11 = vpop.permute.xlu1 %3922  ;;  %4484 = vperm.xlu1 %5655, %v3302_v43   ;;  %v2943_v43 = vld [vmem:[%s8932_s25 + $0x1c8] sm:$0xff] }
 0x372   : > { %11327 = vst [vmem:[#allocation113_spill] sm:$0xff] %v9283_v11  ;;  %v4220_v32 = vpop.permute.xlu0 %4219  ;;  %v3306_v26 = vsub.f32 %v2943_v43, %v3185_v39  ;;  %v11336_v11 = vld [vmem:[#allocation199_spill] sm:$0xff]  ;;  %v2956_v43 = vld [vmem:[%s8932_s25 + $0x230] sm:$0xff] }
 0x373   : > { %v4822_v0 = vadd.f32 %v4220_v32, %v3975_v58  ;;  %v4823_v38 = vadd.f32 %v4220_v32, %v3976_v21  ;;  %4539 = vperm.xlu0 %5654, %v3313_v7   ;;  %v11331_v58 = vld [vmem:[#allocation195_spill] sm:$0xff] }
 0x374   : > { %v3979_v50 = vmul.f32 %v6142_v19, %v11331_v58  ;;  %v3980_v23 = vmul.f32 %v6143_v13, %v11331_v58  ;;  %v11334_v19 = vld [vmem:[#allocation185_spill] sm:$0xff]  ;;  %v11335_v13 = vld [vmem:[#allocation51_spill] sm:$0xff] }
 0x375   : > { %v5064_v21 = vmax.f32 %v4822_v0, 0.0  ;;  %v5065_v7 = vmax.f32 %v4823_v38, 0.0  ;;  %v9302_v32 = vpop.permute.xlu1 %3932  ;;  %4494 = vperm.xlu1 %5655, %v3304_v63   ;;  %v3187_v0 = vmul.f32 %v11334_v19, %v11333_v3  ;;  %v3317_v38 = vsub.f32 %v2954_v14, %v3196_v6  ;;  %v2945_v58 = vld [vmem:[%s8932_s25 + $0x1d8] sm:$0xff]  ;;  %v11337_v14 = vld [vmem:[#allocation40_spill] sm:$0xff]  ;;  %v6146_v3 = vld [vmem:[%s6427_s18 + $0x60] sm:$0xff] }
 0x376   : > { %11332 = vst [vmem:[#allocation172_spill] sm:$0xff] %v9302_v32  ;;  %v4230_v18 = vpop.permute.xlu0 %4229  ;;  %v3198_v63 = vmul.f32 %v8517_v35, %v11335_v13  ;;  %v6144_v32 = vld [vmem:[%s6427_s18 + $0x40] sm:$0xff]  ;;  %v11340_v19 = vld [vmem:[#allocation203_spill] sm:$0xff] }
 0x377   : > { %5306 = vst [vmem:[%s9293_s28] sm:$0xff] %v5064_v21  ;;  %5307 = vst.msk [vmem:[%s9293_s28 + $0x8] sm:$0xff] %vm465_vm0, %v5065_v7  ;;  %v4826_v28 = vadd.f32 %v4230_v18, %v3979_v50  ;;  %v4827_v31 = vadd.f32 %v4230_v18, %v3980_v23  ;;  %4549 = vperm.xlu0 %5654, %v3315_v40   ;;  %v3983_v21 = vmul.f32 %v6144_v32, %v11336_v11 }
 0x378   : > { %v3984_v50 = vmul.f32 %v6145_v59, %v11336_v11  ;;  %v3308_v32 = vsub.f32 %v2945_v58, %v3187_v0  ;;  %v11338_v59 = vld [vmem:[#allocation186_spill] sm:$0xff]  ;;  %v3319_v18 = vsub.f32 %v2956_v43, %v3198_v63  ;;  %v3987_v13 = vmul.f32 %v6146_v3, %v11340_v19 }
 0x379   : > { %v5068_v23 = vmax.f32 %v4826_v28, 0.0  ;;  %v5069_v40 = vmax.f32 %v4827_v31, 0.0  ;;  %v9317_v39 = vpop.permute.xlu1 %3942  ;;  %4504 = vperm.xlu1 %5655, %v3306_v26   ;;  %v3189_v11 = vmul.f32 %v11338_v59, %v11337_v14  ;;  %v2947_v28 = vld [vmem:[%s8932_s25 + $0x1e8] sm:$0xff]  ;;  %v11339_v31 = vld [vmem:[#allocation53_spill] sm:$0xff]  ;;  %v2958_v58 = vld [vmem:[%s8932_s25 + $0x240] sm:$0xff] }
 0x37a   : > { %v4240_v6 = vpop.permute.xlu0 %4239  ;;  %v3200_v26 = vmul.f32 %v8541_v22, %v11339_v31  ;;  %v11342_v14 = vld [vmem:[#allocation188_spill] sm:$0xff]  ;;  %v2949_v59 = vld [vmem:[%s8932_s25 + $0x1f8] sm:$0xff]  ;;  %v11343_v31 = vld [vmem:[#allocation55_spill] sm:$0xff] }
 0x37b   : > { %5310 = vst [vmem:[%s9293_s28 + $0x20] sm:$0xff] %v5068_v23  ;;  %5311 = vst.msk [vmem:[%s9293_s28 + $0x28] sm:$0xff] %vm465_vm0, %v5069_v40  ;;  %v4830_v35 = vadd.f32 %v4240_v6, %v3983_v21  ;;  %v4831_v7 = vadd.f32 %v4240_v6, %v3984_v50  ;;  %4559 = vperm.xlu0 %5654, %v3317_v38   ;;  %v6147_v23 = vld [vmem:[%s6427_s18 + $0x68] sm:$0xff]  ;;  %v3310_v43 = vsub.f32 %v2947_v28, %v3189_v11  ;;  %v11341_v6 = vld [vmem:[#allocation42_spill] sm:$0xff] }
 0x37c   : > { %v3988_v21 = vmul.f32 %v6147_v23, %v11340_v19  ;;  %v6148_v3 = vld [vmem:[%s6427_s18 + $0x80] sm:$0xff]  ;;  %v11344_v19 = vld [vmem:[#allocation207_spill] sm:$0xff]  ;;  %v2960_v28 = vld [vmem:[%s8932_s25 + $0x250] sm:$0xff] }
 0x37d   : > { %v5072_v50 = vmax.f32 %v4830_v35, 0.0  ;;  %v5073_v38 = vmax.f32 %v4831_v7, 0.0  ;;  %v9332_v0 = vpop.permute.xlu1 %3952  ;;  %4514 = vperm.xlu1 %5655, %v3308_v32   ;;  %v3191_v35 = vmul.f32 %v11342_v14, %v11341_v6  ;;  %v3321_v7 = vsub.f32 %v2958_v58, %v3200_v26  ;;  %v11346_v6 = vld [vmem:[#allocation190_spill] sm:$0xff]  ;;  %v2951_v14 = vld [vmem:[%s8932_s25 + $0x208] sm:$0xff] }
 0x37e   : > { %v4250_v63 = vpop.permute.xlu0 %4249  ;;  %v3202_v32 = vmul.f32 %v8565_v37, %v11343_v31  ;;  %v3991_v23 = vmul.f32 %v6148_v3, %v11344_v19  ;;  %v11347_v31 = vld [vmem:[#allocation57_spill] sm:$0xff]  ;;  %v6150_v3 = vld [vmem:[%s6427_s18 + $0xa0] sm:$0xff] }
 0x37f   : > { %5314 = vst [vmem:[%s9293_s28 + $0x40] sm:$0xff] %v5072_v50  ;;  %5315 = vst.msk [vmem:[%s9293_s28 + $0x48] sm:$0xff] %vm465_vm0, %v5073_v38  ;;  %v4834_v22 = vadd.f32 %v4250_v63, %v3987_v13  ;;  %v4835_v40 = vadd.f32 %v4250_v63, %v3988_v21  ;;  %4569 = vperm.xlu0 %5654, %v3319_v18   ;;  %v6149_v50 = vld [vmem:[%s6427_s18 + $0x88] sm:$0xff]  ;;  %v3312_v58 = vsub.f32 %v2949_v59, %v3191_v35  ;;  %v11345_v63 = vld [vmem:[#allocation44_spill] sm:$0xff] }
 0x380   : > { %v3992_v13 = vmul.f32 %v6149_v50, %v11344_v19  ;;  %v11348_v19 = vld [vmem:[#allocation209_spill] sm:$0xff] }
 0x381   : > { %v5076_v21 = vmax.f32 %v4834_v22, 0.0  ;;  %v5077_v18 = vmax.f32 %v4835_v40, 0.0  ;;  %v9347_v11 = vpop.permute.xlu1 %3962  ;;  %4524 = vperm.xlu1 %5655, %v3310_v43   ;;  %v3193_v22 = vmul.f32 %v11346_v6, %v11345_v63  ;;  %v3323_v40 = vsub.f32 %v2960_v28, %v3202_v32  ;;  %v11351_v28 = vld [vmem:[#allocation191_spill] sm:$0xff] }
 0x382   : > { %v4260_v26 = vpop.permute.xlu0 %4259  ;;  %v3204_v43 = vmul.f32 %v8590_v5, %v11347_v31  ;;  %v3995_v50 = vmul.f32 %v6150_v3, %v11348_v19  ;;  %v11352_v6 = vld [vmem:[#allocation59_spill] sm:$0xff]  ;;  %v11353_v3 = vld [vmem:[#allocation193_spill] sm:$0xff] }
 0x383   : > { %5318 = vst [vmem:[%s9293_s28 + $0x60] sm:$0xff] %v5076_v21  ;;  %5319 = vst.msk [vmem:[%s9293_s28 + $0x68] sm:$0xff] %vm465_vm0, %v5077_v18  ;;  %v4838_v37 = vadd.f32 %v4260_v26, %v3991_v23  ;;  %v4839_v38 = vadd.f32 %v4260_v26, %v3992_v13  ;;  %4579 = vperm.xlu0 %5654, %v3321_v7   ;;  %v6151_v21 = vld [vmem:[%s6427_s18 + $0xa8] sm:$0xff]  ;;  %v2962_v13 = vld [vmem:[%s8932_s25 + $0x260] sm:$0xff]  ;;  %v3206_v31 = vmul.f32 %v8613_v16, %v11352_v6 }
 0x384   : > { %v3996_v23 = vmul.f32 %v6151_v21, %v11348_v19  ;;  %v11350_v18 = vld [vmem:[#allocation46_spill] sm:$0xff]  ;;  %v6153_v21 = vld [vmem:[%s6427_s18 + $0x18] sm:$0xff] }
 0x385   : > { %v5080_v7 = vmax.f32 %v4838_v37, 0.0  ;;  %v5081_v35 = vmax.f32 %v4839_v38, 0.0  ;;  %v9362_v59 = vpop.permute.xlu1 %3972  ;;  %4534 = vperm.xlu1 %5655, %v3312_v58   ;;  %v3195_v5 = vmul.f32 %v11351_v28, %v11350_v18  ;;  %v3314_v37 = vsub.f32 %v2951_v14, %v3193_v22  ;;  %v2953_v38 = vld [vmem:[%s8932_s25 + $0x218] sm:$0xff]  ;;  %v6152_v58 = vld [vmem:[%s6427_s18 + $0x10] sm:$0xff]  ;;  %v6154_v28 = vld [vmem:[%s6427_s18 + $0xc0] sm:$0xff] }
 0x386   : > { %11349 = vst [vmem:[#allocation6_spill] sm:$0xff] %v9362_v59  ;;  %v4270_v32 = vpop.permute.xlu0 %4269  ;;  %v3977_v19 = vmul.f32 %v6152_v58, %v11353_v3  ;;  %v3978_v59 = vmul.f32 %v6153_v21, %v11353_v3  ;;  %v3325_v18 = vsub.f32 %v2962_v13, %v3204_v43  ;;  %v11354_v43 = vld [vmem:[#allocation48_spill] sm:$0xff]  ;;  %v11355_v13 = vld [vmem:[#allocation194_spill] sm:$0xff]  ;;  %v2955_v21 = vld [vmem:[%s8932_s25 + $0x228] sm:$0xff] }
 0x387   : > { %5322 = vst [vmem:[%s9293_s28 + $0x80] sm:$0xff] %v5080_v7  ;;  %5323 = vst.msk [vmem:[%s9293_s28 + $0x88] sm:$0xff] %vm465_vm0, %v5081_v35  ;;  %v4842_v26 = vadd.f32 %v4270_v32, %v3995_v50  ;;  %v4843_v63 = vadd.f32 %v4270_v32, %v3996_v23  ;;  %4589 = vperm.xlu0 %5654, %v3323_v40   ;;  %v2964_v7 = vld [vmem:[%s8932_s25 + $0x270] sm:$0xff]  ;;  %v3999_v50 = vmul.f32 %v6154_v28, %v8600_v9  ;;  %v6155_v23 = vld [vmem:[%s6427_s18 + $0xc8] sm:$0xff] }
 0x388   : > { %v4000_v22 = vmul.f32 %v6155_v23, %v8600_v9  ;;  %v3316_v58 = vsub.f32 %v2953_v38, %v3195_v5  ;;  %v3197_v3 = vmul.f32 %v11355_v13, %v11354_v43  ;;  %v11357_v5 = vld [vmem:[#allocation197_spill] sm:$0xff] }
 0x389   : > { %v5084_v40 = vmax.f32 %v4842_v26, 0.0  ;;  %v5085_v14 = vmax.f32 %v4843_v63, 0.0  ;;  %v4225_v16 = vpop.permute.xlu1 %4224  ;;  %4544 = vperm.xlu1 %5655, %v3314_v37   ;;  %v3327_v63 = vsub.f32 %v2964_v7, %v3206_v31  ;;  %v11356_v37 = vld [vmem:[#allocation61_spill] sm:$0xff] }
 0x38a   : > { %v4824_v35 = vadd.f32 %v4225_v16, %v3977_v19  ;;  %v4825_v32 = vadd.f32 %v4225_v16, %v3978_v59  ;;  %v4280_v6 = vpop.permute.xlu0 %4279  ;;  %v3208_v19 = vmul.f32 %v8637_v56, %v11356_v37  ;;  %v6156_v59 = vld [vmem:[%s6427_s18 + $0x30] sm:$0xff]  ;;  %v6157_v28 = vld [vmem:[%s6427_s18 + $0x38] sm:$0xff]  ;;  %v3318_v13 = vsub.f32 %v2955_v21, %v3197_v3  ;;  %v11358_v37 = vld [vmem:[#allocation50_spill] sm:$0xff] }
 0x38b   : > { %5326 = vst [vmem:[%s9293_s28 + $0xa0] sm:$0xff] %v5084_v40  ;;  %5327 = vst.msk [vmem:[%s9293_s28 + $0xa8] sm:$0xff] %vm465_vm0, %v5085_v14  ;;  %v4846_v9 = vadd.f32 %v4280_v6, %v3999_v50  ;;  %v4847_v26 = vadd.f32 %v4280_v6, %v4000_v22  ;;  %4599 = vperm.xlu0 %5654, %v3325_v18   ;;  %v3981_v38 = vmul.f32 %v6156_v59, %v11357_v5  ;;  %v2966_v14 = vld [vmem:[%s8932_s25 + $0x280] sm:$0xff]  ;;  %v6159_v18 = vld [vmem:[%s6427_s18 + $0xe8] sm:$0xff] }
 0x38c   : > { %v3982_v23 = vmul.f32 %v6157_v28, %v11357_v5  ;;  %v5066_v40 = vmax.f32 %v4824_v35, 0.0  ;;  %v5067_v16 = vmax.f32 %v4825_v32, 0.0  ;;  %v6158_v50 = vld [vmem:[%s6427_s18 + $0xe0] sm:$0xff]  ;;  %v4004_v7 = vmul.f32 %v6159_v18, %v8623_v49  ;;  %v11359_v59 = vld [vmem:[#allocation196_spill] sm:$0xff]  ;;  %v11360_v28 = vld [vmem:[#allocation63_spill] sm:$0xff] }
 0x38d   : > { %v4003_v31 = vmul.f32 %v6158_v50, %v8623_v49  ;;  %v5088_v56 = vmax.f32 %v4846_v9, 0.0  ;;  %v5089_v22 = vmax.f32 %v4847_v26, 0.0  ;;  %v4235_v6 = vpop.permute.xlu1 %4234  ;;  %4554 = vperm.xlu1 %5655, %v3316_v58   ;;  %v3199_v5 = vmul.f32 %v11359_v59, %v11358_v37  ;;  %v2957_v26 = vld [vmem:[%s8932_s25 + $0x238] sm:$0xff]  ;;  %v11361_v3 = vld [vmem:[#allocation155_spill] sm:$0xff]  ;;  %v11362_v37 = vld [vmem:[#allocation52_spill] sm:$0xff] }
 0x38e   : > { %5308 = vst [vmem:[%s9293_s28 + $0x10] sm:$0xff] %v5066_v40  ;;  %5309 = vst.msk [vmem:[%s9293_s28 + $0x18] sm:$0xff] %vm465_vm0, %v5067_v16  ;;  %v4828_v35 = vadd.f32 %v4235_v6, %v3981_v38  ;;  %v4829_v32 = vadd.f32 %v4235_v6, %v3982_v23  ;;  %v4290_v43 = vpop.permute.xlu0 %4289  ;;  %v3329_v9 = vsub.f32 %v2966_v14, %v3208_v19  ;;  %v6160_v23 = vld [vmem:[%s6427_s18 + $0x50] sm:$0xff]  ;;  %v6161_v40 = vld [vmem:[%s6427_s18 + $0x58] sm:$0xff] }
 0x38f   : > { %5330 = vst [vmem:[%s9293_s28 + $0xc0] sm:$0xff] %v5088_v56  ;;  %5331 = vst.msk [vmem:[%s9293_s28 + $0xc8] sm:$0xff] %vm465_vm0, %v5089_v22  ;;  %v4850_v49 = vadd.f32 %v4290_v43, %v4003_v31  ;;  %v4851_v58 = vadd.f32 %v4290_v43, %v4004_v7  ;;  %4609 = vperm.xlu0 %5654, %v3327_v63   ;;  %v3210_v38 = vmul.f32 %v8661_v12, %v11360_v28  ;;  %v2968_v56 = vld [vmem:[%s8932_s25 + $0x290] sm:$0xff]  ;;  %v6162_v31 = vld [vmem:[%s6427_s18 + $0x100] sm:$0xff] }
 0x390   : > { %v3985_v21 = vmul.f32 %v6160_v23, %v11361_v3  ;;  %v3986_v16 = vmul.f32 %v6161_v40, %v11361_v3  ;;  %v5070_v50 = vmax.f32 %v4828_v35, 0.0  ;;  %v5071_v18 = vmax.f32 %v4829_v32, 0.0  ;;  %v6163_v19 = vld [vmem:[%s6427_s18 + $0x108] sm:$0xff]  ;;  %v11363_v59 = vld [vmem:[#allocation198_spill] sm:$0xff]  ;;  %v11364_v23 = vld [vmem:[#allocation65_spill] sm:$0xff] }
 0x391   : > { %v4007_v63 = vmul.f32 %v6162_v31, %v8647_v55  ;;  %v4008_v14 = vmul.f32 %v6163_v19, %v8647_v55  ;;  %v5092_v12 = vmax.f32 %v4850_v49, 0.0  ;;  %v5093_v7 = vmax.f32 %v4851_v58, 0.0  ;;  %v4245_v22 = vpop.permute.xlu1 %4244  ;;  %4564 = vperm.xlu1 %5655, %v3318_v13   ;;  %v2959_v58 = vld [vmem:[%s8932_s25 + $0x248] sm:$0xff]  ;;  %v6165_v40 = vld [vmem:[%s6427_s18 + $0x78] sm:$0xff]  ;;  %v2970_v31 = vld [vmem:[%s8932_s25 + $0x2a0] sm:$0xff] }
 0x392   : > { %5312 = vst [vmem:[%s9293_s28 + $0x30] sm:$0xff] %v5070_v50  ;;  %5313 = vst.msk [vmem:[%s9293_s28 + $0x38] sm:$0xff] %vm465_vm0, %v5071_v18  ;;  %v4832_v6 = vadd.f32 %v4245_v22, %v3985_v21  ;;  %v4833_v35 = vadd.f32 %v4245_v22, %v3986_v16  ;;  %v4300_v32 = vpop.permute.xlu0 %4299  ;;  %v3320_v43 = vsub.f32 %v2957_v26, %v3199_v5  ;;  %v6164_v21 = vld [vmem:[%s6427_s18 + $0x70] sm:$0xff]  ;;  %v11365_v5 = vld [vmem:[#allocation205_spill] sm:$0xff] }
 0x393   : > { %v3201_v28 = vmul.f32 %v11363_v59, %v11362_v37  ;;  %5334 = vst [vmem:[%s9293_s28 + $0xe0] sm:$0xff] %v5092_v12  ;;  %5335 = vst.msk [vmem:[%s9293_s28 + $0xe8] sm:$0xff] %vm465_vm0, %v5093_v7  ;;  %v4854_v55 = vadd.f32 %v4300_v32, %v4007_v63  ;;  %v4855_v13 = vadd.f32 %v4300_v32, %v4008_v14  ;;  %4619 = vperm.xlu0 %5654, %v3329_v9   ;;  %v6166_v63 = vld [vmem:[%s6427_s18 + $0x120] sm:$0xff]  ;;  %v11367_v32 = vld [vmem:[#allocation200_spill] sm:$0xff] }
 0x394   : > { %v3331_v49 = vsub.f32 %v2968_v56, %v3210_v38  ;;  %v3212_v3 = vmul.f32 %v8685_v54, %v11364_v23  ;;  %v3989_v26 = vmul.f32 %v6164_v21, %v11365_v5  ;;  %v3990_v16 = vmul.f32 %v6165_v40, %v11365_v5  ;;  %v6167_v38 = vld [vmem:[%s6427_s18 + $0x128] sm:$0xff]  ;;  %v6168_v21 = vld [vmem:[%s6427_s18 + $0x90] sm:$0xff]  ;;  %v6169_v5 = vld [vmem:[%s6427_s18 + $0x98] sm:$0xff] }
 0x395   : > { %v5074_v50 = vmax.f32 %v4832_v6, 0.0  ;;  %v5075_v18 = vmax.f32 %v4833_v35, 0.0  ;;  %v4011_v9 = vmul.f32 %v6166_v63, %v8671_v10  ;;  %v4012_v56 = vmul.f32 %v6167_v38, %v8671_v10  ;;  %v4255_v14 = vpop.permute.xlu1 %4254  ;;  %4574 = vperm.xlu1 %5655, %v3320_v43   ;;  %v11366_v35 = vld [vmem:[#allocation54_spill] sm:$0xff] }
 0x396   : > { %v5096_v54 = vmax.f32 %v4854_v55, 0.0  ;;  %v5097_v19 = vmax.f32 %v4855_v13, 0.0  ;;  %v4836_v12 = vadd.f32 %v4255_v14, %v3989_v26  ;;  %v4837_v7 = vadd.f32 %v4255_v14, %v3990_v16  ;;  %v4310_v22 = vpop.permute.xlu0 %4309  ;;  %v2961_v55 = vld [vmem:[%s8932_s25 + $0x258] sm:$0xff]  ;;  %v11368_v13 = vld [vmem:[#allocation67_spill] sm:$0xff]  ;;  %v11370_v14 = vld [vmem:[#allocation56_spill] sm:$0xff] }
 0x397   : > { %5316 = vst [vmem:[%s9293_s28 + $0x50] sm:$0xff] %v5074_v50  ;;  %5317 = vst.msk [vmem:[%s9293_s28 + $0x58] sm:$0xff] %vm465_vm0, %v5075_v18  ;;  %v3322_v6 = vsub.f32 %v2959_v58, %v3201_v28  ;;  %v3203_v37 = vmul.f32 %v11367_v32, %v11366_v35  ;;  %v4858_v10 = vadd.f32 %v4310_v22, %v4011_v9  ;;  %4629 = vperm.xlu0 %5654, %v3331_v49   ;;  %v11369_v28 = vld [vmem:[#allocation20_spill] sm:$0xff]  ;;  %v6170_v18 = vld [vmem:[%s6427_s18 + $0x140] sm:$0xff] }
 0x398   : > { %5338 = vst [vmem:[%s9293_s28 + $0x100] sm:$0xff] %v5096_v54  ;;  %5339 = vst.msk [vmem:[%s9293_s28 + $0x108] sm:$0xff] %vm465_vm0, %v5097_v19  ;;  %v4859_v43 = vadd.f32 %v4310_v22, %v4012_v56  ;;  %v3333_v59 = vsub.f32 %v2970_v31, %v3212_v3  ;;  %v3214_v23 = vmul.f32 %v8710_v30, %v11368_v13  ;;  %v5078_v40 = vmax.f32 %v4836_v12, 0.0  ;;  %v2972_v50 = vld [vmem:[%s8932_s25 + $0x2b0] sm:$0xff]  ;;  %v6171_v3 = vld [vmem:[%s6427_s18 + $0x148] sm:$0xff] }
 0x399   : > { %v3993_v58 = vmul.f32 %v6168_v21, %v11369_v28  ;;  %v3994_v26 = vmul.f32 %v6169_v5, %v11369_v28  ;;  %v5079_v16 = vmax.f32 %v4837_v7, 0.0  ;;  %v4015_v49 = vmul.f32 %v6170_v18, %v8695_v41  ;;  %v4265_v9 = vpop.permute.xlu1 %4264  ;;  %4584 = vperm.xlu1 %5655, %v3322_v6   ;;  %v11371_v12 = vld [vmem:[#allocation201_spill] sm:$0xff]  ;;  %v2963_v35 = vld [vmem:[%s8932_s25 + $0x268] sm:$0xff]  ;;  %v2974_v5 = vld [vmem:[%s8932_s25 + $0x2c0] sm:$0xff] }
 0x39a   : > { %v4016_v31 = vmul.f32 %v6171_v3, %v8695_v41  ;;  %v5100_v30 = vmax.f32 %v4858_v10, 0.0  ;;  %v5101_v63 = vmax.f32 %v4859_v43, 0.0  ;;  %5320 = vst [vmem:[%s9293_s28 + $0x70] sm:$0xff] %v5078_v40  ;;  %v4320_v54 = vpop.permute.xlu0 %4319  ;;  %v3324_v19 = vsub.f32 %v2961_v55, %v3203_v37  ;;  %v11372_v32 = vld [vmem:[#allocation69_spill] sm:$0xff]  ;;  %v6172_v43 = vld [vmem:[%s6427_s18 + $0xb0] sm:$0xff]  ;;  %v11373_v37 = vld [vmem:[#allocation22_spill] sm:$0xff] }
 0x39b   : > { %5321 = vst.msk [vmem:[%s9293_s28 + $0x78] sm:$0xff] %vm465_vm0, %v5079_v16  ;;  %v4840_v38 = vadd.f32 %v4265_v9, %v3993_v58  ;;  %v4841_v56 = vadd.f32 %v4265_v9, %v3994_v26  ;;  %v3205_v7 = vmul.f32 %v11371_v12, %v11370_v14  ;;  %v4862_v41 = vadd.f32 %v4320_v54, %v4015_v49  ;;  %v6173_v13 = vld [vmem:[%s6427_s18 + $0xb8] sm:$0xff]  ;;  %v6174_v26 = vld [vmem:[%s6427_s18 + $0x160] sm:$0xff]  ;;  %v6176_v12 = vld [vmem:[%s6427_s18 + $0xd0] sm:$0xff] }
 0x39c   : > { %5342 = vst [vmem:[%s9293_s28 + $0x120] sm:$0xff] %v5100_v30  ;;  %5343 = vst.msk [vmem:[%s9293_s28 + $0x128] sm:$0xff] %vm465_vm0, %v5101_v63  ;;  %v4863_v22 = vadd.f32 %v4320_v54, %v4016_v31  ;;  %4639 = vperm.xlu0 %5654, %v3333_v59   ;;  %v3335_v6 = vsub.f32 %v2972_v50, %v3214_v23  ;;  %v3216_v10 = vmul.f32 %v8733_v57, %v11372_v32  ;;  %v6175_v23 = vld [vmem:[%s6427_s18 + $0x168] sm:$0xff]  ;;  %v11374_v30 = vld [vmem:[#allocation58_spill] sm:$0xff] }
 0x39d   : > { %v3997_v55 = vmul.f32 %v6172_v43, %v11373_v37  ;;  %v3998_v21 = vmul.f32 %v6173_v13, %v11373_v37  ;;  %v5082_v28 = vmax.f32 %v4840_v38, 0.0  ;;  %v5083_v58 = vmax.f32 %v4841_v56, 0.0  ;;  %v4275_v50 = vpop.permute.xlu1 %4274  ;;  %4594 = vperm.xlu1 %5655, %v3324_v19   ;;  %v11375_v63 = vld [vmem:[#allocation204_spill] sm:$0xff]  ;;  %v2965_v54 = vld [vmem:[%s8932_s25 + $0x278] sm:$0xff]  ;;  %v11376_v19 = vld [vmem:[#allocation71_spill] sm:$0xff] }
 0x39e   : > { %v4019_v59 = vmul.f32 %v6174_v26, %v8720_v27  ;;  %v4020_v40 = vmul.f32 %v6175_v23, %v8720_v27  ;;  %v5104_v57 = vmax.f32 %v4862_v41, 0.0  ;;  %v5105_v16 = vmax.f32 %v4863_v22, 0.0  ;;  %v4330_v3 = vpop.permute.xlu0 %4329  ;;  %v6177_v22 = vld [vmem:[%s6427_s18 + $0xd8] sm:$0xff]  ;;  %v2976_v37 = vld [vmem:[%s8932_s25 + $0x2d0] sm:$0xff] }
 0x39f   : > { %5324 = vst [vmem:[%s9293_s28 + $0x90] sm:$0xff] %v5082_v28  ;;  %5325 = vst.msk [vmem:[%s9293_s28 + $0x98] sm:$0xff] %vm465_vm0, %v5083_v58  ;;  %v4844_v18 = vadd.f32 %v4275_v50, %v3997_v55  ;;  %v4845_v49 = vadd.f32 %v4275_v50, %v3998_v21  ;;  %v3326_v31 = vsub.f32 %v2963_v35, %v3205_v7  ;;  %v11377_v7 = vld [vmem:[#allocation202_spill] sm:$0xff]  ;;  %v11378_v23 = vld [vmem:[#allocation60_spill] sm:$0xff] }
 0x3a0   : > { %v3207_v9 = vmul.f32 %v11375_v63, %v11374_v30  ;;  %5346 = vst [vmem:[%s9293_s28 + $0x140] sm:$0xff] %v5104_v57  ;;  %5347 = vst.msk [vmem:[%s9293_s28 + $0x148] sm:$0xff] %vm465_vm0, %v5105_v16  ;;  %v4866_v27 = vadd.f32 %v4330_v3, %v4019_v59  ;;  %v4867_v38 = vadd.f32 %v4330_v3, %v4020_v40  ;;  %4649 = vperm.xlu0 %5654, %v3335_v6   ;;  %v6178_v55 = vld [vmem:[%s6427_s18 + $0x180] sm:$0xff]  ;;  %v11381_v30 = vld [vmem:[#allocation157_spill] sm:$0xff] }
 0x3a1   : > { %v3337_v56 = vsub.f32 %v2974_v5, %v3216_v10  ;;  %v3218_v14 = vmul.f32 %v8757_v34, %v11376_v19  ;;  %v4001_v41 = vmul.f32 %v6176_v12, %v11377_v7  ;;  %v4002_v35 = vmul.f32 %v6177_v22, %v11377_v7  ;;  %v6179_v10 = vld [vmem:[%s6427_s18 + $0x188] sm:$0xff]  ;;  %v4285_v28 = vpop.permute.xlu1 %4284  ;;  %4604 = vperm.xlu1 %5655, %v3326_v31   ;;  %v11379_v40 = vld [vmem:[#allocation206_spill] sm:$0xff]  ;;  %v6180_v31 = vld [vmem:[%s6427_s18 + $0xf0] sm:$0xff] }
 0x3a2   : > { %v5086_v32 = vmax.f32 %v4844_v18, 0.0  ;;  %v5087_v43 = vmax.f32 %v4845_v49, 0.0  ;;  %v4023_v6 = vmul.f32 %v6178_v55, %v8743_v20  ;;  %v4024_v13 = vmul.f32 %v6179_v10, %v8743_v20  ;;  %v4340_v26 = vpop.permute.xlu0 %4339  ;;  %v2967_v18 = vld [vmem:[%s8932_s25 + $0x288] sm:$0xff]  ;;  %v11380_v49 = vld [vmem:[#allocation73_spill] sm:$0xff]  ;;  %v2978_v19 = vld [vmem:[%s8932_s25 + $0x2e0] sm:$0xff] }
 0x3a3   : > { %v5108_v34 = vmax.f32 %v4866_v27, 0.0  ;;  %v5109_v21 = vmax.f32 %v4867_v38, 0.0  ;;  %v4848_v58 = vadd.f32 %v4285_v28, %v4001_v41  ;;  %v4849_v5 = vadd.f32 %v4285_v28, %v4002_v35  ;;  %v6182_v12 = vld [vmem:[%s6427_s18 + $0x1a0] sm:$0xff]  ;;  %v11384_v28 = vld [vmem:[#allocation75_spill] sm:$0xff] }
 0x3a4   : > { %5328 = vst [vmem:[%s9293_s28 + $0xb0] sm:$0xff] %v5086_v32  ;;  %5329 = vst.msk [vmem:[%s9293_s28 + $0xb8] sm:$0xff] %vm465_vm0, %v5087_v43  ;;  %v3328_v59 = vsub.f32 %v2965_v54, %v3207_v9  ;;  %v3209_v57 = vmul.f32 %v11379_v40, %v11378_v23  ;;  %v4870_v20 = vadd.f32 %v4340_v26, %v4023_v6  ;;  %4659 = vperm.xlu0 %5654, %v3337_v56   ;;  %v6181_v9 = vld [vmem:[%s6427_s18 + $0xf8] sm:$0xff]  ;;  %v11382_v55 = vld [vmem:[#allocation62_spill] sm:$0xff] }
 0x3a5   : > { %5350 = vst [vmem:[%s9293_s28 + $0x160] sm:$0xff] %v5108_v34  ;;  %5351 = vst.msk [vmem:[%s9293_s28 + $0x168] sm:$0xff] %vm465_vm0, %v5109_v21  ;;  %v4871_v16 = vadd.f32 %v4340_v26, %v4024_v13  ;;  %v3339_v50 = vsub.f32 %v2976_v37, %v3218_v14  ;;  %v3220_v3 = vmul.f32 %v8781_v62, %v11380_v49  ;;  %v5090_v38 = vmax.f32 %v4848_v58, 0.0  ;;  %v6183_v14 = vld [vmem:[%s6427_s18 + $0x1a8] sm:$0xff]  ;;  %v4295_v22 = vpop.permute.xlu1 %4294  ;;  %v11383_v6 = vld [vmem:[#allocation208_spill] sm:$0xff] }
 0x3a6   : > { %v4005_v63 = vmul.f32 %v6180_v31, %v11381_v30  ;;  %v4006_v27 = vmul.f32 %v6181_v9, %v11381_v30  ;;  %v5091_v54 = vmax.f32 %v4849_v5, 0.0  ;;  %v4027_v56 = vmul.f32 %v6182_v12, %v8767_v17  ;;  %4614 = vperm.xlu1 %5655, %v3328_v59   ;;  %v4350_v43 = vpop.permute.xlu0 %4349  ;;  %v2969_v21 = vld [vmem:[%s8932_s25 + $0x298] sm:$0xff]  ;;  %v6184_v5 = vld [vmem:[%s6427_s18 + $0x110] sm:$0xff]  ;;  %v11385_v26 = vld [vmem:[#allocation159_spill] sm:$0xff] }
 0x3a7   : > { %v4028_v7 = vmul.f32 %v6183_v14, %v8767_v17  ;;  %v5112_v62 = vmax.f32 %v4870_v20, 0.0  ;;  %v5113_v41 = vmax.f32 %v4871_v16, 0.0  ;;  %5332 = vst [vmem:[%s9293_s28 + $0xd0] sm:$0xff] %v5090_v38  ;;  %v3330_v37 = vsub.f32 %v2967_v18, %v3209_v57  ;;  %v6185_v23 = vld [vmem:[%s6427_s18 + $0x118] sm:$0xff]  ;;  %v2980_v16 = vld [vmem:[%s8932_s25 + $0x2f0] sm:$0xff]  ;;  %v6186_v18 = vld [vmem:[%s6427_s18 + $0x1c0] sm:$0xff] }
 0x3a8   : > { %5333 = vst.msk [vmem:[%s9293_s28 + $0xd8] sm:$0xff] %vm465_vm0, %v5091_v54  ;;  %v4852_v35 = vadd.f32 %v4295_v22, %v4005_v63  ;;  %v4853_v32 = vadd.f32 %v4295_v22, %v4006_v27  ;;  %v3211_v10 = vmul.f32 %v11383_v6, %v11382_v55  ;;  %v4874_v17 = vadd.f32 %v4350_v43, %v4027_v56  ;;  %v6187_v49 = vld [vmem:[%s6427_s18 + $0x1c8] sm:$0xff]  ;;  %v11386_v54 = vld [vmem:[#allocation64_spill] sm:$0xff] }
 0x3a9   : > { %5354 = vst [vmem:[%s9293_s28 + $0x180] sm:$0xff] %v5112_v62  ;;  %5355 = vst.msk [vmem:[%s9293_s28 + $0x188] sm:$0xff] %vm465_vm0, %v5113_v41  ;;  %v4875_v13 = vadd.f32 %v4350_v43, %v4028_v7  ;;  %4669 = vperm.xlu0 %5654, %v3339_v50   ;;  %v3341_v34 = vsub.f32 %v2978_v19, %v3220_v3  ;;  %v3222_v58 = vmul.f32 %v8805_v33, %v11384_v28  ;;  %v4305_v30 = vpop.permute.xlu1 %4304  ;;  %v11387_v19 = vld [vmem:[#allocation210_spill] sm:$0xff]  ;;  %v2971_v7 = vld [vmem:[%s8932_s25 + $0x2a8] sm:$0xff] }
 0x3aa   : > { %v4009_v59 = vmul.f32 %v6184_v5, %v11385_v26  ;;  %v4010_v40 = vmul.f32 %v6185_v23, %v11385_v26  ;;  %v5094_v57 = vmax.f32 %v4852_v35, 0.0  ;;  %v5095_v20 = vmax.f32 %v4853_v32, 0.0  ;;  %4624 = vperm.xlu1 %5655, %v3330_v37   ;;  %v4360_v27 = vpop.permute.xlu0 %4359  ;;  %v11388_v62 = vld [vmem:[#allocation77_spill] sm:$0xff]  ;;  %v6188_v22 = vld [vmem:[%s6427_s18 + $0x130] sm:$0xff] }
 0x3ab   : > { %v4031_v50 = vmul.f32 %v6186_v18, %v8791_v1  ;;  %v4032_v3 = vmul.f32 %v6187_v49, %v8791_v1  ;;  %v5116_v33 = vmax.f32 %v4874_v17, 0.0  ;;  %v5117_v31 = vmax.f32 %v4875_v13, 0.0  ;;  %v11389_v35 = vld [vmem:[#allocation161_spill] sm:$0xff]  ;;  %v6190_v17 = vld [vmem:[%s6427_s18 + $0x1e0] sm:$0xff]  ;;  %v11392_v49 = vld [vmem:[#allocation79_spill] sm:$0xff] }
 0x3ac   : > { %5336 = vst [vmem:[%s9293_s28 + $0xf0] sm:$0xff] %v5094_v57  ;;  %5337 = vst.msk [vmem:[%s9293_s28 + $0xf8] sm:$0xff] %vm465_vm0, %v5095_v20  ;;  %v4856_v63 = vadd.f32 %v4305_v30, %v4009_v59  ;;  %v4857_v9 = vadd.f32 %v4305_v30, %v4010_v40  ;;  %v3332_v38 = vsub.f32 %v2969_v21, %v3211_v10  ;;  %v6189_v43 = vld [vmem:[%s6427_s18 + $0x138] sm:$0xff]  ;;  %v2982_v10 = vld [vmem:[%s8932_s25 + $0x300] sm:$0xff] }
 0x3ad   : > { %v3213_v12 = vmul.f32 %v11387_v19, %v11386_v54  ;;  %5358 = vst [vmem:[%s9293_s28 + $0x1a0] sm:$0xff] %v5116_v33  ;;  %5359 = vst.msk [vmem:[%s9293_s28 + $0x1a8] sm:$0xff] %vm465_vm0, %v5117_v31  ;;  %v4878_v1 = vadd.f32 %v4360_v27, %v4031_v50  ;;  %v4879_v56 = vadd.f32 %v4360_v27, %v4032_v3  ;;  %4679 = vperm.xlu0 %5654, %v3341_v34   ;;  %v6191_v34 = vld [vmem:[%s6427_s18 + $0x1e8] sm:$0xff]  ;;  %v11390_v40 = vld [vmem:[#allocation66_spill] sm:$0xff] }
 0x3ae   : > { %v3343_v14 = vsub.f32 %v2980_v16, %v3222_v58  ;;  %v3224_v41 = vmul.f32 %v8826_v51, %v11388_v62  ;;  %v4013_v32 = vmul.f32 %v6188_v22, %v11389_v35  ;;  %v4014_v37 = vmul.f32 %v6189_v43, %v11389_v35  ;;  %v4315_v58 = vpop.permute.xlu1 %4314  ;;  %4634 = vperm.xlu1 %5655, %v3332_v38   ;;  %v4370_v59 = vpop.permute.xlu0 %4369  ;;  %v11391_v57 = vld [vmem:[#allocation165_spill] sm:$0xff]  ;;  %v6192_v33 = vld [vmem:[%s6427_s18 + $0x150] sm:$0xff]  ;;  %v11393_v31 = vld [vmem:[#allocation122_spill] sm:$0xff] }
 0x3af   : > { %v5098_v55 = vmax.f32 %v4856_v63, 0.0  ;;  %v5099_v6 = vmax.f32 %v4857_v9, 0.0  ;;  %v4035_v13 = vmul.f32 %v6190_v17, %v8812_v29  ;;  %v4036_v21 = vmul.f32 %v6191_v34, %v8812_v29  ;;  %v2973_v50 = vld [vmem:[%s8932_s25 + $0x2b8] sm:$0xff]  ;;  %v2984_v54 = vld [vmem:[%s8932_s25 + $0x310] sm:$0xff]  ;;  %v6194_v19 = vld [vmem:[%s6427_s18 + $0x200] sm:$0xff] }
 0x3b0   : > { %v5120_v51 = vmax.f32 %v4878_v1, 0.0  ;;  %v5121_v28 = vmax.f32 %v4879_v56, 0.0  ;;  %v4860_v5 = vadd.f32 %v4315_v58, %v4013_v32  ;;  %v4861_v26 = vadd.f32 %v4315_v58, %v4014_v37  ;;  %v6193_v63 = vld [vmem:[%s6427_s18 + $0x158] sm:$0xff]  ;;  %v6195_v1 = vld [vmem:[%s6427_s18 + $0x208] sm:$0xff]  ;;  %v11394_v32 = vld [vmem:[#allocation68_spill] sm:$0xff] }
 0x3b1   : > { %5340 = vst [vmem:[%s9293_s28 + $0x110] sm:$0xff] %v5098_v55  ;;  %5341 = vst.msk [vmem:[%s9293_s28 + $0x118] sm:$0xff] %vm465_vm0, %v5099_v6  ;;  %v3334_v23 = vsub.f32 %v2971_v7, %v3213_v12  ;;  %v3215_v20 = vmul.f32 %v11391_v57, %v11390_v40  ;;  %v4882_v29 = vadd.f32 %v4370_v59, %v4035_v13  ;;  %4689 = vperm.xlu0 %5654, %v3343_v14   ;;  %v11395_v43 = vld [vmem:[#allocation212_spill] sm:$0xff]  ;;  %v11396_v17 = vld [vmem:[#allocation81_spill] sm:$0xff] }
 0x3b2   : > { %5362 = vst [vmem:[%s9293_s28 + $0x1c0] sm:$0xff] %v5120_v51  ;;  %5363 = vst.msk [vmem:[%s9293_s28 + $0x1c8] sm:$0xff] %vm465_vm0, %v5121_v28  ;;  %v4883_v16 = vadd.f32 %v4370_v59, %v4036_v21  ;;  %v3345_v18 = vsub.f32 %v2982_v10, %v3224_v41  ;;  %v3226_v3 = vmul.f32 %v8841_v52, %v11392_v49  ;;  %v5102_v27 = vmax.f32 %v4860_v5, 0.0  ;;  %v4325_v7 = vpop.permute.xlu1 %4324  ;;  %v4380_v22 = vpop.permute.xlu0 %4379  ;;  %v2975_v10 = vld [vmem:[%s8932_s25 + $0x2c8] sm:$0xff]  ;;  %v6196_v34 = vld [vmem:[%s6427_s18 + $0x170] sm:$0xff] }
 0x3b3   : > { %v4017_v30 = vmul.f32 %v6192_v33, %v11393_v31  ;;  %v4018_v9 = vmul.f32 %v6193_v63, %v11393_v31  ;;  %v5103_v38 = vmax.f32 %v4861_v26, 0.0  ;;  %v4039_v12 = vmul.f32 %v6194_v19, %v8831_v46  ;;  %4644 = vperm.xlu1 %5655, %v3334_v23   ;;  %v11397_v21 = vld [vmem:[#allocation211_spill] sm:$0xff]  ;;  %v6197_v28 = vld [vmem:[%s6427_s18 + $0x178] sm:$0xff]  ;;  %v2986_v59 = vld [vmem:[%s8932_s25 + $0x320] sm:$0xff] }
 0x3b4   : > { %v4040_v56 = vmul.f32 %v6195_v1, %v8831_v46  ;;  %v5124_v52 = vmax.f32 %v4882_v29, 0.0  ;;  %v5125_v14 = vmax.f32 %v4883_v16, 0.0  ;;  %5344 = vst [vmem:[%s9293_s28 + $0x130] sm:$0xff] %v5102_v27  ;;  %v3336_v35 = vsub.f32 %v2973_v50, %v3215_v20  ;;  %v6198_v23 = vld [vmem:[%s6427_s18 + $0x220] sm:$0xff]  ;;  %v6199_v57 = vld [vmem:[%s6427_s18 + $0x228] sm:$0xff]  ;;  %v2977_v27 = vld [vmem:[%s8932_s25 + $0x2d8] sm:$0xff] }
 0x3b5   : > { %5345 = vst.msk [vmem:[%s9293_s28 + $0x138] sm:$0xff] %vm465_vm0, %v5103_v38  ;;  %v4864_v62 = vadd.f32 %v4325_v7, %v4017_v30  ;;  %v4865_v41 = vadd.f32 %v4325_v7, %v4018_v9  ;;  %v3217_v37 = vmul.f32 %v11395_v43, %v11394_v32  ;;  %v4886_v46 = vadd.f32 %v4380_v22, %v4039_v12  ;;  %v11398_v33 = vld [vmem:[#allocation70_spill] sm:$0xff]  ;;  %v11400_v38 = vld [vmem:[#allocation83_spill] sm:$0xff]  ;;  %v6200_v19 = vld [vmem:[%s6427_s18 + $0x190] sm:$0xff] }
 0x3b6   : > { %5366 = vst [vmem:[%s9293_s28 + $0x1e0] sm:$0xff] %v5124_v52  ;;  %5367 = vst.msk [vmem:[%s9293_s28 + $0x1e8] sm:$0xff] %vm465_vm0, %v5125_v14  ;;  %v4887_v55 = vadd.f32 %v4380_v22, %v4040_v56  ;;  %4699 = vperm.xlu0 %5654, %v3345_v18   ;;  %v3347_v6 = vsub.f32 %v2984_v54, %v3226_v3  ;;  %v3228_v13 = vmul.f32 %v8857_v36, %v11396_v17  ;;  %v4335_v16 = vpop.permute.xlu1 %4334  ;;  %v4390_v49 = vpop.permute.xlu0 %4389  ;;  %v11399_v31 = vld [vmem:[#allocation214_spill] sm:$0xff]  ;;  %v11401_v12 = vld [vmem:[#allocation213_spill] sm:$0xff] }
 0x3b7   : > { %v4021_v51 = vmul.f32 %v6196_v34, %v11397_v21  ;;  %v4022_v58 = vmul.f32 %v6197_v28, %v11397_v21  ;;  %v5106_v5 = vmax.f32 %v4864_v62, 0.0  ;;  %v5107_v26 = vmax.f32 %v4865_v41, 0.0  ;;  %4654 = vperm.xlu1 %5655, %v3336_v35   ;;  %v6201_v56 = vld [vmem:[%s6427_s18 + $0x198] sm:$0xff]  ;;  %v2988_v62 = vld [vmem:[%s8932_s25 + $0x330] sm:$0xff]  ;;  %v6202_v41 = vld [vmem:[%s6427_s18 + $0x240] sm:$0xff] }
 0x3b8   : > { %v4043_v40 = vmul.f32 %v6198_v23, %v8848_v61  ;;  %v4044_v20 = vmul.f32 %v6199_v57, %v8848_v61  ;;  %v5128_v36 = vmax.f32 %v4886_v46, 0.0  ;;  %v5129_v29 = vmax.f32 %v4887_v55, 0.0  ;;  %v6203_v35 = vld [vmem:[%s6427_s18 + $0x248] sm:$0xff]  ;;  %v11402_v17 = vld [vmem:[#allocation72_spill] sm:$0xff] }
 0x3b9   : > { %5348 = vst [vmem:[%s9293_s28 + $0x150] sm:$0xff] %v5106_v5  ;;  %5349 = vst.msk [vmem:[%s9293_s28 + $0x158] sm:$0xff] %vm465_vm0, %v5107_v26  ;;  %v4868_v18 = vadd.f32 %v4335_v16, %v4021_v51  ;;  %v4869_v50 = vadd.f32 %v4335_v16, %v4022_v58  ;;  %v3338_v3 = vsub.f32 %v2975_v10, %v3217_v37  ;;  %v2979_v28 = vld [vmem:[%s8932_s25 + $0x2e8] sm:$0xff]  ;;  %v11404_v58 = vld [vmem:[#allocation85_spill] sm:$0xff] }
 0x3ba   : > { %v3219_v30 = vmul.f32 %v11399_v31, %v11398_v33  ;;  %5370 = vst [vmem:[%s9293_s28 + $0x200] sm:$0xff] %v5128_v36  ;;  %5371 = vst.msk [vmem:[%s9293_s28 + $0x208] sm:$0xff] %vm465_vm0, %v5129_v29  ;;  %v4890_v61 = vadd.f32 %v4390_v49, %v4043_v40  ;;  %v4891_v63 = vadd.f32 %v4390_v49, %v4044_v20  ;;  %4709 = vperm.xlu0 %5654, %v3347_v6   ;;  %v4345_v37 = vpop.permute.xlu1 %4344  ;;  %v4400_v6 = vpop.permute.xlu0 %4399  ;;  %v6204_v26 = vld [vmem:[%s6427_s18 + $0x1b0] sm:$0xff]  ;;  %v6205_v40 = vld [vmem:[%s6427_s18 + $0x1b8] sm:$0xff] }
 0x3bb   : > { %v3349_v9 = vsub.f32 %v2986_v59, %v3228_v13  ;;  %v3230_v54 = vmul.f32 %v8875_v47, %v11400_v38  ;;  %v4025_v1 = vmul.f32 %v6200_v19, %v11401_v12  ;;  %v4026_v52 = vmul.f32 %v6201_v56, %v11401_v12  ;;  %4664 = vperm.xlu1 %5655, %v3338_v3   ;;  %v11403_v13 = vld [vmem:[#allocation216_spill] sm:$0xff]  ;;  %v11405_v59 = vld [vmem:[#allocation215_spill] sm:$0xff]  ;;  %v2990_v29 = vld [vmem:[%s8932_s25 + $0x340] sm:$0xff] }
 0x3bc   : > { %v5110_v14 = vmax.f32 %v4868_v18, 0.0  ;;  %v5111_v7 = vmax.f32 %v4869_v50, 0.0  ;;  %v4047_v22 = vmul.f32 %v6202_v41, %v8866_v48  ;;  %v4048_v32 = vmul.f32 %v6203_v35, %v8866_v48  ;;  %v6206_v16 = vld [vmem:[%s6427_s18 + $0x260] sm:$0xff]  ;;  %v6207_v50 = vld [vmem:[%s6427_s18 + $0x268] sm:$0xff]  ;;  %v2981_v12 = vld [vmem:[%s8932_s25 + $0x2f8] sm:$0xff] }
 0x3bd   : > { %v5132_v47 = vmax.f32 %v4890_v61, 0.0  ;;  %v5133_v43 = vmax.f32 %v4891_v63, 0.0  ;;  %v4872_v46 = vadd.f32 %v4345_v37, %v4025_v1  ;;  %v4873_v55 = vadd.f32 %v4345_v37, %v4026_v52  ;;  %v11408_v1 = vld [vmem:[#allocation87_spill] sm:$0xff]  ;;  %v6208_v52 = vld [vmem:[%s6427_s18 + $0x1d0] sm:$0xff] }
 0x3be   : > { %5352 = vst [vmem:[%s9293_s28 + $0x170] sm:$0xff] %v5110_v14  ;;  %5353 = vst.msk [vmem:[%s9293_s28 + $0x178] sm:$0xff] %vm465_vm0, %v5111_v7  ;;  %v3340_v10 = vsub.f32 %v2977_v27, %v3219_v30  ;;  %v3221_v34 = vmul.f32 %v11403_v13, %v11402_v17  ;;  %v4894_v48 = vadd.f32 %v4400_v6, %v4047_v22  ;;  %4719 = vperm.xlu0 %5654, %v3349_v9   ;;  %v4355_v33 = vpop.permute.xlu1 %4354  ;;  %v4410_v61 = vpop.permute.xlu0 %4409  ;;  %v11406_v9 = vld [vmem:[#allocation74_spill] sm:$0xff]  ;;  %v11409_v14 = vld [vmem:[#allocation217_spill] sm:$0xff] }
 0x3bf   : > { %5374 = vst [vmem:[%s9293_s28 + $0x220] sm:$0xff] %v5132_v47  ;;  %5375 = vst.msk [vmem:[%s9293_s28 + $0x228] sm:$0xff] %vm465_vm0, %v5133_v43  ;;  %v4895_v21 = vadd.f32 %v4400_v6, %v4048_v32  ;;  %v3351_v51 = vsub.f32 %v2988_v62, %v3230_v54  ;;  %v3232_v5 = vmul.f32 %v8893_v8, %v11404_v58  ;;  %v5114_v20 = vmax.f32 %v4872_v46, 0.0  ;;  %v11407_v27 = vld [vmem:[#allocation218_spill] sm:$0xff]  ;;  %v6209_v62 = vld [vmem:[%s6427_s18 + $0x1d8] sm:$0xff] }
 0x3c0   : > { %v4029_v23 = vmul.f32 %v6204_v26, %v11405_v59  ;;  %v4030_v57 = vmul.f32 %v6205_v40, %v11405_v59  ;;  %v5115_v36 = vmax.f32 %v4873_v55, 0.0  ;;  %v4051_v18 = vmul.f32 %v6206_v16, %v8884_v42  ;;  %4674 = vperm.xlu1 %5655, %v3340_v10   ;;  %v2992_v32 = vld [vmem:[%s8932_s25 + $0x350] sm:$0xff]  ;;  %v6210_v47 = vld [vmem:[%s6427_s18 + $0x280] sm:$0xff]  ;;  %v6211_v37 = vld [vmem:[%s6427_s18 + $0x288] sm:$0xff] }
 0x3c1   : > { %v4052_v49 = vmul.f32 %v6207_v50, %v8884_v42  ;;  %v5136_v8 = vmax.f32 %v4894_v48, 0.0  ;;  %v5137_v3 = vmax.f32 %v4895_v21, 0.0  ;;  %5356 = vst [vmem:[%s9293_s28 + $0x190] sm:$0xff] %v5114_v20  ;;  %v3342_v63 = vsub.f32 %v2979_v28, %v3221_v34  ;;  %v11410_v48 = vld [vmem:[#allocation76_spill] sm:$0xff]  ;;  %v2994_v16 = vld [vmem:[%s8932_s25 + $0x360] sm:$0xff] }
 0x3c2   : > { %5357 = vst.msk [vmem:[%s9293_s28 + $0x198] sm:$0xff] %vm465_vm0, %v5115_v36  ;;  %v4876_v31 = vadd.f32 %v4355_v33, %v4029_v23  ;;  %v4877_v30 = vadd.f32 %v4355_v33, %v4030_v57  ;;  %v3223_v38 = vmul.f32 %v11407_v27, %v11406_v9  ;;  %v4898_v42 = vadd.f32 %v4410_v61, %v4051_v18  ;;  %v4365_v6 = vpop.permute.xlu1 %4364  ;;  %v4420_v13 = vpop.permute.xlu0 %4419  ;;  %v11411_v21 = vld [vmem:[#allocation220_spill] sm:$0xff]  ;;  %v11412_v23 = vld [vmem:[#allocation219_spill] sm:$0xff]  ;;  %v6213_v57 = vld [vmem:[%s6427_s18 + $0x1f8] sm:$0xff] }
 0x3c3   : > { %5378 = vst [vmem:[%s9293_s28 + $0x240] sm:$0xff] %v5136_v8  ;;  %5379 = vst.msk [vmem:[%s9293_s28 + $0x248] sm:$0xff] %vm465_vm0, %v5137_v3  ;;  %v4899_v54 = vadd.f32 %v4410_v61, %v4052_v49  ;;  %4729 = vperm.xlu0 %5654, %v3351_v51   ;;  %v3353_v19 = vsub.f32 %v2990_v29, %v3232_v5  ;;  %v3234_v56 = vmul.f32 %v8911_v15, %v11408_v1  ;;  %v2983_v5 = vld [vmem:[%s8932_s25 + $0x308] sm:$0xff]  ;;  %v6212_v59 = vld [vmem:[%s6427_s18 + $0x1f0] sm:$0xff] }
 0x3c4   : > { %v4033_v7 = vmul.f32 %v6208_v52, %v11409_v14  ;;  %v4034_v41 = vmul.f32 %v6209_v62, %v11409_v14  ;;  %v5118_v22 = vmax.f32 %v4876_v31, 0.0  ;;  %v5119_v35 = vmax.f32 %v4877_v30, 0.0  ;;  %4684 = vperm.xlu1 %5655, %v3342_v63   ;;  %v6214_v18 = vld [vmem:[%s6427_s18 + $0x2a0] sm:$0xff]  ;;  %v6215_v49 = vld [vmem:[%s6427_s18 + $0x2a8] sm:$0xff]  ;;  %v11417_v52 = vld [vmem:[#allocation221_spill] sm:$0xff] }
 0x3c5   : > { %v4055_v43 = vmul.f32 %v6210_v47, %v8902_v53  ;;  %v4056_v46 = vmul.f32 %v6211_v37, %v8902_v53  ;;  %v5140_v15 = vmax.f32 %v4898_v42, 0.0  ;;  %v5141_v55 = vmax.f32 %v4899_v54, 0.0  ;;  %v11413_v63 = vld [vmem:[#allocation78_spill] sm:$0xff]  ;;  %v2985_v54 = vld [vmem:[%s8932_s25 + $0x318] sm:$0xff]  ;;  %v6219_v37 = vld [vmem:[%s6427_s18 + $0x2c8] sm:$0xff] }
 0x3c6   : > { %5360 = vst [vmem:[%s9293_s28 + $0x1b0] sm:$0xff] %v5118_v22  ;;  %5361 = vst.msk [vmem:[%s9293_s28 + $0x1b8] sm:$0xff] %vm465_vm0, %v5119_v35  ;;  %v4880_v10 = vadd.f32 %v4365_v6, %v4033_v7  ;;  %v4881_v17 = vadd.f32 %v4365_v6, %v4034_v41  ;;  %v3344_v34 = vsub.f32 %v2981_v12, %v3223_v38  ;;  %v4375_v3 = vpop.permute.xlu1 %4374  ;;  %v4430_v30 = vpop.permute.xlu0 %4429  ;;  %v11414_v9 = vld [vmem:[#allocation222_spill] sm:$0xff]  ;;  %v11416_v12 = vld [vmem:[#allocation145_spill] sm:$0xff] }
 0x3c7   : > { %v3225_v51 = vmul.f32 %v11411_v21, %v11410_v48  ;;  %5382 = vst [vmem:[%s9293_s28 + $0x260] sm:$0xff] %v5140_v15  ;;  %5383 = vst.msk [vmem:[%s9293_s28 + $0x268] sm:$0xff] %vm465_vm0, %v5141_v55  ;;  %v4902_v53 = vadd.f32 %v4420_v13, %v4055_v43  ;;  %v4903_v28 = vadd.f32 %v4420_v13, %v4056_v46  ;;  %4739 = vperm.xlu0 %5654, %v3353_v19   ;;  %v11415_v19 = vld [vmem:[#allocation91_spill] sm:$0xff]  ;;  %v6217_v7 = vld [vmem:[%s6427_s18 + $0x218] sm:$0xff] }
 0x3c8   : > { %v3355_v58 = vsub.f32 %v2992_v32, %v3234_v56  ;;  %v3236_v26 = vmul.f32 %v8925_v25, %v8778_v24  ;;  %v4037_v40 = vmul.f32 %v6212_v59, %v11412_v23  ;;  %v4038_v20 = vmul.f32 %v6213_v57, %v11412_v23  ;;  %4694 = vperm.xlu1 %5655, %v3344_v34   ;;  %v6216_v56 = vld [vmem:[%s6427_s18 + $0x210] sm:$0xff]  ;;  %v6218_v32 = vld [vmem:[%s6427_s18 + $0x2c0] sm:$0xff]  ;;  %v11418_v47 = vld [vmem:[#allocation241_spill] sm:$0xff] }
 0x3c9   : > { %v5122_v36 = vmax.f32 %v4880_v10, 0.0  ;;  %v5123_v29 = vmax.f32 %v4881_v17, 0.0  ;;  %v4059_v50 = vmul.f32 %v6214_v18, %v8917_v2  ;;  %v4060_v8 = vmul.f32 %v6215_v49, %v8917_v2  ;;  %v2996_v35 = vld [vmem:[%s8932_s25 + $0x370] sm:$0xff]  ;;  %v11422_v59 = vld [vmem:[#allocation143_spill] sm:$0xff]  ;;  %v6222_v49 = vld [vmem:[%s6427_s18 + $0x2e0] sm:$0xff] }
 0x3ca   : > { %v5144_v24 = vmax.f32 %v4902_v53, 0.0  ;;  %v5145_v25 = vmax.f32 %v4903_v28, 0.0  ;;  %v4884_v33 = vadd.f32 %v4375_v3, %v4037_v40  ;;  %v4885_v31 = vadd.f32 %v4375_v3, %v4038_v20  ;;  %v4385_v6 = vpop.permute.xlu1 %4384  ;;  %v4440_v13 = vpop.permute.xlu0 %4439  ;;  %v11419_v48 = vld [vmem:[#allocation80_spill] sm:$0xff]  ;;  %v11423_v57 = vld [vmem:[#allocation223_spill] sm:$0xff] }
 0x3cb   : > { %5364 = vst [vmem:[%s9293_s28 + $0x1d0] sm:$0xff] %v5122_v36  ;;  %5365 = vst.msk [vmem:[%s9293_s28 + $0x1d8] sm:$0xff] %vm465_vm0, %v5123_v29  ;;  %v3346_v61 = vsub.f32 %v2983_v5, %v3225_v51  ;;  %v3227_v27 = vmul.f32 %v11414_v9, %v11413_v63  ;;  %v4906_v2 = vadd.f32 %v4430_v30, %v4059_v50  ;;  %4749 = vperm.xlu0 %5654, %v3355_v58   ;;  %v11420_v21 = vld [vmem:[#allocation224_spill] sm:$0xff]  ;;  %v2987_v5 = vld [vmem:[%s8932_s25 + $0x328] sm:$0xff] }
 0x3cc   : > { %5386 = vst [vmem:[%s9293_s28 + $0x280] sm:$0xff] %v5144_v24  ;;  %5387 = vst.msk [vmem:[%s9293_s28 + $0x288] sm:$0xff] %vm465_vm0, %v5145_v25  ;;  %v4907_v38 = vadd.f32 %v4430_v30, %v4060_v8  ;;  %v3357_v42 = vsub.f32 %v2994_v16, %v3236_v26  ;;  %v3238_v1 = vmul.f32 %v11416_v12, %v11415_v19  ;;  %v5126_v41 = vmax.f32 %v4884_v33, 0.0  ;;  %v11421_v26 = vld [vmem:[#allocation93_spill] sm:$0xff]  ;;  %v6220_v40 = vld [vmem:[%s6427_s18 + $0x230] sm:$0xff] }
 0x3cd   : > { %v4041_v14 = vmul.f32 %v6216_v56, %v11417_v52  ;;  %v4042_v62 = vmul.f32 %v6217_v7, %v11417_v52  ;;  %v5127_v22 = vmax.f32 %v4885_v31, 0.0  ;;  %v4063_v43 = vmul.f32 %v6218_v32, %v11418_v47  ;;  %4704 = vperm.xlu1 %5655, %v3346_v61   ;;  %v6221_v36 = vld [vmem:[%s6427_s18 + $0x238] sm:$0xff]  ;;  %v2998_v50 = vld [vmem:[%s8932_s25 + $0x380] sm:$0xff]  ;;  %v11424_v8 = vld [vmem:[#allocation243_spill] sm:$0xff] }
 0x3ce   : > { %v4064_v46 = vmul.f32 %v6219_v37, %v11418_v47  ;;  %v5148_v15 = vmax.f32 %v4906_v2, 0.0  ;;  %v5149_v55 = vmax.f32 %v4907_v38, 0.0  ;;  %5368 = vst [vmem:[%s9293_s28 + $0x1f0] sm:$0xff] %v5126_v41  ;;  %v3348_v34 = vsub.f32 %v2985_v54, %v3227_v27  ;;  %v6223_v25 = vld [vmem:[%s6427_s18 + $0x2e8] sm:$0xff]  ;;  %v4395_v30 = vpop.permute.xlu1 %4394  ;;  %v4450_v9 = vpop.permute.xlu0 %4449  ;;  %v11425_v2 = vld [vmem:[#allocation82_spill] sm:$0xff]  ;;  %v6224_v7 = vld [vmem:[%s6427_s18 + $0x250] sm:$0xff] }
 0x3cf   : > { %5369 = vst.msk [vmem:[%s9293_s28 + $0x1f8] sm:$0xff] %vm465_vm0, %v5127_v22  ;;  %v4888_v10 = vadd.f32 %v4385_v6, %v4041_v14  ;;  %v4889_v17 = vadd.f32 %v4385_v6, %v4042_v62  ;;  %v3229_v51 = vmul.f32 %v11420_v21, %v11419_v48  ;;  %v4910_v53 = vadd.f32 %v4440_v13, %v4063_v43  ;;  %v11426_v38 = vld [vmem:[#allocation98_spill] sm:$0xff]  ;;  %v11427_v56 = vld [vmem:[#allocation95_spill] sm:$0xff]  ;;  %v11429_v62 = vld [vmem:[#allocation225_spill] sm:$0xff] }
 0x3d0   : > { %5390 = vst [vmem:[%s9293_s28 + $0x2a0] sm:$0xff] %v5148_v15  ;;  %5391 = vst.msk [vmem:[%s9293_s28 + $0x2a8] sm:$0xff] %vm465_vm0, %v5149_v55  ;;  %v4911_v28 = vadd.f32 %v4440_v13, %v4064_v46  ;;  %4759 = vperm.xlu0 %5654, %v3357_v42   ;;  %v3359_v58 = vsub.f32 %v2996_v35, %v3238_v1  ;;  %v3240_v23 = vmul.f32 %v11422_v59, %v11421_v26  ;;  %v2989_v1 = vld [vmem:[%s8932_s25 + $0x338] sm:$0xff]  ;;  %v11428_v52 = vld [vmem:[#allocation151_spill] sm:$0xff] }
 0x3d1   : > { %v4045_v20 = vmul.f32 %v6220_v40, %v11423_v57  ;;  %v4046_v29 = vmul.f32 %v6221_v36, %v11423_v57  ;;  %v5130_v16 = vmax.f32 %v4888_v10, 0.0  ;;  %v5131_v18 = vmax.f32 %v4889_v17, 0.0  ;;  %4714 = vperm.xlu1 %5655, %v3348_v34   ;;  %v6225_v22 = vld [vmem:[%s6427_s18 + $0x258] sm:$0xff]  ;;  %v3000_v43 = vld [vmem:[%s8932_s25 + $0x390] sm:$0xff]  ;;  %v6226_v37 = vld [vmem:[%s6427_s18 + $0x300] sm:$0xff] }
 0x3d2   : > { %v4067_v24 = vmul.f32 %v6222_v49, %v11424_v8  ;;  %v4068_v3 = vmul.f32 %v6223_v25, %v11424_v8  ;;  %v5152_v33 = vmax.f32 %v4910_v53, 0.0  ;;  %v5153_v31 = vmax.f32 %v4911_v28, 0.0  ;;  %v11430_v46 = vld [vmem:[#allocation244_spill] sm:$0xff]  ;;  %v6227_v55 = vld [vmem:[%s6427_s18 + $0x308] sm:$0xff]  ;;  %v4405_v13 = vpop.permute.xlu1 %4404  ;;  %v4460_v21 = vpop.permute.xlu0 %4459  ;;  %v11433_v40 = vld [vmem:[#allocation97_spill] sm:$0xff] }
 0x3d3   : > { %5372 = vst [vmem:[%s9293_s28 + $0x210] sm:$0xff] %v5130_v16  ;;  %5373 = vst.msk [vmem:[%s9293_s28 + $0x218] sm:$0xff] %vm465_vm0, %v5131_v18  ;;  %v4892_v61 = vadd.f32 %v4395_v30, %v4045_v20  ;;  %v4893_v63 = vadd.f32 %v4395_v30, %v4046_v29  ;;  %v3350_v27 = vsub.f32 %v2987_v5, %v3229_v51  ;;  %v11431_v53 = vld [vmem:[#allocation84_spill] sm:$0xff]  ;;  %v11432_v28 = vld [vmem:[#allocation227_spill] sm:$0xff] }
 0x3d4   : > { %v3231_v42 = vmul.f32 %v11426_v38, %v11425_v2  ;;  %5394 = vst [vmem:[%s9293_s28 + $0x2c0] sm:$0xff] %v5152_v33  ;;  %5395 = vst.msk [vmem:[%s9293_s28 + $0x2c8] sm:$0xff] %vm465_vm0, %v5153_v31  ;;  %v4914_v54 = vadd.f32 %v4450_v9, %v4067_v24  ;;  %v4915_v19 = vadd.f32 %v4450_v9, %v4068_v3  ;;  %4769 = vperm.xlu0 %5654, %v3359_v58   ;;  %v11434_v57 = vld [vmem:[#allocation3_spill] sm:$0xff]  ;;  %v6228_v36 = vld [vmem:[%s6427_s18 + $0x270] sm:$0xff] }
 0x3d5   : > { %v3361_v12 = vsub.f32 %v2998_v50, %v3240_v23  ;;  %v3242_v14 = vmul.f32 %v11428_v52, %v11427_v56  ;;  %v4049_v41 = vmul.f32 %v6224_v7, %v11429_v62  ;;  %v4050_v35 = vmul.f32 %v6225_v22, %v11429_v62  ;;  %4724 = vperm.xlu1 %5655, %v3350_v27   ;;  %v2991_v23 = vld [vmem:[%s8932_s25 + $0x348] sm:$0xff]  ;;  %v11435_v29 = vld [vmem:[#allocation226_spill] sm:$0xff]  ;;  %v6229_v18 = vld [vmem:[%s6427_s18 + $0x278] sm:$0xff] }
 0x3d6   : > { %v5134_v32 = vmax.f32 %v4892_v61, 0.0  ;;  %v5135_v47 = vmax.f32 %v4893_v63, 0.0  ;;  %v4071_v15 = vmul.f32 %v6226_v37, %v11430_v46  ;;  %v4072_v6 = vmul.f32 %v6227_v55, %v11430_v46  ;;  %v3002_v24 = vld [vmem:[%s8932_s25 + $0x3a0] sm:$0xff]  ;;  %v11436_v3 = vld [vmem:[#allocation245_spill] sm:$0xff]  ;;  %v6231_v31 = vld [vmem:[%s6427_s18 + $0x328] sm:$0xff]  ;;  %v4415_v9 = vpop.permute.xlu1 %4414  ;;  %v4470_v38 = vpop.permute.xlu0 %4469 }
 0x3d7   : > { %v5156_v10 = vmax.f32 %v4914_v54, 0.0  ;;  %v5157_v17 = vmax.f32 %v4915_v19, 0.0  ;;  %v4896_v34 = vadd.f32 %v4405_v13, %v4049_v41  ;;  %v4897_v48 = vadd.f32 %v4405_v13, %v4050_v35  ;;  %v6230_v25 = vld [vmem:[%s6427_s18 + $0x320] sm:$0xff]  ;;  %v11438_v19 = vld [vmem:[#allocation229_spill] sm:$0xff]  ;;  %v11439_v7 = vld [vmem:[#allocation99_spill] sm:$0xff] }
 0x3d8   : > { %5376 = vst [vmem:[%s9293_s28 + $0x230] sm:$0xff] %v5134_v32  ;;  %5377 = vst.msk [vmem:[%s9293_s28 + $0x238] sm:$0xff] %vm465_vm0, %v5135_v47  ;;  %v3352_v51 = vsub.f32 %v2989_v1, %v3231_v42  ;;  %v3233_v58 = vmul.f32 %v11432_v28, %v11431_v53  ;;  %v4918_v5 = vadd.f32 %v4460_v21, %v4071_v15  ;;  %4779 = vperm.xlu0 %5654, %v3361_v12   ;;  %v11437_v54 = vld [vmem:[#allocation86_spill] sm:$0xff]  ;;  %v11440_v62 = vld [vmem:[#allocation5_spill] sm:$0xff] }
 0x3d9   : > { %5398 = vst [vmem:[%s9293_s28 + $0x2e0] sm:$0xff] %v5156_v10  ;;  %5399 = vst.msk [vmem:[%s9293_s28 + $0x2e8] sm:$0xff] %vm465_vm0, %v5157_v17  ;;  %v4919_v26 = vadd.f32 %v4460_v21, %v4072_v6  ;;  %v3363_v59 = vsub.f32 %v3000_v43, %v3242_v14  ;;  %v3244_v20 = vmul.f32 %v11434_v57, %v11433_v40  ;;  %v5138_v49 = vmax.f32 %v4896_v34, 0.0  ;;  %v2993_v14 = vld [vmem:[%s8932_s25 + $0x358] sm:$0xff]  ;;  %v6232_v22 = vld [vmem:[%s6427_s18 + $0x290] sm:$0xff] }
 0x3da   : > { %v4053_v16 = vmul.f32 %v6228_v36, %v11435_v29  ;;  %v4054_v50 = vmul.f32 %v6229_v18, %v11435_v29  ;;  %v5139_v8 = vmax.f32 %v4897_v48, 0.0  ;;  %v4075_v33 = vmul.f32 %v6230_v25, %v11436_v3  ;;  %4734 = vperm.xlu1 %5655, %v3352_v51   ;;  %v11441_v35 = vld [vmem:[#allocation228_spill] sm:$0xff]  ;;  %v6233_v47 = vld [vmem:[%s6427_s18 + $0x298] sm:$0xff]  ;;  %v6234_v55 = vld [vmem:[%s6427_s18 + $0x340] sm:$0xff]  ;;  %v4425_v21 = vpop.permute.xlu1 %4424  ;;  %v4480_v28 = vpop.permute.xlu0 %4479 }
 0x3db   : > { %v4076_v30 = vmul.f32 %v6231_v31, %v11436_v3  ;;  %v5160_v61 = vmax.f32 %v4918_v5, 0.0  ;;  %v5161_v63 = vmax.f32 %v4919_v26, 0.0  ;;  %5380 = vst [vmem:[%s9293_s28 + $0x250] sm:$0xff] %v5138_v49  ;;  %v3354_v42 = vsub.f32 %v2991_v23, %v3233_v58  ;;  %v3004_v15 = vld [vmem:[%s8932_s25 + $0x3b0] sm:$0xff]  ;;  %v11442_v6 = vld [vmem:[#allocation246_spill] sm:$0xff]  ;;  %v6235_v17 = vld [vmem:[%s6427_s18 + $0x348] sm:$0xff] }
 0x3dc   : > { %5381 = vst.msk [vmem:[%s9293_s28 + $0x258] sm:$0xff] %vm465_vm0, %v5139_v8  ;;  %v4900_v27 = vadd.f32 %v4415_v9, %v4053_v16  ;;  %v4901_v2 = vadd.f32 %v4415_v9, %v4054_v50  ;;  %v3235_v12 = vmul.f32 %v11438_v19, %v11437_v54  ;;  %v4922_v1 = vadd.f32 %v4470_v38, %v4075_v33  ;;  %v11443_v5 = vld [vmem:[#allocation88_spill] sm:$0xff]  ;;  %v11444_v26 = vld [vmem:[#allocation231_spill] sm:$0xff]  ;;  %v11447_v50 = vld [vmem:[#allocation230_spill] sm:$0xff] }
 0x3dd   : > { %5402 = vst [vmem:[%s9293_s28 + $0x300] sm:$0xff] %v5160_v61  ;;  %5403 = vst.msk [vmem:[%s9293_s28 + $0x308] sm:$0xff] %vm465_vm0, %v5161_v63  ;;  %v4923_v56 = vadd.f32 %v4470_v38, %v4076_v30  ;;  %4789 = vperm.xlu0 %5654, %v3363_v59   ;;  %v3365_v52 = vsub.f32 %v3002_v24, %v3244_v20  ;;  %v3246_v41 = vmul.f32 %v11440_v62, %v11439_v7  ;;  %v2995_v20 = vld [vmem:[%s8932_s25 + $0x368] sm:$0xff]  ;;  %v11445_v36 = vld [vmem:[#allocation100_spill] sm:$0xff] }
 0x3de   : > { %v4057_v32 = vmul.f32 %v6232_v22, %v11441_v35  ;;  %v4058_v43 = vmul.f32 %v6233_v47, %v11441_v35  ;;  %v5142_v37 = vmax.f32 %v4900_v27, 0.0  ;;  %v5143_v46 = vmax.f32 %v4901_v2, 0.0  ;;  %4744 = vperm.xlu1 %5655, %v3354_v42   ;;  %v11446_v29 = vld [vmem:[#allocation7_spill] sm:$0xff]  ;;  %v6236_v18 = vld [vmem:[%s6427_s18 + $0x2b0] sm:$0xff]  ;;  %v6237_v8 = vld [vmem:[%s6427_s18 + $0x2b8] sm:$0xff]  ;;  %v4435_v38 = vpop.permute.xlu1 %4434  ;;  %v4490_v19 = vpop.permute.xlu0 %4489 }
 0x3df   : > { %v4079_v10 = vmul.f32 %v6234_v55, %v11442_v6  ;;  %v4080_v13 = vmul.f32 %v6235_v17, %v11442_v6  ;;  %v5164_v34 = vmax.f32 %v4922_v1, 0.0  ;;  %v5165_v48 = vmax.f32 %v4923_v56, 0.0  ;;  %v3006_v33 = vld [vmem:[%s8932_s25 + $0x3c0] sm:$0xff]  ;;  %v11448_v30 = vld [vmem:[#allocation247_spill] sm:$0xff]  ;;  %v11450_v7 = vld [vmem:[#allocation233_spill] sm:$0xff] }
 0x3e0   : > { %5384 = vst [vmem:[%s9293_s28 + $0x270] sm:$0xff] %v5142_v37  ;;  %5385 = vst.msk [vmem:[%s9293_s28 + $0x278] sm:$0xff] %vm465_vm0, %v5143_v46  ;;  %v4904_v51 = vadd.f32 %v4425_v21, %v4057_v32  ;;  %v4905_v53 = vadd.f32 %v4425_v21, %v4058_v43  ;;  %v3356_v58 = vsub.f32 %v2993_v14, %v3235_v12  ;;  %v6238_v31 = vld [vmem:[%s6427_s18 + $0x360] sm:$0xff]  ;;  %v6239_v63 = vld [vmem:[%s6427_s18 + $0x368] sm:$0xff] }
 0x3e1   : > { %v3237_v59 = vmul.f32 %v11444_v26, %v11443_v5  ;;  %5406 = vst [vmem:[%s9293_s28 + $0x320] sm:$0xff] %v5164_v34  ;;  %5407 = vst.msk [vmem:[%s9293_s28 + $0x328] sm:$0xff] %vm465_vm0, %v5165_v48  ;;  %v4926_v23 = vadd.f32 %v4480_v28, %v4079_v10  ;;  %v4927_v40 = vadd.f32 %v4480_v28, %v4080_v13  ;;  %4799 = vperm.xlu0 %5654, %v3365_v52   ;;  %v11449_v14 = vld [vmem:[#allocation90_spill] sm:$0xff]  ;;  %v11451_v22 = vld [vmem:[#allocation232_spill] sm:$0xff] }
 0x3e2   : > { %v3367_v57 = vsub.f32 %v3004_v15, %v3246_v41  ;;  %v3248_v16 = vmul.f32 %v11446_v29, %v11445_v36  ;;  %v4061_v49 = vmul.f32 %v6236_v18, %v11447_v50  ;;  %v4062_v24 = vmul.f32 %v6237_v8, %v11447_v50  ;;  %4754 = vperm.xlu1 %5655, %v3356_v58   ;;  %v6240_v41 = vld [vmem:[%s6427_s18 + $0x2d0] sm:$0xff]  ;;  %v6241_v32 = vld [vmem:[%s6427_s18 + $0x2d8] sm:$0xff]  ;;  %v6242_v15 = vld [vmem:[%s6427_s18 + $0x380] sm:$0xff]  ;;  %v4445_v48 = vpop.permute.xlu1 %4444 }
 0x3e3   : > { %v5146_v25 = vmax.f32 %v4904_v51, 0.0  ;;  %v5147_v3 = vmax.f32 %v4905_v53, 0.0  ;;  %v4083_v61 = vmul.f32 %v6238_v31, %v11448_v30  ;;  %v4084_v9 = vmul.f32 %v6239_v63, %v11448_v30  ;;  %v2997_v46 = vld [vmem:[%s8932_s25 + $0x378] sm:$0xff]  ;;  %v6243_v10 = vld [vmem:[%s6427_s18 + $0x388] sm:$0xff]  ;;  %v4500_v53 = vpop.permute.xlu0 %4499  ;;  %v11453_v26 = vld [vmem:[#allocation92_spill] sm:$0xff] }
 0x3e4   : > { %v5168_v27 = vmax.f32 %v4926_v23, 0.0  ;;  %v5169_v2 = vmax.f32 %v4927_v40, 0.0  ;;  %v4908_v42 = vadd.f32 %v4435_v38, %v4061_v49  ;;  %v4909_v54 = vadd.f32 %v4435_v38, %v4062_v24  ;;  %v11452_v55 = vld [vmem:[#allocation121_spill] sm:$0xff]  ;;  %v6244_v40 = vld [vmem:[%s6427_s18 + $0x2f0] sm:$0xff]  ;;  %v2999_v50 = vld [vmem:[%s8932_s25 + $0x388] sm:$0xff] }
 0x3e5   : > { %5388 = vst [vmem:[%s9293_s28 + $0x290] sm:$0xff] %v5146_v25  ;;  %5389 = vst.msk [vmem:[%s9293_s28 + $0x298] sm:$0xff] %vm465_vm0, %v5147_v3  ;;  %v3358_v12 = vsub.f32 %v2995_v20, %v3237_v59  ;;  %v4930_v1 = vadd.f32 %v4490_v19, %v4083_v61  ;;  %v4931_v56 = vadd.f32 %v4490_v19, %v4084_v9  ;;  %4809 = vperm.xlu0 %5654, %v3367_v57   ;;  %v11454_v59 = vld [vmem:[#allocation235_spill] sm:$0xff]  ;;  %v11455_v57 = vld [vmem:[#allocation234_spill] sm:$0xff] }
 0x3e6   : > { %5410 = vst [vmem:[%s9293_s28 + $0x340] sm:$0xff] %v5168_v27  ;;  %5411 = vst.msk [vmem:[%s9293_s28 + $0x348] sm:$0xff] %vm465_vm0, %v5169_v2  ;;  %v3369_v52 = vsub.f32 %v3006_v33, %v3248_v16  ;;  %v3239_v62 = vmul.f32 %v11450_v7, %v11449_v14  ;;  %v4065_v35 = vmul.f32 %v6240_v41, %v11451_v22  ;;  %v5150_v43 = vmax.f32 %v4908_v42, 0.0  ;;  %v6245_v36 = vld [vmem:[%s6427_s18 + $0x2f8] sm:$0xff]  ;;  %v6246_v49 = vld [vmem:[%s6427_s18 + $0x3a0] sm:$0xff]  ;;  %v4455_v30 = vpop.permute.xlu1 %4454 }
 0x3e7   : > { %v4066_v47 = vmul.f32 %v6241_v32, %v11451_v22  ;;  %v5151_v37 = vmax.f32 %v4909_v54, 0.0  ;;  %v4087_v6 = vmul.f32 %v6242_v15, %v11452_v55  ;;  %v4088_v17 = vmul.f32 %v6243_v10, %v11452_v55  ;;  %4764 = vperm.xlu1 %5655, %v3358_v12   ;;  %v11456_v8 = vld [vmem:[#allocation142_spill] sm:$0xff]  ;;  %v6247_v25 = vld [vmem:[%s6427_s18 + $0x3a8] sm:$0xff]  ;;  %v4510_v9 = vpop.permute.xlu0 %4509  ;;  %v11458_v54 = vld [vmem:[#allocation237_spill] sm:$0xff] }
 0x3e8   : > { %v5172_v13 = vmax.f32 %v4930_v1, 0.0  ;;  %v5173_v34 = vmax.f32 %v4931_v56, 0.0  ;;  %5392 = vst [vmem:[%s9293_s28 + $0x2b0] sm:$0xff] %v5150_v43  ;;  %v4912_v21 = vadd.f32 %v4445_v48, %v4065_v35  ;;  %v3360_v5 = vsub.f32 %v2997_v46, %v3239_v62  ;;  %v11457_v42 = vld [vmem:[#allocation94_spill] sm:$0xff]  ;;  %v6248_v12 = vld [vmem:[%s6427_s18 + $0x310] sm:$0xff]  ;;  %v3001_v41 = vld [vmem:[%s8932_s25 + $0x398] sm:$0xff] }
 0x3e9   : > { %5393 = vst.msk [vmem:[%s9293_s28 + $0x2b8] sm:$0xff] %vm465_vm0, %v5151_v37  ;;  %v4913_v51 = vadd.f32 %v4445_v48, %v4066_v47  ;;  %v4934_v28 = vadd.f32 %v4500_v53, %v4087_v6  ;;  %v4935_v58 = vadd.f32 %v4500_v53, %v4088_v17  ;;  %4819 = vperm.xlu0 %5654, %v3369_v52   ;;  %v11459_v1 = vld [vmem:[#allocation236_spill] sm:$0xff]  ;;  %v6249_v52 = vld [vmem:[%s6427_s18 + $0x318] sm:$0xff]  ;;  %v6250_v22 = vld [vmem:[%s6427_s18 + $0x3c0] sm:$0xff] }
 0x3ea   : > { %5414 = vst [vmem:[%s9293_s28 + $0x360] sm:$0xff] %v5172_v13  ;;  %5415 = vst.msk [vmem:[%s9293_s28 + $0x368] sm:$0xff] %vm465_vm0, %v5173_v34  ;;  %v3241_v23 = vmul.f32 %v11454_v59, %v11453_v26  ;;  %v4069_v20 = vmul.f32 %v6244_v40, %v11455_v57  ;;  %v4070_v29 = vmul.f32 %v6245_v36, %v11455_v57  ;;  %v5154_v16 = vmax.f32 %v4912_v21, 0.0  ;;  %v11460_v35 = vld [vmem:[#allocation127_spill] sm:$0xff]  ;;  %v4465_v15 = vpop.permute.xlu1 %4464  ;;  %v11461_v48 = vld [vmem:[#allocation96_spill] sm:$0xff] }
 0x3eb   : > { %v5155_v18 = vmax.f32 %v4913_v51, 0.0  ;;  %v4091_v24 = vmul.f32 %v6246_v49, %v11456_v8  ;;  %v4092_v3 = vmul.f32 %v6247_v25, %v11456_v8  ;;  %v5176_v33 = vmax.f32 %v4934_v28, 0.0  ;;  %4774 = vperm.xlu1 %5655, %v3360_v5   ;;  %v6251_v47 = vld [vmem:[%s6427_s18 + $0x3c8] sm:$0xff]  ;;  %v4520_v10 = vpop.permute.xlu0 %4519  ;;  %v6252_v53 = vld [vmem:[%s6427_s18 + $0x330] sm:$0xff]  ;;  %v11463_v28 = vld [vmem:[#allocation238_spill] sm:$0xff] }
 0x3ec   : > { %v5177_v31 = vmax.f32 %v4935_v58, 0.0  ;;  %5396 = vst [vmem:[%s9293_s28 + $0x2d0] sm:$0xff] %v5154_v16  ;;  %v4916_v61 = vadd.f32 %v4455_v30, %v4069_v20  ;;  %v4917_v63 = vadd.f32 %v4455_v30, %v4070_v29  ;;  %v3362_v38 = vsub.f32 %v2999_v50, %v3241_v23  ;;  %v11462_v21 = vld [vmem:[#allocation239_spill] sm:$0xff]  ;;  %v6253_v5 = vld [vmem:[%s6427_s18 + $0x338] sm:$0xff]  ;;  %v6254_v57 = vld [vmem:[%s6427_s18 + $0x3e0] sm:$0xff] }
 0x3ed   : > { %5397 = vst.msk [vmem:[%s9293_s28 + $0x2d8] sm:$0xff] %vm465_vm0, %v5155_v18  ;;  %5418 = vst [vmem:[%s9293_s28 + $0x380] sm:$0xff] %v5176_v33  ;;  %v4938_v27 = vadd.f32 %v4510_v9, %v4091_v24  ;;  %v4939_v2 = vadd.f32 %v4510_v9, %v4092_v3  ;;  %v3243_v19 = vmul.f32 %v11458_v54, %v11457_v42  ;;  %v3003_v40 = vld [vmem:[%s8932_s25 + $0x3a8] sm:$0xff]  ;;  %v11464_v20 = vld [vmem:[#allocation146_spill] sm:$0xff] }
 0x3ee   : > { %5419 = vst.msk [vmem:[%s9293_s28 + $0x388] sm:$0xff] %vm465_vm0, %v5177_v31  ;;  %v4073_v56 = vmul.f32 %v6248_v12, %v11459_v1  ;;  %v4074_v14 = vmul.f32 %v6249_v52, %v11459_v1  ;;  %v5158_v7 = vmax.f32 %v4916_v61, 0.0  ;;  %v5159_v62 = vmax.f32 %v4917_v63, 0.0  ;;  %v6255_v29 = vld [vmem:[%s6427_s18 + $0x3e8] sm:$0xff]  ;;  %v4475_v49 = vpop.permute.xlu1 %4474  ;;  %v11465_v30 = vld [vmem:[#allocation89_spill] sm:$0xff]  ;;  %v11466_v61 = vld [vmem:[#allocation242_spill] sm:$0xff] }
 0x3ef   : > { %v4095_v32 = vmul.f32 %v6250_v22, %v11460_v35  ;;  %v4096_v43 = vmul.f32 %v6251_v47, %v11460_v35  ;;  %v5180_v37 = vmax.f32 %v4938_v27, 0.0  ;;  %v5181_v46 = vmax.f32 %v4939_v2, 0.0  ;;  %4784 = vperm.xlu1 %5655, %v3362_v38   ;;  %v4530_v25 = vpop.permute.xlu0 %4529  ;;  %v6256_v9 = vld [vmem:[%s6427_s18 + $0x350] sm:$0xff]  ;;  %v6257_v38 = vld [vmem:[%s6427_s18 + $0x358] sm:$0xff]  ;;  %v6258_v1 = vld [vmem:[%s6427_s18 + $0x400] sm:$0xff] }
 0x3f0   : > { %5400 = vst [vmem:[%s9293_s28 + $0x2f0] sm:$0xff] %v5158_v7  ;;  %5401 = vst.msk [vmem:[%s9293_s28 + $0x2f8] sm:$0xff] %vm465_vm0, %v5159_v62  ;;  %v4920_v55 = vadd.f32 %v4465_v15, %v4073_v56  ;;  %v4921_v6 = vadd.f32 %v4465_v15, %v4074_v14  ;;  %v3364_v34 = vsub.f32 %v3001_v41, %v3243_v19  ;;  %v11467_v27 = vld [vmem:[#allocation240_spill] sm:$0xff]  ;;  %v3005_v12 = vld [vmem:[%s8932_s25 + $0x3b8] sm:$0xff] }
 0x3f1   : > { %5422 = vst [vmem:[%s9293_s28 + $0x3a0] sm:$0xff] %v5180_v37  ;;  %5423 = vst.msk [vmem:[%s9293_s28 + $0x3a8] sm:$0xff] %vm465_vm0, %v5181_v46  ;;  %v4942_v17 = vadd.f32 %v4520_v10, %v4095_v32  ;;  %v4943_v13 = vadd.f32 %v4520_v10, %v4096_v43  ;;  %v3245_v51 = vmul.f32 %v11462_v21, %v11461_v48  ;;  %v11468_v56 = vld [vmem:[#allocation131_spill] sm:$0xff]  ;;  %v6260_v15 = vld [vmem:[%s6427_s18 + $0x370] sm:$0xff] }
 0x3f2   : > { %v4077_v58 = vmul.f32 %v6252_v53, %v11463_v28  ;;  %v4078_v26 = vmul.f32 %v6253_v5, %v11463_v28  ;;  %v5162_v59 = vmax.f32 %v4920_v55, 0.0  ;;  %v5163_v23 = vmax.f32 %v4921_v6, 0.0  ;;  %v6259_v14 = vld [vmem:[%s6427_s18 + $0x408] sm:$0xff]  ;;  %v4485_v22 = vpop.permute.xlu1 %4484  ;;  %v11469_v55 = vld [vmem:[#allocation125_spill] sm:$0xff]  ;;  %v6262_v48 = vld [vmem:[%s6427_s18 + $0x420] sm:$0xff] }
 0x3f3   : > { %v4099_v36 = vmul.f32 %v6254_v57, %v11464_v20  ;;  %v4100_v16 = vmul.f32 %v6255_v29, %v11464_v20  ;;  %v5184_v18 = vmax.f32 %v4942_v17, 0.0  ;;  %v5185_v50 = vmax.f32 %v4943_v13, 0.0  ;;  %4794 = vperm.xlu1 %5655, %v3364_v34   ;;  %v4540_v47 = vpop.permute.xlu0 %4539  ;;  %v6261_v10 = vld [vmem:[%s6427_s18 + $0x378] sm:$0xff]  ;;  %v11470_v21 = vld [vmem:[#allocation150_spill] sm:$0xff]  ;;  %v6263_v53 = vld [vmem:[%s6427_s18 + $0x428] sm:$0xff] }
 0x3f4   : > { %5404 = vst [vmem:[%s9293_s28 + $0x310] sm:$0xff] %v5162_v59  ;;  %5405 = vst.msk [vmem:[%s9293_s28 + $0x318] sm:$0xff] %vm465_vm0, %v5163_v23  ;;  %v4924_v8 = vadd.f32 %v4475_v49, %v4077_v58  ;;  %v4925_v24 = vadd.f32 %v4475_v49, %v4078_v26  ;;  %v3366_v31 = vsub.f32 %v3003_v40, %v3245_v51  ;;  %v11471_v29 = vld [vmem:[#allocation124_spill] sm:$0xff] }
 0x3f5   : > { %5426 = vst [vmem:[%s9293_s28 + $0x3c0] sm:$0xff] %v5184_v18  ;;  %5427 = vst.msk [vmem:[%s9293_s28 + $0x3c8] sm:$0xff] %vm465_vm0, %v5185_v50  ;;  %v4946_v3 = vadd.f32 %v4530_v25, %v4099_v36  ;;  %v4947_v33 = vadd.f32 %v4530_v25, %v4100_v16  ;;  %v3247_v63 = vmul.f32 %v11466_v61, %v11465_v30  ;;  %v6264_v36 = vld [vmem:[%s6427_s18 + $0x390] sm:$0xff]  ;;  %v6265_v18 = vld [vmem:[%s6427_s18 + $0x398] sm:$0xff] }
 0x3f6   : > { %v4081_v2 = vmul.f32 %v6256_v9, %v11467_v27  ;;  %v4082_v42 = vmul.f32 %v6257_v38, %v11467_v27  ;;  %v5166_v54 = vmax.f32 %v4924_v8, 0.0  ;;  %v5167_v19 = vmax.f32 %v4925_v24, 0.0  ;;  %v4495_v26 = vpop.permute.xlu1 %4494  ;;  %v6266_v24 = vld [vmem:[%s6427_s18 + $0x440] sm:$0xff]  ;;  %v11472_v25 = vld [vmem:[#allocation135_spill] sm:$0xff] }
 0x3f7   : > { %v4103_v52 = vmul.f32 %v6258_v1, %v11468_v56  ;;  %v4104_v7 = vmul.f32 %v6259_v14, %v11468_v56  ;;  %v5188_v62 = vmax.f32 %v4946_v3, 0.0  ;;  %v5189_v41 = vmax.f32 %v4947_v33, 0.0  ;;  %4804 = vperm.xlu1 %5655, %v3366_v31   ;;  %v4550_v40 = vpop.permute.xlu0 %4549  ;;  %v6267_v33 = vld [vmem:[%s6427_s18 + $0x448] sm:$0xff]  ;;  %v6269_v1 = vld [vmem:[%s6427_s18 + $0x3b8] sm:$0xff] }
 0x3f8   : > { %5408 = vst [vmem:[%s9293_s28 + $0x330] sm:$0xff] %v5166_v54  ;;  %5409 = vst.msk [vmem:[%s9293_s28 + $0x338] sm:$0xff] %vm465_vm0, %v5167_v19  ;;  %v4928_v35 = vadd.f32 %v4485_v22, %v4081_v2  ;;  %v4929_v32 = vadd.f32 %v4485_v22, %v4082_v42  ;;  %v3368_v46 = vsub.f32 %v3005_v12, %v3247_v63  ;;  %v6268_v54 = vld [vmem:[%s6427_s18 + $0x3b0] sm:$0xff]  ;;  %v11473_v19 = vld [vmem:[#allocation129_spill] sm:$0xff] }
 0x3f9   : > { %5430 = vst [vmem:[%s9293_s28 + $0x3e0] sm:$0xff] %v5188_v62  ;;  %5431 = vst.msk [vmem:[%s9293_s28 + $0x3e8] sm:$0xff] %vm465_vm0, %v5189_v41  ;;  %v4950_v43 = vadd.f32 %v4540_v47, %v4103_v52  ;;  %v4951_v37 = vadd.f32 %v4540_v47, %v4104_v7  ;;  %v4085_v6 = vmul.f32 %v6260_v15, %v11469_v55  ;;  %v6270_v7 = vld [vmem:[%s6427_s18 + $0x460] sm:$0xff]  ;;  %v11474_v62 = vld [vmem:[#allocation101_spill] sm:$0xff] }
 0x3fa   : > { %v4086_v17 = vmul.f32 %v6261_v10, %v11469_v55  ;;  %v5170_v13 = vmax.f32 %v4928_v35, 0.0  ;;  %v5171_v34 = vmax.f32 %v4929_v32, 0.0  ;;  %v4107_v51 = vmul.f32 %v6262_v48, %v11470_v21  ;;  %v4505_v63 = vpop.permute.xlu1 %4504  ;;  %v6271_v22 = vld [vmem:[%s6427_s18 + $0x468] sm:$0xff]  ;;  %v6272_v10 = vld [vmem:[%s6427_s18 + $0x3d0] sm:$0xff] }
 0x3fb   : > { %v4108_v28 = vmul.f32 %v6263_v53, %v11470_v21  ;;  %v5192_v58 = vmax.f32 %v4950_v43, 0.0  ;;  %v5193_v5 = vmax.f32 %v4951_v37, 0.0  ;;  %4814 = vperm.xlu1 %5655, %v3368_v46   ;;  %v4932_v59 = vadd.f32 %v4495_v26, %v4085_v6  ;;  %v4560_v2 = vpop.permute.xlu0 %4559  ;;  %v6274_v53 = vld [vmem:[%s6427_s18 + $0x480] sm:$0xff] }
 0x3fc   : > { %5412 = vst [vmem:[%s9293_s28 + $0x350] sm:$0xff] %v5170_v13  ;;  %5413 = vst.msk [vmem:[%s9293_s28 + $0x358] sm:$0xff] %vm465_vm0, %v5171_v34  ;;  %v4933_v23 = vadd.f32 %v4495_v26, %v4086_v17  ;;  %v4954_v57 = vadd.f32 %v4550_v40, %v4107_v51  ;;  %v4089_v16 = vmul.f32 %v6264_v36, %v11471_v29  ;;  %v11475_v17 = vld [vmem:[#allocation133_spill] sm:$0xff] }
 0x3fd   : > { %5434 = vst [vmem:[%s9293_s28 + $0x400] sm:$0xff] %v5192_v58  ;;  %5435 = vst.msk [vmem:[%s9293_s28 + $0x408] sm:$0xff] %vm465_vm0, %v5193_v5  ;;  %v4955_v20 = vadd.f32 %v4550_v40, %v4108_v28  ;;  %v4090_v50 = vmul.f32 %v6265_v18, %v11471_v29  ;;  %v5174_v49 = vmax.f32 %v4932_v59, 0.0  ;;  %v4111_v3 = vmul.f32 %v6266_v24, %v11472_v25  ;;  %v6273_v34 = vld [vmem:[%s6427_s18 + $0x3d8] sm:$0xff]  ;;  %v11476_v28 = vld [vmem:[#allocation128_spill] sm:$0xff] }
 0x3fe   : > { %v5175_v8 = vmax.f32 %v4933_v23, 0.0  ;;  %v4112_v31 = vmul.f32 %v6267_v33, %v11472_v25  ;;  %v5196_v30 = vmax.f32 %v4954_v57, 0.0  ;;  %v4936_v9 = vadd.f32 %v4505_v63, %v4089_v16  ;;  %v4515_v43 = vpop.permute.xlu1 %4514  ;;  %v6275_v5 = vld [vmem:[%s6427_s18 + $0x488] sm:$0xff]  ;;  %v6276_v18 = vld [vmem:[%s6427_s18 + $0x3f0] sm:$0xff]  ;;  %v6278_v33 = vld [vmem:[%s6427_s18 + $0x4a0] sm:$0xff] }
 0x3ff   : > { %v5197_v61 = vmax.f32 %v4955_v20, 0.0  ;;  %5416 = vst [vmem:[%s9293_s28 + $0x370] sm:$0xff] %v5174_v49  ;;  %v4937_v27 = vadd.f32 %v4505_v63, %v4090_v50  ;;  %v4958_v38 = vadd.f32 %v4560_v2, %v4111_v3  ;;  %v4093_v12 = vmul.f32 %v6268_v54, %v11473_v19  ;;  %v4570_v15 = vpop.permute.xlu0 %4569  ;;  %v11477_v50 = vld [vmem:[#allocation137_spill] sm:$0xff] }
 0x400   : > { %5417 = vst.msk [vmem:[%s9293_s28 + $0x378] sm:$0xff] %vm465_vm0, %v5175_v8  ;;  %5438 = vst [vmem:[%s9293_s28 + $0x420] sm:$0xff] %v5196_v30  ;;  %v4959_v42 = vadd.f32 %v4560_v2, %v4112_v31  ;;  %v4094_v56 = vmul.f32 %v6269_v1, %v11473_v19  ;;  %v5178_v52 = vmax.f32 %v4936_v9, 0.0  ;;  %v4115_v41 = vmul.f32 %v6270_v7, %v11474_v62  ;;  %v6277_v8 = vld [vmem:[%s6427_s18 + $0x3f8] sm:$0xff]  ;;  %v11478_v31 = vld [vmem:[#allocation102_spill] sm:$0xff] }
 0x401   : > { %5439 = vst.msk [vmem:[%s9293_s28 + $0x428] sm:$0xff] %vm465_vm0, %v5197_v61  ;;  %v5179_v14 = vmax.f32 %v4937_v27, 0.0  ;;  %v4116_v35 = vmul.f32 %v6271_v22, %v11474_v62  ;;  %v5200_v32 = vmax.f32 %v4958_v38, 0.0  ;;  %v4940_v37 = vadd.f32 %v4515_v43, %v4093_v12  ;;  %v6279_v61 = vld [vmem:[%s6427_s18 + $0x4a8] sm:$0xff]  ;;  %v6280_v1 = vld [vmem:[%s6427_s18 + $0x410] sm:$0xff]  ;;  %v6282_v22 = vld [vmem:[%s6427_s18 + $0x4c0] sm:$0xff] }
 0x402   : > { %v5201_v47 = vmax.f32 %v4959_v42, 0.0  ;;  %5420 = vst [vmem:[%s9293_s28 + $0x390] sm:$0xff] %v5178_v52  ;;  %v4941_v46 = vadd.f32 %v4515_v43, %v4094_v56  ;;  %v4962_v55 = vadd.f32 %v4570_v15, %v4115_v41  ;;  %v4097_v13 = vmul.f32 %v6272_v10, %v11475_v17  ;;  %v4525_v40 = vpop.permute.xlu1 %4524  ;;  %v11479_v56 = vld [vmem:[#allocation139_spill] sm:$0xff] }
 0x403   : > { %5421 = vst.msk [vmem:[%s9293_s28 + $0x398] sm:$0xff] %vm465_vm0, %v5179_v14  ;;  %5442 = vst [vmem:[%s9293_s28 + $0x440] sm:$0xff] %v5200_v32  ;;  %v4963_v6 = vadd.f32 %v4570_v15, %v4116_v35  ;;  %v4098_v48 = vmul.f32 %v6273_v34, %v11475_v17  ;;  %v5182_v21 = vmax.f32 %v4940_v37, 0.0  ;;  %v4119_v58 = vmul.f32 %v6274_v53, %v11476_v28  ;;  %v4580_v36 = vpop.permute.xlu0 %4579  ;;  %v6281_v14 = vld [vmem:[%s6427_s18 + $0x418] sm:$0xff]  ;;  %v11480_v35 = vld [vmem:[#allocation130_spill] sm:$0xff] }
 0x404   : > { %5443 = vst.msk [vmem:[%s9293_s28 + $0x448] sm:$0xff] %vm465_vm0, %v5201_v47  ;;  %v5183_v51 = vmax.f32 %v4941_v46, 0.0  ;;  %v4120_v26 = vmul.f32 %v6275_v5, %v11476_v28  ;;  %v5204_v59 = vmax.f32 %v4962_v55, 0.0  ;;  %v4944_v57 = vadd.f32 %v4525_v40, %v4097_v13  ;;  %v6283_v47 = vld [vmem:[%s6427_s18 + $0x4c8] sm:$0xff]  ;;  %v6284_v34 = vld [vmem:[%s6427_s18 + $0x430] sm:$0xff]  ;;  %v6286_v5 = vld [vmem:[%s6427_s18 + $0x4e0] sm:$0xff] }
 0x405   : > { %v5205_v23 = vmax.f32 %v4963_v6, 0.0  ;;  %5424 = vst [vmem:[%s9293_s28 + $0x3b0] sm:$0xff] %v5182_v21  ;;  %v4945_v20 = vadd.f32 %v4525_v40, %v4098_v48  ;;  %v4966_v29 = vadd.f32 %v4580_v36, %v4119_v58  ;;  %v4101_v49 = vmul.f32 %v6276_v18, %v11477_v50  ;;  %v11481_v48 = vld [vmem:[#allocation140_spill] sm:$0xff] }
 0x406   : > { %5425 = vst.msk [vmem:[%s9293_s28 + $0x3b8] sm:$0xff] %vm465_vm0, %v5183_v51  ;;  %5446 = vst [vmem:[%s9293_s28 + $0x460] sm:$0xff] %v5204_v59  ;;  %v4967_v16 = vadd.f32 %v4580_v36, %v4120_v26  ;;  %v4102_v24 = vmul.f32 %v6277_v8, %v11477_v50  ;;  %v5186_v25 = vmax.f32 %v4944_v57, 0.0  ;;  %v4123_v30 = vmul.f32 %v6278_v33, %v11478_v31  ;;  %v4535_v2 = vpop.permute.xlu1 %4534  ;;  %v6285_v51 = vld [vmem:[%s6427_s18 + $0x438] sm:$0xff]  ;;  %v11482_v26 = vld [vmem:[#allocation103_spill] sm:$0xff] }
 0x407   : > { %5447 = vst.msk [vmem:[%s9293_s28 + $0x468] sm:$0xff] %vm465_vm0, %v5205_v23  ;;  %v5187_v3 = vmax.f32 %v4945_v20, 0.0  ;;  %v4124_v63 = vmul.f32 %v6279_v61, %v11478_v31  ;;  %v5208_v9 = vmax.f32 %v4966_v29, 0.0  ;;  %v4948_v38 = vadd.f32 %v4535_v2, %v4101_v49  ;;  %v4590_v54 = vpop.permute.xlu0 %4589  ;;  %v6287_v23 = vld [vmem:[%s6427_s18 + $0x4e8] sm:$0xff]  ;;  %v6288_v8 = vld [vmem:[%s6427_s18 + $0x450] sm:$0xff]  ;;  %v6290_v61 = vld [vmem:[%s6427_s18 + $0x500] sm:$0xff] }
 0x408   : > { %v5209_v27 = vmax.f32 %v4967_v16, 0.0  ;;  %5428 = vst [vmem:[%s9293_s28 + $0x3d0] sm:$0xff] %v5186_v25  ;;  %v4949_v42 = vadd.f32 %v4535_v2, %v4102_v24  ;;  %v4970_v19 = vadd.f32 %v4590_v54, %v4123_v30  ;;  %v4105_v52 = vmul.f32 %v6280_v1, %v11479_v56  ;;  %v11483_v24 = vld [vmem:[#allocation9_spill] sm:$0xff] }
 0x409   : > { %5429 = vst.msk [vmem:[%s9293_s28 + $0x3d8] sm:$0xff] %vm465_vm0, %v5187_v3  ;;  %5450 = vst [vmem:[%s9293_s28 + $0x480] sm:$0xff] %v5208_v9  ;;  %v4971_v12 = vadd.f32 %v4590_v54, %v4124_v63  ;;  %v4106_v7 = vmul.f32 %v6281_v14, %v11479_v56  ;;  %v5190_v62 = vmax.f32 %v4948_v38, 0.0  ;;  %v4127_v32 = vmul.f32 %v6282_v22, %v11480_v35  ;;  %v6289_v3 = vld [vmem:[%s6427_s18 + $0x458] sm:$0xff]  ;;  %v11484_v63 = vld [vmem:[#allocation132_spill] sm:$0xff] }
 0x40a   : > { %5451 = vst.msk [vmem:[%s9293_s28 + $0x488] sm:$0xff] %vm465_vm0, %v5209_v27  ;;  %v5191_v41 = vmax.f32 %v4949_v42, 0.0  ;;  %v4128_v43 = vmul.f32 %v6283_v47, %v11480_v35  ;;  %v5212_v37 = vmax.f32 %v4970_v19, 0.0  ;;  %v4545_v15 = vpop.permute.xlu1 %4544  ;;  %v4109_v21 = vmul.f32 %v6284_v34, %v11481_v48  ;;  %v6291_v27 = vld [vmem:[%s6427_s18 + $0x508] sm:$0xff]  ;;  %v6292_v14 = vld [vmem:[%s6427_s18 + $0x470] sm:$0xff]  ;;  %v6294_v47 = vld [vmem:[%s6427_s18 + $0x520] sm:$0xff] }
 0x40b   : > { %v5213_v46 = vmax.f32 %v4971_v12, 0.0  ;;  %5432 = vst [vmem:[%s9293_s28 + $0x3f0] sm:$0xff] %v5190_v62  ;;  %v4952_v55 = vadd.f32 %v4545_v15, %v4105_v52  ;;  %v4953_v6 = vadd.f32 %v4545_v15, %v4106_v7  ;;  %v4600_v10 = vpop.permute.xlu0 %4599  ;;  %v4110_v53 = vmul.f32 %v6285_v51, %v11481_v48  ;;  %v11485_v7 = vld [vmem:[#allocation147_spill] sm:$0xff]  ;;  %v6296_v51 = vld [vmem:[%s6427_s18 + $0x490] sm:$0xff] }
 0x40c   : > { %5433 = vst.msk [vmem:[%s9293_s28 + $0x3f8] sm:$0xff] %vm465_vm0, %v5191_v41  ;;  %5454 = vst [vmem:[%s9293_s28 + $0x4a0] sm:$0xff] %v5212_v37  ;;  %v4974_v17 = vadd.f32 %v4600_v10, %v4127_v32  ;;  %v4975_v13 = vadd.f32 %v4600_v10, %v4128_v43  ;;  %v4131_v59 = vmul.f32 %v6286_v5, %v11482_v26  ;;  %v6293_v41 = vld [vmem:[%s6427_s18 + $0x478] sm:$0xff]  ;;  %v11486_v43 = vld [vmem:[#allocation104_spill] sm:$0xff] }
 0x40d   : > { %5455 = vst.msk [vmem:[%s9293_s28 + $0x4a8] sm:$0xff] %vm465_vm0, %v5213_v46  ;;  %v5194_v28 = vmax.f32 %v4952_v55, 0.0  ;;  %v5195_v58 = vmax.f32 %v4953_v6, 0.0  ;;  %v4132_v40 = vmul.f32 %v6287_v23, %v11482_v26  ;;  %v4113_v25 = vmul.f32 %v6288_v8, %v11483_v24  ;;  %v6295_v46 = vld [vmem:[%s6427_s18 + $0x528] sm:$0xff]  ;;  %v6298_v23 = vld [vmem:[%s6427_s18 + $0x540] sm:$0xff] }
 0x40e   : > { %v5216_v57 = vmax.f32 %v4974_v17, 0.0  ;;  %v5217_v20 = vmax.f32 %v4975_v13, 0.0  ;;  %v4555_v36 = vpop.permute.xlu1 %4554  ;;  %v4114_v33 = vmul.f32 %v6289_v3, %v11483_v24  ;;  %v4135_v9 = vmul.f32 %v6290_v61, %v11484_v63  ;;  %v6300_v3 = vld [vmem:[%s6427_s18 + $0x4b0] sm:$0xff] }
 0x40f   : > { %5436 = vst [vmem:[%s9293_s28 + $0x410] sm:$0xff] %v5194_v28  ;;  %5437 = vst.msk [vmem:[%s9293_s28 + $0x418] sm:$0xff] %vm465_vm0, %v5195_v58  ;;  %v4956_v29 = vadd.f32 %v4555_v36, %v4109_v21  ;;  %v4957_v16 = vadd.f32 %v4555_v36, %v4110_v53  ;;  %v4610_v18 = vpop.permute.xlu0 %4609  ;;  %v4136_v2 = vmul.f32 %v6291_v27, %v11484_v63  ;;  %v11487_v53 = vld [vmem:[#allocation11_spill] sm:$0xff]  ;;  %v6297_v58 = vld [vmem:[%s6427_s18 + $0x498] sm:$0xff] }
 0x410   : > { %5458 = vst [vmem:[%s9293_s28 + $0x4c0] sm:$0xff] %v5216_v57  ;;  %5459 = vst.msk [vmem:[%s9293_s28 + $0x4c8] sm:$0xff] %vm465_vm0, %v5217_v20  ;;  %v4978_v50 = vadd.f32 %v4610_v18, %v4131_v59  ;;  %v4979_v49 = vadd.f32 %v4610_v18, %v4132_v40  ;;  %v4117_v62 = vmul.f32 %v6292_v14, %v11485_v7  ;;  %v11488_v40 = vld [vmem:[#allocation134_spill] sm:$0xff]  ;;  %v6299_v20 = vld [vmem:[%s6427_s18 + $0x548] sm:$0xff] }
 0x411   : > { %v5198_v31 = vmax.f32 %v4956_v29, 0.0  ;;  %v5199_v30 = vmax.f32 %v4957_v16, 0.0  ;;  %v4118_v22 = vmul.f32 %v6293_v41, %v11485_v7  ;;  %v4139_v37 = vmul.f32 %v6294_v47, %v11486_v43  ;;  %v6302_v27 = vld [vmem:[%s6427_s18 + $0x560] sm:$0xff]  ;;  %v6304_v41 = vld [vmem:[%s6427_s18 + $0x4d0] sm:$0xff] }
 0x412   : > { %v5220_v38 = vmax.f32 %v4978_v50, 0.0  ;;  %v5221_v42 = vmax.f32 %v4979_v49, 0.0  ;;  %v4565_v54 = vpop.permute.xlu1 %4564  ;;  %v4140_v15 = vmul.f32 %v6295_v46, %v11486_v43  ;;  %v4121_v28 = vmul.f32 %v6296_v51, %v11487_v53  ;;  %v6306_v46 = vld [vmem:[%s6427_s18 + $0x580] sm:$0xff] }
 0x413   : > { %5440 = vst [vmem:[%s9293_s28 + $0x430] sm:$0xff] %v5198_v31  ;;  %5441 = vst.msk [vmem:[%s9293_s28 + $0x438] sm:$0xff] %vm465_vm0, %v5199_v30  ;;  %v4960_v19 = vadd.f32 %v4565_v54, %v4113_v25  ;;  %v4961_v12 = vadd.f32 %v4565_v54, %v4114_v33  ;;  %v4620_v1 = vpop.permute.xlu0 %4619  ;;  %v4122_v5 = vmul.f32 %v6297_v58, %v11487_v53  ;;  %v11489_v33 = vld [vmem:[#allocation2_spill] sm:$0xff]  ;;  %v6301_v30 = vld [vmem:[%s6427_s18 + $0x4b8] sm:$0xff] }
 0x414   : > { %5462 = vst [vmem:[%s9293_s28 + $0x4e0] sm:$0xff] %v5220_v38  ;;  %5463 = vst.msk [vmem:[%s9293_s28 + $0x4e8] sm:$0xff] %vm465_vm0, %v5221_v42  ;;  %v4982_v56 = vadd.f32 %v4620_v1, %v4135_v9  ;;  %v4983_v52 = vadd.f32 %v4620_v1, %v4136_v2  ;;  %v4143_v57 = vmul.f32 %v6298_v23, %v11488_v40  ;;  %v11490_v2 = vld [vmem:[#allocation105_spill] sm:$0xff]  ;;  %v6303_v42 = vld [vmem:[%s6427_s18 + $0x568] sm:$0xff] }
 0x415   : > { %v5202_v35 = vmax.f32 %v4960_v19, 0.0  ;;  %v5203_v32 = vmax.f32 %v4961_v12, 0.0  ;;  %v4144_v36 = vmul.f32 %v6299_v20, %v11488_v40  ;;  %v4125_v31 = vmul.f32 %v6300_v3, %v11489_v33  ;;  %v6308_v58 = vld [vmem:[%s6427_s18 + $0x4f0] sm:$0xff]  ;;  %v6310_v20 = vld [vmem:[%s6427_s18 + $0x5a0] sm:$0xff] }
 0x416   : > { %v5224_v55 = vmax.f32 %v4982_v56, 0.0  ;;  %v5225_v6 = vmax.f32 %v4983_v52, 0.0  ;;  %v4575_v10 = vpop.permute.xlu1 %4574  ;;  %v4126_v61 = vmul.f32 %v6301_v30, %v11489_v33  ;;  %v4147_v38 = vmul.f32 %v6302_v27, %v11490_v2  ;;  %v6312_v30 = vld [vmem:[%s6427_s18 + $0x510] sm:$0xff] }
 0x417   : > { %5444 = vst [vmem:[%s9293_s28 + $0x450] sm:$0xff] %v5202_v35  ;;  %5445 = vst.msk [vmem:[%s9293_s28 + $0x458] sm:$0xff] %vm465_vm0, %v5203_v32  ;;  %v4964_v17 = vadd.f32 %v4575_v10, %v4117_v62  ;;  %v4965_v13 = vadd.f32 %v4575_v10, %v4118_v22  ;;  %v4630_v34 = vpop.permute.xlu0 %4629  ;;  %v4148_v54 = vmul.f32 %v6303_v42, %v11490_v2  ;;  %v11491_v22 = vld [vmem:[#allocation13_spill] sm:$0xff]  ;;  %v6314_v42 = vld [vmem:[%s6427_s18 + $0x5c0] sm:$0xff] }
 0x418   : > { %5466 = vst [vmem:[%s9293_s28 + $0x500] sm:$0xff] %v5224_v55  ;;  %5467 = vst.msk [vmem:[%s9293_s28 + $0x508] sm:$0xff] %vm465_vm0, %v5225_v6  ;;  %v4986_v48 = vadd.f32 %v4630_v34, %v4139_v37  ;;  %v4987_v21 = vadd.f32 %v4630_v34, %v4140_v15  ;;  %v4129_v35 = vmul.f32 %v6304_v41, %v11491_v22  ;;  %v6305_v32 = vld [vmem:[%s6427_s18 + $0x4d8] sm:$0xff]  ;;  %v11492_v15 = vld [vmem:[#allocation136_spill] sm:$0xff] }
 0x419   : > { %v5206_v26 = vmax.f32 %v4964_v17, 0.0  ;;  %v5207_v59 = vmax.f32 %v4965_v13, 0.0  ;;  %v4130_v47 = vmul.f32 %v6305_v32, %v11491_v22  ;;  %v4151_v55 = vmul.f32 %v6306_v46, %v11492_v15  ;;  %v6307_v6 = vld [vmem:[%s6427_s18 + $0x588] sm:$0xff] }
 0x41a   : > { %v5228_v29 = vmax.f32 %v4986_v48, 0.0  ;;  %v5229_v16 = vmax.f32 %v4987_v21, 0.0  ;;  %v4585_v18 = vpop.permute.xlu1 %4584  ;;  %v4152_v10 = vmul.f32 %v6307_v6, %v11492_v15  ;;  %v6318_v15 = vld [vmem:[%s6427_s18 + $0x5e0] sm:$0xff] }
 0x41b   : > { %5448 = vst [vmem:[%s9293_s28 + $0x470] sm:$0xff] %v5206_v26  ;;  %5449 = vst.msk [vmem:[%s9293_s28 + $0x478] sm:$0xff] %vm465_vm0, %v5207_v59  ;;  %v4968_v50 = vadd.f32 %v4585_v18, %v4121_v28  ;;  %v4969_v49 = vadd.f32 %v4585_v18, %v4122_v5  ;;  %v4640_v8 = vpop.permute.xlu0 %4639  ;;  %v11493_v5 = vld [vmem:[#allocation4_spill] sm:$0xff]  ;;  %v6309_v59 = vld [vmem:[%s6427_s18 + $0x4f8] sm:$0xff] }
 0x41c   : > { %5470 = vst [vmem:[%s9293_s28 + $0x520] sm:$0xff] %v5228_v29  ;;  %5471 = vst.msk [vmem:[%s9293_s28 + $0x528] sm:$0xff] %vm465_vm0, %v5229_v16  ;;  %v4990_v24 = vadd.f32 %v4640_v8, %v4143_v57  ;;  %v4991_v25 = vadd.f32 %v4640_v8, %v4144_v36  ;;  %v4133_v26 = vmul.f32 %v6308_v58, %v11493_v5  ;;  %v11494_v36 = vld [vmem:[#allocation106_spill] sm:$0xff]  ;;  %v6311_v16 = vld [vmem:[%s6427_s18 + $0x5a8] sm:$0xff] }
 0x41d   : > { %v5210_v63 = vmax.f32 %v4968_v50, 0.0  ;;  %v5211_v9 = vmax.f32 %v4969_v49, 0.0  ;;  %v4134_v23 = vmul.f32 %v6309_v59, %v11493_v5  ;;  %v4155_v29 = vmul.f32 %v6310_v20, %v11494_v36  ;;  %v6320_v5 = vld [vmem:[%s6427_s18 + $0x550] sm:$0xff] }
 0x41e   : > { %v5232_v19 = vmax.f32 %v4990_v24, 0.0  ;;  %v5233_v12 = vmax.f32 %v4991_v25, 0.0  ;;  %v4595_v1 = vpop.permute.xlu1 %4594  ;;  %v4156_v18 = vmul.f32 %v6311_v16, %v11494_v36  ;;  %v6322_v36 = vld [vmem:[%s6427_s18 + $0x600] sm:$0xff] }
 0x41f   : > { %5452 = vst [vmem:[%s9293_s28 + $0x490] sm:$0xff] %v5210_v63  ;;  %5453 = vst.msk [vmem:[%s9293_s28 + $0x498] sm:$0xff] %vm465_vm0, %v5211_v9  ;;  %v4972_v56 = vadd.f32 %v4595_v1, %v4125_v31  ;;  %v4973_v52 = vadd.f32 %v4595_v1, %v4126_v61  ;;  %v4650_v14 = vpop.permute.xlu0 %4649  ;;  %v11495_v61 = vld [vmem:[#allocation154_spill] sm:$0xff]  ;;  %v6313_v9 = vld [vmem:[%s6427_s18 + $0x518] sm:$0xff] }
 0x420   : > { %5474 = vst [vmem:[%s9293_s28 + $0x540] sm:$0xff] %v5232_v19  ;;  %5475 = vst.msk [vmem:[%s9293_s28 + $0x548] sm:$0xff] %vm465_vm0, %v5233_v12  ;;  %v4994_v7 = vadd.f32 %v4650_v14, %v4147_v38  ;;  %v4995_v62 = vadd.f32 %v4650_v14, %v4148_v54  ;;  %v4137_v63 = vmul.f32 %v6312_v30, %v11495_v61  ;;  %v6315_v19 = vld [vmem:[%s6427_s18 + $0x5c8] sm:$0xff] }
 0x421   : > { %v5214_v43 = vmax.f32 %v4972_v56, 0.0  ;;  %v5215_v37 = vmax.f32 %v4973_v52, 0.0  ;;  %v4138_v27 = vmul.f32 %v6313_v9, %v11495_v61  ;;  %v4159_v54 = vmul.f32 %v6314_v42, %v9187_v44  ;;  %v6324_v61 = vld [vmem:[%s6427_s18 + $0x570] sm:$0xff] }
 0x422   : > { %v5236_v17 = vmax.f32 %v4994_v7, 0.0  ;;  %v5237_v13 = vmax.f32 %v4995_v62, 0.0  ;;  %v4605_v34 = vpop.permute.xlu1 %4604  ;;  %v4160_v12 = vmul.f32 %v6315_v19, %v9187_v44  ;;  %v11496_v44 = vld [vmem:[#allocation149_spill] sm:$0xff] }
 0x423   : > { %5456 = vst [vmem:[%s9293_s28 + $0x4b0] sm:$0xff] %v5214_v43  ;;  %5457 = vst.msk [vmem:[%s9293_s28 + $0x4b8] sm:$0xff] %vm465_vm0, %v5215_v37  ;;  %v4976_v48 = vadd.f32 %v4605_v34, %v4129_v35  ;;  %v4977_v21 = vadd.f32 %v4605_v34, %v4130_v47  ;;  %v4660_v51 = vpop.permute.xlu0 %4659  ;;  %v6316_v35 = vld [vmem:[%s6427_s18 + $0x530] sm:$0xff]  ;;  %v6317_v47 = vld [vmem:[%s6427_s18 + $0x538] sm:$0xff] }
 0x424   : > { %5478 = vst [vmem:[%s9293_s28 + $0x560] sm:$0xff] %v5236_v17  ;;  %5479 = vst.msk [vmem:[%s9293_s28 + $0x568] sm:$0xff] %vm465_vm0, %v5237_v13  ;;  %v4998_v53 = vadd.f32 %v4660_v51, %v4151_v55  ;;  %v4999_v28 = vadd.f32 %v4660_v51, %v4152_v10  ;;  %v4141_v32 = vmul.f32 %v6316_v35, %v11496_v44  ;;  %v11497_v55 = vld [vmem:[#allocation14_spill] sm:$0xff]  ;;  %v6319_v10 = vld [vmem:[%s6427_s18 + $0x5e8] sm:$0xff] }
 0x425   : > { %v5218_v40 = vmax.f32 %v4976_v48, 0.0  ;;  %v5219_v57 = vmax.f32 %v4977_v21, 0.0  ;;  %v4142_v43 = vmul.f32 %v6317_v47, %v11496_v44  ;;  %v4163_v6 = vmul.f32 %v6318_v15, %v11497_v55  ;;  %v6328_v44 = vld [vmem:[%s6427_s18 + $0x590] sm:$0xff]  ;;  %v6329_v47 = vld [vmem:[%s6427_s18 + $0x598] sm:$0xff]  ;;  %v6330_v15 = vld [vmem:[%s6427_s18 + $0x640] sm:$0xff] }
 0x426   : > { %v5240_v50 = vmax.f32 %v4998_v53, 0.0  ;;  %v5241_v49 = vmax.f32 %v4999_v28, 0.0  ;;  %v4615_v8 = vpop.permute.xlu1 %4614  ;;  %v4164_v17 = vmul.f32 %v6319_v10, %v11497_v55  ;;  %v11502_v55 = vld [vmem:[#allocation109_spill] sm:$0xff]  ;;  %v6331_v10 = vld [vmem:[%s6427_s18 + $0x648] sm:$0xff] }
 0x427   : > { %5460 = vst [vmem:[%s9293_s28 + $0x4d0] sm:$0xff] %v5218_v40  ;;  %5461 = vst.msk [vmem:[%s9293_s28 + $0x4d8] sm:$0xff] %vm465_vm0, %v5219_v57  ;;  %v4980_v24 = vadd.f32 %v4615_v8, %v4133_v26  ;;  %v4981_v25 = vadd.f32 %v4615_v8, %v4134_v23  ;;  %v11498_v26 = vld [vmem:[#allocation17_spill] sm:$0xff] }
 0x428   : > { %v4670_v3 = vpop.permute.xlu0 %4669  ;;  %5482 = vst [vmem:[%s9293_s28 + $0x580] sm:$0xff] %v5240_v50  ;;  %5483 = vst.msk [vmem:[%s9293_s28 + $0x588] sm:$0xff] %vm465_vm0, %v5241_v49  ;;  %v4145_v59 = vmul.f32 %v6320_v5, %v11498_v26  ;;  %v6321_v23 = vld [vmem:[%s6427_s18 + $0x558] sm:$0xff]  ;;  %v6332_v5 = vld [vmem:[%s6427_s18 + $0x5b0] sm:$0xff] }
 0x429   : > { %v5002_v33 = vadd.f32 %v4670_v3, %v4155_v29  ;;  %v5003_v31 = vadd.f32 %v4670_v3, %v4156_v18  ;;  %v5222_v2 = vmax.f32 %v4980_v24, 0.0  ;;  %v5223_v38 = vmax.f32 %v4981_v25, 0.0  ;;  %v11499_v29 = vld [vmem:[#allocation27_spill] sm:$0xff] }
 0x42a   : > { %v4625_v52 = vpop.permute.xlu1 %4624  ;;  %v4146_v40 = vmul.f32 %v6321_v23, %v11498_v26  ;;  %v4167_v16 = vmul.f32 %v6322_v36, %v11499_v29  ;;  %v6323_v18 = vld [vmem:[%s6427_s18 + $0x608] sm:$0xff]  ;;  %v11503_v26 = vld [vmem:[#allocation8_spill] sm:$0xff]  ;;  %v6333_v23 = vld [vmem:[%s6427_s18 + $0x5b8] sm:$0xff] }
 0x42b   : > { %v5244_v1 = vmax.f32 %v5002_v33, 0.0  ;;  %v5245_v56 = vmax.f32 %v5003_v31, 0.0  ;;  %5464 = vst [vmem:[%s9293_s28 + $0x4f0] sm:$0xff] %v5222_v2  ;;  %5465 = vst.msk [vmem:[%s9293_s28 + $0x4f8] sm:$0xff] %vm465_vm0, %v5223_v38  ;;  %v4984_v14 = vadd.f32 %v4625_v52, %v4137_v63  ;;  %v4985_v7 = vadd.f32 %v4625_v52, %v4138_v27  ;;  %v11500_v63 = vld [vmem:[#allocation152_spill] sm:$0xff]  ;;  %v6325_v27 = vld [vmem:[%s6427_s18 + $0x578] sm:$0xff] }
 0x42c   : > { %v4680_v62 = vpop.permute.xlu0 %4679  ;;  %v4168_v50 = vmul.f32 %v6323_v18, %v11499_v29  ;;  %v4149_v9 = vmul.f32 %v6324_v61, %v11500_v63  ;;  %v4150_v2 = vmul.f32 %v6325_v27, %v11500_v63  ;;  %v6334_v36 = vld [vmem:[%s6427_s18 + $0x660] sm:$0xff]  ;;  %v6337_v63 = vld [vmem:[%s6427_s18 + $0x5d8] sm:$0xff] }
 0x42d   : > { %5486 = vst [vmem:[%s9293_s28 + $0x5a0] sm:$0xff] %v5244_v1  ;;  %5487 = vst.msk [vmem:[%s9293_s28 + $0x5a8] sm:$0xff] %vm465_vm0, %v5245_v56  ;;  %v5006_v41 = vadd.f32 %v4680_v62, %v4159_v54  ;;  %v5007_v22 = vadd.f32 %v4680_v62, %v4160_v12  ;;  %v5226_v37 = vmax.f32 %v4984_v14, 0.0  ;;  %v5227_v46 = vmax.f32 %v4985_v7, 0.0  ;;  %v6326_v54 = vld [vmem:[%s6427_s18 + $0x620] sm:$0xff]  ;;  %v6327_v12 = vld [vmem:[%s6427_s18 + $0x628] sm:$0xff] }
 0x42e   : > { %v4635_v48 = vpop.permute.xlu1 %4634  ;;  %v4171_v19 = vmul.f32 %v6326_v54, %v9217_v4  ;;  %v4172_v1 = vmul.f32 %v6327_v12, %v9217_v4  ;;  %v11501_v4 = vld [vmem:[#allocation19_spill] sm:$0xff]  ;;  %v4179_v29 = vmul.f32 %v6334_v36, %v9237_v45 }
 0x42f   : > { %v5248_v13 = vmax.f32 %v5006_v41, 0.0  ;;  %v5249_v34 = vmax.f32 %v5007_v22, 0.0  ;;  %5468 = vst [vmem:[%s9293_s28 + $0x510] sm:$0xff] %v5226_v37  ;;  %5469 = vst.msk [vmem:[%s9293_s28 + $0x518] sm:$0xff] %vm465_vm0, %v5227_v46  ;;  %v4988_v21 = vadd.f32 %v4635_v48, %v4141_v32  ;;  %v4989_v51 = vadd.f32 %v4635_v48, %v4142_v43  ;;  %v6339_v54 = vld [vmem:[%s6427_s18 + $0x688] sm:$0xff] }
 0x430   : > { %v4690_v53 = vpop.permute.xlu0 %4689  ;;  %v4153_v32 = vmul.f32 %v6328_v44, %v11501_v4  ;;  %v4154_v43 = vmul.f32 %v6329_v47, %v11501_v4  ;;  %v6341_v44 = vld [vmem:[%s6427_s18 + $0x5f8] sm:$0xff]  ;;  %v6347_v36 = vld [vmem:[%s6427_s18 + $0x6c8] sm:$0xff] }
 0x431   : > { %5490 = vst [vmem:[%s9293_s28 + $0x5c0] sm:$0xff] %v5248_v13  ;;  %5491 = vst.msk [vmem:[%s9293_s28 + $0x5c8] sm:$0xff] %vm465_vm0, %v5249_v34  ;;  %v5010_v28 = vadd.f32 %v4690_v53, %v4163_v6  ;;  %v5011_v58 = vadd.f32 %v4690_v53, %v4164_v17  ;;  %v5230_v57 = vmax.f32 %v4988_v21, 0.0  ;;  %v5231_v20 = vmax.f32 %v4989_v51, 0.0 }
 0x432   : > { %v4645_v24 = vpop.permute.xlu1 %4644  ;;  %v4175_v6 = vmul.f32 %v6330_v15, %v11502_v55  ;;  %v4176_v17 = vmul.f32 %v6331_v10, %v11502_v55  ;;  %v6343_v15 = vld [vmem:[%s6427_s18 + $0x6a8] sm:$0xff] }
 0x433   : > { %v5252_v49 = vmax.f32 %v5010_v28, 0.0  ;;  %v5253_v8 = vmax.f32 %v5011_v58, 0.0  ;;  %5472 = vst [vmem:[%s9293_s28 + $0x530] sm:$0xff] %v5230_v57  ;;  %5473 = vst.msk [vmem:[%s9293_s28 + $0x538] sm:$0xff] %vm465_vm0, %v5231_v20  ;;  %v4992_v25 = vadd.f32 %v4645_v24, %v4145_v59  ;;  %v4993_v3 = vadd.f32 %v4645_v24, %v4146_v40 }
 0x434   : > { %v4157_v59 = vmul.f32 %v6332_v5, %v11503_v26  ;;  %v4158_v40 = vmul.f32 %v6333_v23, %v11503_v26  ;;  %v6345_v5 = vld [vmem:[%s6427_s18 + $0x618] sm:$0xff] }
 0x435   : > { %v4700_v33 = vpop.permute.xlu0 %4699  ;;  %5494 = vst [vmem:[%s9293_s28 + $0x5e0] sm:$0xff] %v5252_v49  ;;  %5495 = vst.msk [vmem:[%s9293_s28 + $0x5e8] sm:$0xff] %vm465_vm0, %v5253_v8  ;;  %v5234_v38 = vmax.f32 %v4992_v25, 0.0  ;;  %v5235_v42 = vmax.f32 %v4993_v3, 0.0 }
 0x436   : > { %v5014_v31 = vadd.f32 %v4700_v33, %v4167_v16  ;;  %v5015_v30 = vadd.f32 %v4700_v33, %v4168_v50  ;;  %v4655_v14 = vpop.permute.xlu1 %4654  ;;  %v6335_v16 = vld [vmem:[%s6427_s18 + $0x668] sm:$0xff] }
 0x437   : > { %5476 = vst [vmem:[%s9293_s28 + $0x550] sm:$0xff] %v5234_v38  ;;  %5477 = vst.msk [vmem:[%s9293_s28 + $0x558] sm:$0xff] %vm465_vm0, %v5235_v42  ;;  %v4996_v7 = vadd.f32 %v4655_v14, %v4149_v9  ;;  %v4997_v62 = vadd.f32 %v4655_v14, %v4150_v2  ;;  %v4180_v18 = vmul.f32 %v6335_v16, %v9237_v45  ;;  %v11504_v45 = vld [vmem:[#allocation21_spill] sm:$0xff]  ;;  %v6338_v38 = vld [vmem:[%s6427_s18 + $0x680] sm:$0xff] }
 0x438   : > { %v5256_v56 = vmax.f32 %v5014_v31, 0.0  ;;  %v5257_v52 = vmax.f32 %v5015_v30, 0.0  ;;  %v6336_v30 = vld [vmem:[%s6427_s18 + $0x5d0] sm:$0xff]  ;;  %v4162_v9 = vmul.f32 %v6337_v63, %v11504_v45  ;;  %v4183_v42 = vmul.f32 %v6338_v38, %v9247_v60 }
 0x439   : > { %v4710_v41 = vpop.permute.xlu0 %4709  ;;  %v5238_v37 = vmax.f32 %v4996_v7, 0.0  ;;  %v5239_v46 = vmax.f32 %v4997_v62, 0.0  ;;  %v4161_v61 = vmul.f32 %v6336_v30, %v11504_v45  ;;  %v6349_v45 = vld [vmem:[%s6427_s18 + $0x638] sm:$0xff] }
 0x43a   : > { %5498 = vst [vmem:[%s9293_s28 + $0x600] sm:$0xff] %v5256_v56  ;;  %5499 = vst.msk [vmem:[%s9293_s28 + $0x608] sm:$0xff] %vm465_vm0, %v5257_v52  ;;  %v5018_v22 = vadd.f32 %v4710_v41, %v4171_v19  ;;  %v5019_v35 = vadd.f32 %v4710_v41, %v4172_v1  ;;  %v4665_v48 = vpop.permute.xlu1 %4664  ;;  %v4184_v19 = vmul.f32 %v6339_v54, %v9247_v60  ;;  %v11505_v60 = vld [vmem:[#allocation10_spill] sm:$0xff] }
 0x43b   : > { %5480 = vst [vmem:[%s9293_s28 + $0x570] sm:$0xff] %v5238_v37  ;;  %5481 = vst.msk [vmem:[%s9293_s28 + $0x578] sm:$0xff] %vm465_vm0, %v5239_v46  ;;  %v5000_v21 = vadd.f32 %v4665_v48, %v4153_v32  ;;  %v5001_v51 = vadd.f32 %v4665_v48, %v4154_v43  ;;  %v4166_v4 = vmul.f32 %v6341_v44, %v11505_v60  ;;  %v6342_v43 = vld [vmem:[%s6427_s18 + $0x6a0] sm:$0xff]  ;;  %v11506_v37 = vld [vmem:[#allocation15_spill] sm:$0xff] }
 0x43c   : > { %v5260_v13 = vmax.f32 %v5018_v22, 0.0  ;;  %v5261_v34 = vmax.f32 %v5019_v35, 0.0  ;;  %v6340_v22 = vld [vmem:[%s6427_s18 + $0x5f0] sm:$0xff]  ;;  %v4187_v46 = vmul.f32 %v6342_v43, %v11506_v37  ;;  %v4188_v55 = vmul.f32 %v6343_v15, %v11506_v37 }
 0x43d   : > { %v4720_v53 = vpop.permute.xlu0 %4719  ;;  %v5242_v57 = vmax.f32 %v5000_v21, 0.0  ;;  %v5243_v20 = vmax.f32 %v5001_v51, 0.0  ;;  %v4165_v35 = vmul.f32 %v6340_v22, %v11505_v60  ;;  %v11511_v22 = vld [vmem:[#allocation164_spill] sm:$0xff] }
 0x43e   : > { %5502 = vst [vmem:[%s9293_s28 + $0x620] sm:$0xff] %v5260_v13  ;;  %5503 = vst.msk [vmem:[%s9293_s28 + $0x628] sm:$0xff] %vm465_vm0, %v5261_v34  ;;  %v5022_v28 = vadd.f32 %v4720_v53, %v4175_v6  ;;  %v5023_v58 = vadd.f32 %v4720_v53, %v4176_v17  ;;  %v6344_v53 = vld [vmem:[%s6427_s18 + $0x610] sm:$0xff] }
 0x43f   : > { %v4675_v8 = vpop.permute.xlu1 %4674  ;;  %5484 = vst [vmem:[%s9293_s28 + $0x590] sm:$0xff] %v5242_v57  ;;  %5485 = vst.msk [vmem:[%s9293_s28 + $0x598] sm:$0xff] %vm465_vm0, %v5243_v20  ;;  %v11508_v57 = vld [vmem:[#allocation148_spill] sm:$0xff] }
 0x440   : > { %v5264_v50 = vmax.f32 %v5022_v28, 0.0  ;;  %v5265_v49 = vmax.f32 %v5023_v58, 0.0  ;;  %v5004_v24 = vadd.f32 %v4675_v8, %v4157_v59  ;;  %v5005_v25 = vadd.f32 %v4675_v8, %v4158_v40  ;;  %v11507_v28 = vld [vmem:[#allocation23_spill] sm:$0xff]  ;;  %v6346_v40 = vld [vmem:[%s6427_s18 + $0x6c0] sm:$0xff]  ;;  %v11512_v43 = vld [vmem:[#allocation172_spill] sm:$0xff] }
 0x441   : > { %v4169_v58 = vmul.f32 %v6344_v53, %v11507_v28  ;;  %v4170_v26 = vmul.f32 %v6345_v5, %v11507_v28  ;;  %v4191_v20 = vmul.f32 %v6346_v40, %v11508_v57  ;;  %v11513_v53 = vld [vmem:[#allocation138_spill] sm:$0xff] }
 0x442   : > { %v4730_v3 = vpop.permute.xlu0 %4729  ;;  %5506 = vst [vmem:[%s9293_s28 + $0x640] sm:$0xff] %v5264_v50  ;;  %5507 = vst.msk [vmem:[%s9293_s28 + $0x648] sm:$0xff] %vm465_vm0, %v5265_v49  ;;  %v5246_v27 = vmax.f32 %v5004_v24, 0.0  ;;  %v5247_v2 = vmax.f32 %v5005_v25, 0.0 }
 0x443   : > { %v5026_v33 = vadd.f32 %v4730_v3, %v4179_v29  ;;  %v5027_v31 = vadd.f32 %v4730_v3, %v4180_v18  ;;  %v4685_v56 = vpop.permute.xlu1 %4684  ;;  %v4192_v29 = vmul.f32 %v6347_v36, %v11508_v57  ;;  %v6359_v57 = vld [vmem:[%s6427_s18 + $0x728] sm:$0xff] }
 0x444   : > { %5488 = vst [vmem:[%s9293_s28 + $0x5b0] sm:$0xff] %v5246_v27  ;;  %5489 = vst.msk [vmem:[%s9293_s28 + $0x5b8] sm:$0xff] %vm465_vm0, %v5247_v2  ;;  %v5008_v52 = vadd.f32 %v4685_v56, %v4161_v61  ;;  %v5009_v14 = vadd.f32 %v4685_v56, %v4162_v9  ;;  %v6350_v27 = vld [vmem:[%s6427_s18 + $0x6e0] sm:$0xff]  ;;  %v11510_v2 = vld [vmem:[#allocation113_spill] sm:$0xff] }
 0x445   : > { %v5268_v12 = vmax.f32 %v5026_v33, 0.0  ;;  %v5269_v1 = vmax.f32 %v5027_v31, 0.0  ;;  %v6348_v33 = vld [vmem:[%s6427_s18 + $0x630] sm:$0xff]  ;;  %v4195_v38 = vmul.f32 %v6350_v27, %v11510_v2 }
 0x446   : > { %v4740_v7 = vpop.permute.xlu0 %4739  ;;  %v5250_v32 = vmax.f32 %v5008_v52, 0.0  ;;  %v5251_v47 = vmax.f32 %v5009_v14, 0.0  ;;  %v11509_v31 = vld [vmem:[#allocation12_spill] sm:$0xff] }
 0x447   : > { %5510 = vst [vmem:[%s9293_s28 + $0x660] sm:$0xff] %v5268_v12  ;;  %5511 = vst.msk [vmem:[%s9293_s28 + $0x668] sm:$0xff] %vm465_vm0, %v5269_v1  ;;  %v5030_v62 = vadd.f32 %v4740_v7, %v4183_v42  ;;  %v5031_v41 = vadd.f32 %v4740_v7, %v4184_v19  ;;  %v4695_v17 = vpop.permute.xlu1 %4694  ;;  %v4173_v30 = vmul.f32 %v6348_v33, %v11509_v31  ;;  %v6351_v42 = vld [vmem:[%s6427_s18 + $0x6e8] sm:$0xff]  ;;  %v6361_v33 = vld [vmem:[%s6427_s18 + $0x698] sm:$0xff] }
 0x448   : > { %5492 = vst [vmem:[%s9293_s28 + $0x5d0] sm:$0xff] %v5250_v32  ;;  %5493 = vst.msk [vmem:[%s9293_s28 + $0x5d8] sm:$0xff] %vm465_vm0, %v5251_v47  ;;  %v5012_v13 = vadd.f32 %v4695_v17, %v4165_v35  ;;  %v5013_v34 = vadd.f32 %v4695_v17, %v4166_v4  ;;  %v4174_v61 = vmul.f32 %v6349_v45, %v11509_v31  ;;  %v6353_v35 = vld [vmem:[%s6427_s18 + $0x658] sm:$0xff]  ;;  %v6354_v47 = vld [vmem:[%s6427_s18 + $0x700] sm:$0xff] }
 0x449   : > { %v5272_v6 = vmax.f32 %v5030_v62, 0.0  ;;  %v5273_v10 = vmax.f32 %v5031_v41, 0.0  ;;  %v4196_v54 = vmul.f32 %v6351_v42, %v11510_v2  ;;  %v6352_v41 = vld [vmem:[%s6427_s18 + $0x650] sm:$0xff]  ;;  %v4178_v44 = vmul.f32 %v6353_v35, %v11511_v22 }
 0x44a   : > { %v4750_v48 = vpop.permute.xlu0 %4749  ;;  %v5254_v59 = vmax.f32 %v5012_v13, 0.0  ;;  %v5255_v23 = vmax.f32 %v5013_v34, 0.0  ;;  %v4177_v60 = vmul.f32 %v6352_v41, %v11511_v22  ;;  %v4199_v37 = vmul.f32 %v6354_v47, %v11512_v43 }
 0x44b   : > { %5514 = vst [vmem:[%s9293_s28 + $0x680] sm:$0xff] %v5272_v6  ;;  %5515 = vst.msk [vmem:[%s9293_s28 + $0x688] sm:$0xff] %vm465_vm0, %v5273_v10  ;;  %v5034_v21 = vadd.f32 %v4750_v48, %v4187_v46  ;;  %v5035_v51 = vadd.f32 %v4750_v48, %v4188_v55  ;;  %v6355_v46 = vld [vmem:[%s6427_s18 + $0x708] sm:$0xff] }
 0x44c   : > { %v4705_v50 = vpop.permute.xlu1 %4704  ;;  %5496 = vst [vmem:[%s9293_s28 + $0x5f0] sm:$0xff] %v5254_v59  ;;  %5497 = vst.msk [vmem:[%s9293_s28 + $0x5f8] sm:$0xff] %vm465_vm0, %v5255_v23  ;;  %v4200_v15 = vmul.f32 %v6355_v46, %v11512_v43  ;;  %v6358_v23 = vld [vmem:[%s6427_s18 + $0x720] sm:$0xff] }
 0x44d   : > { %v5276_v16 = vmax.f32 %v5034_v21, 0.0  ;;  %v5277_v18 = vmax.f32 %v5035_v51, 0.0  ;;  %v5016_v49 = vadd.f32 %v4705_v50, %v4169_v58  ;;  %v5017_v8 = vadd.f32 %v4705_v50, %v4170_v26  ;;  %v6356_v51 = vld [vmem:[%s6427_s18 + $0x670] sm:$0xff]  ;;  %v6357_v58 = vld [vmem:[%s6427_s18 + $0x678] sm:$0xff] }
 0x44e   : > { %v4181_v28 = vmul.f32 %v6356_v51, %v11513_v53  ;;  %v4182_v5 = vmul.f32 %v6357_v58, %v11513_v53  ;;  %v4203_v40 = vmul.f32 %v6358_v23, %v9317_v39  ;;  %v6370_v58 = vld [vmem:[%s6427_s18 + $0x780] sm:$0xff] }
 0x44f   : > { %v4760_v24 = vpop.permute.xlu0 %4759  ;;  %5518 = vst [vmem:[%s9293_s28 + $0x6a0] sm:$0xff] %v5276_v16  ;;  %5519 = vst.msk [vmem:[%s9293_s28 + $0x6a8] sm:$0xff] %vm465_vm0, %v5277_v18  ;;  %v5258_v63 = vmax.f32 %v5016_v49, 0.0  ;;  %v5259_v9 = vmax.f32 %v5017_v8, 0.0 }
 0x450   : > { %v5038_v25 = vadd.f32 %v4760_v24, %v4191_v20  ;;  %v5039_v3 = vadd.f32 %v4760_v24, %v4192_v29  ;;  %v4715_v1 = vpop.permute.xlu1 %4714  ;;  %v4204_v20 = vmul.f32 %v6359_v57, %v9317_v39  ;;  %v11514_v39 = vld [vmem:[#allocation107_spill] sm:$0xff] }
 0x451   : > { %5500 = vst [vmem:[%s9293_s28 + $0x610] sm:$0xff] %v5258_v63  ;;  %5501 = vst.msk [vmem:[%s9293_s28 + $0x618] sm:$0xff] %vm465_vm0, %v5259_v9  ;;  %v5020_v56 = vadd.f32 %v4715_v1, %v4173_v30  ;;  %v5021_v52 = vadd.f32 %v4715_v1, %v4174_v61  ;;  %v4186_v31 = vmul.f32 %v6361_v33, %v11514_v39  ;;  %v6362_v61 = vld [vmem:[%s6427_s18 + $0x740] sm:$0xff]  ;;  %v6363_v9 = vld [vmem:[%s6427_s18 + $0x748] sm:$0xff] }
 0x452   : > { %v5280_v19 = vmax.f32 %v5038_v25, 0.0  ;;  %v5281_v12 = vmax.f32 %v5039_v3, 0.0  ;;  %v6360_v25 = vld [vmem:[%s6427_s18 + $0x690] sm:$0xff]  ;;  %v4207_v63 = vmul.f32 %v6362_v61, %v9332_v0  ;;  %v4208_v27 = vmul.f32 %v6363_v9, %v9332_v0  ;;  %v11515_v0 = vld [vmem:[#allocation141_spill] sm:$0xff] }
 0x453   : > { %v4770_v14 = vpop.permute.xlu0 %4769  ;;  %v5262_v4 = vmax.f32 %v5020_v56, 0.0  ;;  %v5263_v32 = vmax.f32 %v5021_v52, 0.0  ;;  %v4185_v3 = vmul.f32 %v6360_v25, %v11514_v39  ;;  %v6364_v52 = vld [vmem:[%s6427_s18 + $0x6b0] sm:$0xff]  ;;  %v6375_v9 = vld [vmem:[%s6427_s18 + $0x718] sm:$0xff] }
 0x454   : > { %5522 = vst [vmem:[%s9293_s28 + $0x6c0] sm:$0xff] %v5280_v19  ;;  %5523 = vst.msk [vmem:[%s9293_s28 + $0x6c8] sm:$0xff] %vm465_vm0, %v5281_v12  ;;  %v5042_v7 = vadd.f32 %v4770_v14, %v4195_v38  ;;  %v5043_v62 = vadd.f32 %v4770_v14, %v4196_v54  ;;  %v4725_v10 = vpop.permute.xlu1 %4724  ;;  %v4189_v14 = vmul.f32 %v6364_v52, %v11515_v0  ;;  %v11519_v61 = vld [vmem:[#allocation144_spill] sm:$0xff]  ;;  %v6377_v52 = vld [vmem:[%s6427_s18 + $0x738] sm:$0xff] }
 0x455   : > { %5504 = vst [vmem:[%s9293_s28 + $0x630] sm:$0xff] %v5262_v4  ;;  %5505 = vst.msk [vmem:[%s9293_s28 + $0x638] sm:$0xff] %vm465_vm0, %v5263_v32  ;;  %v5024_v17 = vadd.f32 %v4725_v10, %v4177_v60  ;;  %v5025_v13 = vadd.f32 %v4725_v10, %v4178_v44  ;;  %v6366_v60 = vld [vmem:[%s6427_s18 + $0x760] sm:$0xff]  ;;  %v6367_v44 = vld [vmem:[%s6427_s18 + $0x768] sm:$0xff] }
 0x456   : > { %v5284_v55 = vmax.f32 %v5042_v7, 0.0  ;;  %v5285_v6 = vmax.f32 %v5043_v62, 0.0  ;;  %v6365_v7 = vld [vmem:[%s6427_s18 + $0x6b8] sm:$0xff]  ;;  %v4211_v35 = vmul.f32 %v6366_v60, %v9347_v11  ;;  %v4212_v4 = vmul.f32 %v6367_v44, %v9347_v11  ;;  %v6368_v10 = vld [vmem:[%s6427_s18 + $0x6d0] sm:$0xff] }
 0x457   : > { %v4780_v34 = vpop.permute.xlu0 %4779  ;;  %v5266_v26 = vmax.f32 %v5024_v17, 0.0  ;;  %v5267_v59 = vmax.f32 %v5025_v13, 0.0  ;;  %v4190_v62 = vmul.f32 %v6365_v7, %v11515_v0  ;;  %v11516_v11 = vld [vmem:[#allocation16_spill] sm:$0xff]  ;;  %v6369_v13 = vld [vmem:[%s6427_s18 + $0x6d8] sm:$0xff] }
 0x458   : > { %5526 = vst [vmem:[%s9293_s28 + $0x6e0] sm:$0xff] %v5284_v55  ;;  %5527 = vst.msk [vmem:[%s9293_s28 + $0x6e8] sm:$0xff] %vm465_vm0, %v5285_v6  ;;  %v5046_v48 = vadd.f32 %v4780_v34, %v4199_v37  ;;  %v5047_v21 = vadd.f32 %v4780_v34, %v4200_v15  ;;  %v4193_v17 = vmul.f32 %v6368_v10, %v11516_v11  ;;  %v6378_v60 = vld [vmem:[%s6427_s18 + $0x750] sm:$0xff] }
 0x459   : > { %v4735_v16 = vpop.permute.xlu1 %4734  ;;  %5508 = vst [vmem:[%s9293_s28 + $0x650] sm:$0xff] %v5266_v26  ;;  %5509 = vst.msk [vmem:[%s9293_s28 + $0x658] sm:$0xff] %vm465_vm0, %v5267_v59  ;;  %v4194_v34 = vmul.f32 %v6369_v13, %v11516_v11  ;;  %v6371_v59 = vld [vmem:[%s6427_s18 + $0x788] sm:$0xff]  ;;  %v6380_v10 = vld [vmem:[%s6427_s18 + $0x770] sm:$0xff] }
 0x45a   : > { %v5288_v36 = vmax.f32 %v5046_v48, 0.0  ;;  %v5289_v29 = vmax.f32 %v5047_v21, 0.0  ;;  %v5028_v18 = vadd.f32 %v4735_v16, %v4181_v28  ;;  %v5029_v50 = vadd.f32 %v4735_v16, %v4182_v5  ;;  %v11517_v5 = vld [vmem:[#allocation6_spill] sm:$0xff]  ;;  %v6372_v16 = vld [vmem:[%s6427_s18 + $0x6f0] sm:$0xff]  ;;  %v11522_v11 = vld [vmem:[#allocation153_spill] sm:$0xff] }
 0x45b   : > { %v4215_v26 = vmul.f32 %v6370_v58, %v11517_v5  ;;  %v4216_v23 = vmul.f32 %v6371_v59, %v11517_v5  ;;  %v6381_v13 = vld [vmem:[%s6427_s18 + $0x778] sm:$0xff] }
 0x45c   : > { %v4790_v49 = vpop.permute.xlu0 %4789  ;;  %5530 = vst [vmem:[%s9293_s28 + $0x700] sm:$0xff] %v5288_v36  ;;  %5531 = vst.msk [vmem:[%s9293_s28 + $0x708] sm:$0xff] %vm465_vm0, %v5289_v29  ;;  %v5270_v30 = vmax.f32 %v5028_v18, 0.0  ;;  %v5271_v45 = vmax.f32 %v5029_v50, 0.0  ;;  %v11518_v18 = vld [vmem:[#allocation168_spill] sm:$0xff] }
 0x45d   : > { %v5050_v8 = vadd.f32 %v4790_v49, %v4203_v40  ;;  %v5051_v24 = vadd.f32 %v4790_v49, %v4204_v20  ;;  %v4745_v42 = vpop.permute.xlu1 %4744  ;;  %v4197_v50 = vmul.f32 %v6372_v16, %v11518_v18  ;;  %v6373_v49 = vld [vmem:[%s6427_s18 + $0x6f8] sm:$0xff] }
 0x45e   : > { %5512 = vst [vmem:[%s9293_s28 + $0x670] sm:$0xff] %v5270_v30  ;;  %5513 = vst.msk [vmem:[%s9293_s28 + $0x678] sm:$0xff] %vm465_vm0, %v5271_v45  ;;  %v5032_v54 = vadd.f32 %v4745_v42, %v4185_v3  ;;  %v5033_v19 = vadd.f32 %v4745_v42, %v4186_v31  ;;  %v6374_v45 = vld [vmem:[%s6427_s18 + $0x710] sm:$0xff] }
 0x45f   : > { %v5292_v2 = vmax.f32 %v5050_v8, 0.0  ;;  %v5293_v38 = vmax.f32 %v5051_v24, 0.0  ;;  %v4198_v8 = vmul.f32 %v6373_v49, %v11518_v18 }
 0x460   : > { %v4800_v12 = vpop.permute.xlu0 %4799  ;;  %v5274_v41 = vmax.f32 %v5032_v54, 0.0  ;;  %v5275_v22 = vmax.f32 %v5033_v19, 0.0 }
 0x461   : > { %5534 = vst [vmem:[%s9293_s28 + $0x720] sm:$0xff] %v5292_v2  ;;  %5535 = vst.msk [vmem:[%s9293_s28 + $0x728] sm:$0xff] %vm465_vm0, %v5293_v38  ;;  %v5054_v1 = vadd.f32 %v4800_v12, %v4207_v63  ;;  %v5055_v56 = vadd.f32 %v4800_v12, %v4208_v27  ;;  %v4755_v43 = vpop.permute.xlu1 %4754  ;;  %v4201_v63 = vmul.f32 %v6374_v45, %v11519_v61  ;;  %v6376_v12 = vld [vmem:[%s6427_s18 + $0x730] sm:$0xff] }
 0x462   : > { %5516 = vst [vmem:[%s9293_s28 + $0x690] sm:$0xff] %v5274_v41  ;;  %5517 = vst.msk [vmem:[%s9293_s28 + $0x698] sm:$0xff] %vm465_vm0, %v5275_v22  ;;  %v5036_v37 = vadd.f32 %v4755_v43, %v4189_v14  ;;  %v5037_v46 = vadd.f32 %v4755_v43, %v4190_v62  ;;  %v4202_v27 = vmul.f32 %v6375_v9, %v11519_v61 }
 0x463   : > { %v5296_v32 = vmax.f32 %v5054_v1, 0.0  ;;  %v5297_v47 = vmax.f32 %v5055_v56, 0.0  ;;  %v11520_v1 = vld [vmem:[#allocation18_spill] sm:$0xff] }
 0x464   : > { %v4810_v15 = vpop.permute.xlu0 %4809  ;;  %v5278_v48 = vmax.f32 %v5036_v37, 0.0  ;;  %v5279_v21 = vmax.f32 %v5037_v46, 0.0  ;;  %v4205_v56 = vmul.f32 %v6376_v12, %v11520_v1  ;;  %v4206_v0 = vmul.f32 %v6377_v52, %v11520_v1 }
 0x465   : > { %5538 = vst [vmem:[%s9293_s28 + $0x740] sm:$0xff] %v5296_v32  ;;  %5539 = vst.msk [vmem:[%s9293_s28 + $0x748] sm:$0xff] %vm465_vm0, %v5297_v47  ;;  %v5058_v55 = vadd.f32 %v4810_v15, %v4211_v35  ;;  %v5059_v6 = vadd.f32 %v4810_v15, %v4212_v4  ;;  %v11521_v35 = vld [vmem:[#allocation170_spill] sm:$0xff]  ;;  %v6379_v4 = vld [vmem:[%s6427_s18 + $0x758] sm:$0xff] }
 0x466   : > { %v4765_v28 = vpop.permute.xlu1 %4764  ;;  %5520 = vst [vmem:[%s9293_s28 + $0x6b0] sm:$0xff] %v5278_v48  ;;  %5521 = vst.msk [vmem:[%s9293_s28 + $0x6b8] sm:$0xff] %vm465_vm0, %v5279_v21  ;;  %v4209_v44 = vmul.f32 %v6378_v60, %v11521_v35  ;;  %v4210_v32 = vmul.f32 %v6379_v4, %v11521_v35 }
 0x467   : > { %v5300_v51 = vmax.f32 %v5058_v55, 0.0  ;;  %v5301_v53 = vmax.f32 %v5059_v6, 0.0  ;;  %v5040_v40 = vadd.f32 %v4765_v28, %v4193_v17  ;;  %v5041_v57 = vadd.f32 %v4765_v28, %v4194_v34 }
 0x468   : > { %v4820_v20 = vpop.permute.xlu0 %4819  ;;  %v4213_v17 = vmul.f32 %v6380_v10, %v11522_v11  ;;  %v4214_v34 = vmul.f32 %v6381_v13, %v11522_v11 }
 0x469   : > { %5542 = vst [vmem:[%s9293_s28 + $0x760] sm:$0xff] %v5300_v51  ;;  %5543 = vst.msk [vmem:[%s9293_s28 + $0x768] sm:$0xff] %vm465_vm0, %v5301_v53  ;;  %v5062_v36 = vadd.f32 %v4820_v20, %v4215_v26  ;;  %v5063_v29 = vadd.f32 %v4820_v20, %v4216_v23  ;;  %v5282_v24 = vmax.f32 %v5040_v40, 0.0  ;;  %v5283_v25 = vmax.f32 %v5041_v57, 0.0 }
 0x46a   : > { %v4775_v33 = vpop.permute.xlu1 %4774 }
 0x46b   : > { %v5304_v39 = vmax.f32 %v5062_v36, 0.0  ;;  %v5305_v3 = vmax.f32 %v5063_v29, 0.0  ;;  %5524 = vst [vmem:[%s9293_s28 + $0x6d0] sm:$0xff] %v5282_v24  ;;  %5525 = vst.msk [vmem:[%s9293_s28 + $0x6d8] sm:$0xff] %vm465_vm0, %v5283_v25  ;;  %v5044_v31 = vadd.f32 %v4775_v33, %v4197_v50  ;;  %v5045_v30 = vadd.f32 %v4775_v33, %v4198_v8 }
 0x46d   : > { %5546 = vst [vmem:[%s9293_s28 + $0x780] sm:$0xff] %v5304_v39  ;;  %5547 = vst.msk [vmem:[%s9293_s28 + $0x788] sm:$0xff] %vm465_vm0, %v5305_v3  ;;  %v5286_v2 = vmax.f32 %v5044_v31, 0.0  ;;  %v5287_v38 = vmax.f32 %v5045_v30, 0.0 }
 0x46e   : > { %v4785_v42 = vpop.permute.xlu1 %4784 }
 0x46f   : > { %5528 = vst [vmem:[%s9293_s28 + $0x6f0] sm:$0xff] %v5286_v2  ;;  %5529 = vst.msk [vmem:[%s9293_s28 + $0x6f8] sm:$0xff] %vm465_vm0, %v5287_v38  ;;  %v5048_v54 = vadd.f32 %v4785_v42, %v4201_v63  ;;  %v5049_v19 = vadd.f32 %v4785_v42, %v4202_v27 }
 0x471   : > { %v5290_v14 = vmax.f32 %v5048_v54, 0.0  ;;  %v5291_v7 = vmax.f32 %v5049_v19, 0.0 }
 0x472   : > { %v4795_v62 = vpop.permute.xlu1 %4794 }
 0x473   : > { %5532 = vst [vmem:[%s9293_s28 + $0x710] sm:$0xff] %v5290_v14  ;;  %5533 = vst.msk [vmem:[%s9293_s28 + $0x718] sm:$0xff] %vm465_vm0, %v5291_v7  ;;  %v5052_v41 = vadd.f32 %v4795_v62, %v4205_v56  ;;  %v5053_v22 = vadd.f32 %v4795_v62, %v4206_v0 }
 0x475   : > { %v5294_v47 = vmax.f32 %v5052_v41, 0.0  ;;  %v5295_v43 = vmax.f32 %v5053_v22, 0.0 }
 0x476   : > { %v4805_v37 = vpop.permute.xlu1 %4804 }
 0x477   : > { %5536 = vst [vmem:[%s9293_s28 + $0x730] sm:$0xff] %v5294_v47  ;;  %5537 = vst.msk [vmem:[%s9293_s28 + $0x738] sm:$0xff] %vm465_vm0, %v5295_v43  ;;  %v5056_v46 = vadd.f32 %v4805_v37, %v4209_v44  ;;  %v5057_v15 = vadd.f32 %v4805_v37, %v4210_v32 }
 0x479   : > { %v5298_v55 = vmax.f32 %v5056_v46, 0.0  ;;  %v5299_v6 = vmax.f32 %v5057_v15, 0.0 }
 0x47a   : > { %v4815_v48 = vpop.permute.xlu1 %4814 }
 0x47b   : > { %5540 = vst [vmem:[%s9293_s28 + $0x750] sm:$0xff] %v5298_v55  ;;  %5541 = vst.msk [vmem:[%s9293_s28 + $0x758] sm:$0xff] %vm465_vm0, %v5299_v6  ;;  %v5060_v21 = vadd.f32 %v4815_v48, %v4213_v17  ;;  %v5061_v51 = vadd.f32 %v4815_v48, %v4214_v34 }
 0x47d   : > { %v5302_v53 = vmax.f32 %v5060_v21, 0.0  ;;  %v5303_v28 = vmax.f32 %v5061_v51, 0.0 }
 0x47f   : > { %5544 = vst [vmem:[%s9293_s28 + $0x770] sm:$0xff] %v5302_v53  ;;  %5545 = vst.msk [vmem:[%s9293_s28 + $0x778] sm:$0xff] %vm465_vm0, %v5303_v28 }
 0x480 PF: > { %s13_s12 = sadd.s32 1, %s6388_s12  }
 0x481   : > { %p10_p4 = scmp.ge.s32.totalorder %s13_s12, 5  }
 0x483   :  { %12 = sbr.rel (!%p10_p4) target bundleno = 1 (0x1), region = 68 }

</bundles_post_ra>
